<compile_context>
chip_gen: v7x
topology: tpu7x:2x2x1
jax: 0.10.0
libtpu: 0.0.40
codegen_flags: <defaults>
</compile_context>

<pallas_src>
import functools

import jax
import jax.numpy as jnp
from jax.experimental import pallas as pl
from jax.experimental.pallas import tpu as pltpu


_VPU_PROJ_MAX = 8    # projections with <= this many rows/cols run on the VPU
_MIN_PER_TC = 1024   # min batch elems per grid step before a dual-TC split pays off


def _silu(x):
    # Single-EUP-push SiLU: x * sigmoid(x) == 0.5 * x * (tanh(0.5 * x) + 1).
    return 0.5 * x * (jnp.tanh(0.5 * x) + 1.0)


def _mlp_kernel(
    x_ref, t_ref,
    wt1_ref, bt1_ref,
    w1x_ref, w1t_ref, b1_ref,
    w2_ref, b2_ref,
    w3_ref, b3_ref,
    w4t_ref, b4_ref,
    o_ref,
    *, point_dim, bf16_elementwise,
):
    f32, bf16 = jnp.float32, jnp.bfloat16
    vpu_proj = point_dim <= _VPU_PROJ_MAX

    def act(pre_f32, *, out_bf16=True):
        # bias-added pre-activation (f32) -> SiLU -> dtype the consumer wants.
        if bf16_elementwise:
            return _silu(pre_f32.astype(bf16))        # bf16 VPU/EUP (v6e/v7x)
        y = _silu(pre_f32)                            # f32 path (v5e-safe)
        return y.astype(bf16) if out_bf16 else y

    # ---- time embed, first layer Linear(1, T): outer product on the VPU ----
    t = t_ref[...]                                            # (1, bt)  f32
    h_t = act(wt1_ref[...] * t + bt1_ref[...])                # (T, bt)
    # (the second time-embed Linear is folded into w1t'/b1' host-side)

    # ---- net layer 1: Linear(P + T, H) ----
    acc = jnp.dot(w1t_ref[...], h_t, preferred_element_type=f32)   # (H, bt) MXU
    x = x_ref[...]                                            # (P, bt)  f32
    w1x = w1x_ref[...]                                        # (H, P)   f32
    if vpu_proj:
        for p in range(point_dim):                            # K=P broadcast FMAs (VPU)
            acc = acc + w1x[:, p:p + 1] * x[p:p + 1, :]
    else:
        acc = acc + jnp.dot(w1x.astype(bf16), x.astype(bf16),
                            preferred_element_type=f32)
    h1 = act(acc + b1_ref[...])                               # (H, bt)

    # ---- net layers 2 & 3: the only full (H, H) MXU matmuls ----
    h2 = act(jnp.dot(w2_ref[...], h1, preferred_element_type=f32) + b2_ref[...])
    h3 = act(jnp.dot(w3_ref[...], h2, preferred_element_type=f32) + b3_ref[...],
             out_bf16=not vpu_proj)

    # ---- output projection Linear(H, P): M = P tiny -> VPU + sublane reduce ----
    w4t = w4t_ref[...]                                        # (H, P)  f32
    if vpu_proj:
        rows = [jnp.sum(w4t[:, p:p + 1] * h3, axis=0, keepdims=True)
                for p in range(point_dim)]                    # each (1, bt) f32
        out = jnp.concatenate(rows, axis=0)                   # (P, bt)
    else:
        out = jax.lax.dot_general(w4t.astype(bf16), h3,
                                  (((0,), (0,)), ((), ())),
                                  preferred_element_type=f32)
    o_ref[...] = (out + b4_ref[...]).astype(o_ref.dtype)      # lane-dense store


# ----------------------------- host-side helpers -----------------------------

def _device_kind():
    try:
        return jax.devices()[0].device_kind.lower()
    except Exception:
        return ""


def _bf16_elementwise_ok(kind):
    # bf16 VPU/EUP exists on v6e / v7x; v5e and older stay on the f32 path.
    return ("v6" in kind) or ("v7" in kind)


def _mxu_lane_align(kind):
    # MXU N width: 256 on v6e/v7x, 128 on v5e and older.
    return 256 if (("v6" in kind) or ("v7" in kind)) else 128


def _is_dual_tensorcore(kind):
    return "v7" in kind


def _choose_batch_tile(B, requested, *, dual_tc, align):
    """Largest tile that (a) divides B, (b) is MXU/lane aligned whenever B is
    actually split, and (c) keeps >= 2 grid steps only when a dual-TensorCore
    split is worth it (>= _MIN_PER_TC batch elements per step)."""
    split_for_tc = dual_tc and B >= 2 * _MIN_PER_TC
    if B <= requested and not split_for_tc:
        return B                                    # single grid step
    cap = min(requested, B // 2 if split_for_tc else B)
    bt = (cap // align) * align
    while bt >= align:
        if B % bt == 0:
            return bt
        bt -= align
    return B                                        # odd B: one full-batch block


def _vmem_limit_bytes(P, T, H, bt, bf16_elementwise):
    act_bytes = 2 if bf16_elementwise else 4
    acts = bt * (T + 3 * H) * act_bytes + 2 * bt * H * 4        # live activations + f32 temps
    io = 2 * 3 * 8 * bt * 4                                     # x/t/out blocks, sublane-padded, 2x buffered
    weights = 2 * ((H * T + 2 * H * H) * 2                      # bf16 MXU weights
                   + 2 * H * max(P, 1) * 4                      # w1x, w4^T (f32, VPU path)
                   + (2 * T + 3 * H + P) * 128 * 4)             # wt1 / biases, lane-padded
    total = acts + io + weights + (8 << 20)                     # compiler-scratch headroom
    return int(min(max(total, 32 << 20), 56 << 20))             # stay under v7x 64 MiB


def simple_point_mlp_forward(x, t, params, *, batch_tile=2048):
    """x: (B, point_dim) f32, t: (B,) f32 -> (B, point_dim) f32."""
    B, P = x.shape
    T = params["wt1"].shape[0]
    H = params["w2"].shape[0]

    kind = _device_kind()
    bf16_elem = _bf16_elementwise_ok(kind)
    bt = _choose_batch_tile(B, batch_tile,
                            dual_tc=_is_dual_tensorcore(kind),
                            align=_mxu_lane_align(kind))
    assert B % bt == 0

    # Feature-major views: batch on the 128-lane axis (pure layout plumbing).
    xT = x.T                    # (P, B)
    tT = t.reshape(1, B)        # (1, B)  == torch's t.unsqueeze(-1), transposed

    def _full(shape):
        return pl.BlockSpec(shape, lambda i: (0, 0))

    in_specs = [
        pl.BlockSpec((P, bt), lambda i: (0, i)),       # x^T
        pl.BlockSpec((1, bt), lambda i: (0, i)),       # t^T
        _full((T, 1)), _full((T, 1)),                  # wt1, bt1
        _full((H, P)), _full((H, T)), _full((H, 1)),   # w1x, w1t' (fused), b1'
        _full((H, H)), _full((H, 1)),                  # w2, b2
        _full((H, H)), _full((H, 1)),                  # w3, b3
        _full((H, P)), _full((P, 1)),                  # w4^T, b4
    ]
    out_spec = pl.BlockSpec((P, bt), lambda i: (0, i))

    kernel = functools.partial(_mlp_kernel, point_dim=P,
                               bf16_elementwise=bf16_elem)
    fn = pl.pallas_call(
        kernel,
        out_shape=jax.ShapeDtypeStruct((P, B), jnp.float32),
        grid_spec=pltpu.PrefetchScalarGridSpec(
            num_scalar_prefetch=0,
            grid=(B // bt,),
            in_specs=in_specs,
            out_specs=out_spec,
        ),
        compiler_params=pltpu.CompilerParams(
            dimension_semantics=("parallel",),
            vmem_limit_bytes=_vmem_limit_bytes(P, T, H, bt, bf16_elem),
        ),
    )
    outT = fn(
        xT, tT,
        params["wt1"], params["bt1"],
        params["w1x"], params["w1t"], params["b1"],
        params["w2"], params["b2"],
        params["w3"], params["b3"],
        params["w4t"], params["b4"],
    )
    return outT.T


# ----------------------------- params & reference -----------------------------

def init_raw_params(key, point_dim, time_embed_dim, hidden_dim):
    """PyTorch nn.Linear-style init; weights (out, in), biases (out,), all f32."""
    def linear(k, fan_in, fan_out):
        kw, kb = jax.random.split(k)
        bound = 1.0 / float(fan_in) ** 0.5
        w = jax.random.uniform(kw, (fan_out, fan_in), jnp.float32, -bound, bound)
        b = jax.random.uniform(kb, (fan_out,), jnp.float32, -bound, bound)
        return w, b

    keys = jax.random.split(key, 6)
    wt1, bt1 = linear(keys[0], 1, time_embed_dim)
    wt2, bt2 = linear(keys[1], time_embed_dim, time_embed_dim)
    w1, b1 = linear(keys[2], point_dim + time_embed_dim, hidden_dim)
    w2, b2 = linear(keys[3], hidden_dim, hidden_dim)
    w3, b3 = linear(keys[4], hidden_dim, hidden_dim)
    w4, b4 = linear(keys[5], hidden_dim, point_dim)
    return dict(wt1=wt1, bt1=bt1, wt2=wt2, bt2=bt2,
                w1=w1, b1=b1, w2=w2, b2=b2, w3=w3, b3=b3, w4=w4, b4=b4)


def prepare_params(raw, point_dim):
    """Kernel-layout params.  Folds the second time-embed Linear into the first
    net layer (in f32, before any bf16 cast):
        t_emb = Wt2 @ h + bt2,  net_in = W1x @ x + W1t @ t_emb + b1
     => net_in = W1x @ x + (W1t @ Wt2) @ h + (b1 + W1t @ bt2)."""
    bf16, f32 = jnp.bfloat16, jnp.float32
    P = point_dim
    w1x = raw["w1"][:, :P]
    w1t = raw["w1"][:, P:]
    w1t_fused = (w1t @ raw["wt2"]).astype(bf16)                 # (H, T)
    b1_fused = raw["b1"] + w1t @ raw["bt2"]                     # (H,)
    col = lambda v: v.reshape(-1, 1).astype(f32)
    return {
        "wt1": raw["wt1"].astype(f32),                          # (T, 1) VPU outer product
        "bt1": col(raw["bt1"]),
        "w1x": w1x.astype(f32),                                 # (H, P) VPU path
        "w1t": w1t_fused,                                       # (H, T) bf16 MXU
        "b1": col(b1_fused),
        "w2": raw["w2"].astype(bf16), "b2": col(raw["b2"]),
        "w3": raw["w3"].astype(bf16), "b3": col(raw["b3"]),
        "w4t": raw["w4"].T.astype(f32),                         # (H, P) VPU path
        "b4": col(raw["b4"]),
    }


def reference_forward(x, t, raw):
    """Pure-f32 JAX reference with exactly the PyTorch module's math."""
    t2 = t[:, None]
    h = jax.nn.silu(t2 @ raw["wt1"].T + raw["bt1"])
    t_emb = h @ raw["wt2"].T + raw["bt2"]
    xt = jnp.concatenate([x, t_emb], axis=-1)
    h1 = jax.nn.silu(xt @ raw["w1"].T + raw["b1"])
    h2 = jax.nn.silu(h1 @ raw["w2"].T + raw["b2"])
    h3 = jax.nn.silu(h2 @ raw["w3"].T + raw["b3"])
    return h3 @ raw["w4"].T + raw["b4"]


if __name__ == "__main__":
    point_dim = 2
    time_embed_dim = 64      # module default
    hidden_dim = 256         # module default
    batch = 512

    key = jax.random.PRNGKey(0)
    k_params, k_x, k_t = jax.random.split(key, 3)
    raw = init_raw_params(k_params, point_dim, time_embed_dim, hidden_dim)
    params = prepare_params(raw, point_dim)

    x = jax.random.normal(k_x, (batch, point_dim), jnp.float32)
    t = jax.random.uniform(k_t, (batch,), jnp.float32)

    out = jax.block_until_ready(simple_point_mlp_forward(x, t, params))
    ref = reference_forward(x, t, raw)

    assert out.shape == (batch, point_dim)
    max_diff = float(jnp.max(jnp.abs(out - ref)))
    assert jnp.allclose(out, ref, atol=2e-2, rtol=2e-2), (
        f"mismatch vs reference, max|diff|={max_diff}")

    print("KERNEL_OK")
</pallas_src>

<mosaic_0001>
module attributes {stable_mosaic.version = 11 : i64} {
  func.func @_mlp_kernel(%arg0: i32, %arg1: memref<2x512xf32, #tpu.memory_space<vmem>>, %arg2: memref<1x512xf32, #tpu.memory_space<vmem>>, %arg3: memref<64x1xf32, #tpu.memory_space<vmem>>, %arg4: memref<64x1xf32, #tpu.memory_space<vmem>>, %arg5: memref<256x2xf32, #tpu.memory_space<vmem>>, %arg6: memref<256x64xbf16, #tpu.memory_space<vmem>>, %arg7: memref<256x1xf32, #tpu.memory_space<vmem>>, %arg8: memref<256x256xbf16, #tpu.memory_space<vmem>>, %arg9: memref<256x1xf32, #tpu.memory_space<vmem>>, %arg10: memref<256x256xbf16, #tpu.memory_space<vmem>>, %arg11: memref<256x1xf32, #tpu.memory_space<vmem>>, %arg12: memref<256x2xf32, #tpu.memory_space<vmem>>, %arg13: memref<2x1xf32, #tpu.memory_space<vmem>>, %arg14: memref<2x512xf32, #tpu.memory_space<vmem>>) attributes {dimension_semantics = [#tpu.dimension_semantics<parallel>], iteration_bounds = array<i64: 1>, scalar_prefetch = 0 : i64, scratch_operands = 0 : i64, tpu.core_type = #tpu.core_type<tc>, window_params = [{transform_indices = @transform_0, window_bounds = array<i64: 2, 512>}, {transform_indices = @transform_1, window_bounds = array<i64: 1, 512>}, {pipeline_mode = #tpu.pipeline_mode<synchronous>, transform_indices = @transform_2, window_bounds = array<i64: 64, 1>}, {pipeline_mode = #tpu.pipeline_mode<synchronous>, transform_indices = @transform_3, window_bounds = array<i64: 64, 1>}, {pipeline_mode = #tpu.pipeline_mode<synchronous>, transform_indices = @transform_4, window_bounds = array<i64: 256, 2>}, {pipeline_mode = #tpu.pipeline_mode<synchronous>, transform_indices = @transform_5, window_bounds = array<i64: 256, 64>}, {pipeline_mode = #tpu.pipeline_mode<synchronous>, transform_indices = @transform_6, window_bounds = array<i64: 256, 1>}, {pipeline_mode = #tpu.pipeline_mode<synchronous>, transform_indices = @transform_7, window_bounds = array<i64: 256, 256>}, {pipeline_mode = #tpu.pipeline_mode<synchronous>, transform_indices = @transform_8, window_bounds = array<i64: 256, 1>}, {pipeline_mode = #tpu.pipeline_mode<synchronous>, transform_indices = @transform_9, window_bounds = array<i64: 256, 256>}, {pipeline_mode = #tpu.pipeline_mode<synchronous>, transform_indices = @transform_10, window_bounds = array<i64: 256, 1>}, {pipeline_mode = #tpu.pipeline_mode<synchronous>, transform_indices = @transform_11, window_bounds = array<i64: 256, 2>}, {pipeline_mode = #tpu.pipeline_mode<synchronous>, transform_indices = @transform_12, window_bounds = array<i64: 2, 1>}, {transform_indices = @transform_13, window_bounds = array<i64: 2, 512>}]} {
    %c0 = arith.constant 0 : index
    %c0_0 = arith.constant 0 : index
    %0 = vector.load %arg2[%c0, %c0_0] : memref<1x512xf32, #tpu.memory_space<vmem>>, vector<1x512xf32>
    %c0_1 = arith.constant 0 : index
    %c0_2 = arith.constant 0 : index
    %1 = vector.load %arg3[%c0_1, %c0_2] : memref<64x1xf32, #tpu.memory_space<vmem>>, vector<64x1xf32>
    %2 = vector.broadcast %1 : vector<64x1xf32> to vector<64x512xf32>
    %3 = vector.broadcast %0 : vector<1x512xf32> to vector<64x512xf32>
    %4 = arith.mulf %2, %3 : vector<64x512xf32>
    %c0_3 = arith.constant 0 : index
    %c0_4 = arith.constant 0 : index
    %5 = vector.load %arg4[%c0_3, %c0_4] : memref<64x1xf32, #tpu.memory_space<vmem>>, vector<64x1xf32>
    %6 = vector.broadcast %5 : vector<64x1xf32> to vector<64x512xf32>
    %7 = arith.addf %4, %6 : vector<64x512xf32>
    %cst = arith.constant 5.000000e-01 : f32
    %8 = vector.broadcast %cst : f32 to vector<64x512xf32>
    %9 = arith.mulf %8, %7 : vector<64x512xf32>
    %cst_5 = arith.constant 5.000000e-01 : f32
    %10 = vector.broadcast %cst_5 : f32 to vector<64x512xf32>
    %11 = arith.mulf %10, %7 : vector<64x512xf32>
    %12 = math.tanh %11 : vector<64x512xf32>
    %cst_6 = arith.constant 1.000000e+00 : f32
    %13 = vector.broadcast %cst_6 : f32 to vector<64x512xf32>
    %14 = arith.addf %12, %13 : vector<64x512xf32>
    %15 = arith.mulf %9, %14 : vector<64x512xf32>
    %16 = arith.truncf %15 : vector<64x512xf32> to vector<64x512xbf16>
    %c0_7 = arith.constant 0 : index
    %c0_8 = arith.constant 0 : index
    %17 = vector.load %arg6[%c0_7, %c0_8] : memref<256x64xbf16, #tpu.memory_space<vmem>>, vector<256x64xbf16>
    %cst_9 = arith.constant dense<0.000000e+00> : vector<256x512xf32>
    %18 = tpu.matmul %17, %16, %cst_9 {dimension_numbers = #tpu.dot_dimension_numbers<[1], [0], [0], [1], [0, 0, 1, 1], [], []>} : vector<256x64xbf16>, vector<64x512xbf16>, vector<256x512xf32> -> vector<256x512xf32>
    %c0_10 = arith.constant 0 : index
    %c0_11 = arith.constant 0 : index
    %19 = vector.load %arg1[%c0_10, %c0_11] : memref<2x512xf32, #tpu.memory_space<vmem>>, vector<2x512xf32>
    %c0_12 = arith.constant 0 : index
    %c0_13 = arith.constant 0 : index
    %20 = vector.load %arg5[%c0_12, %c0_13] : memref<256x2xf32, #tpu.memory_space<vmem>>, vector<256x2xf32>
    %21 = vector.extract_strided_slice %20 {offsets = [0, 0], sizes = [256, 1], strides = [1, 1]} : vector<256x2xf32> to vector<256x1xf32>
    %22 = vector.extract_strided_slice %19 {offsets = [0, 0], sizes = [1, 512], strides = [1, 1]} : vector<2x512xf32> to vector<1x512xf32>
    %23 = vector.broadcast %21 : vector<256x1xf32> to vector<256x512xf32>
    %24 = vector.broadcast %22 : vector<1x512xf32> to vector<256x512xf32>
    %25 = arith.mulf %23, %24 : vector<256x512xf32>
    %26 = arith.addf %18, %25 : vector<256x512xf32>
    %27 = vector.extract_strided_slice %20 {offsets = [0, 1], sizes = [256, 1], strides = [1, 1]} : vector<256x2xf32> to vector<256x1xf32>
    %28 = vector.extract_strided_slice %19 {offsets = [1, 0], sizes = [1, 512], strides = [1, 1]} : vector<2x512xf32> to vector<1x512xf32>
    %29 = vector.broadcast %27 : vector<256x1xf32> to vector<256x512xf32>
    %30 = vector.broadcast %28 : vector<1x512xf32> to vector<256x512xf32>
    %31 = arith.mulf %29, %30 : vector<256x512xf32>
    %32 = arith.addf %26, %31 : vector<256x512xf32>
    %c0_14 = arith.constant 0 : index
    %c0_15 = arith.constant 0 : index
    %33 = vector.load %arg7[%c0_14, %c0_15] : memref<256x1xf32, #tpu.memory_space<vmem>>, vector<256x1xf32>
    %34 = vector.broadcast %33 : vector<256x1xf32> to vector<256x512xf32>
    %35 = arith.addf %32, %34 : vector<256x512xf32>
    %cst_16 = arith.constant 5.000000e-01 : f32
    %36 = vector.broadcast %cst_16 : f32 to vector<256x512xf32>
    %37 = arith.mulf %36, %35 : vector<256x512xf32>
    %cst_17 = arith.constant 5.000000e-01 : f32
    %38 = vector.broadcast %cst_17 : f32 to vector<256x512xf32>
    %39 = arith.mulf %38, %35 : vector<256x512xf32>
    %40 = math.tanh %39 : vector<256x512xf32>
    %cst_18 = arith.constant 1.000000e+00 : f32
    %41 = vector.broadcast %cst_18 : f32 to vector<256x512xf32>
    %42 = arith.addf %40, %41 : vector<256x512xf32>
    %43 = arith.mulf %37, %42 : vector<256x512xf32>
    %44 = arith.truncf %43 : vector<256x512xf32> to vector<256x512xbf16>
    %c0_19 = arith.constant 0 : index
    %c0_20 = arith.constant 0 : index
    %45 = vector.load %arg8[%c0_19, %c0_20] : memref<256x256xbf16, #tpu.memory_space<vmem>>, vector<256x256xbf16>
    %cst_21 = arith.constant dense<0.000000e+00> : vector<256x512xf32>
    %46 = tpu.matmul %45, %44, %cst_21 {dimension_numbers = #tpu.dot_dimension_numbers<[1], [0], [0], [1], [0, 0, 1, 1], [], []>} : vector<256x256xbf16>, vector<256x512xbf16>, vector<256x512xf32> -> vector<256x512xf32>
    %c0_22 = arith.constant 0 : index
    %c0_23 = arith.constant 0 : index
    %47 = vector.load %arg9[%c0_22, %c0_23] : memref<256x1xf32, #tpu.memory_space<vmem>>, vector<256x1xf32>
    %48 = vector.broadcast %47 : vector<256x1xf32> to vector<256x512xf32>
    %49 = arith.addf %46, %48 : vector<256x512xf32>
    %cst_24 = arith.constant 5.000000e-01 : f32
    %50 = vector.broadcast %cst_24 : f32 to vector<256x512xf32>
    %51 = arith.mulf %50, %49 : vector<256x512xf32>
    %cst_25 = arith.constant 5.000000e-01 : f32
    %52 = vector.broadcast %cst_25 : f32 to vector<256x512xf32>
    %53 = arith.mulf %52, %49 : vector<256x512xf32>
    %54 = math.tanh %53 : vector<256x512xf32>
    %cst_26 = arith.constant 1.000000e+00 : f32
    %55 = vector.broadcast %cst_26 : f32 to vector<256x512xf32>
    %56 = arith.addf %54, %55 : vector<256x512xf32>
    %57 = arith.mulf %51, %56 : vector<256x512xf32>
    %58 = arith.truncf %57 : vector<256x512xf32> to vector<256x512xbf16>
    %c0_27 = arith.constant 0 : index
    %c0_28 = arith.constant 0 : index
    %59 = vector.load %arg10[%c0_27, %c0_28] : memref<256x256xbf16, #tpu.memory_space<vmem>>, vector<256x256xbf16>
    %cst_29 = arith.constant dense<0.000000e+00> : vector<256x512xf32>
    %60 = tpu.matmul %59, %58, %cst_29 {dimension_numbers = #tpu.dot_dimension_numbers<[1], [0], [0], [1], [0, 0, 1, 1], [], []>} : vector<256x256xbf16>, vector<256x512xbf16>, vector<256x512xf32> -> vector<256x512xf32>
    %c0_30 = arith.constant 0 : index
    %c0_31 = arith.constant 0 : index
    %61 = vector.load %arg11[%c0_30, %c0_31] : memref<256x1xf32, #tpu.memory_space<vmem>>, vector<256x1xf32>
    %62 = vector.broadcast %61 : vector<256x1xf32> to vector<256x512xf32>
    %63 = arith.addf %60, %62 : vector<256x512xf32>
    %cst_32 = arith.constant 5.000000e-01 : f32
    %64 = vector.broadcast %cst_32 : f32 to vector<256x512xf32>
    %65 = arith.mulf %64, %63 : vector<256x512xf32>
    %cst_33 = arith.constant 5.000000e-01 : f32
    %66 = vector.broadcast %cst_33 : f32 to vector<256x512xf32>
    %67 = arith.mulf %66, %63 : vector<256x512xf32>
    %68 = math.tanh %67 : vector<256x512xf32>
    %cst_34 = arith.constant 1.000000e+00 : f32
    %69 = vector.broadcast %cst_34 : f32 to vector<256x512xf32>
    %70 = arith.addf %68, %69 : vector<256x512xf32>
    %71 = arith.mulf %65, %70 : vector<256x512xf32>
    %c0_35 = arith.constant 0 : index
    %c0_36 = arith.constant 0 : index
    %72 = vector.load %arg12[%c0_35, %c0_36] : memref<256x2xf32, #tpu.memory_space<vmem>>, vector<256x2xf32>
    %73 = vector.extract_strided_slice %72 {offsets = [0, 0], sizes = [256, 1], strides = [1, 1]} : vector<256x2xf32> to vector<256x1xf32>
    %74 = vector.broadcast %73 : vector<256x1xf32> to vector<256x512xf32>
    %75 = arith.mulf %74, %71 : vector<256x512xf32>
    %cst_37 = arith.constant dense<0.000000e+00> : vector<512xf32>
    %76 = vector.multi_reduction <add>, %75, %cst_37 [0] : vector<256x512xf32> to vector<512xf32>
    %77 = vector.shape_cast %76 : vector<512xf32> to vector<1x512xf32>
    %78 = vector.extract_strided_slice %72 {offsets = [0, 1], sizes = [256, 1], strides = [1, 1]} : vector<256x2xf32> to vector<256x1xf32>
    %79 = vector.broadcast %78 : vector<256x1xf32> to vector<256x512xf32>
    %80 = arith.mulf %79, %71 : vector<256x512xf32>
    %cst_38 = arith.constant dense<0.000000e+00> : vector<512xf32>
    %81 = vector.multi_reduction <add>, %80, %cst_38 [0] : vector<256x512xf32> to vector<512xf32>
    %82 = vector.shape_cast %81 : vector<512xf32> to vector<1x512xf32>
    %83 = tpu.concatenate %77, %82 in 0 : vector<1x512xf32>, vector<1x512xf32> -> vector<2x512xf32>
    %c0_39 = arith.constant 0 : index
    %c0_40 = arith.constant 0 : index
    %84 = vector.load %arg13[%c0_39, %c0_40] : memref<2x1xf32, #tpu.memory_space<vmem>>, vector<2x1xf32>
    %85 = vector.broadcast %84 : vector<2x1xf32> to vector<2x512xf32>
    %86 = arith.addf %83, %85 : vector<2x512xf32>
    %c0_41 = arith.constant 0 : index
    %c0_42 = arith.constant 0 : index
    %87 = vector.load %arg14[%c0_41, %c0_42] : memref<2x512xf32, #tpu.memory_space<vmem>>, vector<2x512xf32>
    tpu.vector_store %arg14[%c0_41, %c0_42], %86 {strides = array<i32>} : memref<2x512xf32, #tpu.memory_space<vmem>>, vector<2x512xf32>,
    return
  }
  func.func @transform_0(%arg0: i32) -> (i32, i32) {
    %c0_i32 = arith.constant 0 : i32
    %c0_i32_0 = arith.constant 0 : i32
    return %c0_i32, %arg0 : i32, i32
  }
  func.func @transform_1(%arg0: i32) -> (i32, i32) {
    %c0_i32 = arith.constant 0 : i32
    %c0_i32_0 = arith.constant 0 : i32
    return %c0_i32, %arg0 : i32, i32
  }
  func.func @transform_2(%arg0: i32) -> (i32, i32) {
    %c0_i32 = arith.constant 0 : i32
    %c0_i32_0 = arith.constant 0 : i32
    %c0_i32_1 = arith.constant 0 : i32
    return %c0_i32, %c0_i32_0 : i32, i32
  }
  func.func @transform_3(%arg0: i32) -> (i32, i32) {
    %c0_i32 = arith.constant 0 : i32
    %c0_i32_0 = arith.constant 0 : i32
    %c0_i32_1 = arith.constant 0 : i32
    return %c0_i32, %c0_i32_0 : i32, i32
  }
  func.func @transform_4(%arg0: i32) -> (i32, i32) {
    %c0_i32 = arith.constant 0 : i32
    %c0_i32_0 = arith.constant 0 : i32
    %c0_i32_1 = arith.constant 0 : i32
    return %c0_i32, %c0_i32_0 : i32, i32
  }
  func.func @transform_5(%arg0: i32) -> (i32, i32) {
    %c0_i32 = arith.constant 0 : i32
    %c0_i32_0 = arith.constant 0 : i32
    %c0_i32_1 = arith.constant 0 : i32
    return %c0_i32, %c0_i32_0 : i32, i32
  }
  func.func @transform_6(%arg0: i32) -> (i32, i32) {
    %c0_i32 = arith.constant 0 : i32
    %c0_i32_0 = arith.constant 0 : i32
    %c0_i32_1 = arith.constant 0 : i32
    return %c0_i32, %c0_i32_0 : i32, i32
  }
  func.func @transform_7(%arg0: i32) -> (i32, i32) {
    %c0_i32 = arith.constant 0 : i32
    %c0_i32_0 = arith.constant 0 : i32
    %c0_i32_1 = arith.constant 0 : i32
    return %c0_i32, %c0_i32_0 : i32, i32
  }
  func.func @transform_8(%arg0: i32) -> (i32, i32) {
    %c0_i32 = arith.constant 0 : i32
    %c0_i32_0 = arith.constant 0 : i32
    %c0_i32_1 = arith.constant 0 : i32
    return %c0_i32, %c0_i32_0 : i32, i32
  }
  func.func @transform_9(%arg0: i32) -> (i32, i32) {
    %c0_i32 = arith.constant 0 : i32
    %c0_i32_0 = arith.constant 0 : i32
    %c0_i32_1 = arith.constant 0 : i32
    return %c0_i32, %c0_i32_0 : i32, i32
  }
  func.func @transform_10(%arg0: i32) -> (i32, i32) {
    %c0_i32 = arith.constant 0 : i32
    %c0_i32_0 = arith.constant 0 : i32
    %c0_i32_1 = arith.constant 0 : i32
    return %c0_i32, %c0_i32_0 : i32, i32
  }
  func.func @transform_11(%arg0: i32) -> (i32, i32) {
    %c0_i32 = arith.constant 0 : i32
    %c0_i32_0 = arith.constant 0 : i32
    %c0_i32_1 = arith.constant 0 : i32
    return %c0_i32, %c0_i32_0 : i32, i32
  }
  func.func @transform_12(%arg0: i32) -> (i32, i32) {
    %c0_i32 = arith.constant 0 : i32
    %c0_i32_0 = arith.constant 0 : i32
    %c0_i32_1 = arith.constant 0 : i32
    return %c0_i32, %c0_i32_0 : i32, i32
  }
  func.func @transform_13(%arg0: i32) -> (i32, i32) {
    %c0_i32 = arith.constant 0 : i32
    %c0_i32_0 = arith.constant 0 : i32
    return %c0_i32, %arg0 : i32, i32
  }
}

</mosaic_0001>

<bundles_post_ra>
// kernel: tpu_custom_call.1
= control target key start
LH: loop header
LB: loop body
LE: loop exit
PB: predicated region body
PF: predicated region fallthrough
CT: control target
= control target key end

     0   :  { %v14015_v2 = vmov 0   ;;  %v96_v7 = vlaneseq  ;;  %v14011_v30 = vmov 1   ;;  %s13997_s0 = inlined_call_operand.vmem [shape: f32[2,512], index: 0, kind: input, shape index: {}]   ;;  %s13998_s1 = inlined_call_operand.vmem [shape: f32[1,512], index: 1, kind: input, shape index: {}]   ;;  %s13999_s2 = inlined_call_operand.vmem [shape: f32[64,1], index: 2, kind: input, shape index: {}]   ;;  %s14000_s3 = inlined_call_operand.vmem [shape: f32[64,1], index: 3, kind: input, shape index: {}]   ;;  %s14001_s4 = inlined_call_operand.vmem [shape: f32[256,2], index: 4, kind: input, shape index: {}]   ;;  %s14002_s5 = inlined_call_operand.vmem [shape: bf16[256,64], index: 5, kind: input, shape index: {}]   ;;  %s14003_s6 = inlined_call_operand.vmem [shape: f32[256,1], index: 6, kind: input, shape index: {}]   ;;  %s14004_s7 = inlined_call_operand.vmem [shape: bf16[256,256], index: 7, kind: input, shape index: {}]   ;;  %s14005_s8 = inlined_call_operand.vmem [shape: f32[256,1], index: 8, kind: input, shape index: {}]   ;;  %s14006_s9 = inlined_call_operand.vmem [shape: bf16[256,256], index: 9, kind: input, shape index: {}]   ;;  %s14007_s10 = inlined_call_operand.vmem [shape: f32[256,1], index: 10, kind: input, shape index: {}]   ;;  %s14008_s11 = inlined_call_operand.vmem [shape: f32[256,2], index: 11, kind: input, shape index: {}]   ;;  %s14009_s12 = inlined_call_operand.vmem [shape: f32[2,1], index: 12, kind: input, shape index: {}]   ;;  %s14010_s13 = inlined_call_operand.hbm [shape: f32[2,512], index: 13, kind: output, shape index: {}]  }
   0x1   :  { %v148_v0 = vld [vmem:[%s14000_s3] sm:$0xff]  ;;  %6262 = vset.pattern.permute.xlu1 %v14015_v2  ;;  %6261 = vset.pattern.permute.xlu0 %v14015_v2  ;;  %v149_v3 = vld [vmem:[%s14000_s3 + $0x8] sm:$0xff]  ;;  %v50_v5 = vld [vmem:[%s13999_s2 + $0x18] sm:$0xff] }
   0x2   :  { %v47_v1 = vld [vmem:[%s13999_s2] sm:$0xff]  ;;  %158 = vperm.xlu1 %6262, %v148_v0   ;;  %v48_v4 = vld [vmem:[%s13999_s2 + $0x8] sm:$0xff]  ;;  %923 = vmatprep.mubr.bf16.mxu0 %v14015_v2  ;;  %v49_v6 = vld [vmem:[%s13999_s2 + $0x10] sm:$0xff]  ;;  %v7388_v10 = vshrl.u32 %v96_v7, 7 }
   0x3   :  { %57 = vperm.xlu0 %6261, %v47_v1   ;;  %1116 = vmatprep.mubr.bf16.mxu1 %v14015_v2  ;;  %v151_v8 = vld [vmem:[%s14000_s3 + $0x18] sm:$0xff]  ;;  %v150_v9 = vld [vmem:[%s14000_s3 + $0x10] sm:$0xff]  ;;  %v52_v11 = vld [vmem:[%s13999_s2 + $0x28] sm:$0xff] }
   0x4   :  { %14175 = vst [vmem:[#allocation5_spill] sm:$0xff] %v7388_v10  ;;  %v51_v12 = vld [vmem:[%s13999_s2 + $0x20] sm:$0xff]  ;;  %v106_v13 = vsub.s32 2, %v7388_v10  ;;  %v110_v14 = vsub.s32 3, %v7388_v10  ;;  %v153_v16 = vld [vmem:[%s14000_s3 + $0x28] sm:$0xff]  ;;  %v7408_v18 = vsub.s32 0, %v7388_v10 }
   0x5   :  { %v404_v15 = vld [vmem:[%s13997_s0] sm:$0xff]  ;;  %v7411_v19 = vsub.s32 1, %v7388_v10  ;;  %v54_v23 = vld [vmem:[%s13999_s2 + $0x38] sm:$0xff]  ;;  %v53_v24 = vld [vmem:[%s13999_s2 + $0x30] sm:$0xff] }
   0x6   :  { %163 = vperm.xlu1 %6262, %v149_v3   ;;  %v152_v17 = vld [vmem:[%s14000_s3 + $0x20] sm:$0xff]  ;;  %v605_v20 = vrot.slane %v404_v15, %v106_v13  ;;  %v1412_v21 = vrot.slane %v404_v15, %v110_v14  ;;  %v155_v26 = vld [vmem:[%s14000_s3 + $0x38] sm:$0xff]  ;;  %v154_v27 = vld [vmem:[%s14000_s3 + $0x30] sm:$0xff] }
   0x7   :  { %62 = vperm.xlu0 %6261, %v48_v4   ;;  %v406_v28 = vld [vmem:[%s14001_s4 + $0x8] sm:$0xff]  ;;  %v7441_v29 = vld [vmem:[%s14001_s4] sm:$0xff]  ;;  %v411_v32 = vld [vmem:[%s14001_s4 + $0x30] sm:$0xff] }
   0x8   :  { %v7418_v22 = vrot.slane %v605_v20, %v7408_v18  ;;  %v7427_v25 = vrot.slane %v1412_v21, %v7411_v19  ;;  %v7448_v31 = vld [vmem:[%s14001_s4 + $0x20] sm:$0xff]  ;;  %v407_v33 = vld [vmem:[%s14001_s4 + $0x10] sm:$0xff]  ;;  %v408_v36 = vld [vmem:[%s14001_s4 + $0x18] sm:$0xff] }
   0x9   :  { %v413_v34 = vld [vmem:[%s14001_s4 + $0x40] sm:$0xff]  ;;  %v415_v35 = vld [vmem:[%s14001_s4 + $0x50] sm:$0xff] }
   0xa   :  { %72 = vperm.xlu1 %6262, %v50_v5   ;;  %14176 = vst [vmem:[#allocation6_spill] sm:$0xff] %v7418_v22  ;;  %14177 = vst [vmem:[#allocation7_spill] sm:$0xff] %v7427_v25  ;;  %v7472_v37 = vld [vmem:[%s14001_s4 + $0x60] sm:$0xff] }
   0xb   :  { %67 = vperm.xlu0 %6261, %v49_v6  }
   0xe   :  { %173 = vperm.xlu1 %6262, %v151_v8  }
   0xf   :  { %168 = vperm.xlu0 %6261, %v150_v9  }
  0x12   :  { %82 = vperm.xlu1 %6262, %v52_v11  }
  0x13   :  { %77 = vperm.xlu0 %6261, %v51_v12  }
  0x16   :  { %183 = vperm.xlu1 %6262, %v153_v16  }
  0x17   :  { %178 = vperm.xlu0 %6261, %v152_v17  }
  0x1a   :  { %92 = vperm.xlu1 %6262, %v54_v23  }
  0x1b   :  { %87 = vperm.xlu0 %6261, %v53_v24  }
  0x1e   :  { %193 = vperm.xlu1 %6262, %v155_v26  }
  0x1f   :  { %188 = vperm.xlu0 %6261, %v154_v27  }
  0x22   :  { %444 = vperm.xlu1 %6262, %v406_v28  }
  0x23   :  { %6263 = vset.pattern.permute.xlu0 %v14011_v30 }
  0x24   :  { %1278 = vperm.xlu0 %6263, %v7441_v29  }
  0x26   :  { %6264 = vset.pattern.permute.xlu1 %v14011_v30 }
  0x27   :  { %1282 = vperm.xlu1 %6264, %v406_v28  }
  0x28   :  { %1294 = vperm.xlu0 %6263, %v7448_v31  }
  0x2b   :  { %6265 = vset.pattern.permute.xlu1 %v14015_v2 }
  0x2c   :  { %1302 = vperm.xlu0 %6263, %v411_v32   ;;  %449 = vperm.xlu1 %6265, %v407_v33  }
  0x30   :  { %1310 = vperm.xlu0 %6263, %v413_v34   ;;  %6266 = vset.pattern.permute.xlu1 %v14011_v30 }
  0x31   :  { %1286 = vperm.xlu1 %6266, %v407_v33  }
  0x34   :  { %1318 = vperm.xlu0 %6263, %v415_v35  }
  0x35   :  { %1290 = vperm.xlu1 %6266, %v408_v36  }
  0x36   :  { %18 = vsyncpa [#allocation3], 0  ;;  %v1698_v38 = vld [vmem:[%s14003_s6 + $0x8] sm:$0xff]  ;;  %v7481_v39 = vld [vmem:[%s14001_s4 + $0x70] sm:$0xff]  ;;  %vm842_vm0 = vcmask 523264   ;;  %vm6093_vm1 = vcmask 1040384  }
  0x37   :  { %v410_v40 = vld [vmem:[%s14001_s4 + $0x28] sm:$0xff]  ;;  %v7491_v41 = vld [vmem:[%s14001_s4 + $0x80] sm:$0xff]  ;;  %v7497_v42 = vld [vmem:[%s14001_s4 + $0x90] sm:$0xff] }
  0x38   :  { %1326 = vperm.xlu0 %6263, %v7472_v37   ;;  %v7504_v43 = vld [vmem:[%s14001_s4 + $0xa0] sm:$0xff]  ;;  %v1699_v44 = vld [vmem:[%s14003_s6 + $0x10] sm:$0xff]  ;;  %v412_v47 = vld [vmem:[%s14001_s4 + $0x38] sm:$0xff] }
  0x39   :  { %6267 = vset.pattern.permute.xlu1 %v14015_v2  ;;  %v7514_v45 = vld [vmem:[%s14001_s4 + $0xb0] sm:$0xff]  ;;  %v7520_v46 = vld [vmem:[%s14001_s4 + $0xc0] sm:$0xff]  ;;  %v414_v52 = vld [vmem:[%s14001_s4 + $0x48] sm:$0xff] }
  0x3a   :  { %1736 = vperm.xlu1 %6267, %v1698_v38   ;;  %v431_v48 = vld [vmem:[%s14001_s4 + $0xd0] sm:$0xff]  ;;  %v433_v49 = vld [vmem:[%s14001_s4 + $0xe0] sm:$0xff]  ;;  %v1700_v55 = vld [vmem:[%s14003_s6 + $0x18] sm:$0xff] }
  0x3b   :  { %v1701_v50 = vld [vmem:[%s14003_s6 + $0x20] sm:$0xff]  ;;  %v435_v51 = vld [vmem:[%s14001_s4 + $0xf0] sm:$0xff]  ;;  %v416_v56 = vld [vmem:[%s14001_s4 + $0x58] sm:$0xff] }
  0x3c   :  { %1334 = vperm.xlu0 %6263, %v7481_v39   ;;  %v1697_v53 = vld [vmem:[%s14003_s6] sm:$0xff]  ;;  %v1703_v54 = vld [vmem:[%s14003_s6 + $0x30] sm:$0xff]  ;;  %v1702_v57 = vld [vmem:[%s14003_s6 + $0x28] sm:$0xff] }
  0x3d   :  { %v1704_v58 = vld [vmem:[%s14003_s6 + $0x38] sm:$0xff]  ;;  %v1706_v59 = vld [vmem:[%s14003_s6 + $0x48] sm:$0xff]  ;;  %v1705_v60 = vld [vmem:[%s14003_s6 + $0x40] sm:$0xff] }
  0x3e   :  { %464 = vperm.xlu1 %6267, %v410_v40   ;;  %v46_v61 = vld [vmem:[%s13998_s1] sm:$0xf]  ;;  %v1708_v62 = vld [vmem:[%s14003_s6 + $0x58] sm:$0xff]  ;;  %v1710_v6 = vld [vmem:[%s14003_s6 + $0x68] sm:$0xff] }
  0x3f   :  { %v7581_v63 = vrot.slane %v46_v61, %v7408_v18  ;;  %v7584_v0 = vrot.slane %v46_v61, %v7411_v19  ;;  %v7588_v1 = vrot.slane %v46_v61, %v106_v13  ;;  %v7592_v3 = vrot.slane %v46_v61, %v110_v14  ;;  %v418_v12 = vld [vmem:[%s14001_s4 + $0x68] sm:$0xff]  ;;  %v1712_v20 = vld [vmem:[%s14003_s6 + $0x78] sm:$0xff] }
  0x40   :  { %1342 = vperm.xlu0 %6263, %v7491_v41  }
  0x42   :  { %6268 = vset.pattern.permute.xlu1 %v14011_v30 }
  0x43   :  { %1298 = vperm.xlu1 %6268, %v410_v40  }
  0x44   :  { %1350 = vperm.xlu0 %6263, %v7497_v42  }
  0x47   :  { %6269 = vset.pattern.permute.xlu1 %v14015_v2 }
  0x48   :  { %1358 = vperm.xlu0 %6263, %v7504_v43   ;;  %1741 = vperm.xlu1 %6269, %v1699_v44  }
  0x4c   :  { %1366 = vperm.xlu0 %6263, %v7514_v45   ;;  %469 = vperm.xlu1 %6269, %v411_v32  }
  0x50   :  { %1374 = vperm.xlu0 %6263, %v7520_v46   ;;  %474 = vperm.xlu1 %6269, %v412_v47  }
  0x54   :  { %1382 = vperm.xlu0 %6263, %v431_v48   ;;  %6270 = vset.pattern.permute.xlu1 %v14011_v30 }
  0x55   :  { %1306 = vperm.xlu1 %6270, %v412_v47  }
  0x58   :  { %1390 = vperm.xlu0 %6263, %v433_v49  }
  0x59   :  { %6271 = vset.pattern.permute.xlu1 %v14015_v2 }
  0x5a   :  { %1751 = vperm.xlu1 %6271, %v1701_v50  }
  0x5c   :  { %1398 = vperm.xlu0 %6263, %v435_v51  }
  0x5e   :  { %479 = vperm.xlu1 %6271, %v413_v34  }
  0x60   :  { %6294 = vset.pattern.permute.xlu0 %v14015_v2 }
  0x61   :  { %439 = vperm.xlu0 %6294, %v7441_v29  }
  0x62   :  { %484 = vperm.xlu1 %6271, %v414_v52  }
  0x65   :  { %454 = vperm.xlu0 %6294, %v408_v36   ;;  %v1714_v36 = vld [vmem:[%s14003_s6 + $0x88] sm:$0xff] }
  0x66   :  { %6272 = vset.pattern.permute.xlu1 %v14011_v30 }
  0x67   :  { %1314 = vperm.xlu1 %6272, %v414_v52  }
  0x69   :  { %1731 = vperm.xlu0 %6294, %v1697_v53  }
  0x6b   :  { %6273 = vset.pattern.permute.xlu1 %v14015_v2 }
  0x6c   :  { %1761 = vperm.xlu1 %6273, %v1703_v54  }
  0x6d   :  { %459 = vperm.xlu0 %6294, %v7448_v31  }
  0x70   :  { %489 = vperm.xlu1 %6273, %v415_v35  }
  0x71   :  { %1746 = vperm.xlu0 %6294, %v1700_v55  }
  0x74   :  { %494 = vperm.xlu1 %6273, %v416_v56  }
  0x75   :  { %1756 = vperm.xlu0 %6294, %v1702_v57   ;;  %v1707_v57 = vld [vmem:[%s14003_s6 + $0x50] sm:$0xff] }
  0x78   :  { %6274 = vset.pattern.permute.xlu1 %v14011_v30 }
  0x79   :  { %1766 = vperm.xlu0 %6294, %v1704_v58   ;;  %1322 = vperm.xlu1 %6274, %v416_v56   ;;  %v1716_v58 = vld [vmem:[%s14003_s6 + $0x98] sm:$0xff] }
  0x7d   :  { %1776 = vperm.xlu0 %6294, %v1706_v59   ;;  %6275 = vset.pattern.permute.xlu1 %v14015_v2 }
  0x7e   :  { %1771 = vperm.xlu1 %6275, %v1705_v60  }
  0x81   :  { %1786 = vperm.xlu0 %6294, %v1708_v62   ;;  %v159_v4 = vpop.permute.xlu1 %158 }
  0x82   :  { %v58_v5 = vpop.permute.xlu0 %57  ;;  %499 = vperm.xlu1 %6275, %v7472_v37  }
  0x83   :  { %v117_v7 = vmul.f32 %v7584_v0, %v58_v5  ;;  %v119_v8 = vmul.f32 %v7592_v3, %v58_v5  ;;  %v116_v9 = vmul.f32 %v7581_v63, %v58_v5  ;;  %v118_v11 = vmul.f32 %v7588_v1, %v58_v5 }
  0x85   :  { %1796 = vperm.xlu0 %6294, %v1710_v6   ;;  %v197_v13 = vadd.f32 %v159_v4, %v117_v7  ;;  %v199_v14 = vadd.f32 %v159_v4, %v119_v8  ;;  %v196_v15 = vadd.f32 %v159_v4, %v116_v9  ;;  %v164_v16 = vpop.permute.xlu1 %163  ;;  %v198_v21 = vadd.f32 %v159_v4, %v118_v11 }
  0x86   :  { %v63_v17 = vpop.permute.xlu0 %62  ;;  %504 = vperm.xlu1 %6275, %v418_v12  }
  0x87   :  { %v121_v23 = vmul.f32 %v7584_v0, %v63_v17  ;;  %v7609_v24 = vmul.f32 0.5, %v197_v13  ;;  %v123_v26 = vmul.f32 %v7592_v3, %v63_v17  ;;  %v7612_v27 = vmul.f32 0.5, %v199_v14  ;;  %v1718_v13 = vld [vmem:[%s14003_s6 + $0xa8] sm:$0xff] }
  0x88   :  { %v120_v28 = vmul.f32 %v7581_v63, %v63_v17  ;;  %v122_v29 = vmul.f32 %v7588_v1, %v63_v17  ;;  %v7617_v33 = vmul.f32 0.5, %v196_v15  ;;  %v7623_v40 = vmul.f32 0.5, %v198_v21 }
  0x89   :  { %1806 = vperm.xlu0 %6294, %v1712_v20   ;;  %v201_v31 = vadd.f32 %v164_v16, %v121_v23  ;;  %6413 = vtanh.f32 %v7609_v24  ;;  %v203_v32 = vadd.f32 %v164_v16, %v123_v26  ;;  %v73_v34 = vpop.permute.xlu1 %72 }
  0x8a   :  { %v68_v35 = vpop.permute.xlu0 %67  ;;  %6415 = vtanh.f32 %v7612_v27  ;;  %v200_v37 = vadd.f32 %v164_v16, %v120_v28  ;;  %v202_v38 = vadd.f32 %v164_v16, %v122_v29  ;;  %6276 = vset.pattern.permute.xlu1 %v14011_v30  ;;  %v128_v44 = vmul.f32 %v7581_v63, %v73_v34 }
  0x8b   :  { %v129_v47 = vmul.f32 %v7584_v0, %v73_v34  ;;  %v125_v48 = vmul.f32 %v7584_v0, %v68_v35  ;;  %v127_v49 = vmul.f32 %v7592_v3, %v68_v35  ;;  %1330 = vperm.xlu1 %6276, %v418_v12   ;;  %v7630_v50 = vmul.f32 0.5, %v201_v31 }
  0x8c   :  { %v7632_v51 = vmul.f32 0.5, %v203_v32  ;;  %v7634_v52 = vmul.f32 0.5, %v200_v37  ;;  %6417 = vtanh.f32 %v7617_v33  ;;  %v131_v53 = vmul.f32 %v7592_v3, %v73_v34 }
  0x8d   :  { %1816 = vperm.xlu0 %6294, %v1714_v36   ;;  %v124_v54 = vmul.f32 %v7581_v63, %v68_v35  ;;  %v174_v55 = vpop.permute.xlu1 %173  ;;  %v7645_v59 = vmul.f32 0.5, %v202_v38  ;;  %6419 = vtanh.f32 %v7623_v40  ;;  %v130_v7 = vmul.f32 %v7588_v1, %v73_v34 }
  0x8e   :  { %v169_v56 = vpop.permute.xlu0 %168  ;;  %6421 = vtanh.f32 %v7630_v50  ;;  %v209_v61 = vadd.f32 %v174_v55, %v129_v47  ;;  %v211_v4 = vadd.f32 %v174_v55, %v131_v53  ;;  %v208_v6 = vadd.f32 %v174_v55, %v128_v44 }
  0x8f   :  { %v205_v60 = vadd.f32 %v169_v56, %v125_v48  ;;  %v207_v62 = vadd.f32 %v169_v56, %v127_v49  ;;  %6277 = vset.pattern.permute.xlu1 %v14015_v2  ;;  %6423 = vtanh.f32 %v7632_v51  ;;  %v204_v5 = vadd.f32 %v169_v56, %v124_v54  ;;  %v420_v49 = vld [vmem:[%s14001_s4 + $0x78] sm:$0xff] }
  0x90   :  { %v126_v8 = vmul.f32 %v7588_v1, %v68_v35  ;;  %1781 = vperm.xlu1 %6277, %v1707_v57   ;;  %6425 = vtanh.f32 %v7634_v52  ;;  %v7660_v14 = vmul.f32 0.5, %v209_v61  ;;  %v7664_v16 = vmul.f32 0.5, %v211_v4 }
  0x91   :  { %1826 = vperm.xlu0 %6294, %v1716_v58   ;;  %v7654_v9 = vmul.f32 0.5, %v205_v60  ;;  %v83_v11 = vpop.permute.xlu1 %82  ;;  %6427 = vtanh.f32 %v7645_v59  ;;  %v7662_v15 = vmul.f32 0.5, %v207_v62  ;;  %v7670_v23 = vmul.f32 0.5, %v204_v5 }
  0x92   :  { %v78_v12 = vpop.permute.xlu0 %77  ;;  %v7667_v20 = vmul.f32 %v7581_v63, %v83_v11  ;;  %v137_v21 = vmul.f32 %v7584_v0, %v83_v11  ;;  %v7672_v26 = vmul.f32 0.5, %v208_v6  ;;  %v7675_v29 = vmul.f32 %v7588_v1, %v83_v11 }
  0x93   :  { %v6414_v17 = vpop.eup %6413  ;;  %v7678_v31 = vmul.f32 %v7592_v3, %v83_v11  ;;  %v7681_v32 = vmul.f32 %v7581_v63, %v78_v12  ;;  %v133_v34 = vmul.f32 %v7584_v0, %v78_v12  ;;  %6429 = vtanh.f32 %v7654_v9  ;;  %v1722_v11 = vld [vmem:[%s14003_s6 + $0xc8] sm:$0xff] }
  0x94   :  { %v6416_v28 = vpop.eup %6415  ;;  %509 = vperm.xlu1 %6277, %v7481_v39   ;;  %v293_v35 = vadd.f32 1.0, %v6414_v17  ;;  %v206_v37 = vadd.f32 %v169_v56, %v126_v8  ;;  %v7687_v38 = vmul.f32 %v7588_v1, %v78_v12  ;;  %v135_v44 = vmul.f32 %v7592_v3, %v78_v12  ;;  %v1720_v39 = vld [vmem:[%s14003_s6 + $0xb8] sm:$0xff] }
  0x95   :  { %1836 = vperm.xlu0 %6294, %v1718_v13   ;;  %v295_v36 = vadd.f32 1.0, %v6416_v28  ;;  %v7690_v47 = vpop.permute.xlu1 %183  ;;  %6431 = vtanh.f32 %v7660_v14  ;;  %v210_v53 = vadd.f32 %v174_v55, %v130_v7 }
  0x96   :  { %v7692_v48 = vpop.permute.xlu0 %178  ;;  %v6418_v54 = vpop.eup %6417  ;;  %v325_v56 = vmul.f32 %v293_v35, %v7609_v24  ;;  %6433 = vtanh.f32 %v7662_v15  ;;  %v7706_v58 = vmul.f32 0.5, %v206_v37  ;;  %v217_v24 = vadd.f32 %v7690_v47, %v137_v21 }
  0x97   :  { %v7703_v57 = vmul.f32 %v295_v36, %v7612_v27  ;;  %v6420_v60 = vpop.eup %6419  ;;  %v292_v61 = vadd.f32 1.0, %v6418_v54  ;;  %6435 = vtanh.f32 %v7664_v16  ;;  %v7709_v62 = vmul.f32 0.5, %v210_v53 }
  0x98   :  { %v213_v4 = vadd.f32 %v7692_v48, %v133_v34  ;;  %v6422_v5 = vpop.eup %6421  ;;  %514 = vperm.xlu1 %6277, %v420_v49   ;;  %v294_v55 = vadd.f32 1.0, %v6420_v60  ;;  %6437 = vtanh.f32 %v7670_v23  ;;  %v215_v27 = vadd.f32 %v7692_v48, %v135_v44 }
  0x99   :  { %1846 = vperm.xlu0 %6294, %v1720_v39   ;;  %v6424_v6 = vpop.eup %6423  ;;  %v93_v7 = vpop.permute.xlu1 %92  ;;  %v297_v12 = vadd.f32 1.0, %v6422_v5  ;;  %v324_v13 = vmul.f32 %v292_v61, %v7617_v33  ;;  %6439 = vtanh.f32 %v7672_v26  ;;  %v219_v5 = vadd.f32 %v7690_v47, %v7678_v31 }
  0x9a   :  { %v88_v8 = vpop.permute.xlu0 %87  ;;  %v7720_v17 = vmul.f32 0.5, %v213_v4  ;;  %v6426_v28 = vpop.eup %6425  ;;  %v7723_v34 = vmul.f32 %v7581_v63, %v93_v7  ;;  %v7726_v21 = vmul.f32 %v7584_v0, %v93_v7  ;;  %v7729_v35 = vmul.f32 %v7588_v1, %v93_v7 }
  0x9b   :  { %v7732_v36 = vmul.f32 %v7592_v3, %v93_v7  ;;  %v6428_v37 = vpop.eup %6427  ;;  %v7735_v33 = vmul.f32 %v7581_v63, %v88_v8  ;;  %v7738_v44 = vmul.f32 %v7584_v0, %v88_v8  ;;  %v7741_v39 = vmul.f32 %v7588_v1, %v88_v8  ;;  %v1724_v1 = vld [vmem:[%s14003_s6 + $0xd8] sm:$0xff] }
  0x9c   :  { %v7744_v53 = vmul.f32 %v7592_v3, %v88_v8  ;;  %6278 = vset.pattern.permute.xlu1 %v14011_v30  ;;  %v329_v54 = vmul.f32 %v297_v12, %v7630_v50  ;;  %v299_v60 = vadd.f32 1.0, %v6424_v6  ;;  %v296_v61 = vadd.f32 1.0, %v6426_v28 }
  0x9d   :  { %1856 = vperm.xlu0 %6294, %v1722_v11   ;;  %v298_v4 = vadd.f32 1.0, %v6428_v37  ;;  %1338 = vperm.xlu1 %6278, %v420_v49   ;;  %v7748_v63 = vpop.permute.xlu1 %193  ;;  %v326_v0 = vmul.f32 %v294_v55, %v7623_v40  ;;  %6441 = vtanh.f32 %v7706_v58  ;;  %v7755_v3 = vmul.f32 0.5, %v217_v24  ;;  %v6430_v50 = vpop.eup %6429 }
  0x9e   :  { %v357_v6 = vpack.c.bf16 %v329_v54, %v325_v56  ;;  %v331_v7 = vmul.f32 %v299_v60, %v7632_v51  ;;  %v328_v49 = vmul.f32 %v296_v61, %v7634_v52  ;;  %v301_v55 = vadd.f32 1.0, %v6430_v50  ;;  %v1709_v51 = vld [vmem:[%s14003_s6 + $0x60] sm:$0xff]  ;;  %v1726_v54 = vld [vmem:[%s14003_s6 + $0xe8] sm:$0xff] }
  0x9f   :  { %v330_v8 = vmul.f32 %v298_v4, %v7645_v59  ;;  %v6432_v40 = vpop.eup %6431  ;;  %6443 = vtanh.f32 %v7709_v62  ;;  %v7763_v11 = vmul.f32 0.5, %v215_v27  ;;  %v7765_v12 = vmul.f32 0.5, %v219_v5 }
  0xa0   :  { %v6434_v24 = vpop.eup %6433  ;;  %891 = vmatprep.subr.bf16.mxu0 %v357_v6  ;;  %v359_v31 = vpack.c.bf16 %v331_v7, %v7703_v57  ;;  %v356_v28 = vpack.c.bf16 %v328_v49, %v324_v13  ;;  %v305_v52 = vadd.f32 1.0, %v6432_v40  ;;  %v333_v27 = vmul.f32 %v301_v55, %v7654_v9  ;;  %v2625_v49 = vld [vmem:[%s14005_s8] sm:$0xff] }
  0xa1   :  { %v358_v56 = vpack.c.bf16 %v330_v8, %v326_v0  ;;  %1866 = vperm.xlu0 %6294, %v1724_v1   ;;  %v6436_v59 = vpop.eup %6435  ;;  %6279 = vset.pattern.permute.xlu1 %v14015_v2  ;;  %v303_v37 = vadd.f32 1.0, %v6434_v24  ;;  %6445 = vtanh.f32 %v7720_v17  ;;  %v212_v57 = vadd.f32 %v7692_v48, %v7681_v32  ;;  %v7779_v60 = vpop.permute.xlu1 %444 }
  0xa2   :  { %v6438_v13 = vpop.eup %6437  ;;  %1084 = vmatprep.subr.bf16.mxu1 %v359_v31  ;;  %892 = vmatpush1.bf16.msra.mxu0 %v356_v28  ;;  %v337_v61 = vmul.f32 %v305_v52, %v7660_v14  ;;  %v307_v4 = vadd.f32 1.0, %v6436_v59  ;;  %6447 = vtanh.f32 %v7755_v3  ;;  %v216_v9 = vadd.f32 %v7690_v47, %v7667_v20  ;;  %v189_v1 = vpop.permute.xlu0 %188 }
  0xa3   :  { %v6440_v0 = vpop.eup %6439  ;;  %1085 = vmatpush1.bf16.msra.mxu1 %v358_v56  ;;  %1791 = vperm.xlu1 %6279, %v1709_v51   ;;  %v335_v5 = vmul.f32 %v303_v37, %v7662_v15  ;;  %v300_v32 = vadd.f32 1.0, %v6438_v13  ;;  %6449 = vtanh.f32 %v7763_v11  ;;  %v7787_v50 = vmul.f32 0.5, %v212_v57  ;;  %v2627_v51 = vld [vmem:[%s14005_s8 + $0x10] sm:$0xff] }
  0xa4   :  { %v361_v6 = vpack.c.bf16 %v337_v61, %v333_v27  ;;  %v339_v14 = vmul.f32 %v307_v4, %v7664_v16  ;;  %v304_v7 = vadd.f32 1.0, %v6440_v0  ;;  %6451 = vtanh.f32 %v7765_v12 }
  0xa5   :  { %1876 = vperm.xlu0 %6294, %v1726_v54   ;;  %v332_v20 = vmul.f32 %v300_v32, %v7670_v23  ;;  %v7795_v8 = vmul.f32 0.5, %v216_v9  ;;  %6453 = vtanh.f32 %v7787_v50  ;;  %v214_v15 = vadd.f32 %v7692_v48, %v7687_v38 }
  0xa6   :  { %893 = vmatprep.subr.bf16.mxu0 %v361_v6  ;;  %v363_v40 = vpack.c.bf16 %v339_v14, %v335_v5  ;;  %v336_v16 = vmul.f32 %v304_v7, %v7672_v26  ;;  %v218_v55 = vadd.f32 %v7690_v47, %v7675_v29  ;;  %v221_v23 = vadd.f32 %v189_v1, %v7738_v44  ;;  %v7804_v24 = vpop.permute.xlu1 %1282  ;;  %v422_v29 = vld [vmem:[%s14001_s4 + $0x88] sm:$0xff]  ;;  %v2629_v14 = vld [vmem:[%s14005_s8 + $0x20] sm:$0xff] }
  0xa7   :  { %v6442_v31 = vpop.eup %6441  ;;  %519 = vperm.xlu1 %6279, %v7491_v41   ;;  %6455 = vtanh.f32 %v7795_v8  ;;  %v7808_v28 = vmul.f32 0.5, %v214_v15  ;;  %v225_v38 = vadd.f32 %v7748_v63, %v7726_v21  ;;  %v223_v48 = vadd.f32 %v189_v1, %v7744_v53 }
  0xa8   :  { %1086 = vmatprep.subr.bf16.mxu1 %v363_v40  ;;  %v360_v26 = vpack.c.bf16 %v336_v16, %v332_v20  ;;  %v302_v56 = vadd.f32 1.0, %v6442_v31  ;;  %v7816_v47 = vmul.f32 0.5, %v218_v55  ;;  %v7818_v41 = vmul.f32 0.5, %v221_v23  ;;  %v7868_v23 = vpop.permute.xlu0 %1278 }
  0xa9   :  { %2659 = vperm.xlu0 %6294, %v2625_v49   ;;  %v6444_v44 = vpop.eup %6443  ;;  %6457 = vtanh.f32 %v7808_v28  ;;  %v7824_v21 = vmul.f32 0.5, %v225_v38  ;;  %v227_v53 = vadd.f32 %v7748_v63, %v7732_v36  ;;  %v7828_v52 = vmul.f32 0.5, %v223_v48  ;;  %v1711_v38 = vld [vmem:[%s14003_s6 + $0x70] sm:$0xff] }
  0xaa   :  { %894 = vmatpush1.bf16.msra.mxu0 %v360_v26  ;;  %v306_v59 = vadd.f32 1.0, %v6444_v44  ;;  %v334_v27 = vmul.f32 %v302_v56, %v7706_v58  ;;  %6459 = vtanh.f32 %v7816_v47  ;;  %v220_v37 = vadd.f32 %v189_v1, %v7735_v33 }
  0xab   :  { %v6446_v54 = vpop.eup %6445  ;;  %524 = vperm.xlu1 %6279, %v422_v29   ;;  %6461 = vtanh.f32 %v7818_v41  ;;  %v7834_v57 = vmul.f32 0.5, %v227_v53  ;;  %v224_v13 = vadd.f32 %v7748_v63, %v7723_v34  ;;  %v222_v36 = vadd.f32 %v189_v1, %v7741_v39  ;;  %v7839_v61 = vpop.permute.xlu1 %449 }
  0xac   :  { %v6448_v4 = vpop.eup %6447  ;;  %v338_v58 = vmul.f32 %v306_v59, %v7709_v62  ;;  %v309_v9 = vadd.f32 1.0, %v6446_v54  ;;  %6463 = vtanh.f32 %v7824_v21  ;;  %v7843_v33 = vmul.f32 0.5, %v220_v37 }
  0xad   :  { %2669 = vperm.xlu0 %6294, %v2627_v51   ;;  %v6450_v0 = vpop.eup %6449  ;;  %v313_v5 = vadd.f32 1.0, %v6448_v4  ;;  %6465 = vtanh.f32 %v7828_v52  ;;  %v7846_v32 = vmul.f32 0.5, %v224_v13  ;;  %v226_v34 = vadd.f32 %v7748_v63, %v7729_v35 }
  0xae   :  { %v6452_v39 = vpop.eup %6451  ;;  %v362_v1 = vpack.c.bf16 %v338_v58, %v334_v27  ;;  %v341_v6 = vmul.f32 %v309_v9, %v7720_v17  ;;  %v311_v62 = vadd.f32 1.0, %v6450_v0  ;;  %6467 = vtanh.f32 %v7834_v57  ;;  %v7887_v9 = vpop.permute.xlu0 %1294 }
  0xaf   :  { %v6454_v7 = vpop.eup %6453  ;;  %v345_v20 = vmul.f32 %v313_v5, %v7755_v3  ;;  %v315_v49 = vadd.f32 1.0, %v6452_v39  ;;  %6280 = vset.pattern.permute.xlu1 %v14011_v30  ;;  %6469 = vtanh.f32 %v7843_v33  ;;  %v7858_v35 = vmul.f32 0.5, %v222_v36 }
  0xb0   :  { %1087 = vmatpush1.bf16.msra.mxu1 %v362_v1  ;;  %v343_v17 = vmul.f32 %v311_v62, %v7763_v11  ;;  %v308_v63 = vadd.f32 1.0, %v6454_v7  ;;  %1346 = vperm.xlu1 %6280, %v422_v29   ;;  %6471 = vtanh.f32 %v7846_v32  ;;  %v7862_v15 = vmul.f32 0.5, %v226_v34  ;;  %v7864_v40 = vpop.permute.xlu1 %1286  ;;  %v424_v7 = vld [vmem:[%s14001_s4 + $0x98] sm:$0xff] }
  0xb1   :  { %v6456_v16 = vpop.eup %6455  ;;  %v365_v3 = vpack.c.bf16 %v345_v20, %v341_v6  ;;  %v347_v55 = vmul.f32 %v315_v49, %v7765_v12  ;;  %2679 = vperm.xlu0 %6294, %v2629_v14   ;;  %6473 = vtanh.f32 %v7858_v35  ;;  %v2631_v12 = vld [vmem:[%s14005_s8 + $0x30] sm:$0xff] }
  0xb2   :  { %v312_v31 = vadd.f32 1.0, %v6456_v16  ;;  %v340_v11 = vmul.f32 %v308_v63, %v7787_v50  ;;  %6475 = vtanh.f32 %v7862_v15 }
  0xb3   :  { %v6458_v48 = vpop.eup %6457  ;;  %895 = vmatprep.subr.bf16.mxu0 %v365_v3  ;;  %v367_v26 = vpack.c.bf16 %v347_v55, %v343_v17 }
  0xb4   :  { %v6460_v56 = vpop.eup %6459  ;;  %v344_v29 = vmul.f32 %v312_v31, %v7795_v8  ;;  %v310_v44 = vadd.f32 1.0, %v6458_v48  ;;  %6281 = vset.pattern.permute.xlu1 %v14015_v2  ;;  %v7880_v50 = vpop.permute.xlu1 %1290  ;;  %v2633_v8 = vld [vmem:[%s14005_s8 + $0x40] sm:$0xff] }
  0xb5   :  { %v6462_v51 = vpop.eup %6461  ;;  %1088 = vmatprep.subr.bf16.mxu1 %v367_v26  ;;  %v314_v53 = vadd.f32 1.0, %v6460_v56  ;;  %1801 = vperm.xlu1 %6281, %v1711_v38   ;;  %v1713_v56 = vld [vmem:[%s14003_s6 + $0x80] sm:$0xff] }
  0xb6   :  { %v6464_v59 = vpop.eup %6463  ;;  %v364_v27 = vpack.c.bf16 %v344_v29, %v340_v11  ;;  %v342_v37 = vmul.f32 %v310_v44, %v7808_v28  ;;  %v317_v54 = vadd.f32 1.0, %v6462_v51  ;;  %2689 = vperm.xlu0 %6294, %v2631_v12   ;;  %v7906_v11 = vpop.permute.xlu0 %1302  ;;  %v2641_v29 = vld [vmem:[%s14005_s8 + $0x80] sm:$0xff]  ;;  %v6302_v51 = vld [vmem:[%s14002_s5 + $0x8] sm:$0xff]  }
  0xb7   :  { %v6466_v13 = vpop.eup %6465  ;;  %v346_v36 = vmul.f32 %v314_v53, %v7816_v47  ;;  %v321_v4 = vadd.f32 1.0, %v6464_v59  ;;  %v2643_v59 = vld [vmem:[%s14005_s8 + $0x90] sm:$0xff] }
  0xb8   :  { %v6468_v58 = vpop.eup %6467  ;;  %896 = vmatpush1.bf16.msra.mxu0 %v364_v27  ;;  %v349_v0 = vmul.f32 %v317_v54, %v7818_v41  ;;  %v319_v5 = vadd.f32 1.0, %v6466_v13  ;;  %v2645_v54 = vld [vmem:[%s14005_s8 + $0xa0] sm:$0xff] }
  0xb9   :  { %v6470_v34 = vpop.eup %6469  ;;  %v366_v39 = vpack.c.bf16 %v346_v36, %v342_v37  ;;  %v353_v28 = vmul.f32 %v321_v4, %v7824_v21  ;;  %v323_v1 = vadd.f32 1.0, %v6468_v58  ;;  %529 = vperm.xlu1 %6281, %v7497_v42   ;;  %v7892_v47 = vpop.permute.xlu1 %1736  ;;  %v2635_v42 = vld [vmem:[%s14005_s8 + $0x50] sm:$0xff]  ;;  %v426_v37 = vld [vmem:[%s14001_s4 + $0xa8] sm:$0xff] }
  0xba   :  { %14178 = vst [vmem:[#allocation8_spill] sm:$0xff] %v7892_v47  ;;  %v6472_v6 = vpop.eup %6471  ;;  %v351_v62 = vmul.f32 %v319_v5, %v7828_v52  ;;  %v316_v14 = vadd.f32 1.0, %v6470_v34  ;;  %2699 = vperm.xlu0 %6294, %v2633_v8   ;;  %v7922_v12 = vpop.permute.xlu0 %1310  ;;  %v2647_v4 = vld [vmem:[%s14005_s8 + $0xb0] sm:$0xff]  ;;  %v2649_v5 = vld [vmem:[%s14005_s8 + $0xc0] sm:$0xff]  ;;  %v6304_v34 = vld [vmem:[%s14002_s5 + $0x18] sm:$0xff]   ;;  %v612_v47 = vsub.s32 6, %v7388_v10 }
  0xbb   :  { %v6474_v41 = vpop.eup %6473  ;;  %1089 = vmatpush1.bf16.msra.mxu1 %v366_v39  ;;  %v369_v20 = vpack.c.bf16 %v353_v28, %v349_v0  ;;  %v355_v49 = vmul.f32 %v323_v1, %v7834_v57  ;;  %v320_v21 = vadd.f32 1.0, %v6472_v6  ;;  %v1715_v0 = vld [vmem:[%s14003_s6 + $0x90] sm:$0xff] }
  0xbc   :  { %v6476_v17 = vpop.eup %6475  ;;  %v348_v63 = vmul.f32 %v316_v14, %v7843_v33  ;;  %v318_v52 = vadd.f32 1.0, %v6474_v41  ;;  %v2637_v33 = vld [vmem:[%s14005_s8 + $0x60] sm:$0xff]  ;;  %v2651_v1 = vld [vmem:[%s14005_s8 + $0xd0] sm:$0xff] }
  0xbd   :  { %897 = vmatprep.subr.bf16.mxu0 %v369_v20  ;;  %v371_v16 = vpack.c.bf16 %v355_v49, %v351_v62  ;;  %v352_v3 = vmul.f32 %v320_v21, %v7846_v32  ;;  %v322_v55 = vadd.f32 1.0, %v6476_v17  ;;  %534 = vperm.xlu1 %6281, %v424_v7   ;;  %v7904_v31 = vpop.permute.xlu1 %464  ;;  %v6301_v32 = vld [vmem:[%s14002_s5] sm:$0xff]   ;;  %v428_v62 = vld [vmem:[%s14001_s4 + $0xb8] sm:$0xff] }
  0xbe   :  { %v350_v57 = vmul.f32 %v318_v52, %v7858_v35  ;;  %2709 = vperm.xlu0 %6294, %v2635_v42   ;;  %v7940_v53 = vpop.permute.xlu0 %1318  ;;  %v6305_v14 = vld [vmem:[%s14002_s5 + $0x20] sm:$0xff]   ;;  %v6306_v42 = vld [vmem:[%s14002_s5 + $0x28] sm:$0xff]  }
  0xbf   :  { %1090 = vmatprep.subr.bf16.mxu1 %v371_v16  ;;  %v368_v38 = vpack.c.bf16 %v352_v3, %v348_v63  ;;  %v354_v48 = vmul.f32 %v322_v55, %v7862_v15  ;;  %v2639_v15 = vld [vmem:[%s14005_s8 + $0x70] sm:$0xff]  ;;  %v3971_v17 = vld [vmem:[%s14007_s10] sm:$0xff] }
  0xc0   :  { %v1717_v63 = vld [vmem:[%s14003_s6 + $0xa0] sm:$0xff]  ;;  %v3973_v16 = vld [vmem:[%s14007_s10 + $0x10] sm:$0xff] }
  0xc1   :  { %898 = vmatpush1.bf16.msra.mxu0 %v368_v38  ;;  %v370_v26 = vpack.c.bf16 %v354_v48, %v350_v57  ;;  %6282 = vset.pattern.permute.xlu1 %v14011_v30  ;;  %v6307_v57 = vld [vmem:[%s14002_s5 + $0x30] sm:$0xff]   ;;  %v3975_v38 = vld [vmem:[%s14007_s10 + $0x20] sm:$0xff]  ;;  %v430_v48 = vld [vmem:[%s14001_s4 + $0xc8] sm:$0xff] }
  0xc2   :  { %2719 = vperm.xlu0 %6294, %v2637_v33   ;;  %1354 = vperm.xlu1 %6282, %v424_v7   ;;  %v7917_v35 = vpop.permute.xlu1 %1298  ;;  %v7960_v36 = vpop.permute.xlu0 %1326  ;;  %v2653_v7 = vld [vmem:[%s14005_s8 + $0xe0] sm:$0xff] }
  0xc3   :  { %1091 = vmatpush1.bf16.msra.mxu1 %v370_v26  ;;  %v3977_v26 = vld [vmem:[%s14007_s10 + $0x30] sm:$0xff] }
  0xc4   :  { %6161 = vmatmul.mubr.msk.bf16.vlgmr.msra.gmra.mrb[0].mxu0 %vm842_vm0, %v6301_v32 }
  0xc5   :  { %933 = vmatprep.mubr.bf16.mxu0 %v14015_v2 }
  0xc6   :  { %6177 = vmatmul.mubr.msk.bf16.vlgmr.msra.gmra.mrb[0].mxu1 %vm842_vm0, %v6301_v32  ;;  %2729 = vperm.xlu0 %6294, %v2639_v15   ;;  %v7973_v58 = vpop.permute.xlu0 %1334  ;;  %v3979_v15 = vld [vmem:[%s14007_s10 + $0x40] sm:$0xff] }
  0xc7   :  { %1126 = vmatprep.mubr.bf16.mxu1 %v14015_v2  ;;  %6283 = vset.pattern.permute.xlu1 %v14015_v2  ;;  %v7935_v44 = vpop.permute.xlu1 %1741 }
  0xc8   :  { %14179 = vst [vmem:[#allocation9_spill] sm:$0xff] %v7935_v44  ;;  %1811 = vperm.xlu1 %6283, %v1713_v56   ;;  %v5245_v44 = vld [vmem:[%s14008_s11 + $0xc0] sm:$0xff] }
  0xca   :  { %2739 = vperm.xlu0 %6294, %v2641_v29   ;;  %v7989_v28 = vpop.permute.xlu0 %1342 }
  0xcb   :  { %v7945_v27 = vpop.permute.xlu1 %469 }
  0xcc   :  { %6162 = vmatmul.mubr.msk.bf16.gmra.mrb[4].mxu0 %vm842_vm0, %v6302_v51  ;;  %539 = vperm.xlu1 %6283, %v7504_v43   ;;  %v6303_v43 = vld [vmem:[%s14002_s5 + $0x10] sm:$0xff]  }
  0xcd   :  { %943 = vmatprep.mubr.bf16.mxu0 %v14015_v2 }
  0xce   :  { %6178 = vmatmul.mubr.msk.bf16.gmra.mrb[4].mxu1 %vm842_vm0, %v6302_v51  ;;  %2749 = vperm.xlu0 %6294, %v2643_v59   ;;  %v8012_v20 = vpop.permute.xlu0 %1350  ;;  %v1719_v51 = vld [vmem:[%s14003_s6 + $0xb0] sm:$0xff] }
  0xcf   :  { %1136 = vmatprep.mubr.bf16.mxu1 %v14015_v2  ;;  %v7958_v13 = vpop.permute.xlu1 %474  ;;  %v3981_v59 = vld [vmem:[%s14007_s10 + $0x50] sm:$0xff] }
  0xd0   :  { %544 = vperm.xlu1 %6283, %v426_v37  }
  0xd2   :  { %2759 = vperm.xlu0 %6294, %v2645_v54   ;;  %v8024_v21 = vpop.permute.xlu0 %1358 }
  0xd4   :  { %6163 = vmatmul.mubr.msk.bf16.gmra.mrb[8].mxu0 %vm842_vm0, %v6303_v43  ;;  %6284 = vset.pattern.permute.xlu1 %v14011_v30  ;;  %v7970_v8 = vpop.permute.xlu1 %1306 }
  0xd5   :  { %953 = vmatprep.mubr.bf16.mxu0 %v14015_v2  ;;  %1362 = vperm.xlu1 %6284, %v426_v37  }
  0xd6   :  { %6179 = vmatmul.mubr.msk.bf16.gmra.mrb[8].mxu1 %vm842_vm0, %v6303_v43  ;;  %2769 = vperm.xlu0 %6294, %v2647_v4   ;;  %v8043_v3 = vpop.permute.xlu0 %1366  ;;  %v6309_v43 = vld [vmem:[%s14002_s5 + $0x40] sm:$0xff]  }
  0xd7   :  { %1146 = vmatprep.mubr.bf16.mxu1 %v14015_v2  ;;  %14182 = vst [vmem:[#allocation12_spill] sm:$0xff] %v8043_v3  ;;  %v3983_v4 = vld [vmem:[%s14007_s10 + $0x60] sm:$0xff] }
  0xd9   :  { %6285 = vset.pattern.permute.xlu1 %v14015_v2  ;;  %v7987_v39 = vpop.permute.xlu1 %1751 }
  0xda   :  { %14180 = vst [vmem:[#allocation10_spill] sm:$0xff] %v7987_v39  ;;  %1821 = vperm.xlu1 %6285, %v1715_v0   ;;  %2779 = vperm.xlu0 %6294, %v2649_v5   ;;  %v8061_v32 = vpop.permute.xlu0 %1374  ;;  %v7245_v5 = vld [vmem:[%s14001_s4 + $0xd0] sm:$0xff]  ;;  %v5241_v39 = vld [vmem:[%s14008_s11 + $0xa0] sm:$0xff] }
  0xdb   :  { %14183 = vst [vmem:[#allocation13_spill] sm:$0xff] %v8061_v32 }
  0xdc   :  { %6164 = vmatmul.mubr.msk.bf16.gmra.mrb[12].mxu0 %vm842_vm0, %v6304_v34 }
  0xdd   :  { %963 = vmatprep.mubr.bf16.mxu0 %v14015_v2  ;;  %v7996_v6 = vpop.permute.xlu1 %479 }
  0xde   :  { %6180 = vmatmul.mubr.msk.bf16.gmra.mrb[12].mxu1 %vm842_vm0, %v6304_v34  ;;  %549 = vperm.xlu1 %6285, %v7514_v45   ;;  %v2655_v45 = vld [vmem:[%s14005_s8 + $0xf0] sm:$0xff]  ;;  %v8079_v29 = vpop.permute.xlu0 %1382  ;;  %v432_v34 = vld [vmem:[%s14001_s4 + $0xd8] sm:$0xff] }
  0xdf   :  { %1156 = vmatprep.mubr.bf16.mxu1 %v14015_v2  ;;  %2789 = vperm.xlu0 %6294, %v2651_v1   ;;  %14184 = vst [vmem:[#allocation14_spill] sm:$0xff] %v8079_v29  ;;  %v3985_v1 = vld [vmem:[%s14007_s10 + $0x70] sm:$0xff] }
  0xe1   :  { %v8010_v41 = vpop.permute.xlu1 %484 }
  0xe2   :  { %554 = vperm.xlu1 %6285, %v428_v62   ;;  %v8094_v54 = vpop.permute.xlu0 %1390 }
  0xe3   :  { %2799 = vperm.xlu0 %6294, %v2653_v7   ;;  %14186 = vst [vmem:[#allocation16_spill] sm:$0xff] %v8094_v54  ;;  %v6310_v7 = vld [vmem:[%s14002_s5 + $0x48] sm:$0xff]  }
  0xe4   :  { %6165 = vmatmul.mubr.msk.bf16.gmra.mrb[16].mxu0 %vm842_vm0, %v6305_v14 }
  0xe5   :  { %973 = vmatprep.mubr.bf16.mxu0 %v14015_v2 }
  0xe6   :  { %6181 = vmatmul.mubr.msk.bf16.gmra.mrb[16].mxu1 %vm842_vm0, %v6305_v14  ;;  %6286 = vset.pattern.permute.xlu1 %v14011_v30  ;;  %v8021_v49 = vpop.permute.xlu1 %1314  ;;  %v8117_v14 = vpop.permute.xlu0 %1398 }
  0xe7   :  { %1166 = vmatprep.mubr.bf16.mxu1 %v14015_v2  ;;  %2809 = vperm.xlu0 %6294, %v2655_v45   ;;  %14187 = vst [vmem:[#allocation17_spill] sm:$0xff] %v8117_v14  ;;  %v3987_v45 = vld [vmem:[%s14007_s10 + $0x80] sm:$0xff]  ;;  %v6315_v14 = vld [vmem:[%s14002_s5 + $0x70] sm:$0xff]  }
  0xe8   :  { %1370 = vperm.xlu1 %6286, %v428_v62  }
  0xeb   :  { %4005 = vperm.xlu0 %6294, %v3971_v17   ;;  %v8035_v52 = vpop.permute.xlu1 %1761  ;;  %v8130_v17 = vpop.permute.xlu0 %439 }
  0xec   :  { %14181 = vst [vmem:[#allocation11_spill] sm:$0xff] %v8035_v52  ;;  %6166 = vmatmul.mubr.msk.bf16.gmra.mrb[20].mxu0 %vm842_vm0, %v6306_v42  ;;  %6287 = vset.pattern.permute.xlu1 %v14015_v2 }
  0xed   :  { %983 = vmatprep.mubr.bf16.mxu0 %v14015_v2  ;;  %1831 = vperm.xlu1 %6287, %v1717_v63   ;;  %v3989_v63 = vld [vmem:[%s14007_s10 + $0x90] sm:$0xff] }
  0xee   :  { %6182 = vmatmul.mubr.msk.bf16.gmra.mrb[20].mxu1 %vm842_vm0, %v6306_v42 }
  0xef   :  { %1176 = vmatprep.mubr.bf16.mxu1 %v14015_v2  ;;  %4015 = vperm.xlu0 %6294, %v3973_v16   ;;  %v8047_v55 = vpop.permute.xlu1 %489  ;;  %v1721_v16 = vld [vmem:[%s14003_s6 + $0xc0] sm:$0xff] }
  0xf1   :  { %559 = vperm.xlu1 %6287, %v7520_v46   ;;  %v6308_v46 = vld [vmem:[%s14002_s5 + $0x38] sm:$0xff]  }
  0xf3   :  { %4025 = vperm.xlu0 %6294, %v3975_v38   ;;  %v8059_v33 = vpop.permute.xlu1 %494  ;;  %v6311_v38 = vld [vmem:[%s14002_s5 + $0x50] sm:$0xff]  }
  0xf4   :  { %6167 = vmatmul.mubr.msk.bf16.gmra.mrb[24].mxu0 %vm842_vm0, %v6307_v57 }
  0xf5   :  { %993 = vmatprep.mubr.bf16.mxu0 %v14015_v2  ;;  %564 = vperm.xlu1 %6287, %v430_v48  }
  0xf6   :  { %6183 = vmatmul.mubr.msk.bf16.gmra.mrb[24].mxu1 %vm842_vm0, %v6307_v57 }
  0xf7   :  { %1186 = vmatprep.mubr.bf16.mxu1 %v14015_v2  ;;  %4035 = vperm.xlu0 %6294, %v3977_v26   ;;  %v8151_v26 = vpop.permute.xlu0 %454 }
  0xf8   :  { %v8076_v56 = vpop.permute.xlu1 %1322 }
  0xf9   :  { %6288 = vset.pattern.permute.xlu1 %v14011_v30 }
  0xfa   :  { %1378 = vperm.xlu1 %6288, %v430_v48   ;;  %v3991_v48 = vld [vmem:[%s14007_s10 + $0xa0] sm:$0xff] }
  0xfb   :  { %4045 = vperm.xlu0 %6294, %v3979_v15   ;;  %v3993_v15 = vld [vmem:[%s14007_s10 + $0xb0] sm:$0xff] }
  0xfc   :  { %6168 = vmatmul.mubr.msk.bf16.gmra.mrb[28].mxu0 %vm842_vm0, %v6308_v46 }
  0xfd   :  { %1003 = vmatprep.mubr.bf16.mxu0 %v14015_v2  ;;  %v8089_v37 = vpop.permute.xlu1 %1771 }
  0xfe   :  { %14185 = vst [vmem:[#allocation15_spill] sm:$0xff] %v8089_v37  ;;  %6184 = vmatmul.mubr.msk.bf16.gmra.mrb[28].mxu1 %vm842_vm0, %v6308_v46  ;;  %6289 = vset.pattern.permute.xlu1 %v14015_v2  ;;  %v14196_v37 = vmov 0  }
  0xff   :  { %1196 = vmatprep.mubr.bf16.mxu1 %v14015_v2  ;;  %1841 = vperm.xlu1 %6289, %v1719_v51   ;;  %v7246_v51 = vld [vmem:[%s14001_s4 + $0xe0] sm:$0xff] }
 0x100   :  { %4055 = vperm.xlu0 %6294, %v3981_v59   ;;  %v434_v59 = vld [vmem:[%s14001_s4 + $0xe8] sm:$0xff] }
 0x101   :  { %v8102_v0 = vpop.permute.xlu1 %499 }
 0x103   :  { %569 = vperm.xlu1 %6289, %v7245_v5   ;;  %v6312_v5 = vld [vmem:[%s14002_s5 + $0x58] sm:$0xff]  }
 0x104   :  { %6169 = vmatmul.mubr.msk.bf16.gmra.mrb[32].mxu0 %vm842_vm0, %v6309_v43  ;;  %4065 = vperm.xlu0 %6294, %v3983_v4   ;;  %v8170_v4 = vpop.permute.xlu0 %1731 }
 0x105   :  { %1013 = vmatprep.mubr.bf16.mxu0 %v14015_v2  ;;  %v8115_v62 = vpop.permute.xlu1 %504  ;;  %14189 = vst [vmem:[#allocation19_spill] sm:$0xff] %v8170_v4  ;;  %v2640_v4 = vld [vmem:[%s14005_s8 + $0x78] sm:$0xff] }
 0x106   :  { %6185 = vmatmul.mubr.msk.bf16.gmra.mrb[32].mxu1 %vm842_vm0, %v6309_v43 }
 0x107   :  { %1206 = vmatprep.mubr.bf16.mxu1 %v14015_v2  ;;  %574 = vperm.xlu1 %6289, %v432_v34  }
 0x108   :  { %4075 = vperm.xlu0 %6294, %v3985_v1  }
 0x10a   :  { %v8127_v42 = vpop.permute.xlu1 %1330 }
 0x10b   :  { %6290 = vset.pattern.permute.xlu1 %v14011_v30 }
 0x10c   :  { %6170 = vmatmul.mubr.msk.bf16.gmra.mrb[36].mxu0 %vm842_vm0, %v6310_v7  ;;  %4085 = vperm.xlu0 %6294, %v3987_v45   ;;  %v8185_v45 = vpop.permute.xlu0 %459 }
 0x10d   :  { %1023 = vmatprep.mubr.bf16.mxu0 %v14015_v2  ;;  %1386 = vperm.xlu1 %6290, %v432_v34   ;;  %v3995_v34 = vld [vmem:[%s14007_s10 + $0xc0] sm:$0xff] }
 0x10e   :  { %6186 = vmatmul.mubr.msk.bf16.gmra.mrb[36].mxu1 %vm842_vm0, %v6310_v7  ;;  %v3997_v7 = vld [vmem:[%s14007_s10 + $0xd0] sm:$0xff] }
 0x10f   :  { %1216 = vmatprep.mubr.bf16.mxu1 %v14015_v2  ;;  %v8142_v57 = vpop.permute.xlu1 %1781 }
 0x110   :  { %14188 = vst [vmem:[#allocation18_spill] sm:$0xff] %v8142_v57  ;;  %4095 = vperm.xlu0 %6294, %v3989_v63   ;;  %v6313_v63 = vld [vmem:[%s14002_s5 + $0x60] sm:$0xff]  }
 0x111   :  { %6291 = vset.pattern.permute.xlu1 %v14015_v2 }
 0x112   :  { %1851 = vperm.xlu1 %6291, %v1721_v16   ;;  %v1723_v16 = vld [vmem:[%s14003_s6 + $0xd0] sm:$0xff] }
 0x113   :  { %v8153_v46 = vpop.permute.xlu1 %509 }
 0x114   :  { %6171 = vmatmul.mubr.msk.bf16.gmra.mrb[40].mxu0 %vm842_vm0, %v6311_v38  ;;  %4105 = vperm.xlu0 %6294, %v3991_v48  }
 0x115   :  { %1033 = vmatprep.mubr.bf16.mxu0 %v14015_v2 }
 0x116   :  { %6187 = vmatmul.mubr.msk.bf16.gmra.mrb[40].mxu1 %vm842_vm0, %v6311_v38  ;;  %579 = vperm.xlu1 %6291, %v7246_v51   ;;  %v3999_v38 = vld [vmem:[%s14007_s10 + $0xe0] sm:$0xff]  ;;  %v4001_v51 = vld [vmem:[%s14007_s10 + $0xf0] sm:$0xff] }
 0x117   :  { %1226 = vmatprep.mubr.bf16.mxu1 %v14015_v2  ;;  %v8168_v43 = vpop.permute.xlu1 %514 }
 0x118   :  { %4115 = vperm.xlu0 %6294, %v3993_v15   ;;  %v8202_v15 = vpop.permute.xlu0 %1746 }
 0x119   :  { %14191 = vst [vmem:[#allocation21_spill] sm:$0xff] %v8202_v15 }
 0x11a   :  { %584 = vperm.xlu1 %6291, %v434_v59  }
 0x11c   :  { %6172 = vmatmul.mubr.msk.bf16.gmra.mrb[44].mxu0 %vm842_vm0, %v6312_v5  ;;  %4125 = vperm.xlu0 %6294, %v3995_v34   ;;  %v8179_v1 = vpop.permute.xlu1 %1338  ;;  %v7247_v34 = vld [vmem:[%s14001_s4 + $0xf0] sm:$0xff] }
 0x11d   :  { %1043 = vmatprep.mubr.bf16.mxu0 %v14015_v2 }
 0x11e   :  { %6188 = vmatmul.mubr.msk.bf16.gmra.mrb[44].mxu1 %vm842_vm0, %v6312_v5  ;;  %6292 = vset.pattern.permute.xlu1 %v14011_v30  ;;  %v6314_v5 = vld [vmem:[%s14002_s5 + $0x68] sm:$0xff]  }
 0x11f   :  { %1236 = vmatprep.mubr.bf16.mxu1 %v14015_v2  ;;  %1394 = vperm.xlu1 %6292, %v434_v59  }
 0x120   :  { %4135 = vperm.xlu0 %6294, %v3997_v7   ;;  %v436_v7 = vld [vmem:[%s14001_s4 + $0xf8] sm:$0xff] }
 0x122   :  { %v8199_v48 = vpop.permute.xlu1 %1791 }
 0x123   :  { %14190 = vst [vmem:[#allocation20_spill] sm:$0xff] %v8199_v48  ;;  %6293 = vset.pattern.permute.xlu1 %v14015_v2  ;;  %v14194_v48 = vmov 1  }
 0x124   :  { %6173 = vmatmul.mubr.msk.bf16.gmra.mrb[48].mxu0 %vm842_vm0, %v6313_v63  ;;  %1861 = vperm.xlu1 %6293, %v1723_v16   ;;  %v8227_v16 = vld [vmem:[%s14008_s11] sm:$0xff] }
 0x125   :  { %1053 = vmatprep.mubr.bf16.mxu0 %v14015_v2  ;;  %4145 = vperm.xlu0 %6294, %v3999_v38  }
 0x126   :  { %6189 = vmatmul.mubr.msk.bf16.gmra.mrb[48].mxu1 %vm842_vm0, %v6313_v63  ;;  %v8210_v59 = vpop.permute.xlu1 %519  ;;  %v8222_v63 = vpop.permute.xlu0 %1756 }
 0x127   :  { %1246 = vmatprep.mubr.bf16.mxu1 %v14015_v2  ;;  %14192 = vst [vmem:[#allocation22_spill] sm:$0xff] %v8222_v63 }
 0x128   :  { %589 = vperm.xlu1 %6293, %v7247_v34  }
 0x129   :  { %4155 = vperm.xlu0 %6294, %v4001_v51   ;;  %v5223_v51 = vld [vmem:[%s14008_s11 + $0x10] sm:$0xff] }
 0x12a   :  { %v8229_v38 = vpop.permute.xlu1 %524  ;;  %v8241_v30 = vpop.permute.xlu0 %1766 }
 0x12b   :  { %14193 = vst [vmem:[#allocation23_spill] sm:$0xff] %v8241_v30 }
 0x12c   :  { %6174 = vmatmul.mubr.msk.bf16.gmra.mrb[52].mxu0 %vm842_vm0, %v6314_v5  ;;  %594 = vperm.xlu1 %6293, %v436_v7  }
 0x12d   :  { %1063 = vmatprep.mubr.bf16.mxu0 %v14015_v2  ;;  %5255 = vperm.xlu0 %6294, %v8227_v16  }
 0x12e   :  { %6190 = vmatmul.mubr.msk.bf16.gmra.mrb[52].mxu1 %vm842_vm0, %v6314_v5  ;;  %v5225_v5 = vld [vmem:[%s14008_s11 + $0x20] sm:$0xff]  ;;  %v8257_v30 = vpop.permute.xlu0 %1776 }
 0x12f   :  { %1256 = vmatprep.mubr.bf16.mxu1 %v14015_v2  ;;  %v8239_v34 = vpop.permute.xlu1 %1346  ;;  %v1725_v2 = vld [vmem:[%s14003_s6 + $0xe0] sm:$0xff]  ;;  %14197 = vst [vmem:[#allocation25_spill] sm:$0xff] %v8257_v30 }
 0x130   :  { %6295 = vset.pattern.permute.xlu1 %v14194_v48 }
 0x131   :  { %5265 = vperm.xlu0 %6294, %v5223_v51   ;;  %1402 = vperm.xlu1 %6295, %v436_v7   ;;  %v5227_v7 = vld [vmem:[%s14008_s11 + $0x30] sm:$0xff]  ;;  %v6316_v51 = vld [vmem:[%s14002_s5 + $0x78] sm:$0xff]  }
 0x132   :  { %v8276_v30 = vpop.permute.xlu0 %1786 }
 0x133   :  { %14198 = vst [vmem:[#allocation26_spill] sm:$0xff] %v8276_v30 }
 0x134   :  { %6175 = vmatmul.mubr.msk.bf16.gmra.mrb[56].mxu0 %vm842_vm0, %v6315_v14  ;;  %v8254_v57 = vpop.permute.xlu1 %1801 }
 0x135   :  { %14195 = vst [vmem:[#allocation24_spill] sm:$0xff] %v8254_v57  ;;  %1073 = vmatprep.mubr.bf16.mxu0 %v14196_v37  ;;  %5275 = vperm.xlu0 %6294, %v5225_v5   ;;  %v1727_v5 = vld [vmem:[%s14003_s6 + $0xf0] sm:$0xff] }
 0x136   :  { %6191 = vmatmul.mubr.msk.bf16.gmra.mrb[56].mxu1 %vm842_vm0, %v6315_v14  ;;  %6296 = vset.pattern.permute.xlu1 %v14196_v37  ;;  %v5229_v14 = vld [vmem:[%s14008_s11 + $0x40] sm:$0xff]  ;;  %v8293_v52 = vpop.permute.xlu0 %1796 }
 0x137   :  { %1266 = vmatprep.mubr.bf16.mxu1 %v14196_v37  ;;  %1871 = vperm.xlu1 %6296, %v1725_v2   ;;  %v1728_v2 = vld [vmem:[%s14003_s6 + $0xf8] sm:$0xff]  ;;  %14199 = vst [vmem:[#allocation27_spill] sm:$0xff] %v8293_v52  ;;  %v2630_v52 = vld [vmem:[%s14005_s8 + $0x28] sm:$0xff] }
 0x138   :  { %v8271_v57 = vpop.permute.xlu1 %529 }
 0x139   :  { %5285 = vperm.xlu0 %6294, %v5227_v7   ;;  %v5231_v7 = vld [vmem:[%s14008_s11 + $0x50] sm:$0xff] }
 0x13a   :  { %v8306_v63 = vpop.permute.xlu0 %1806 }
 0x13b   :  { %1881 = vperm.xlu1 %6296, %v1727_v5   ;;  %v2626_v5 = vld [vmem:[%s14005_s8 + $0x8] sm:$0xff]  ;;  %14201 = vst [vmem:[#allocation29_spill] sm:$0xff] %v8306_v63  ;;  %v5239_v63 = vld [vmem:[%s14008_s11 + $0x90] sm:$0xff] }
 0x13c   :  { %6176 = vmatmul.mubr.msk.bf16.gmra.mrb[60].mxu0 %vm842_vm0, %v6316_v51  ;;  %v8282_v37 = vpop.permute.xlu1 %534 }
 0x13d   :  { %5295 = vperm.xlu0 %6294, %v5229_v14   ;;  %v5233_v14 = vld [vmem:[%s14008_s11 + $0x60] sm:$0xff] }
 0x13e   :  { %6192 = vmatmul.mubr.msk.bf16.gmra.mrb[60].mxu1 %vm842_vm0, %v6316_v51  ;;  %v2628_v51 = vld [vmem:[%s14005_s8 + $0x18] sm:$0xff] }
 0x13f   :  { %1886 = vperm.xlu1 %6296, %v1728_v2   ;;  %v5235_v2 = vld [vmem:[%s14008_s11 + $0x70] sm:$0xff] }
 0x141   :  { %5305 = vperm.xlu0 %6294, %v5231_v7   ;;  %v8291_v30 = vpop.permute.xlu1 %1354 }
 0x143   :  { %2664 = vperm.xlu1 %6296, %v2626_v5   ;;  %v5237_v5 = vld [vmem:[%s14008_s11 + $0x80] sm:$0xff] }
 0x145   :  { %5315 = vperm.xlu0 %6294, %v5233_v14  }
 0x147   :  { %2674 = vperm.xlu1 %6296, %v2628_v51   ;;  %v8304_v7 = vpop.permute.xlu1 %1811  ;;  %v2632_v51 = vld [vmem:[%s14005_s8 + $0x38] sm:$0xff] }
 0x148   :  { %14200 = vst [vmem:[#allocation28_spill] sm:$0xff] %v8304_v7  ;;  %v8319_v7 = vpop.permute.xlu0 %1816 }
 0x149   :  { %5325 = vperm.xlu0 %6294, %v5235_v2   ;;  %14203 = vst [vmem:[#allocation31_spill] sm:$0xff] %v8319_v7  ;;  %v2636_v7 = vld [vmem:[%s14005_s8 + $0x58] sm:$0xff] }
 0x14b   :  { %2684 = vperm.xlu1 %6296, %v2630_v52   ;;  %v8314_v14 = vpop.permute.xlu1 %539  ;;  %v2634_v52 = vld [vmem:[%s14005_s8 + $0x48] sm:$0xff] }
 0x14c   :  { %14202 = vst [vmem:[#allocation30_spill] sm:$0xff] %v8314_v14 }
 0x14d   :  { %5335 = vperm.xlu0 %6294, %v5237_v5   ;;  %v8332_v5 = vpop.permute.xlu0 %1826 }
 0x14e   :  { %14205 = vst [vmem:[#allocation33_spill] sm:$0xff] %v8332_v5 }
 0x14f   :  { %2694 = vperm.xlu1 %6296, %v2632_v51   ;;  %v8324_v2 = vpop.permute.xlu1 %544  ;;  %v5243_v51 = vld [vmem:[%s14008_s11 + $0xb0] sm:$0xff] }
 0x150   :  { %14204 = vst [vmem:[#allocation32_spill] sm:$0xff] %v8324_v2 }
 0x151   :  { %5345 = vperm.xlu0 %6294, %v5239_v63   ;;  %v2638_v63 = vld [vmem:[%s14005_s8 + $0x68] sm:$0xff]  ;;  %v8347_v5 = vpop.permute.xlu0 %1836 }
 0x152   :  { %14208 = vst [vmem:[#allocation36_spill] sm:$0xff] %v8347_v5  ;;  %v5247_v5 = vld [vmem:[%s14008_s11 + $0xd0] sm:$0xff] }
 0x153   :  { %2704 = vperm.xlu1 %6296, %v2634_v52  }
 0x154   :  { %v8337_v15 = vpop.permute.xlu1 %1362 }
 0x155   :  { %14206 = vst [vmem:[#allocation34_spill] sm:$0xff] %v8337_v15  ;;  %5355 = vperm.xlu0 %6294, %v5241_v39   ;;  %v608_v39 = vsub.s32 4, %v7388_v10 }
 0x157   :  { %2714 = vperm.xlu1 %6296, %v2636_v7   ;;  %v1415_v7 = vsub.s32 5, %v7388_v10 }
 0x159   :  { %5365 = vperm.xlu0 %6294, %v5243_v51   ;;  %v8345_v52 = vpop.permute.xlu1 %1821  ;;  %v1419_v51 = vsub.s32 7, %v7388_v10  ;;  %v8369_v10 = vpop.permute.xlu0 %1846 }
 0x15a   :  { %14207 = vst [vmem:[#allocation35_spill] sm:$0xff] %v8345_v52  ;;  %14210 = vst [vmem:[#allocation38_spill] sm:$0xff] %v8369_v10 }
 0x15b   :  { %2724 = vperm.xlu1 %6296, %v2638_v63   ;;  %v7248_v63 = vld [vmem:[%s13997_s0] sm:$0xff] }
 0x15c   :  { %v601_v54 = vrot.slane %v7248_v63, %v7408_v18  ;;  %v609_v29 = vrot.slane %v7248_v63, %v608_v39  ;;  %v1408_v15 = vrot.slane %v7248_v63, %v7411_v19  ;;  %v613_v2 = vrot.slane %v7248_v63, %v612_v47 }
 0x15d   :  { %5375 = vperm.xlu0 %6294, %v5245_v44   ;;  %v8359_v52 = vpop.permute.xlu1 %549  ;;  %v1416_v14 = vrot.slane %v7248_v63, %v1415_v7  ;;  %v2642_v44 = vld [vmem:[%s14005_s8 + $0x88] sm:$0xff] }
 0x15e   :  { %14209 = vst [vmem:[#allocation37_spill] sm:$0xff] %v8359_v52  ;;  %v1420_v52 = vrot.slane %v7248_v63, %v1419_v51  ;;  %v8377_v3 = vrot.slane %v601_v54, %v7408_v18  ;;  %v8380_v39 = vrot.slane %v609_v29, %v7408_v18  ;;  %v8386_v47 = vrot.slane %v613_v2, %v7408_v18  ;;  %v8398_v29 = vpop.permute.xlu0 %1856  ;;  %v2646_v2 = vld [vmem:[%s14005_s8 + $0xa8] sm:$0xff] }
 0x15f   :  { %2734 = vperm.xlu1 %6296, %v2640_v4   ;;  %v8383_v4 = vrot.slane %v1408_v15, %v7411_v19  ;;  %v8389_v7 = vrot.slane %v1416_v14, %v7411_v19  ;;  %14217 = vst [vmem:[#allocation45_spill] sm:$0xff] %v8398_v29  ;;  %v8428_v51 = vmul.f32 %v7427_v25, %v7804_v24 }
 0x160   :  { %14211 = vst [vmem:[#allocation39_spill] sm:$0xff] %v8377_v3  ;;  %14212 = vst [vmem:[#allocation40_spill] sm:$0xff] %v8380_v39  ;;  %v8395_v54 = vrot.slane %v1420_v52, %v7411_v19  ;;  %v8405_v18 = vmul.f32 %v8377_v3, %v7779_v60  ;;  %v8413_v19 = vmul.f32 %v8380_v39, %v7779_v60 }
 0x161   :  { %5385 = vperm.xlu0 %6294, %v5247_v5   ;;  %v8374_v32 = vpop.permute.xlu1 %554  ;;  %14213 = vst [vmem:[#allocation41_spill] sm:$0xff] %v8383_v4  ;;  %14214 = vst [vmem:[#allocation42_spill] sm:$0xff] %v8386_v47  ;;  %v2644_v5 = vld [vmem:[%s14005_s8 + $0x98] sm:$0xff]  ;;  %v8409_v14 = vmul.f32 %v8383_v4, %v7804_v24  ;;  %v8424_v52 = vmul.f32 %v7418_v22, %v7779_v60  ;;  %v8432_v63 = vmul.f32 %v8386_v47, %v7779_v60 }
 0x162   :  { %14215 = vst [vmem:[#allocation43_spill] sm:$0xff] %v8389_v7  ;;  %14216 = vst [vmem:[#allocation44_spill] sm:$0xff] %v8395_v54  ;;  %v8444_v29 = vmul.f32 %v8383_v4, %v7864_v40  ;;  %v8448_v10 = vmul.f32 %v8380_v39, %v7839_v61  ;;  %v8452_v60 = vmul.f32 %v8389_v7, %v7864_v40 }
 0x163   :  { %2744 = vperm.xlu1 %6296, %v2642_v44   ;;  %v8436_v44 = vmul.f32 %v8395_v54, %v7804_v24 }
 0x164   :  { %14219 = vst [vmem:[#allocation47_spill] sm:$0xff] %v8444_v29  ;;  %14220 = vst [vmem:[#allocation48_spill] sm:$0xff] %v8452_v60  ;;  %v8468_v29 = vmul.f32 %v8395_v54, %v7864_v40  ;;  %v8472_v60 = vmul.f32 %v8383_v4, %v7880_v50 }
 0x165   :  { %6297 = vset.pattern.permute.xlu0 %v14194_v48  ;;  %v8460_v48 = vmul.f32 %v7427_v25, %v7864_v40  ;;  %v8489_v40 = vmul.f32 %v8395_v54, %v7880_v50 }
 0x166   :  { %5690 = vperm.xlu0 %6297, %v8227_v16   ;;  %v8420_v16 = vmul.f32 %v8389_v7, %v7804_v24  ;;  %v8456_v24 = vmul.f32 %v7418_v22, %v7839_v61  ;;  %14223 = vst [vmem:[#allocation51_spill] sm:$0xff] %v8468_v29  ;;  %14224 = vst [vmem:[#allocation52_spill] sm:$0xff] %v8472_v60  ;;  %v8493_v60 = vmul.f32 %v8377_v3, %v7904_v31 }
 0x167   :  { %2754 = vperm.xlu1 %6296, %v2644_v5   ;;  %v8401_v15 = vpop.permute.xlu1 %1370  ;;  %v8440_v5 = vmul.f32 %v8377_v3, %v7839_v61  ;;  %14222 = vst [vmem:[#allocation50_spill] sm:$0xff] %v8460_v48  ;;  %v8480_v48 = vmul.f32 %v7427_v25, %v7880_v50  ;;  %v8505_v29 = vmul.f32 %v8383_v4, %v7917_v35 }
 0x168   :  { %14221 = vst [vmem:[#allocation49_spill] sm:$0xff] %v8456_v24  ;;  %v8476_v24 = vmul.f32 %v8389_v7, %v7880_v50  ;;  %14228 = vst [vmem:[#allocation56_spill] sm:$0xff] %v8493_v60  ;;  %v8509_v50 = vmul.f32 %v8389_v7, %v7917_v35  ;;  %v8517_v60 = vmul.f32 %v8386_v47, %v7904_v31 }
 0x169   :  { %14218 = vst [vmem:[#allocation46_spill] sm:$0xff] %v8440_v5  ;;  %v8464_v5 = vmul.f32 %v8386_v47, %v7839_v61  ;;  %14226 = vst [vmem:[#allocation54_spill] sm:$0xff] %v8480_v48  ;;  %v2648_v61 = vld [vmem:[%s14005_s8 + $0xb8] sm:$0xff]  ;;  %v8501_v48 = vmul.f32 %v7418_v22, %v7904_v31 }
 0x16a   :  { %14225 = vst [vmem:[#allocation53_spill] sm:$0xff] %v8476_v24  ;;  %v8497_v24 = vmul.f32 %v8380_v39, %v7904_v31  ;;  %14231 = vst [vmem:[#allocation59_spill] sm:$0xff] %v8505_v29  ;;  %v8529_v29 = vmul.f32 %v8380_v39, %v7945_v27  ;;  %v8537_v31 = vmul.f32 %v8386_v47, %v7945_v27 }
 0x16b   :  { %2764 = vperm.xlu1 %6296, %v2646_v2   ;;  %14230 = vst [vmem:[#allocation58_spill] sm:$0xff] %v8501_v48  ;;  %14232 = vst [vmem:[#allocation60_spill] sm:$0xff] %v8509_v50  ;;  %v8525_v48 = vmul.f32 %v8377_v3, %v7945_v27  ;;  %v8533_v50 = vmul.f32 %v7418_v22, %v7945_v27  ;;  %v8558_v27 = vmul.f32 %v8383_v4, %v7970_v8 }
 0x16c   :  { %v8485_v2 = vpop.permute.xlu1 %1831  ;;  %14229 = vst [vmem:[#allocation57_spill] sm:$0xff] %v8497_v24  ;;  %v8521_v24 = vmul.f32 %v8395_v54, %v7917_v35  ;;  %14235 = vst [vmem:[#allocation63_spill] sm:$0xff] %v8529_v29  ;;  %v8549_v29 = vmul.f32 %v7418_v22, %v7958_v13 }
 0x16d   :  { %14227 = vst [vmem:[#allocation55_spill] sm:$0xff] %v8485_v2  ;;  %v8513_v2 = vmul.f32 %v7427_v25, %v7917_v35  ;;  %14236 = vst [vmem:[#allocation64_spill] sm:$0xff] %v8533_v50  ;;  %v8541_v35 = vmul.f32 %v8377_v3, %v7958_v13 }
 0x16e   :  { %14234 = vst [vmem:[#allocation62_spill] sm:$0xff] %v8521_v24  ;;  %14237 = vst [vmem:[#allocation65_spill] sm:$0xff] %v8537_v31  ;;  %v8545_v24 = vmul.f32 %v8380_v39, %v7958_v13  ;;  %v8574_v31 = vmul.f32 %v8395_v54, %v7970_v8 }
 0x16f   :  { %14233 = vst [vmem:[#allocation61_spill] sm:$0xff] %v8513_v2  ;;  %2774 = vperm.xlu1 %6296, %v2648_v61   ;;  %14238 = vst [vmem:[#allocation66_spill] sm:$0xff] %v8541_v35  ;;  %v2650_v61 = vld [vmem:[%s14005_s8 + $0xc8] sm:$0xff]  ;;  %v8562_v35 = vmul.f32 %v8389_v7, %v7970_v8  ;;  %v8578_v2 = vmul.f32 %v8377_v3, %v7996_v6 }
 0x170   :  { %14239 = vst [vmem:[#allocation67_spill] sm:$0xff] %v8545_v24  ;;  %14240 = vst [vmem:[#allocation68_spill] sm:$0xff] %v8549_v29  ;;  %v8554_v50 = vpop.permute.xlu1 %559  ;;  %v8566_v24 = vmul.f32 %v7427_v25, %v7970_v8  ;;  %v8570_v29 = vmul.f32 %v8386_v47, %v7958_v13  ;;  %v8590_v13 = vmul.f32 %v8386_v47, %v7996_v6 }
 0x171   :  { %14241 = vst [vmem:[#allocation69_spill] sm:$0xff] %v8554_v50  ;;  %14242 = vst [vmem:[#allocation70_spill] sm:$0xff] %v8558_v27  ;;  %v8582_v27 = vmul.f32 %v8380_v39, %v7996_v6  ;;  %v8594_v8 = vmul.f32 %v8377_v3, %v8010_v41 }
 0x172   :  { %14243 = vst [vmem:[#allocation71_spill] sm:$0xff] %v8562_v35  ;;  %14244 = vst [vmem:[#allocation72_spill] sm:$0xff] %v8566_v24  ;;  %v8586_v35 = vmul.f32 %v7418_v22, %v7996_v6  ;;  %v8610_v6 = vmul.f32 %v8389_v7, %v8021_v49  ;;  %v8810_v24 = vmul.f32 %v8380_v39, %v8153_v46 }
 0x173   :  { %14245 = vst [vmem:[#allocation73_spill] sm:$0xff] %v8570_v29  ;;  %14246 = vst [vmem:[#allocation74_spill] sm:$0xff] %v8574_v31  ;;  %v8598_v31 = vmul.f32 %v8380_v39, %v8010_v41  ;;  %2784 = vperm.xlu1 %6296, %v2650_v61   ;;  %v2652_v61 = vld [vmem:[%s14005_s8 + $0xd8] sm:$0xff]  ;;  %v8814_v29 = vmul.f32 %v7418_v22, %v8153_v46 }
 0x174   :  { %14247 = vst [vmem:[#allocation75_spill] sm:$0xff] %v8578_v2  ;;  %14248 = vst [vmem:[#allocation76_spill] sm:$0xff] %v8582_v27  ;;  %v8602_v2 = vmul.f32 %v7418_v22, %v8010_v41  ;;  %v8797_v27 = vmul.f32 %v8395_v54, %v7906_v11 }
 0x175   :  { %14249 = vst [vmem:[#allocation77_spill] sm:$0xff] %v8586_v35  ;;  %14250 = vst [vmem:[#allocation78_spill] sm:$0xff] %v8590_v13  ;;  %v8606_v35 = vmul.f32 %v8383_v4, %v8021_v49  ;;  %v8789_v13 = vmul.f32 %v8389_v7, %v7906_v11 }
 0x176   :  { %14251 = vst [vmem:[#allocation79_spill] sm:$0xff] %v8594_v8  ;;  %14252 = vst [vmem:[#allocation80_spill] sm:$0xff] %v8598_v31  ;;  %v8614_v8 = vmul.f32 %v7427_v25, %v8021_v49  ;;  %v8618_v31 = vmul.f32 %v8386_v47, %v8010_v41  ;;  %v8639_v41 = vmul.f32 %v7418_v22, %v8047_v55 }
 0x177   :  { %14253 = vst [vmem:[#allocation81_spill] sm:$0xff] %v8602_v2  ;;  %14254 = vst [vmem:[#allocation82_spill] sm:$0xff] %v8606_v35  ;;  %v8623_v2 = vpop.permute.xlu1 %564  ;;  %v8627_v35 = vmul.f32 %v8395_v54, %v8021_v49  ;;  %v8647_v49 = vmul.f32 %v8377_v3, %v8059_v33  ;;  %2794 = vperm.xlu1 %6296, %v2652_v61   ;;  %v8698_v61 = vmul.f32 %v8377_v3, %v8115_v62 }
 0x178   :  { %14255 = vst [vmem:[#allocation83_spill] sm:$0xff] %v8610_v6  ;;  %14256 = vst [vmem:[#allocation84_spill] sm:$0xff] %v8614_v8  ;;  %v8631_v6 = vmul.f32 %v8377_v3, %v8047_v55  ;;  %v8635_v8 = vmul.f32 %v8380_v39, %v8047_v55 }
 0x179   :  { %14257 = vst [vmem:[#allocation85_spill] sm:$0xff] %v8618_v31  ;;  %14258 = vst [vmem:[#allocation86_spill] sm:$0xff] %v8623_v2  ;;  %v8643_v31 = vmul.f32 %v8386_v47, %v8047_v55  ;;  %v8651_v2 = vmul.f32 %v8380_v39, %v8059_v33  ;;  %v8663_v55 = vmul.f32 %v8389_v7, %v8076_v56 }
 0x17a   :  { %14259 = vst [vmem:[#allocation87_spill] sm:$0xff] %v8627_v35  ;;  %14260 = vst [vmem:[#allocation88_spill] sm:$0xff] %v8631_v6  ;;  %v8655_v6 = vmul.f32 %v7418_v22, %v8059_v33  ;;  %v8785_v35 = vmul.f32 %v8383_v4, %v7906_v11 }
 0x17b   :  { %14261 = vst [vmem:[#allocation89_spill] sm:$0xff] %v8635_v8  ;;  %14262 = vst [vmem:[#allocation90_spill] sm:$0xff] %v8639_v41  ;;  %v8659_v8 = vmul.f32 %v8383_v4, %v8076_v56  ;;  %v8781_v41 = vmul.f32 %v8395_v54, %v7887_v9 }
 0x17c   :  { %14263 = vst [vmem:[#allocation91_spill] sm:$0xff] %v8643_v31  ;;  %14264 = vst [vmem:[#allocation92_spill] sm:$0xff] %v8647_v49  ;;  %v8667_v31 = vmul.f32 %v7427_v25, %v8076_v56  ;;  %v8671_v49 = vmul.f32 %v8386_v47, %v8059_v33  ;;  %v2654_v33 = vld [vmem:[%s14005_s8 + $0xe8] sm:$0xff] }
 0x17d   :  { %14265 = vst [vmem:[#allocation93_spill] sm:$0xff] %v8651_v2  ;;  %14266 = vst [vmem:[#allocation94_spill] sm:$0xff] %v8655_v6  ;;  %v8675_v6 = vmul.f32 %v8395_v54, %v8076_v56  ;;  %v8694_v56 = vmul.f32 %v8386_v47, %v8102_v0  ;;  %2804 = vperm.xlu1 %6296, %v2654_v33   ;;  %v8763_v33 = vmul.f32 %v8380_v39, %v8130_v17  ;;  %v8777_v2 = vpop.permute.xlu0 %1866 }
 0x17e   :  { %14267 = vst [vmem:[#allocation95_spill] sm:$0xff] %v8659_v8  ;;  %14268 = vst [vmem:[#allocation96_spill] sm:$0xff] %v8663_v55  ;;  %v8679_v8 = vmul.f32 %v8377_v3, %v8102_v0  ;;  %v8683_v55 = vmul.f32 %v8380_v39, %v8102_v0 }
 0x17f   :  { %14269 = vst [vmem:[#allocation97_spill] sm:$0xff] %v8667_v31  ;;  %14270 = vst [vmem:[#allocation98_spill] sm:$0xff] %v8671_v49  ;;  %v8687_v31 = vmul.f32 %v7418_v22, %v8102_v0  ;;  %v8714_v0 = vmul.f32 %v8383_v4, %v8127_v42  ;;  %v8775_v49 = vmul.f32 %v7427_v25, %v7887_v9 }
 0x180   :  { %14271 = vst [vmem:[#allocation99_spill] sm:$0xff] %v8675_v6  ;;  %14272 = vst [vmem:[#allocation100_spill] sm:$0xff] %v8679_v8  ;;  %v8702_v8 = vmul.f32 %v8380_v39, %v8115_v62  ;;  %v8732_v6 = vmul.f32 %v8389_v7, %v7868_v23 }
 0x181   :  { %14273 = vst [vmem:[#allocation101_spill] sm:$0xff] %v8683_v55  ;;  %14274 = vst [vmem:[#allocation102_spill] sm:$0xff] %v8687_v31  ;;  %v8706_v55 = vmul.f32 %v7418_v22, %v8115_v62  ;;  %v8710_v31 = vmul.f32 %v8377_v3, %v8130_v17 }
 0x182   :  { %14275 = vst [vmem:[#allocation103_spill] sm:$0xff] %v8694_v56  ;;  %14276 = vst [vmem:[#allocation104_spill] sm:$0xff] %v8698_v61  ;;  %v8718_v56 = vmul.f32 %v8389_v7, %v8127_v42  ;;  %v8722_v61 = vmul.f32 %v8386_v47, %v8115_v62  ;;  %v8744_v62 = vmul.f32 %v7427_v25, %v7868_v23 }
 0x183   :  { %14277 = vst [vmem:[#allocation105_spill] sm:$0xff] %v8702_v8  ;;  %14278 = vst [vmem:[#allocation106_spill] sm:$0xff] %v8706_v55  ;;  %v8724_v8 = vpop.permute.xlu1 %1378  ;;  %v8728_v55 = vmul.f32 %v8383_v4, %v7868_v23 }
 0x184   :  { %14279 = vst [vmem:[#allocation107_spill] sm:$0xff] %v8714_v0  ;;  %14280 = vst [vmem:[#allocation108_spill] sm:$0xff] %v8718_v56  ;;  %v8736_v0 = vmul.f32 %v7427_v25, %v8127_v42  ;;  %v8740_v56 = vmul.f32 %v8395_v54, %v8127_v42  ;;  %v2656_v42 = vld [vmem:[%s14005_s8 + $0xf8] sm:$0xff] }
 0x185   :  { %14281 = vst [vmem:[#allocation109_spill] sm:$0xff] %v8722_v61  ;;  %14282 = vst [vmem:[#allocation110_spill] sm:$0xff] %v8724_v8  ;;  %v8748_v8 = vmul.f32 %v8395_v54, %v7868_v23  ;;  %v8752_v61 = vmul.f32 %v8383_v4, %v7887_v9  ;;  %v8767_v23 = vmul.f32 %v7418_v22, %v8130_v17  ;;  %2814 = vperm.xlu1 %6296, %v2656_v42  }
 0x186   :  { %14283 = vst [vmem:[#allocation111_spill] sm:$0xff] %v8736_v0  ;;  %14284 = vst [vmem:[#allocation112_spill] sm:$0xff] %v8740_v56  ;;  %v8756_v0 = vmul.f32 %v8389_v7, %v7887_v9  ;;  %v8771_v56 = vmul.f32 %v8386_v47, %v8130_v17  ;;  %v8793_v17 = vmul.f32 %v7427_v25, %v7906_v11  ;;  %v8802_v9 = vld [vmem:[%s14008_s11 + $0x18] sm:$0xff] }
 0x187   :  { %14285 = vst [vmem:[#allocation113_spill] sm:$0xff] %v8777_v2  ;;  %14286 = vst [vmem:[#allocation114_spill] sm:$0xff] %v8785_v35  ;;  %v8806_v2 = vmul.f32 %v8377_v3, %v8153_v46  ;;  %v8818_v11 = vmul.f32 %v8386_v47, %v8153_v46  ;;  %5702 = vperm.xlu0 %6297, %v8802_v9   ;;  %v8836_v46 = vmul.f32 %v8377_v3, %v8151_v26 }
 0x188   :  { %14287 = vst [vmem:[#allocation115_spill] sm:$0xff] %v8789_v13  ;;  %14288 = vst [vmem:[#allocation116_spill] sm:$0xff] %v8793_v17  ;;  %v8840_v42 = vmul.f32 %v8380_v39, %v8151_v26  ;;  %v8864_v17 = vmul.f32 %v8389_v7, %v8179_v1  ;;  %v8891_v13 = vmul.f32 %v7418_v22, %v8185_v45 }
 0x189   :  { %14289 = vst [vmem:[#allocation117_spill] sm:$0xff] %v8797_v27  ;;  %14290 = vst [vmem:[#allocation118_spill] sm:$0xff] %v8802_v9  ;;  %v8822_v27 = vmul.f32 %v8377_v3, %v8168_v43  ;;  %v8860_v9 = vmul.f32 %v8383_v4, %v8179_v1  ;;  %v8895_v35 = vmul.f32 %v8383_v4, %v7922_v12 }
 0x18a   :  { %14291 = vst [vmem:[#allocation119_spill] sm:$0xff] %v8806_v2  ;;  %14292 = vst [vmem:[#allocation120_spill] sm:$0xff] %v8810_v24  ;;  %v8826_v2 = vmul.f32 %v8380_v39, %v8168_v43  ;;  %v3972_v24 = vld [vmem:[%s14007_s10 + $0x8] sm:$0xff] }
 0x18b   :  { %14293 = vst [vmem:[#allocation121_spill] sm:$0xff] %v8814_v29  ;;  %14294 = vst [vmem:[#allocation122_spill] sm:$0xff] %v8818_v11  ;;  %v8832_v29 = vpop.permute.xlu1 %1841  ;;  %v8852_v11 = vmul.f32 %v7418_v22, %v8151_v26  ;;  %4010 = vperm.xlu1 %6296, %v3972_v24   ;;  %v8907_v24 = vmul.f32 %v8386_v47, %v8185_v45 }
 0x18c   :  { %14295 = vst [vmem:[#allocation123_spill] sm:$0xff] %v8822_v27  ;;  %14296 = vst [vmem:[#allocation124_spill] sm:$0xff] %v8826_v2  ;;  %v8844_v27 = vmul.f32 %v7418_v22, %v8168_v43  ;;  %v8848_v2 = vmul.f32 %v8386_v47, %v8168_v43  ;;  %v8868_v43 = vmul.f32 %v8377_v3, %v8185_v45 }
 0x18d   :  { %14297 = vst [vmem:[#allocation125_spill] sm:$0xff] %v8832_v29  ;;  %v8856_v29 = vmul.f32 %v8386_v47, %v8151_v26  ;;  %14300 = vst [vmem:[#allocation128_spill] sm:$0xff] %v8860_v9  ;;  %v8876_v26 = vmul.f32 %v7427_v25, %v8179_v1  ;;  %v8887_v9 = vpop.permute.xlu0 %1876 }
 0x18e   :  { %14298 = vst [vmem:[#allocation126_spill] sm:$0xff] %v8844_v27  ;;  %14299 = vst [vmem:[#allocation127_spill] sm:$0xff] %v8848_v2  ;;  %v8872_v2 = vmul.f32 %v8380_v39, %v8185_v45  ;;  %v8880_v27 = vmul.f32 %v8395_v54, %v8179_v1  ;;  %v8899_v1 = vmul.f32 %v8389_v7, %v7922_v12 }
 0x18f   :  { %14301 = vst [vmem:[#allocation129_spill] sm:$0xff] %v8864_v17  ;;  %14302 = vst [vmem:[#allocation130_spill] sm:$0xff] %v8876_v26  ;;  %v8885_v17 = vld [vmem:[%s14008_s11 + $0x28] sm:$0xff]  ;;  %v8915_v26 = vmul.f32 %v8395_v54, %v7922_v12  ;;  %v8927_v45 = vmul.f32 %v7427_v25, %v7940_v53 }
 0x190   :  { %14303 = vst [vmem:[#allocation131_spill] sm:$0xff] %v8880_v27  ;;  %14304 = vst [vmem:[#allocation132_spill] sm:$0xff] %v8885_v17  ;;  %5710 = vperm.xlu0 %6297, %v8885_v17   ;;  %v3974_v27 = vld [vmem:[%s14007_s10 + $0x18] sm:$0xff]  ;;  %v8931_v17 = vmul.f32 %v8395_v54, %v7940_v53 }
 0x191   :  { %14305 = vst [vmem:[#allocation133_spill] sm:$0xff] %v8887_v9  ;;  %14306 = vst [vmem:[#allocation134_spill] sm:$0xff] %v8895_v35  ;;  %v8911_v9 = vmul.f32 %v7427_v25, %v7922_v12  ;;  %v8923_v35 = vmul.f32 %v8389_v7, %v7940_v53  ;;  %v8935_v12 = vmul.f32 %v8377_v3, %v8210_v59  ;;  %4020 = vperm.xlu1 %6296, %v3974_v27   ;;  %v3976_v27 = vld [vmem:[%s14007_s10 + $0x28] sm:$0xff] }
 0x192   :  { %14307 = vst [vmem:[#allocation135_spill] sm:$0xff] %v8899_v1  ;;  %14308 = vst [vmem:[#allocation136_spill] sm:$0xff] %v8915_v26  ;;  %v8919_v1 = vmul.f32 %v8383_v4, %v7940_v53  ;;  %v8937_v26 = vpop.permute.xlu1 %569  ;;  %v8953_v53 = vmul.f32 %v8377_v3, %v8229_v38 }
 0x193   :  { %14310 = vst [vmem:[#allocation138_spill] sm:$0xff] %v8923_v35  ;;  %14311 = vst [vmem:[#allocation139_spill] sm:$0xff] %v8927_v45  ;;  %v8945_v35 = vmul.f32 %v7418_v22, %v8210_v59  ;;  %v8949_v45 = vmul.f32 %v8386_v47, %v8210_v59 }
 0x194   :  { %14309 = vst [vmem:[#allocation137_spill] sm:$0xff] %v8919_v1  ;;  %14312 = vst [vmem:[#allocation140_spill] sm:$0xff] %v8931_v17  ;;  %v8941_v1 = vmul.f32 %v8380_v39, %v8210_v59  ;;  %v8969_v59 = vmul.f32 %v8386_v47, %v8229_v38 }
 0x195   :  { %14313 = vst [vmem:[#allocation141_spill] sm:$0xff] %v8935_v12  ;;  %14314 = vst [vmem:[#allocation142_spill] sm:$0xff] %v8937_v26  ;;  %v8957_v26 = vmul.f32 %v8383_v4, %v7960_v36  ;;  %v9000_v12 = vmul.f32 %v8395_v54, %v7973_v58  ;;  %4030 = vperm.xlu1 %6296, %v3976_v27   ;;  %v3978_v27 = vld [vmem:[%s14007_s10 + $0x38] sm:$0xff] }
 0x196   :  { %14315 = vst [vmem:[#allocation143_spill] sm:$0xff] %v8941_v1  ;;  %14316 = vst [vmem:[#allocation144_spill] sm:$0xff] %v8945_v35  ;;  %v8961_v1 = vmul.f32 %v8380_v39, %v8229_v38  ;;  %v8965_v35 = vmul.f32 %v7418_v22, %v8229_v38  ;;  %v8988_v38 = vmul.f32 %v8383_v4, %v7973_v58 }
 0x197   :  { %14317 = vst [vmem:[#allocation145_spill] sm:$0xff] %v8949_v45  ;;  %14318 = vst [vmem:[#allocation146_spill] sm:$0xff] %v8953_v53  ;;  %v8976_v53 = vmul.f32 %v8389_v7, %v7960_v36  ;;  %v8980_v45 = vmul.f32 %v7427_v25, %v7960_v36 }
 0x198   :  { %14319 = vst [vmem:[#allocation147_spill] sm:$0xff] %v8957_v26  ;;  %14320 = vst [vmem:[#allocation148_spill] sm:$0xff] %v8961_v1  ;;  %v8984_v1 = vmul.f32 %v8395_v54, %v7960_v36  ;;  %v9004_v36 = vmul.f32 %v8383_v4, %v8239_v34 }
 0x199   :  { %14321 = vst [vmem:[#allocation149_spill] sm:$0xff] %v8965_v35  ;;  %14322 = vst [vmem:[#allocation150_spill] sm:$0xff] %v8969_v59  ;;  %v8992_v59 = vmul.f32 %v8389_v7, %v7973_v58  ;;  %v8996_v35 = vmul.f32 %v7427_v25, %v7973_v58  ;;  %v9020_v58 = vmul.f32 %v8395_v54, %v8239_v34  ;;  %4040 = vperm.xlu1 %6296, %v3978_v27   ;;  %v3980_v27 = vld [vmem:[%s14007_s10 + $0x48] sm:$0xff] }
 0x19a   :  { %14323 = vst [vmem:[#allocation151_spill] sm:$0xff] %v8976_v53  ;;  %14324 = vst [vmem:[#allocation152_spill] sm:$0xff] %v8980_v45 }
 0x19b   :  { %14325 = vst [vmem:[#allocation153_spill] sm:$0xff] %v8984_v1  ;;  %14326 = vst [vmem:[#allocation154_spill] sm:$0xff] %v8988_v38  ;;  %v9008_v1 = vmul.f32 %v8383_v4, %v7989_v28  ;;  %v9012_v38 = vmul.f32 %v8389_v7, %v8239_v34 }
 0x19c   :  { %14327 = vst [vmem:[#allocation155_spill] sm:$0xff] %v8992_v59  ;;  %14328 = vst [vmem:[#allocation156_spill] sm:$0xff] %v8996_v35  ;;  %v9016_v59 = vmul.f32 %v7427_v25, %v8239_v34  ;;  %v9040_v34 = vpop.permute.xlu1 %574 }
 0x19d   :  { %14329 = vst [vmem:[#allocation157_spill] sm:$0xff] %v9000_v12  ;;  %14330 = vst [vmem:[#allocation158_spill] sm:$0xff] %v9004_v36  ;;  %v9022_v12 = vpop.permute.xlu0 %2659  ;;  %v9026_v36 = vmul.f32 %v8389_v7, %v7989_v28  ;;  %4050 = vperm.xlu1 %6296, %v3980_v27   ;;  %v3982_v27 = vld [vmem:[%s14007_s10 + $0x58] sm:$0xff] }
 0x19e   :  { %14331 = vst [vmem:[#allocation159_spill] sm:$0xff] %v9008_v1  ;;  %14332 = vst [vmem:[#allocation160_spill] sm:$0xff] %v9012_v38  ;;  %v9030_v1 = vmul.f32 %v7427_v25, %v7989_v28  ;;  %v9034_v38 = vmul.f32 %v8395_v54, %v7989_v28  ;;  %v9055_v28 = vmul.f32 %v7418_v22, %v8271_v57 }
 0x19f   :  { %14333 = vst [vmem:[#allocation161_spill] sm:$0xff] %v9016_v59  ;;  %14334 = vst [vmem:[#allocation162_spill] sm:$0xff] %v9020_v58  ;;  %v9038_v59 = vmul.f32 %v8377_v3, %v8271_v57  ;;  %v9051_v58 = vmul.f32 %v8380_v39, %v8271_v57 }
 0x1a0   :  { %14335 = vst [vmem:[#allocation163_spill] sm:$0xff] %v9022_v12  ;;  %14336 = vst [vmem:[#allocation164_spill] sm:$0xff] %v9026_v36  ;;  %v9047_v12 = vmul.f32 %v8383_v4, %v8012_v20 }
 0x1a1   :  { %14337 = vst [vmem:[#allocation165_spill] sm:$0xff] %v9030_v1  ;;  %14338 = vst [vmem:[#allocation166_spill] sm:$0xff] %v9034_v38  ;;  %v9088_v38 = vmul.f32 %v7418_v22, %v8282_v37  ;;  %4060 = vperm.xlu1 %6296, %v3982_v27  }
 0x1a2   :  { %14339 = vst [vmem:[#allocation167_spill] sm:$0xff] %v9038_v59  ;;  %14340 = vst [vmem:[#allocation168_spill] sm:$0xff] %v9040_v34  ;;  %v9059_v59 = vmul.f32 %v8386_v47, %v8271_v57  ;;  %v9064_v34 = vld [vmem:[%s14008_s11 + $0x38] sm:$0xff]  ;;  %v9080_v57 = vmul.f32 %v8377_v3, %v8282_v37 }
 0x1a3   :  { %14341 = vst [vmem:[#allocation169_spill] sm:$0xff] %v9047_v12  ;;  %14342 = vst [vmem:[#allocation170_spill] sm:$0xff] %v9051_v58  ;;  %v9068_v12 = vmul.f32 %v8389_v7, %v8012_v20  ;;  %v9072_v58 = vmul.f32 %v7427_v25, %v8012_v20  ;;  %5718 = vperm.xlu0 %6297, %v9064_v34  }
 0x1a4   :  { %14343 = vst [vmem:[#allocation171_spill] sm:$0xff] %v9055_v28  ;;  %14344 = vst [vmem:[#allocation172_spill] sm:$0xff] %v9059_v59  ;;  %v9076_v28 = vmul.f32 %v8395_v54, %v8012_v20  ;;  %v9084_v59 = vmul.f32 %v8380_v39, %v8282_v37  ;;  %v9096_v20 = vmul.f32 %v8383_v4, %v8024_v21 }
 0x1a5   :  { %14345 = vst [vmem:[#allocation173_spill] sm:$0xff] %v9068_v12  ;;  %14346 = vst [vmem:[#allocation174_spill] sm:$0xff] %v9072_v58  ;;  %v9092_v12 = vmul.f32 %v8386_v47, %v8282_v37  ;;  %v9105_v58 = vmul.f32 %v8389_v7, %v8024_v21  ;;  %v9113_v37 = vmul.f32 %v8395_v54, %v8024_v21 }
 0x1a6   :  { %14347 = vst [vmem:[#allocation175_spill] sm:$0xff] %v9076_v28  ;;  %14348 = vst [vmem:[#allocation176_spill] sm:$0xff] %v9080_v57  ;;  %v9101_v28 = vmul.f32 %v8383_v4, %v8291_v30 }
 0x1a7   :  { %14349 = vst [vmem:[#allocation177_spill] sm:$0xff] %v9084_v59  ;;  %14350 = vst [vmem:[#allocation178_spill] sm:$0xff] %v9088_v38  ;;  %v9109_v38 = vmul.f32 %v7427_v25, %v8024_v21  ;;  %v14369_v59 = vld [vmem:[#allocation30_spill] sm:$0xff] }
 0x1a8   :  { %14351 = vst [vmem:[#allocation179_spill] sm:$0xff] %v9092_v12  ;;  %14352 = vst [vmem:[#allocation180_spill] sm:$0xff] %v9096_v20  ;;  %v9120_v20 = vmul.f32 %v8389_v7, %v8291_v30  ;;  %v9124_v12 = vmul.f32 %v7427_v25, %v8291_v30  ;;  %v9161_v57 = vmul.f32 %v8377_v3, %v14369_v59 }
 0x1a9   :  { %14353 = vst [vmem:[#allocation181_spill] sm:$0xff] %v9101_v28  ;;  %14354 = vst [vmem:[#allocation182_spill] sm:$0xff] %v9105_v58  ;;  %v9128_v58 = vmul.f32 %v8395_v54, %v8291_v30  ;;  %v9139_v28 = vld [vmem:[%s14008_s11 + $0x48] sm:$0xff] }
 0x1aa   :  { %14355 = vst [vmem:[#allocation183_spill] sm:$0xff] %v9109_v38  ;;  %14356 = vst [vmem:[#allocation184_spill] sm:$0xff] %v9113_v37  ;;  %v14360_v38 = vld [vmem:[#allocation12_spill] sm:$0xff]  ;;  %v9134_v37 = vpop.permute.xlu0 %2669  ;;  %5726 = vperm.xlu0 %6297, %v9139_v28  }
 0x1ab   :  { %14357 = vst [vmem:[#allocation185_spill] sm:$0xff] %v9120_v20  ;;  %14358 = vst [vmem:[#allocation186_spill] sm:$0xff] %v9124_v12  ;;  %v9132_v21 = vmul.f32 %v8383_v4, %v14360_v38  ;;  %v9143_v20 = vmul.f32 %v8389_v7, %v14360_v38  ;;  %v9147_v12 = vmul.f32 %v7427_v25, %v14360_v38 }
 0x1ac   :  { %14359 = vst [vmem:[#allocation187_spill] sm:$0xff] %v9128_v58  ;;  %14362 = vst [vmem:[#allocation188_spill] sm:$0xff] %v9134_v37  ;;  %v9151_v30 = vmul.f32 %v8395_v54, %v14360_v38  ;;  %v9157_v58 = vpop.permute.xlu1 %1386 }
 0x1ad   :  { %14361 = vst [vmem:[#allocation12_spill] sm:$0xff] %v9132_v21  ;;  %14363 = vst [vmem:[#allocation189_spill] sm:$0xff] %v9143_v20  ;;  %v14366_v21 = vld [vmem:[#allocation13_spill] sm:$0xff]  ;;  %v9165_v20 = vmul.f32 %v8380_v39, %v14369_v59 }
 0x1ae   :  { %14364 = vst [vmem:[#allocation190_spill] sm:$0xff] %v9147_v12  ;;  %14365 = vst [vmem:[#allocation191_spill] sm:$0xff] %v9151_v30  ;;  %v9155_v37 = vmul.f32 %v8383_v4, %v14366_v21  ;;  %v9169_v12 = vmul.f32 %v7418_v22, %v14369_v59  ;;  %v9173_v38 = vmul.f32 %v8389_v7, %v14366_v21 }
 0x1af   :  { %14368 = vst [vmem:[#allocation192_spill] sm:$0xff] %v9157_v58  ;;  %14370 = vst [vmem:[#allocation30_spill] sm:$0xff] %v9161_v57  ;;  %v9178_v58 = vmul.f32 %v8386_v47, %v14369_v59  ;;  %v14385_v57 = vld [vmem:[#allocation37_spill] sm:$0xff] }
 0x1b0   :  { %14367 = vst [vmem:[#allocation13_spill] sm:$0xff] %v9155_v37  ;;  %14371 = vst [vmem:[#allocation193_spill] sm:$0xff] %v9165_v20  ;;  %v14375_v37 = vld [vmem:[#allocation32_spill] sm:$0xff]  ;;  %v9217_v1 = vmul.f32 %v8377_v3, %v14385_v57  ;;  %v9262_v27 = vpop.permute.xlu1 %1851 }
 0x1b1   :  { %14372 = vst [vmem:[#allocation194_spill] sm:$0xff] %v9169_v12  ;;  %14373 = vst [vmem:[#allocation195_spill] sm:$0xff] %v9173_v38  ;;  %v9182_v30 = vmul.f32 %v8377_v3, %v14375_v37  ;;  %v9186_v20 = vmul.f32 %v8380_v39, %v14375_v37  ;;  %v9190_v12 = vmul.f32 %v7418_v22, %v14375_v37  ;;  %v14379_v38 = vld [vmem:[#allocation34_spill] sm:$0xff] }
 0x1b2   :  { %14374 = vst [vmem:[#allocation196_spill] sm:$0xff] %v9178_v58  ;;  %v9197_v59 = vmul.f32 %v8383_v4, %v14379_v38  ;;  %v9201_v58 = vmul.f32 %v8389_v7, %v14379_v38  ;;  %14386 = vst [vmem:[#allocation37_spill] sm:$0xff] %v9217_v1  ;;  %v9241_v1 = vmul.f32 %v7418_v22, %v8374_v32 }
 0x1b3   :  { %14376 = vst [vmem:[#allocation32_spill] sm:$0xff] %v9182_v30  ;;  %14377 = vst [vmem:[#allocation197_spill] sm:$0xff] %v9186_v20  ;;  %v9205_v30 = vmul.f32 %v7427_v25, %v14379_v38  ;;  %v9209_v20 = vmul.f32 %v8386_v47, %v14375_v37  ;;  %v9229_v37 = vmul.f32 %v8386_v47, %v14385_v57 }
 0x1b4   :  { %14378 = vst [vmem:[#allocation198_spill] sm:$0xff] %v9190_v12  ;;  %14380 = vst [vmem:[#allocation34_spill] sm:$0xff] %v9197_v59  ;;  %v9213_v12 = vmul.f32 %v8395_v54, %v14379_v38  ;;  %v9221_v59 = vmul.f32 %v8380_v39, %v14385_v57  ;;  %v9233_v38 = vmul.f32 %v8377_v3, %v8374_v32 }
 0x1b5   :  { %14381 = vst [vmem:[#allocation199_spill] sm:$0xff] %v9201_v58  ;;  %14382 = vst [vmem:[#allocation200_spill] sm:$0xff] %v9205_v30  ;;  %v9225_v58 = vmul.f32 %v7418_v22, %v14385_v57  ;;  %v9247_v57 = vmul.f32 %v8383_v4, %v8401_v15  ;;  %v9259_v22 = vmul.f32 %v8386_v47, %v8374_v32  ;;  %v14402_v47 = vld [vmem:[#allocation14_spill] sm:$0xff] }
 0x1b6   :  { %14383 = vst [vmem:[#allocation201_spill] sm:$0xff] %v9209_v20  ;;  %14384 = vst [vmem:[#allocation202_spill] sm:$0xff] %v9213_v12  ;;  %v9237_v12 = vmul.f32 %v8380_v39, %v8374_v32  ;;  %v925_v20 = vpop.f32.mrb[0].mxu0  ;;  %v9277_v32 = vmul.f32 %v8395_v54, %v14366_v21 }
 0x1b7   :  { %14387 = vst [vmem:[#allocation203_spill] sm:$0xff] %v9221_v59  ;;  %14388 = vst [vmem:[#allocation204_spill] sm:$0xff] %v9225_v58  ;;  %v9243_v59 = vpop.permute.xlu0 %2679 }
 0x1b8   :  { %14389 = vst [vmem:[#allocation205_spill] sm:$0xff] %v9229_v37  ;;  %14390 = vst [vmem:[#allocation206_spill] sm:$0xff] %v9233_v38  ;;  %v9251_v37 = vmul.f32 %v8389_v7, %v8401_v15  ;;  %v9255_v38 = vmul.f32 %v7427_v25, %v8401_v15 }
 0x1b9   :  { %14391 = vst [vmem:[#allocation207_spill] sm:$0xff] %v9237_v12  ;;  %14392 = vst [vmem:[#allocation208_spill] sm:$0xff] %v9241_v1  ;;  %v927_v1 = vpop.f32.mrb[1].mxu0  ;;  %v9297_v12 = vmul.f32 %v8395_v54, %v14402_v47 }
 0x1ba   :  { %14393 = vst [vmem:[#allocation209_spill] sm:$0xff] %v9243_v59  ;;  %14394 = vst [vmem:[#allocation210_spill] sm:$0xff] %v9247_v57  ;;  %v926_v59 = vadd.f32 %v925_v20, %v8710_v31  ;;  %v3984_v57 = vld [vmem:[%s14007_s10 + $0x68] sm:$0xff]  ;;  %v1118_v31 = vpop.f32.mrb[0].mxu1  ;;  %v928_v20 = vadd.f32 %v927_v1, %v8767_v23 }
 0x1bb   :  { %14395 = vst [vmem:[#allocation211_spill] sm:$0xff] %v9251_v37  ;;  %14396 = vst [vmem:[#allocation212_spill] sm:$0xff] %v9255_v38  ;;  %v9269_v37 = vmul.f32 %v8395_v54, %v8401_v15  ;;  %v9273_v38 = vmul.f32 %v7427_v25, %v14366_v21  ;;  %v9286_v15 = vmul.f32 %v8389_v7, %v14402_v47  ;;  %4070 = vperm.xlu1 %6296, %v3984_v57   ;;  %v14411_v57 = vld [vmem:[#allocation8_spill] sm:$0xff] }
 0x1bc   :  { %14397 = vst [vmem:[#allocation213_spill] sm:$0xff] %v9259_v22  ;;  %14398 = vst [vmem:[#allocation214_spill] sm:$0xff] %v9262_v27  ;;  %v929_v27 = vpop.f32.mrb[2].mxu0  ;;  %v9282_v22 = vmul.f32 %v8383_v4, %v14402_v47  ;;  %v1119_v21 = vadd.f32 %v1118_v31, %v8763_v33  ;;  %v14409_v33 = vld [vmem:[#allocation19_spill] sm:$0xff] }
 0x1bd   :  { %14399 = vst [vmem:[#allocation215_spill] sm:$0xff] %v9269_v37  ;;  %14400 = vst [vmem:[#allocation216_spill] sm:$0xff] %v9273_v38  ;;  %v9290_v37 = vmul.f32 %v7427_v25, %v14402_v47  ;;  %v1569_v38 = vadd.f32 %v8728_v55, %v926_v59  ;;  %v930_v23 = vadd.f32 %v929_v27, %v8405_v18  ;;  %v931_v1 = vpop.f32.mrb[3].mxu0 }
 0x1be   :  { %14401 = vst [vmem:[#allocation217_spill] sm:$0xff] %v9277_v32  ;;  %14403 = vst [vmem:[#allocation14_spill] sm:$0xff] %v9282_v22  ;;  %v1120_v32 = vpop.f32.mrb[1].mxu1  ;;  %v1570_v22 = vadd.f32 %v8744_v62, %v928_v20  ;;  %v932_v25 = vadd.f32 %v931_v1, %v8424_v52  ;;  %v1571_v18 = vadd.f32 %v8732_v6, %v1119_v21  ;;  %v9316_v52 = vld [vmem:[%s14008_s11 + $0x58] sm:$0xff]  ;;  %v9328_v21 = vpop.permute.xlu0 %2689 }
 0x1bf   :  { %14404 = vst [vmem:[#allocation218_spill] sm:$0xff] %v9286_v15  ;;  %14405 = vst [vmem:[#allocation219_spill] sm:$0xff] %v9290_v37  ;;  %v1121_v15 = vadd.f32 %v1120_v32, %v8771_v56  ;;  %v1122_v58 = vpop.f32.mrb[2].mxu1  ;;  %v14407_v37 = vld [vmem:[#allocation16_spill] sm:$0xff]  ;;  %v1889_v59 = vadd.f32 %v14409_v33, %v1569_v38  ;;  %v1573_v27 = vadd.f32 %v8409_v14, %v930_v23  ;;  %v3986_v56 = vld [vmem:[%s14007_s10 + $0x78] sm:$0xff]  ;;  %5734 = vperm.xlu0 %6297, %v9316_v52  }
 0x1c0   :  { %14406 = vst [vmem:[#allocation220_spill] sm:$0xff] %v9297_v12  ;;  %v9304_v55 = vmul.f32 %v8383_v4, %v14407_v37  ;;  %v1123_v47 = vadd.f32 %v1122_v58, %v8413_v19  ;;  %v1124_v31 = vpop.f32.mrb[3].mxu1  ;;  %14410 = vst [vmem:[#allocation19_spill] sm:$0xff] %v9316_v52  ;;  %v1890_v62 = vadd.f32 %v14409_v33, %v1570_v22  ;;  %4080 = vperm.xlu1 %6296, %v3986_v56   ;;  %v14460_v52 = vld [vmem:[#allocation66_spill] sm:$0xff] }
 0x1c1   :  { %v1572_v38 = vadd.f32 %v8748_v8, %v1121_v15  ;;  %v1574_v6 = vadd.f32 %v8428_v51, %v932_v25  ;;  %v1125_v14 = vadd.f32 %v1124_v31, %v8432_v63  ;;  %v9323_v19 = vmul.f32 0.5, %v1889_v59  ;;  %14412 = vst [vmem:[#allocation8_spill] sm:$0xff] %v9328_v21  ;;  %v935_v63 = vpop.f32.mrb[4].mxu0  ;;  %v9341_v59 = vpop.permute.xlu1 %579 }
 0x1c2   :  { %14408 = vst [vmem:[#allocation221_spill] sm:$0xff] %v9304_v55  ;;  %v1891_v58 = vadd.f32 %v14409_v33, %v1571_v18  ;;  %v1893_v32 = vadd.f32 %v14411_v57, %v1573_v27  ;;  %v1575_v20 = vadd.f32 %v8420_v16, %v1123_v47  ;;  %v9330_v23 = vmul.f32 0.5, %v1890_v62  ;;  %v937_v1 = vpop.f32.mrb[5].mxu0  ;;  %14413 = vst [vmem:[#allocation222_spill] sm:$0xff] %v9341_v59  ;;  %v1128_v31 = vpop.f32.mrb[4].mxu1  ;;  %v14418_v55 = vld [vmem:[#allocation48_spill] sm:$0xff] }
 0x1c3   :  { %v1892_v22 = vadd.f32 %v14409_v33, %v1572_v38  ;;  %v1894_v25 = vadd.f32 %v14411_v57, %v1574_v6  ;;  %v1576_v51 = vadd.f32 %v8436_v44, %v1125_v14  ;;  %6477 = vtanh.f32 %v9323_v19  ;;  %v3988_v33 = vld [vmem:[%s14007_s10 + $0x88] sm:$0xff]  ;;  %v939_v56 = vpop.f32.mrb[6].mxu0  ;;  %v14415_v38 = vld [vmem:[#allocation46_spill] sm:$0xff] }
 0x1c4   :  { %v9336_v8 = vmul.f32 0.5, %v1891_v58  ;;  %v9338_v15 = vmul.f32 0.5, %v1893_v32  ;;  %v1895_v16 = vadd.f32 %v14411_v57, %v1575_v20  ;;  %v9349_v44 = vld [vmem:[%s14008_s11 + $0x68] sm:$0xff]  ;;  %6479 = vtanh.f32 %v9330_v23  ;;  %v1130_v58 = vpop.f32.mrb[5].mxu1  ;;  %v941_v32 = vpop.f32.mrb[7].mxu0  ;;  %4090 = vperm.xlu1 %6296, %v3988_v33  }
 0x1c5   :  { %14414 = vst [vmem:[#allocation223_spill] sm:$0xff] %v9349_v44  ;;  %v9352_v18 = vmul.f32 0.5, %v1892_v22  ;;  %v9354_v27 = vmul.f32 0.5, %v1894_v25  ;;  %v1896_v47 = vadd.f32 %v14411_v57, %v1576_v51  ;;  %5742 = vperm.xlu0 %6297, %v9349_v44   ;;  %v936_v6 = vadd.f32 %v935_v63, %v14415_v38  ;;  %v14416_v22 = vld [vmem:[#allocation49_spill] sm:$0xff]  ;;  %v1132_v51 = vpop.f32.mrb[6].mxu1 }
 0x1c6   :  { %6481 = vtanh.f32 %v9336_v8  ;;  %v9359_v62 = vmul.f32 0.5, %v1895_v16  ;;  %v1129_v14 = vadd.f32 %v1128_v31, %v8448_v10  ;;  %v938_v57 = vadd.f32 %v937_v1, %v14416_v22  ;;  %v14417_v16 = vld [vmem:[#allocation47_spill] sm:$0xff]  ;;  %v1134_v31 = vpop.f32.mrb[7].mxu1  ;;  %v14419_v1 = vld [vmem:[#allocation50_spill] sm:$0xff] }
 0x1c7   :  { %6483 = vtanh.f32 %v9352_v18  ;;  %v9364_v20 = vmul.f32 0.5, %v1896_v47  ;;  %v1131_v25 = vadd.f32 %v1130_v58, %v8464_v5  ;;  %v1577_v21 = vadd.f32 %v14417_v16, %v936_v6  ;;  %v3990_v47 = vld [vmem:[%s14007_s10 + $0x98] sm:$0xff]  ;;  %v14421_v6 = vld [vmem:[#allocation9_spill] sm:$0xff] }
 0x1c8   :  { %6485 = vtanh.f32 %v9338_v15  ;;  %v1579_v63 = vadd.f32 %v14418_v55, %v1129_v14  ;;  %v940_v10 = vadd.f32 %v939_v56, %v8836_v46  ;;  %v1578_v38 = vadd.f32 %v14419_v1, %v938_v57  ;;  %v14420_v5 = vld [vmem:[#allocation51_spill] sm:$0xff]  ;;  %v14422_v46 = vld [vmem:[#allocation52_spill] sm:$0xff]  ;;  %v9383_v14 = vpop.permute.xlu0 %2699  ;;  %v14424_v1 = vld [vmem:[#allocation53_spill] sm:$0xff]  ;;  %4100 = vperm.xlu1 %6296, %v3990_v47  }
 0x1c9   :  { %6487 = vtanh.f32 %v9359_v62  ;;  %v1580_v58 = vadd.f32 %v14420_v5, %v1131_v25  ;;  %v1133_v33 = vadd.f32 %v1132_v51, %v8840_v42  ;;  %v1897_v22 = vadd.f32 %v14421_v6, %v1577_v21  ;;  %14423 = vst [vmem:[#allocation46_spill] sm:$0xff] %v9383_v14  ;;  %v945_v5 = vpop.f32.mrb[8].mxu0  ;;  %v14425_v21 = vld [vmem:[#allocation21_spill] sm:$0xff] }
 0x1ca   :  { %6489 = vtanh.f32 %v9354_v27  ;;  %v1899_v55 = vadd.f32 %v14421_v6, %v1579_v63  ;;  %v1581_v56 = vadd.f32 %v14422_v46, %v940_v10  ;;  %v1898_v16 = vadd.f32 %v14421_v6, %v1578_v38  ;;  %v9395_v46 = vpop.permute.xlu1 %584  ;;  %v947_v14 = vpop.f32.mrb[9].mxu0  ;;  %v3992_v38 = vld [vmem:[%s14007_s10 + $0xa8] sm:$0xff] }
 0x1cb   :  { %6491 = vtanh.f32 %v9364_v20  ;;  %v1900_v57 = vadd.f32 %v14421_v6, %v1580_v58  ;;  %v1583_v25 = vadd.f32 %v14424_v1, %v1133_v33  ;;  %v9389_v42 = vmul.f32 0.5, %v1897_v22  ;;  %14426 = vst [vmem:[#allocation49_spill] sm:$0xff] %v9395_v46  ;;  %v1138_v22 = vpop.f32.mrb[8].mxu1 }
 0x1cc   :  { %v9391_v51 = vmul.f32 0.5, %v1899_v55  ;;  %v1901_v63 = vadd.f32 %v14425_v21, %v1581_v56  ;;  %v942_v10 = vadd.f32 %v941_v32, %v8852_v11  ;;  %v9400_v58 = vmul.f32 0.5, %v1898_v16  ;;  %v949_v55 = vpop.f32.mrb[10].mxu0  ;;  %v14427_v32 = vld [vmem:[#allocation54_spill] sm:$0xff]  ;;  %v1140_v59 = vpop.f32.mrb[9].mxu1  ;;  %4110 = vperm.xlu1 %6296, %v3992_v38  }
 0x1cd   :  { %v9402_v33 = vmul.f32 0.5, %v1900_v57  ;;  %v1903_v47 = vadd.f32 %v14425_v21, %v1583_v25  ;;  %v1135_v6 = vadd.f32 %v1134_v31, %v8856_v29  ;;  %v6478_v56 = vpop.eup %6477  ;;  %6493 = vtanh.f32 %v9389_v42  ;;  %v951_v16 = vpop.f32.mrb[11].mxu0 }
 0x1ce   :  { %v9407_v11 = vmul.f32 0.5, %v1901_v63  ;;  %v1582_v1 = vadd.f32 %v14427_v32, %v942_v10  ;;  %v946_v46 = vadd.f32 %v945_v5, %v8868_v43  ;;  %v9411_v12 = vpop.eup %6479  ;;  %v2273_v57 = vadd.f32 1.0, %v6478_v56  ;;  %v1142_v31 = vpop.f32.mrb[10].mxu1  ;;  %v9420_v63 = vld [vmem:[%s14008_s11 + $0x78] sm:$0xff] }
 0x1cf   :  { %6495 = vtanh.f32 %v9391_v51  ;;  %v9414_v25 = vmul.f32 0.5, %v1903_v47  ;;  %v1584_v29 = vadd.f32 %v8489_v40, %v1135_v6  ;;  %14428 = vst [vmem:[#allocation47_spill] sm:$0xff] %v9420_v63  ;;  %v1139_v56 = vadd.f32 %v1138_v22, %v8872_v2  ;;  %v1144_v47 = vpop.f32.mrb[11].mxu1  ;;  %v3994_v40 = vld [vmem:[%s14007_s10 + $0xb8] sm:$0xff]  ;;  %5750 = vperm.xlu0 %6297, %v9420_v63   ;;  %v9443_v30 = vpop.permute.xlu0 %2709  ;;  %v14455_v63 = vld [vmem:[#allocation65_spill] sm:$0xff] }
 0x1d0   :  { %v6482_v10 = vpop.eup %6481  ;;  %6497 = vtanh.f32 %v9400_v58  ;;  %v1902_v43 = vadd.f32 %v14425_v21, %v1582_v1  ;;  %v1585_v5 = vadd.f32 %v8752_v61, %v946_v46  ;;  %v9436_v1 = vmul.f32 %v8389_v7, %v14407_v37  ;;  %v14430_v46 = vld [vmem:[#allocation10_spill] sm:$0xff]  ;;  %14431 = vst [vmem:[#allocation50_spill] sm:$0xff] %v9443_v30  ;;  %4120 = vperm.xlu1 %6296, %v3994_v40   ;;  %v9469_v30 = vpop.permute.xlu1 %1394  ;;  %v3996_v37 = vld [vmem:[%s14007_s10 + $0xc8] sm:$0xff] }
 0x1d1   :  { %v9430_v38 = vpop.eup %6483  ;;  %v2275_v6 = vadd.f32 1.0, %v6482_v10  ;;  %6499 = vtanh.f32 %v9402_v33  ;;  %v1904_v32 = vadd.f32 %v14425_v21, %v1584_v29  ;;  %v1587_v54 = vadd.f32 %v8756_v0, %v1139_v56  ;;  %v955_v21 = vpop.f32.mrb[12].mxu0  ;;  %v9452_v29 = vld [vmem:[%s14008_s11 + $0x88] sm:$0xff]  ;;  %14435 = vst [vmem:[#allocation53_spill] sm:$0xff] %v9469_v30 }
 0x1d2   :  { %14429 = vst [vmem:[#allocation48_spill] sm:$0xff] %v9436_v1  ;;  %v6486_v61 = vpop.eup %6485  ;;  %6501 = vtanh.f32 %v9407_v11  ;;  %v9439_v2 = vmul.f32 0.5, %v1902_v43  ;;  %v1905_v22 = vadd.f32 %v14430_v46, %v1585_v5  ;;  %v9446_v10 = vmul.f32 %v2273_v57, %v9323_v19  ;;  %14432 = vst [vmem:[#allocation51_spill] sm:$0xff] %v9452_v29  ;;  %v9471_v1 = vpop.f32.mrb[13].mxu0 }
 0x1d3   :  { %v6488_v4 = vpop.eup %6487  ;;  %6503 = vtanh.f32 %v9414_v25  ;;  %v9456_v43 = vmul.f32 %v8377_v3, %v8554_v50  ;;  %v9460_v0 = vmul.f32 %v8380_v39, %v8554_v50  ;;  %v2277_v19 = vadd.f32 1.0, %v6486_v61  ;;  %5758 = vperm.xlu0 %6297, %v9452_v29   ;;  %v9487_v30 = vpop.f32.mrb[14].mxu0  ;;  %v14436_v50 = vld [vmem:[#allocation56_spill] sm:$0xff] }
 0x1d4   :  { %v9462_v5 = vpop.eup %6489  ;;  %v9464_v57 = vmul.f32 0.5, %v1904_v32  ;;  %v9466_v56 = vmul.f32 0.5, %v1905_v22  ;;  %v1907_v40 = vadd.f32 %v14430_v46, %v1587_v54  ;;  %v9480_v61 = vmul.f32 %v2275_v6, %v9336_v8  ;;  %v9485_v22 = vpop.f32.mrb[12].mxu1  ;;  %4130 = vperm.xlu1 %6296, %v3996_v37  }
 0x1d5   :  { %14433 = vst [vmem:[#allocation9_spill] sm:$0xff] %v9456_v43  ;;  %14434 = vst [vmem:[#allocation52_spill] sm:$0xff] %v9460_v0  ;;  %v9477_v7 = vpop.eup %6491  ;;  %6505 = vtanh.f32 %v9439_v2  ;;  %v948_v32 = vadd.f32 %v947_v14, %v8891_v13  ;;  %v1141_v54 = vadd.f32 %v1140_v59, %v8907_v24  ;;  %v2279_v39 = vadd.f32 1.0, %v6488_v4  ;;  %v9493_v43 = vpop.f32.mrb[13].mxu1  ;;  %v14437_v24 = vld [vmem:[#allocation57_spill] sm:$0xff]  ;;  %v14438_v14 = vld [vmem:[#allocation58_spill] sm:$0xff] }
 0x1d6   :  { %6507 = vtanh.f32 %v9466_v56  ;;  %v9490_v3 = vmul.f32 0.5, %v1907_v40  ;;  %v950_v0 = vadd.f32 %v949_v55, %v14436_v50  ;;  %v9495_v8 = vpop.f32.mrb[15].mxu0  ;;  %v1143_v59 = vadd.f32 %v1142_v31, %v14437_v24  ;;  %v9501_v35 = vpop.f32.mrb[14].mxu1  ;;  %v14439_v50 = vld [vmem:[#allocation59_spill] sm:$0xff]  ;;  %v14441_v24 = vld [vmem:[#allocation22_spill] sm:$0xff] }
 0x1d7   :  { %v1586_v6 = vadd.f32 %v8775_v49, %v948_v32  ;;  %v1588_v13 = vadd.f32 %v8781_v41, %v1141_v54  ;;  %v952_v36 = vadd.f32 %v951_v16, %v14438_v14  ;;  %v6494_v4 = vpop.eup %6493  ;;  %v9504_v40 = vmul.f32 %v2277_v19, %v9338_v15  ;;  %v9509_v49 = vpop.f32.mrb[15].mxu1  ;;  %v3998_v41 = vld [vmem:[%s14007_s10 + $0xd8] sm:$0xff]  ;;  %v14440_v32 = vld [vmem:[#allocation60_spill] sm:$0xff] }
 0x1d8   :  { %6509 = vtanh.f32 %v9464_v57  ;;  %v1589_v55 = vadd.f32 %v14439_v50, %v950_v0  ;;  %v1145_v45 = vadd.f32 %v1144_v47, %v8517_v60  ;;  %v1591_v15 = vadd.f32 %v14440_v32, %v1143_v59  ;;  %v14442_v47 = vld [vmem:[#allocation61_spill] sm:$0xff]  ;;  %v14443_v50 = vld [vmem:[#allocation62_spill] sm:$0xff]  ;;  %v9525_v29 = vpop.permute.xlu0 %2719  ;;  %4140 = vperm.xlu1 %6296, %v3998_v41  }
 0x1d9   :  { %v6496_v16 = vpop.eup %6495  ;;  %v1906_v31 = vadd.f32 %v14430_v46, %v1586_v6  ;;  %v1908_v37 = vadd.f32 %v14430_v46, %v1588_v13  ;;  %v956_v19 = vadd.f32 %v955_v21, %v8525_v48  ;;  %v2281_v0 = vadd.f32 1.0, %v6494_v4  ;;  %14444 = vst [vmem:[#allocation21_spill] sm:$0xff] %v9525_v29  ;;  %v9533_v21 = vpop.f32.mrb[16].mxu0 }
 0x1da   :  { %v9518_v54 = vpop.eup %6497  ;;  %v1909_v60 = vadd.f32 %v14441_v24, %v1589_v55  ;;  %v1590_v14 = vadd.f32 %v14442_v47, %v952_v36  ;;  %v1592_v53 = vadd.f32 %v14443_v50, %v1145_v45  ;;  %6511 = vtanh.f32 %v9490_v3  ;;  %v9539_v55 = vpop.permute.xlu1 %1861 }
 0x1db   :  { %v9523_v26 = vpop.eup %6499  ;;  %v9528_v46 = vmul.f32 0.5, %v1906_v31  ;;  %v9530_v6 = vmul.f32 0.5, %v1908_v37  ;;  %v1911_v48 = vadd.f32 %v14441_v24, %v1591_v15  ;;  %v2283_v59 = vadd.f32 1.0, %v6496_v16  ;;  %14447 = vst [vmem:[#allocation56_spill] sm:$0xff] %v9539_v55  ;;  %v9541_v32 = vpop.f32.mrb[17].mxu0  ;;  %v4000_v31 = vld [vmem:[%s14007_s10 + $0xe8] sm:$0xff] }
 0x1dc   :  { %v6502_v13 = vpop.eup %6501  ;;  %v9535_v36 = vmul.f32 0.5, %v1909_v60  ;;  %v1910_v45 = vadd.f32 %v14441_v24, %v1590_v14  ;;  %v1912_v4 = vadd.f32 %v14441_v24, %v1592_v53  ;;  %v14448_v16 = vld [vmem:[#allocation114_spill] sm:$0xff]  ;;  %v9550_v47 = vpop.f32.mrb[16].mxu1  ;;  %v9555_v53 = vmul.f32 %v2279_v39, %v9359_v62  ;;  %v14451_v62 = vld [vmem:[#allocation11_spill] sm:$0xff]  ;;  %4150 = vperm.xlu1 %6296, %v4000_v31  }
 0x1dd   :  { %14445 = vst [vmem:[#allocation54_spill] sm:$0xff] %v9528_v46  ;;  %14446 = vst [vmem:[#allocation10_spill] sm:$0xff] %v9530_v6  ;;  %v6504_v37 = vpop.eup %6503  ;;  %v2285_v15 = vadd.f32 1.0, %v6502_v13  ;;  %6513 = vtanh.f32 %v9528_v46  ;;  %v9547_v41 = vmul.f32 0.5, %v1911_v48  ;;  %v1593_v60 = vadd.f32 %v14448_v16, %v956_v19  ;;  %v9552_v14 = vpop.f32.mrb[18].mxu0  ;;  %v9570_v19 = vld [vmem:[%s14008_s11 + $0x98] sm:$0xff] }
 0x1de   :  { %v9558_v24 = vmul.f32 %v2281_v0, %v9389_v42  ;;  %6515 = vtanh.f32 %v9530_v6  ;;  %v9561_v50 = vmul.f32 0.5, %v1910_v45  ;;  %v9563_v13 = vpop.f32.mrb[17].mxu1  ;;  %v9565_v48 = vpop.f32.mrb[19].mxu0  ;;  %14450 = vst [vmem:[#allocation58_spill] sm:$0xff] %v9570_v19  ;;  %v2287_v39 = vadd.f32 1.0, %v6504_v37  ;;  %v14452_v0 = vld [vmem:[#allocation63_spill] sm:$0xff]  ;;  %5766 = vperm.xlu0 %6297, %v9570_v19  }
 0x1df   :  { %v9572_v16 = vpop.eup %6505  ;;  %6517 = vtanh.f32 %v9535_v36  ;;  %v1913_v42 = vadd.f32 %v14451_v62, %v1593_v60  ;;  %v1149_v45 = vadd.f32 %v9485_v22, %v14452_v0  ;;  %v9578_v29 = vpop.f32.mrb[18].mxu1  ;;  %v9582_v6 = vmul.f32 %v2283_v59, %v9391_v51  ;;  %v14454_v46 = vld [vmem:[#allocation64_spill] sm:$0xff]  ;;  %v4002_v22 = vld [vmem:[%s14007_s10 + $0xf8] sm:$0xff] }
 0x1e0   :  { %14449 = vst [vmem:[#allocation57_spill] sm:$0xff] %v9561_v50  ;;  %v6508_v55 = vpop.eup %6507  ;;  %6519 = vtanh.f32 %v9547_v41  ;;  %v958_v37 = vadd.f32 %v9471_v1, %v14454_v46  ;;  %v1151_v60 = vadd.f32 %v9493_v43, %v14455_v63  ;;  %v9589_v44 = vpop.f32.mrb[19].mxu1  ;;  %v9595_v31 = vmul.f32 %v2285_v15, %v9407_v11  ;;  %v14457_v59 = vld [vmem:[#allocation115_spill] sm:$0xff]  ;;  %v14458_v63 = vld [vmem:[#allocation116_spill] sm:$0xff]  ;;  %v14459_v43 = vld [vmem:[#allocation117_spill] sm:$0xff]  ;;  %4160 = vperm.xlu1 %6296, %v4002_v22  }
 0x1e1   :  { %14453 = vst [vmem:[#allocation59_spill] sm:$0xff] %v9582_v6  ;;  %v9597_v0 = vmul.f32 0.5, %v1912_v4  ;;  %v9599_v51 = vmul.f32 0.5, %v1913_v42  ;;  %v1595_v19 = vadd.f32 %v14457_v59, %v1149_v45  ;;  %6521 = vtanh.f32 %v9561_v50  ;;  %v9612_v11 = vld [vmem:[%s14008_s11 + $0xa8] sm:$0xff]  ;;  %v9614_v4 = vpop.permute.xlu0 %2729  ;;  %v14474_v50 = vld [vmem:[#allocation71_spill] sm:$0xff] }
 0x1e2   :  { %v9602_v17 = vpop.eup %6509  ;;  %v1594_v1 = vadd.f32 %v14458_v63, %v958_v37  ;;  %v1596_v46 = vadd.f32 %v14459_v43, %v1151_v60  ;;  %v960_v6 = vadd.f32 %v9487_v30, %v14460_v52  ;;  %14461 = vst [vmem:[#allocation22_spill] sm:$0xff] %v9612_v11  ;;  %14462 = vst [vmem:[#allocation61_spill] sm:$0xff] %v9614_v4  ;;  %v2289_v42 = vadd.f32 1.0, %v6508_v55  ;;  %v9621_v37 = vpop.f32.mrb[20].mxu0  ;;  %v14463_v60 = vld [vmem:[#allocation70_spill] sm:$0xff]  ;;  %v14464_v63 = vld [vmem:[#allocation67_spill] sm:$0xff] }
 0x1e3   :  { %14456 = vst [vmem:[#allocation60_spill] sm:$0xff] %v9597_v0  ;;  %v9617_v15 = vmul.f32 %v2287_v39, %v9414_v25  ;;  %6523 = vtanh.f32 %v9599_v51  ;;  %v1915_v45 = vadd.f32 %v14451_v62, %v1595_v19  ;;  %5774 = vperm.xlu0 %6297, %v9612_v11   ;;  %v1153_v25 = vadd.f32 %v9501_v35, %v14464_v63  ;;  %v9629_v39 = vpop.permute.xlu1 %589  ;;  %v9631_v55 = vpop.f32.mrb[21].mxu0  ;;  %v9636_v19 = vld [vmem:[%s14008_s11 + $0x8] sm:$0xff] }
 0x1e4   :  { %v1914_v30 = vadd.f32 %v14451_v62, %v1594_v1  ;;  %v1916_v52 = vadd.f32 %v14451_v62, %v1596_v46  ;;  %v1597_v59 = vadd.f32 %v14463_v60, %v960_v6  ;;  %14465 = vst [vmem:[#allocation62_spill] sm:$0xff] %v9629_v39  ;;  %14466 = vst [vmem:[#allocation114_spill] sm:$0xff] %v9631_v55  ;;  %v6512_v22 = vpop.eup %6511  ;;  %6525 = vtanh.f32 %v9597_v0  ;;  %v14468_v62 = vld [vmem:[#allocation68_spill] sm:$0xff]  ;;  %v14469_v43 = vld [vmem:[#allocation73_spill] sm:$0xff]  ;;  %v9645_v46 = vpop.f32.mrb[20].mxu1 }
 0x1e5   :  { %14467 = vst [vmem:[#allocation11_spill] sm:$0xff] %v9636_v19  ;;  %v9639_v1 = vmul.f32 0.5, %v1915_v45  ;;  %v962_v6 = vadd.f32 %v9495_v8, %v14468_v62  ;;  %v1155_v35 = vadd.f32 %v9509_v49, %v14469_v43  ;;  %v9647_v60 = vpop.f32.mrb[22].mxu0  ;;  %v14473_v39 = vld [vmem:[#allocation23_spill] sm:$0xff]  ;;  %v1599_v0 = vadd.f32 %v14474_v50, %v1153_v25  ;;  %v9655_v45 = vpop.f32.mrb[21].mxu1  ;;  %v14478_v49 = vld [vmem:[#allocation72_spill] sm:$0xff]  ;;  %5260 = vperm.xlu1 %6296, %v9636_v19  }
 0x1e6   :  { %14470 = vst [vmem:[#allocation63_spill] sm:$0xff] %v9647_v60  ;;  %v9649_v63 = vmul.f32 0.5, %v1914_v30  ;;  %v9651_v4 = vmul.f32 0.5, %v1916_v52  ;;  %v1917_v11 = vadd.f32 %v14473_v39, %v1597_v59  ;;  %14475 = vst [vmem:[#allocation115_spill] sm:$0xff] %v9655_v45  ;;  %v9657_v55 = vpop.f32.mrb[23].mxu0  ;;  %v14479_v43 = vld [vmem:[#allocation74_spill] sm:$0xff] }
 0x1e7   :  { %14476 = vst [vmem:[#allocation116_spill] sm:$0xff] %v9657_v55  ;;  %v9659_v8 = vpop.eup %6513  ;;  %6527 = vtanh.f32 %v9639_v1  ;;  %v1598_v62 = vadd.f32 %v14478_v49, %v962_v6  ;;  %v1600_v60 = vadd.f32 %v14479_v43, %v1155_v35  ;;  %v2274_v30 = vadd.f32 1.0, %v9411_v12  ;;  %v9665_v52 = vpop.f32.mrb[22].mxu1 }
 0x1e8   :  { %14471 = vst [vmem:[#allocation64_spill] sm:$0xff] %v9649_v63  ;;  %14472 = vst [vmem:[#allocation65_spill] sm:$0xff] %v9651_v4  ;;  %v9668_v59 = vpop.eup %6515  ;;  %v2291_v50 = vadd.f32 1.0, %v6512_v22  ;;  %v9670_v25 = vmul.f32 0.5, %v1917_v11  ;;  %v1919_v55 = vadd.f32 %v14473_v39, %v1599_v0  ;;  %v9674_v45 = vpop.f32.mrb[23].mxu1  ;;  %6529 = vtanh.f32 %v9649_v63 }
 0x1e9   :  { %14477 = vst [vmem:[#allocation117_spill] sm:$0xff] %v9659_v8  ;;  %v2278_v8 = vadd.f32 1.0, %v9462_v5  ;;  %v6518_v6 = vpop.eup %6517  ;;  %v1918_v12 = vadd.f32 %v14473_v39, %v1598_v62  ;;  %v1920_v35 = vadd.f32 %v14473_v39, %v1600_v60  ;;  %v2402_v49 = vmul.f32 %v2274_v30, %v9330_v23  ;;  %v9684_v5 = vpop.permute.xlu0 %2739  ;;  %v14481_v23 = vld [vmem:[#allocation118_spill] sm:$0xff] }
 0x1ea   :  { %v6520_v43 = vpop.eup %6519  ;;  %v2293_v19 = vadd.f32 1.0, %v6518_v6  ;;  %6531 = vtanh.f32 %v9670_v25  ;;  %v9681_v11 = vmul.f32 0.5, %v1919_v55  ;;  %14480 = vst [vmem:[#allocation66_spill] sm:$0xff] %v9684_v5  ;;  %v9687_v22 = vmul.f32 %v2289_v42, %v9466_v56  ;;  %v9691_v60 = vpop.f32.mrb[24].mxu0  ;;  %5270 = vperm.xlu1 %6296, %v14481_v23   ;;  %v14486_v23 = vld [vmem:[#allocation76_spill] sm:$0xff] }
 0x1eb   :  { %v2406_v0 = vmul.f32 %v2278_v8, %v9354_v27  ;;  %v2295_v63 = vadd.f32 1.0, %v6520_v43  ;;  %6533 = vtanh.f32 %v9651_v4  ;;  %v2276_v39 = vadd.f32 1.0, %v9430_v38  ;;  %v9694_v62 = vpop.eup %6521  ;;  %v9701_v42 = vpop.permute.xlu1 %594 }
 0x1ec   :  { %v9697_v55 = vmul.f32 %v2291_v50, %v9490_v3  ;;  %6535 = vtanh.f32 %v9681_v11  ;;  %v2280_v56 = vadd.f32 1.0, %v9477_v7  ;;  %14482 = vst [vmem:[#allocation70_spill] sm:$0xff] %v9701_v42  ;;  %v9703_v8 = vpop.f32.mrb[25].mxu0  ;;  %v9706_v38 = vmul.f32 %v2293_v19, %v9535_v36  ;;  %v9715_v50 = vpop.f32.mrb[24].mxu1  ;;  %v9722_v7 = vld [vmem:[%s14008_s11 + $0xb8] sm:$0xff] }
 0x1ed   :  { %v2530_v27 = vpack.c.bf16 %v2406_v0, %v2402_v49  ;;  %v6524_v30 = vpop.eup %6523  ;;  %v9709_v6 = vmul.f32 %v2295_v63, %v9547_v41  ;;  %v9711_v43 = vmul.f32 0.5, %v1918_v12  ;;  %v2529_v3 = vpack.c.bf16 %v9504_v40, %v9446_v10  ;;  %v9717_v49 = vpop.f32.mrb[26].mxu0  ;;  %14483 = vst [vmem:[#allocation67_spill] sm:$0xff] %v9722_v7  ;;  %5782 = vperm.xlu0 %6297, %v9722_v7   ;;  %v14485_v12 = vld [vmem:[#allocation75_spill] sm:$0xff] }
 0x1ee   :  { %v9724_v0 = vmul.f32 0.5, %v1920_v35  ;;  %v2404_v36 = vmul.f32 %v2276_v39, %v9352_v18  ;;  %v2408_v41 = vmul.f32 %v2280_v56, %v9364_v20  ;;  %v2531_v19 = vpack.c.bf16 %v9555_v53, %v9480_v61  ;;  %v9730_v10 = vpop.f32.mrb[25].mxu1  ;;  %v9732_v40 = vpop.f32.mrb[27].mxu0  ;;  %v14487_v39 = vld [vmem:[#allocation77_spill] sm:$0xff]  ;;  %v14490_v42 = vld [vmem:[#allocation79_spill] sm:$0xff] }
 0x1ef   :  { %2977 = vmatprep.subr.bf16.mxu0 %v2530_v27  ;;  %14484 = vst [vmem:[#allocation68_spill] sm:$0xff] %v9732_v40  ;;  %v9735_v63 = vpop.eup %6525  ;;  %v966_v35 = vadd.f32 %v9533_v21, %v14485_v12  ;;  %v1159_v18 = vadd.f32 %v9550_v47, %v14486_v23  ;;  %v968_v20 = vadd.f32 %v9541_v32, %v14487_v39  ;;  %v14488_v27 = vld [vmem:[#allocation78_spill] sm:$0xff]  ;;  %v9745_v53 = vpop.f32.mrb[26].mxu1  ;;  %v2297_v56 = vadd.f32 1.0, %v6524_v30  ;;  %v14493_v12 = vld [vmem:[#allocation132_spill] sm:$0xff]  ;;  %v14495_v39 = vld [vmem:[#allocation135_spill] sm:$0xff] }
 0x1f0   :  { %2978 = vmatpush1.bf16.msra.mxu0 %v2529_v3  ;;  %v1161_v61 = vadd.f32 %v9563_v13, %v14488_v27  ;;  %14489 = vst [vmem:[#allocation73_spill] sm:$0xff] %v9745_v53  ;;  %v2532_v5 = vpack.c.bf16 %v2408_v41, %v2404_v36  ;;  %v970_v4 = vadd.f32 %v9552_v14, %v14490_v42  ;;  %v14491_v3 = vld [vmem:[#allocation80_spill] sm:$0xff]  ;;  %v9751_v21 = vpop.f32.mrb[27].mxu1  ;;  %v14494_v23 = vld [vmem:[#allocation134_spill] sm:$0xff]  ;;  %v14498_v42 = vld [vmem:[#allocation83_spill] sm:$0xff]  ;;  %6537 = vtanh.f32 %v9711_v43 }
 0x1f1   :  { %v1163_v7 = vadd.f32 %v9578_v29, %v14491_v3  ;;  %14492 = vst [vmem:[#allocation23_spill] sm:$0xff] %v9751_v21  ;;  %5280 = vperm.xlu1 %6296, %v14493_v12   ;;  %v6528_v47 = vpop.eup %6527  ;;  %v1601_v32 = vadd.f32 %v14494_v23, %v966_v35  ;;  %v1603_v40 = vadd.f32 %v14495_v39, %v1159_v18  ;;  %v14496_v27 = vld [vmem:[#allocation136_spill] sm:$0xff]  ;;  %v14497_v41 = vld [vmem:[#allocation82_spill] sm:$0xff]  ;;  %v14499_v29 = vld [vmem:[#allocation81_spill] sm:$0xff]  ;;  %6539 = vtanh.f32 %v9724_v0 }
 0x1f2   :  { %v1602_v13 = vadd.f32 %v8911_v9, %v968_v20  ;;  %v1604_v30 = vadd.f32 %v14496_v27, %v1161_v61  ;;  %v2299_v36 = vadd.f32 1.0, %v6528_v47  ;;  %3170 = vmatprep.subr.bf16.mxu1 %v2532_v5  ;;  %v1605_v14 = vadd.f32 %v14497_v41, %v970_v4  ;;  %v9762_v21 = vpop.eup %6529  ;;  %v14500_v12 = vld [vmem:[#allocation15_spill] sm:$0xff]  ;;  %v9768_v61 = vpop.f32.mrb[28].mxu0  ;;  %v14501_v4 = vld [vmem:[#allocation25_spill] sm:$0xff] }
 0x1f3   :  { %v1607_v53 = vadd.f32 %v14498_v42, %v1163_v7  ;;  %v972_v3 = vadd.f32 %v9565_v48, %v14499_v29  ;;  %3171 = vmatpush1.bf16.msra.mxu1 %v2531_v19  ;;  %v1921_v35 = vadd.f32 %v14500_v12, %v1601_v32  ;;  %v1923_v18 = vadd.f32 %v14500_v12, %v1603_v40  ;;  %v9773_v47 = vpop.permute.xlu1 %1402  ;;  %v14503_v19 = vld [vmem:[#allocation84_spill] sm:$0xff]  ;;  %v9776_v32 = vpop.f32.mrb[29].mxu0 }
 0x1f4   :  { %v1922_v9 = vadd.f32 %v14500_v12, %v1602_v13  ;;  %v1924_v20 = vadd.f32 %v14500_v12, %v1604_v30  ;;  %v6532_v5 = vpop.eup %6531  ;;  %v1925_v7 = vadd.f32 %v14501_v4, %v1605_v14  ;;  %14502 = vst [vmem:[#allocation71_spill] sm:$0xff] %v9773_v47  ;;  %v9786_v30 = vpop.f32.mrb[28].mxu1  ;;  %v9791_v14 = vmul.f32 %v2297_v56, %v9599_v51 }
 0x1f5   :  { %v1927_v48 = vadd.f32 %v14501_v4, %v1607_v53  ;;  %v1606_v23 = vadd.f32 %v14503_v19, %v972_v3  ;;  %5290 = vperm.xlu1 %6296, %v9064_v34   ;;  %v9779_v40 = vpop.eup %6533  ;;  %v2301_v39 = vadd.f32 1.0, %v6532_v5  ;;  %v9782_v13 = vmul.f32 0.5, %v1921_v35  ;;  %v9788_v53 = vpop.f32.mrb[30].mxu0  ;;  %v14505_v5 = vld [vmem:[#allocation85_spill] sm:$0xff] }
 0x1f6   :  { %v9784_v27 = vmul.f32 0.5, %v1923_v18  ;;  %v6536_v41 = vpop.eup %6535  ;;  %v9794_v42 = vmul.f32 %v2299_v36, %v9639_v1  ;;  %v9796_v34 = vmul.f32 0.5, %v1922_v9  ;;  %v9798_v29 = vmul.f32 0.5, %v1924_v20  ;;  %v9800_v3 = vpop.f32.mrb[29].mxu1 }
 0x1f7   :  { %v9802_v12 = vpop.f32.mrb[31].mxu0  ;;  %6541 = vtanh.f32 %v9782_v13  ;;  %v9805_v35 = vmul.f32 0.5, %v1925_v7  ;;  %v9807_v18 = vmul.f32 0.5, %v1927_v48  ;;  %v1165_v51 = vadd.f32 %v9589_v44, %v14505_v5  ;;  %v9811_v56 = vpop.f32.mrb[30].mxu1  ;;  %v14506_v44 = vld [vmem:[#allocation87_spill] sm:$0xff] }
 0x1f8   :  { %14504 = vst [vmem:[#allocation72_spill] sm:$0xff] %v9798_v29  ;;  %6543 = vtanh.f32 %v9784_v27  ;;  %v1926_v1 = vadd.f32 %v14501_v4, %v1606_v23  ;;  %v2282_v36 = vadd.f32 1.0, %v9518_v54  ;;  %v2286_v9 = vadd.f32 1.0, %v9572_v16  ;;  %v9817_v20 = vpop.f32.mrb[31].mxu1  ;;  %v9831_v47 = vpop.permute.xlu0 %2749 }
 0x1f9   :  { %5300 = vperm.xlu1 %6296, %v9139_v28   ;;  %v9821_v7 = vmul.f32 %v2301_v39, %v9670_v25  ;;  %v9823_v48 = vadd.f32 1.0, %v6536_v41  ;;  %v1608_v19 = vadd.f32 %v14506_v44, %v1165_v51  ;;  %v2284_v5 = vadd.f32 1.0, %v9523_v26  ;;  %14507 = vst [vmem:[#allocation74_spill] sm:$0xff] %v9831_v47  ;;  %v9838_v26 = vpop.f32.mrb[32].mxu0  ;;  %v14509_v41 = vld [vmem:[#allocation59_spill] sm:$0xff]  ;;  %v9844_v51 = vpop.permute.xlu1 %1871  ;;  %v14521_v47 = vld [vmem:[#allocation92_spill] sm:$0xff] }
 0x1fa   :  { %6545 = vtanh.f32 %v9796_v34  ;;  %v2410_v23 = vmul.f32 %v2282_v36, %v9400_v58  ;;  %v2414_v54 = vmul.f32 %v2286_v9, %v9439_v2  ;;  %v2288_v16 = vadd.f32 1.0, %v9602_v17  ;;  %14508 = vst [vmem:[#allocation118_spill] sm:$0xff] %v9838_v26  ;;  %14510 = vst [vmem:[#allocation75_spill] sm:$0xff] %v9844_v51  ;;  %v9846_v36 = vpop.f32.mrb[33].mxu0  ;;  %v14514_v9 = vld [vmem:[#allocation89_spill] sm:$0xff]  ;;  %v14522_v51 = vld [vmem:[#allocation63_spill] sm:$0xff] }
 0x1fb   :  { %6547 = vtanh.f32 %v9805_v35  ;;  %v1928_v28 = vadd.f32 %v14501_v4, %v1608_v19  ;;  %v2412_v25 = vmul.f32 %v2284_v5, %v9402_v33  ;;  %v2533_v39 = vpack.c.bf16 %v9595_v31, %v9558_v24  ;;  %14511 = vst [vmem:[#allocation76_spill] sm:$0xff] %v9846_v36  ;;  %v14512_v4 = vld [vmem:[#allocation19_spill] sm:$0xff]  ;;  %v14513_v24 = vld [vmem:[#allocation88_spill] sm:$0xff]  ;;  %v9858_v19 = vpop.f32.mrb[34].mxu0  ;;  %v14532_v26 = vld [vmem:[#allocation94_spill] sm:$0xff] }
 0x1fc   :  { %6549 = vtanh.f32 %v9807_v18  ;;  %v2534_v58 = vpack.c.bf16 %v2414_v54, %v2410_v23  ;;  %v2416_v2 = vmul.f32 %v2288_v16, %v9464_v57  ;;  %v2535_v17 = vpack.c.bf16 %v9617_v15, %v14509_v41  ;;  %v9856_v57 = vpop.f32.mrb[32].mxu1  ;;  %14516 = vst [vmem:[#allocation78_spill] sm:$0xff] %v9858_v19  ;;  %v9860_v15 = vpop.eup %6537  ;;  %v14517_v23 = vld [vmem:[#allocation90_spill] sm:$0xff]  ;;  %v14519_v41 = vld [vmem:[#allocation91_spill] sm:$0xff] }
 0x1fd   :  { %5310 = vperm.xlu1 %6296, %v14512_v4   ;;  %6551 = vtanh.f32 %v9798_v29  ;;  %v9850_v33 = vmul.f32 0.5, %v1926_v1  ;;  %v976_v31 = vadd.f32 %v9621_v37, %v14513_v24  ;;  %v1169_v44 = vadd.f32 %v9645_v46, %v14514_v9  ;;  %14515 = vst [vmem:[#allocation77_spill] sm:$0xff] %v9856_v57  ;;  %v14518_v54 = vld [vmem:[#allocation114_spill] sm:$0xff]  ;;  %v14520_v1 = vld [vmem:[#allocation115_spill] sm:$0xff]  ;;  %v9868_v24 = vpop.f32.mrb[33].mxu1  ;;  %v9870_v46 = vpop.f32.mrb[35].mxu0 }
 0x1fe   :  { %2979 = vmatprep.subr.bf16.mxu0 %v2534_v58  ;;  %v2536_v5 = vpack.c.bf16 %v2416_v2, %v2412_v25  ;;  %v978_v16 = vadd.f32 %v14518_v54, %v14517_v23  ;;  %v1171_v4 = vadd.f32 %v14520_v1, %v14519_v41  ;;  %v980_v37 = vadd.f32 %v14522_v51, %v14521_v47  ;;  %v9872_v9 = vpop.eup %6539  ;;  %v14525_v58 = vld [vmem:[#allocation137_spill] sm:$0xff]  ;;  %v14526_v2 = vld [vmem:[#allocation138_spill] sm:$0xff]  ;;  %v9880_v41 = vpop.f32.mrb[34].mxu1  ;;  %v14529_v47 = vld [vmem:[#allocation139_spill] sm:$0xff] }
 0x1ff   :  { %14523 = vst [vmem:[#allocation79_spill] sm:$0xff] %v9868_v24  ;;  %14524 = vst [vmem:[#allocation80_spill] sm:$0xff] %v9870_v46  ;;  %v9874_v19 = vmul.f32 0.5, %v1928_v28  ;;  %2980 = vmatpush1.bf16.msra.mxu0 %v2533_v39  ;;  %v1609_v25 = vadd.f32 %v14525_v58, %v976_v31  ;;  %v1611_v36 = vadd.f32 %v14526_v2, %v1169_v44  ;;  %v14527_v23 = vld [vmem:[#allocation93_spill] sm:$0xff]  ;;  %v14530_v1 = vld [vmem:[#allocation140_spill] sm:$0xff]  ;;  %v9887_v39 = vpop.f32.mrb[35].mxu1  ;;  %6553 = vtanh.f32 %v9850_v33 }
 0x200   :  { %v1173_v54 = vadd.f32 %v9665_v52, %v14527_v23  ;;  %14528 = vst [vmem:[#allocation132_spill] sm:$0xff] %v9880_v41  ;;  %3172 = vmatprep.subr.bf16.mxu1 %v2536_v5  ;;  %v1610_v51 = vadd.f32 %v14529_v47, %v978_v16  ;;  %v1612_v24 = vadd.f32 %v14530_v1, %v1171_v4  ;;  %v14531_v46 = vld [vmem:[#allocation95_spill] sm:$0xff]  ;;  %v14533_v28 = vld [vmem:[#allocation116_spill] sm:$0xff]  ;;  %14534 = vst [vmem:[#allocation134_spill] sm:$0xff] %v9887_v39  ;;  %v9931_v39 = vpop.f32.mrb[36].mxu1 }
 0x201   :  { %v1613_v57 = vadd.f32 %v14531_v46, %v980_v37  ;;  %v982_v29 = vadd.f32 %v14533_v28, %v14532_v26  ;;  %v6542_v31 = vpop.eup %6541  ;;  %3173 = vmatpush1.bf16.msra.mxu1 %v2535_v17  ;;  %v14535_v44 = vld [vmem:[#allocation18_spill] sm:$0xff]  ;;  %v14536_v2 = vld [vmem:[#allocation96_spill] sm:$0xff]  ;;  %v9897_v4 = vld [vmem:[%s14008_s11 + $0xc8] sm:$0xff]  ;;  %6555 = vtanh.f32 %v9874_v19  ;;  %v9913_v28 = vpop.f32.mrb[36].mxu0  ;;  %14547 = vst [vmem:[#allocation25_spill] sm:$0xff] %v9931_v39  ;;  %v9953_v39 = vmul.f32 %v9823_v48, %v9681_v11 }
 0x202   :  { %v1929_v58 = vadd.f32 %v14535_v44, %v1609_v25  ;;  %v1931_v52 = vadd.f32 %v14535_v44, %v1611_v36  ;;  %v1615_v23 = vadd.f32 %v14536_v2, %v1173_v54  ;;  %v14537_v5 = vld [vmem:[#allocation98_spill] sm:$0xff]  ;;  %v6544_v37 = vpop.eup %6543  ;;  %v1930_v26 = vadd.f32 %v14535_v44, %v1610_v51  ;;  %v14539_v36 = vld [vmem:[#allocation223_spill] sm:$0xff]  ;;  %5790 = vperm.xlu0 %6297, %v9897_v4   ;;  %v9905_v54 = vpop.permute.xlu0 %2759 }
 0x203   :  { %v1175_v16 = vadd.f32 %v9674_v45, %v14537_v5  ;;  %v1932_v17 = vadd.f32 %v14535_v44, %v1612_v24  ;;  %v14538_v46 = vld [vmem:[#allocation26_spill] sm:$0xff]  ;;  %5320 = vperm.xlu1 %6296, %v14539_v36   ;;  %14540 = vst [vmem:[#allocation135_spill] sm:$0xff] %v9905_v54  ;;  %14541 = vst [vmem:[#allocation136_spill] sm:$0xff] %v9913_v28  ;;  %v2305_v24 = vadd.f32 1.0, %v6542_v31  ;;  %v9921_v5 = vpop.permute.xlu1 %1881  ;;  %v9923_v36 = vpop.f32.mrb[37].mxu0  ;;  %v14546_v54 = vld [vmem:[#allocation97_spill] sm:$0xff] }
 0x204   :  { %v1933_v25 = vadd.f32 %v14538_v46, %v1613_v57  ;;  %v9908_v45 = vmul.f32 0.5, %v1929_v58  ;;  %v9910_v47 = vmul.f32 0.5, %v1931_v52  ;;  %v1935_v1 = vadd.f32 %v14538_v46, %v1615_v23  ;;  %v9915_v51 = vpop.eup %6545  ;;  %14544 = vst [vmem:[#allocation81_spill] sm:$0xff] %v9921_v5  ;;  %14545 = vst [vmem:[#allocation15_spill] sm:$0xff] %v9923_v36  ;;  %v9933_v31 = vpop.f32.mrb[38].mxu0  ;;  %v14549_v5 = vld [vmem:[#allocation99_spill] sm:$0xff] }
 0x205   :  { %v2307_v57 = vadd.f32 1.0, %v6544_v37  ;;  %v9917_v44 = vmul.f32 0.5, %v1930_v26  ;;  %v9919_v2 = vmul.f32 0.5, %v1932_v17  ;;  %v6548_v58 = vpop.eup %6547  ;;  %v1614_v28 = vadd.f32 %v14546_v54, %v982_v29  ;;  %14548 = vst [vmem:[#allocation84_spill] sm:$0xff] %v9933_v31  ;;  %v9938_v37 = vld [vmem:[%s14008_s11 + $0xd8] sm:$0xff]  ;;  %v14550_v36 = vld [vmem:[#allocation117_spill] sm:$0xff] }
 0x206   :  { %6557 = vtanh.f32 %v9908_v45  ;;  %v9926_v52 = vmul.f32 0.5, %v1933_v25  ;;  %v9928_v23 = vmul.f32 0.5, %v1935_v1  ;;  %v6550_v26 = vpop.eup %6549  ;;  %v2309_v17 = vadd.f32 1.0, %v6548_v58  ;;  %v9943_v41 = vpop.f32.mrb[37].mxu1  ;;  %v14553_v54 = vld [vmem:[#allocation47_spill] sm:$0xff]  ;;  %5798 = vperm.xlu0 %6297, %v9938_v37  }
 0x207   :  { %14542 = vst [vmem:[#allocation82_spill] sm:$0xff] %v9917_v44  ;;  %14543 = vst [vmem:[#allocation83_spill] sm:$0xff] %v9919_v2  ;;  %6559 = vtanh.f32 %v9910_v47  ;;  %v1616_v25 = vadd.f32 %v14549_v5, %v1175_v16  ;;  %v2290_v1 = vadd.f32 1.0, %v14550_v36  ;;  %v9945_v29 = vpop.f32.mrb[39].mxu0  ;;  %5330 = vperm.xlu1 %6296, %v14553_v54   ;;  %v9949_v31 = vpop.eup %6551  ;;  %v1934_v16 = vadd.f32 %v14538_v46, %v1614_v28  ;;  %v14556_v28 = vld [vmem:[#allocation54_spill] sm:$0xff] }
 0x208   :  { %14551 = vst [vmem:[#allocation85_spill] sm:$0xff] %v9943_v41  ;;  %14552 = vst [vmem:[#allocation87_spill] sm:$0xff] %v9945_v29  ;;  %6561 = vtanh.f32 %v9917_v44  ;;  %v2294_v5 = vadd.f32 1.0, %v9694_v62  ;;  %v9958_v36 = vpop.f32.mrb[38].mxu1  ;;  %v9961_v58 = vmul.f32 %v2305_v24, %v9782_v13  ;;  %v9964_v54 = vmul.f32 %v2307_v57, %v9784_v27  ;;  %v14557_v62 = vld [vmem:[#allocation57_spill] sm:$0xff]  ;;  %v14558_v24 = vld [vmem:[#allocation51_spill] sm:$0xff] }
 0x209   :  { %14554 = vst [vmem:[#allocation59_spill] sm:$0xff] %v9958_v36  ;;  %6563 = vtanh.f32 %v9919_v2  ;;  %v1936_v29 = vadd.f32 %v14538_v46, %v1616_v25  ;;  %v9968_v11 = vpop.f32.mrb[39].mxu1  ;;  %v2311_v48 = vadd.f32 1.0, %v6550_v26  ;;  %v2418_v41 = vmul.f32 %v2290_v1, %v14556_v28  ;;  %v9986_v1 = vpop.f32.mrb[40].mxu0 }
 0x20a   :  { %14555 = vst [vmem:[#allocation19_spill] sm:$0xff] %v9968_v11  ;;  %6565 = vtanh.f32 %v9926_v52  ;;  %v2422_v44 = vmul.f32 %v2294_v5, %v14557_v62  ;;  %v9974_v36 = vmul.f32 %v2309_v17, %v9805_v35  ;;  %v2292_v13 = vadd.f32 1.0, %v9668_v59  ;;  %14559 = vst [vmem:[#allocation88_spill] sm:$0xff] %v9986_v1  ;;  %v9988_v35 = vpop.eup %6553  ;;  %v14560_v59 = vld [vmem:[#allocation10_spill] sm:$0xff]  ;;  %v9994_v62 = vpop.permute.xlu1 %1886  ;;  %v14573_v1 = vld [vmem:[#allocation73_spill] sm:$0xff] }
 0x20b   :  { %6567 = vtanh.f32 %v9928_v23  ;;  %v2296_v27 = vadd.f32 1.0, %v9735_v63  ;;  %5340 = vperm.xlu1 %6296, %v14558_v24   ;;  %v9980_v46 = vmul.f32 0.5, %v1934_v16  ;;  %v2537_v26 = vpack.c.bf16 %v9706_v38, %v9687_v22  ;;  %v14561_v63 = vld [vmem:[#allocation60_spill] sm:$0xff]  ;;  %14562 = vst [vmem:[#allocation89_spill] sm:$0xff] %v9994_v62  ;;  %v10000_v22 = vpop.eup %6555  ;;  %v14567_v24 = vld [vmem:[#allocation103_spill] sm:$0xff] }
 0x20c   :  { %v2538_v57 = vpack.c.bf16 %v2422_v44, %v2418_v41  ;;  %v2539_v25 = vpack.c.bf16 %v9709_v6, %v9697_v55  ;;  %v9990_v17 = vmul.f32 0.5, %v1936_v29  ;;  %v2420_v5 = vmul.f32 %v2292_v13, %v14560_v59  ;;  %v14563_v16 = vld [vmem:[#allocation100_spill] sm:$0xff]  ;;  %v9998_v44 = vpop.f32.mrb[41].mxu0  ;;  %v14565_v55 = vld [vmem:[#allocation101_spill] sm:$0xff]  ;;  %v14566_v6 = vld [vmem:[#allocation102_spill] sm:$0xff] }
 0x20d   :  { %v2424_v28 = vmul.f32 %v2296_v27, %v14561_v63  ;;  %v986_v41 = vadd.f32 %v9691_v60, %v14563_v16  ;;  %14564 = vst [vmem:[#allocation90_spill] sm:$0xff] %v9998_v44  ;;  %v1179_v38 = vadd.f32 %v9715_v50, %v14565_v55  ;;  %v988_v29 = vadd.f32 %v9703_v8, %v14566_v6  ;;  %v14568_v27 = vld [vmem:[#allocation104_spill] sm:$0xff]  ;;  %v10010_v63 = vpop.f32.mrb[40].mxu1  ;;  %v10012_v60 = vpop.f32.mrb[42].mxu0  ;;  %v14571_v62 = vld [vmem:[#allocation147_spill] sm:$0xff]  ;;  %v14572_v44 = vld [vmem:[#allocation105_spill] sm:$0xff] }
 0x20e   :  { %2981 = vmatprep.subr.bf16.mxu0 %v2538_v57  ;;  %v1181_v13 = vadd.f32 %v9730_v10, %v14567_v24  ;;  %v990_v59 = vadd.f32 %v9717_v49, %v14568_v27  ;;  %14569 = vst [vmem:[#allocation114_spill] sm:$0xff] %v10010_v63  ;;  %14570 = vst [vmem:[#allocation91_spill] sm:$0xff] %v10012_v60  ;;  %v1183_v50 = vadd.f32 %v14573_v1, %v14572_v44  ;;  %v14574_v55 = vld [vmem:[#allocation106_spill] sm:$0xff]  ;;  %v14575_v11 = vld [vmem:[#allocation68_spill] sm:$0xff]  ;;  %v10019_v6 = vpop.f32.mrb[41].mxu1  ;;  %v10021_v10 = vpop.f32.mrb[43].mxu0 }
 0x20f   :  { %v2540_v16 = vpack.c.bf16 %v2424_v28, %v2420_v5  ;;  %2982 = vmatpush1.bf16.msra.mxu0 %v2537_v26  ;;  %v1617_v57 = vadd.f32 %v14571_v62, %v986_v41  ;;  %v992_v8 = vadd.f32 %v14575_v11, %v14574_v55  ;;  %14576 = vst [vmem:[#allocation115_spill] sm:$0xff] %v10019_v6  ;;  %14577 = vst [vmem:[#allocation92_spill] sm:$0xff] %v10021_v10  ;;  %v14578_v49 = vld [vmem:[#allocation151_spill] sm:$0xff]  ;;  %v14579_v63 = vld [vmem:[#allocation152_spill] sm:$0xff]  ;;  %v10027_v62 = vpop.f32.mrb[42].mxu1 }
 0x210   :  { %v6558_v24 = vpop.eup %6557  ;;  %v1619_v27 = vadd.f32 %v14578_v49, %v1179_v38  ;;  %v1618_v2 = vadd.f32 %v14579_v63, %v988_v29  ;;  %v14580_v60 = vld [vmem:[#allocation153_spill] sm:$0xff]  ;;  %v14581_v26 = vld [vmem:[#allocation107_spill] sm:$0xff]  ;;  %v14582_v41 = vld [vmem:[#allocation58_spill] sm:$0xff]  ;;  %6569 = vtanh.f32 %v9980_v46  ;;  %v10033_v38 = vpop.f32.mrb[43].mxu1 }
 0x211   :  { %v1620_v5 = vadd.f32 %v14580_v60, %v1181_v13  ;;  %v1621_v28 = vadd.f32 %v14581_v26, %v990_v59  ;;  %5350 = vperm.xlu1 %6296, %v14582_v41   ;;  %v6560_v1 = vpop.eup %6559  ;;  %v2313_v44 = vadd.f32 1.0, %v6558_v24  ;;  %3174 = vmatprep.subr.bf16.mxu1 %v2540_v16  ;;  %v14583_v11 = vld [vmem:[#allocation20_spill] sm:$0xff]  ;;  %v14585_v60 = vld [vmem:[#allocation111_spill] sm:$0xff]  ;;  %6571 = vtanh.f32 %v9990_v17 }
 0x212   :  { %v1937_v55 = vadd.f32 %v14583_v11, %v1617_v57  ;;  %v14584_v10 = vld [vmem:[#allocation108_spill] sm:$0xff]  ;;  %v10035_v29 = vpop.eup %6561  ;;  %v2315_v13 = vadd.f32 1.0, %v6560_v1  ;;  %3175 = vmatpush1.bf16.msra.mxu1 %v2539_v25  ;;  %v1939_v59 = vadd.f32 %v14583_v11, %v1619_v27  ;;  %v1938_v63 = vadd.f32 %v14583_v11, %v1618_v2  ;;  %v14586_v57 = vld [vmem:[#allocation27_spill] sm:$0xff]  ;;  %v14587_v27 = vld [vmem:[#allocation22_spill] sm:$0xff] }
 0x213   :  { %v1623_v6 = vadd.f32 %v14584_v10, %v1183_v50  ;;  %v1622_v49 = vadd.f32 %v14585_v60, %v992_v8  ;;  %v10040_v24 = vpop.eup %6563  ;;  %v1940_v16 = vadd.f32 %v14583_v11, %v1620_v5  ;;  %v1941_v50 = vadd.f32 %v14586_v57, %v1621_v28  ;;  %v10055_v8 = vpop.f32.mrb[44].mxu0  ;;  %v14591_v60 = vld [vmem:[#allocation23_spill] sm:$0xff] }
 0x214   :  { %v10042_v26 = vmul.f32 0.5, %v1937_v55  ;;  %v6566_v41 = vpop.eup %6565  ;;  %v10048_v1 = vmul.f32 %v2311_v48, %v9807_v18  ;;  %v10051_v25 = vmul.f32 0.5, %v1939_v59  ;;  %v10053_v2 = vmul.f32 0.5, %v1938_v63  ;;  %v10064_v18 = vpop.permute.xlu1 %2664  ;;  %v14590_v63 = vld [vmem:[#allocation109_spill] sm:$0xff] }
 0x215   :  { %v1943_v10 = vadd.f32 %v14586_v57, %v1623_v6  ;;  %5360 = vperm.xlu1 %6296, %v14587_v27   ;;  %v6568_v55 = vpop.eup %6567  ;;  %v10059_v5 = vmul.f32 %v2313_v44, %v9908_v45  ;;  %v2317_v28 = vadd.f32 1.0, %v6566_v41  ;;  %v10062_v6 = vmul.f32 0.5, %v1941_v50  ;;  %14588 = vst [vmem:[#allocation63_spill] sm:$0xff] %v10064_v18  ;;  %v10066_v48 = vpop.f32.mrb[45].mxu0 }
 0x216   :  { %6573 = vtanh.f32 %v10042_v26  ;;  %14589 = vst [vmem:[#allocation137_spill] sm:$0xff] %v10066_v48  ;;  %v10069_v11 = vmul.f32 %v2315_v13, %v9910_v47  ;;  %v1185_v45 = vadd.f32 %v14591_v60, %v14590_v63  ;;  %v10076_v44 = vpop.f32.mrb[44].mxu1  ;;  %v10078_v41 = vpop.f32.mrb[46].mxu0  ;;  %v10080_v50 = vmul.f32 0.5, %v1940_v16  ;;  %v14595_v60 = vld [vmem:[#allocation112_spill] sm:$0xff] }
 0x217   :  { %6575 = vtanh.f32 %v10051_v25  ;;  %v10072_v59 = vmul.f32 0.5, %v1943_v10  ;;  %14592 = vst [vmem:[#allocation138_spill] sm:$0xff] %v10078_v41  ;;  %v1942_v27 = vadd.f32 %v14586_v57, %v1622_v49  ;;  %v2298_v18 = vadd.f32 1.0, %v9762_v21  ;;  %v10085_v13 = vpop.f32.mrb[45].mxu1  ;;  %v10087_v48 = vpop.f32.mrb[47].mxu0  ;;  %v14597_v49 = vld [vmem:[#allocation67_spill] sm:$0xff] }
 0x218   :  { %v2302_v47 = vadd.f32 1.0, %v9860_v15  ;;  %14593 = vst [vmem:[#allocation93_spill] sm:$0xff] %v10085_v13  ;;  %14594 = vst [vmem:[#allocation139_spill] sm:$0xff] %v10087_v48  ;;  %v10090_v10 = vmul.f32 %v2317_v28, %v9926_v52  ;;  %v10092_v63 = vadd.f32 1.0, %v6568_v55  ;;  %6577 = vtanh.f32 %v10053_v2  ;;  %v10096_v41 = vpop.f32.mrb[46].mxu1  ;;  %v14598_v21 = vld [vmem:[#allocation64_spill] sm:$0xff] }
 0x219   :  { %v1624_v16 = vadd.f32 %v14595_v60, %v1185_v45  ;;  %14596 = vst [vmem:[#allocation140_spill] sm:$0xff] %v10096_v41  ;;  %5370 = vperm.xlu1 %6296, %v14597_v49   ;;  %6579 = vtanh.f32 %v10062_v6  ;;  %v2426_v15 = vmul.f32 %v2298_v18, %v14598_v21  ;;  %v2300_v48 = vadd.f32 1.0, %v9779_v40  ;;  %v10103_v52 = vpop.f32.mrb[47].mxu1 }
 0x21a   :  { %v2430_v13 = vmul.f32 %v2302_v47, %v9711_v43  ;;  %14599 = vst [vmem:[#allocation95_spill] sm:$0xff] %v10103_v52  ;;  %6581 = vtanh.f32 %v10072_v59  ;;  %v2304_v28 = vadd.f32 1.0, %v9872_v9  ;;  %v2541_v45 = vpack.c.bf16 %v9821_v7, %v9791_v14  ;;  %v10110_v60 = vpop.eup %6569  ;;  %v14600_v47 = vld [vmem:[#allocation65_spill] sm:$0xff]  ;;  %v10123_v7 = vpop.f32.mrb[48].mxu0 }
 0x21b   :  { %v1944_v55 = vadd.f32 %v14586_v57, %v1624_v16  ;;  %6583 = vtanh.f32 %v10080_v50  ;;  %v10113_v18 = vmul.f32 0.5, %v1942_v27  ;;  %v2543_v40 = vpack.c.bf16 %v9953_v39, %v9794_v42  ;;  %v14601_v57 = vld [vmem:[#allocation119_spill] sm:$0xff]  ;;  %v14602_v16 = vld [vmem:[#allocation120_spill] sm:$0xff]  ;;  %14603 = vst [vmem:[#allocation94_spill] sm:$0xff] %v10123_v7  ;;  %v10126_v27 = vpop.permute.xlu1 %2674  ;;  %v14606_v39 = vld [vmem:[#allocation122_spill] sm:$0xff] }
 0x21c   :  { %v2542_v43 = vpack.c.bf16 %v2430_v13, %v2426_v15  ;;  %v2428_v49 = vmul.f32 %v2300_v48, %v14600_v47  ;;  %v2432_v21 = vmul.f32 %v2304_v28, %v9724_v0  ;;  %v996_v9 = vadd.f32 %v9768_v61, %v14601_v57  ;;  %14604 = vst [vmem:[#allocation116_spill] sm:$0xff] %v10126_v27  ;;  %v14605_v13 = vld [vmem:[#allocation121_spill] sm:$0xff]  ;;  %v14607_v0 = vld [vmem:[#allocation123_spill] sm:$0xff]  ;;  %v14608_v61 = vld [vmem:[#allocation124_spill] sm:$0xff]  ;;  %v10138_v47 = vpop.eup %6571  ;;  %v10144_v27 = vpop.f32.mrb[48].mxu1 }
 0x21d   :  { %v1189_v14 = vadd.f32 %v9786_v30, %v14602_v16  ;;  %5380 = vperm.xlu1 %6296, %v9897_v4   ;;  %v998_v42 = vadd.f32 %v9776_v32, %v14605_v13  ;;  %v1191_v48 = vadd.f32 %v9800_v3, %v14606_v39  ;;  %v1000_v15 = vadd.f32 %v9788_v53, %v14607_v0  ;;  %v10136_v30 = vpop.f32.mrb[49].mxu0  ;;  %v14610_v57 = vld [vmem:[#allocation154_spill] sm:$0xff]  ;;  %v14611_v32 = vld [vmem:[#allocation155_spill] sm:$0xff]  ;;  %v14614_v39 = vld [vmem:[#allocation156_spill] sm:$0xff]  ;;  %v10152_v41 = vpop.f32.mrb[49].mxu1 }
 0x21e   :  { %2983 = vmatprep.subr.bf16.mxu0 %v2542_v43  ;;  %v1193_v28 = vadd.f32 %v9811_v56, %v14608_v61  ;;  %14609 = vst [vmem:[#allocation18_spill] sm:$0xff] %v10136_v30  ;;  %v10140_v4 = vmul.f32 0.5, %v1944_v55  ;;  %v2544_v43 = vpack.c.bf16 %v2432_v21, %v2428_v49  ;;  %v1625_v16 = vadd.f32 %v14610_v57, %v996_v9  ;;  %v10146_v3 = vpop.f32.mrb[50].mxu0  ;;  %v14615_v56 = vld [vmem:[#allocation157_spill] sm:$0xff]  ;;  %v14616_v30 = vld [vmem:[#allocation128_spill] sm:$0xff] }
 0x21f   :  { %2984 = vmatpush1.bf16.msra.mxu0 %v2541_v45  ;;  %v1627_v13 = vadd.f32 %v14611_v32, %v1189_v14  ;;  %14612 = vst [vmem:[#allocation96_spill] sm:$0xff] %v10144_v27  ;;  %14613 = vst [vmem:[#allocation98_spill] sm:$0xff] %v10146_v3  ;;  %v1626_v0 = vadd.f32 %v14614_v39, %v998_v42  ;;  %v1628_v61 = vadd.f32 %v14615_v56, %v1191_v48  ;;  %v14617_v52 = vld [vmem:[#allocation129_spill] sm:$0xff]  ;;  %v10154_v45 = vpop.f32.mrb[51].mxu0  ;;  %v14620_v9 = vld [vmem:[#allocation24_spill] sm:$0xff]  ;;  %v10160_v39 = vpop.f32.mrb[50].mxu1 }
 0x220   :  { %v6574_v53 = vpop.eup %6573  ;;  %v1629_v7 = vadd.f32 %v14616_v30, %v1000_v15  ;;  %v1631_v55 = vadd.f32 %v14617_v52, %v1193_v28  ;;  %14618 = vst [vmem:[#allocation26_spill] sm:$0xff] %v10152_v41  ;;  %14619 = vst [vmem:[#allocation223_spill] sm:$0xff] %v10154_v45  ;;  %3176 = vmatprep.subr.bf16.mxu1 %v2544_v43  ;;  %v1945_v14 = vadd.f32 %v14620_v9, %v1625_v16  ;;  %v14621_v32 = vld [vmem:[#allocation126_spill] sm:$0xff]  ;;  %v14623_v15 = vld [vmem:[#allocation29_spill] sm:$0xff]  ;;  %v10166_v30 = vpop.f32.mrb[51].mxu1 }
 0x221   :  { %v6576_v49 = vpop.eup %6575  ;;  %v2321_v21 = vadd.f32 1.0, %v6574_v53  ;;  %v1947_v57 = vadd.f32 %v14620_v9, %v1627_v13  ;;  %v1002_v42 = vadd.f32 %v9802_v12, %v14621_v32  ;;  %14622 = vst [vmem:[#allocation97_spill] sm:$0xff] %v10160_v39  ;;  %5390 = vperm.xlu1 %6296, %v9938_v37   ;;  %6585 = vtanh.f32 %v10113_v18  ;;  %3177 = vmatpush1.bf16.msra.mxu1 %v2543_v40  ;;  %v14664_v45 = vld [vmem:[#allocation149_spill] sm:$0xff]  ;;  %v14665_v39 = vld [vmem:[#allocation80_spill] sm:$0xff] }
 0x222   :  { %v2323_v48 = vadd.f32 1.0, %v6576_v49  ;;  %v1946_v52 = vadd.f32 %v14620_v9, %v1626_v0  ;;  %v1949_v28 = vadd.f32 %v14623_v15, %v1629_v7  ;;  %14624 = vst [vmem:[#allocation99_spill] sm:$0xff] %v10166_v30  ;;  %v10168_v43 = vpop.eup %6577  ;;  %v10170_v16 = vmul.f32 0.5, %v1945_v14  ;;  %v14650_v30 = vld [vmem:[#allocation148_spill] sm:$0xff]  ;;  %v14703_v41 = vld [vmem:[#allocation185_spill] sm:$0xff] }
 0x223   :  { %v10172_v13 = vmul.f32 0.5, %v1947_v57  ;;  %v1948_v12 = vadd.f32 %v14620_v9, %v1628_v61  ;;  %v1951_v37 = vadd.f32 %v14623_v15, %v1631_v55  ;;  %v6580_v53 = vpop.eup %6579  ;;  %v10178_v40 = vmul.f32 %v10092_v63, %v9928_v23  ;;  %v14625_v61 = vld [vmem:[#allocation130_spill] sm:$0xff]  ;;  %v10190_v9 = vpop.f32.mrb[52].mxu0 }
 0x224   :  { %v10181_v0 = vmul.f32 %v2321_v21, %v10042_v26  ;;  %6587 = vtanh.f32 %v10140_v4  ;;  %v10184_v7 = vmul.f32 0.5, %v1946_v52  ;;  %v6582_v56 = vpop.eup %6581  ;;  %v2325_v49 = vadd.f32 1.0, %v6580_v53  ;;  %14626 = vst [vmem:[#allocation117_spill] sm:$0xff] %v10190_v9  ;;  %v10198_v63 = vpop.permute.xlu1 %2684  ;;  %v14629_v21 = vld [vmem:[#allocation127_spill] sm:$0xff] }
 0x225   :  { %6589 = vtanh.f32 %v10170_v16  ;;  %v10187_v14 = vmul.f32 0.5, %v1949_v28  ;;  %v1630_v55 = vadd.f32 %v14625_v61, %v1002_v42  ;;  %v14627_v57 = vmov 1   ;;  %v10193_v23 = vpop.eup %6583  ;;  %14628 = vst [vmem:[#allocation47_spill] sm:$0xff] %v10198_v63  ;;  %v10203_v28 = vpop.f32.mrb[53].mxu0  ;;  %v14631_v42 = vld [vmem:[#allocation11_spill] sm:$0xff] }
 0x226   :  { %6298 = vset.pattern.permute.xlu1 %v14627_v57  ;;  %6591 = vtanh.f32 %v10172_v13  ;;  %v10196_v26 = vmul.f32 0.5, %v1951_v37  ;;  %v1195_v32 = vadd.f32 %v9817_v20, %v14629_v21  ;;  %v2306_v52 = vadd.f32 1.0, %v9915_v51  ;;  %14630 = vst [vmem:[#allocation54_spill] sm:$0xff] %v10203_v28  ;;  %v10213_v9 = vpop.f32.mrb[52].mxu1  ;;  %v10215_v63 = vpop.f32.mrb[54].mxu0  ;;  %v14634_v21 = vld [vmem:[#allocation131_spill] sm:$0xff] }
 0x227   :  { %5694 = vperm.xlu1 %6298, %v14631_v42   ;;  %v10207_v53 = vmul.f32 %v2323_v48, %v10051_v25  ;;  %v10209_v61 = vmul.f32 0.5, %v1948_v12  ;;  %v1950_v57 = vadd.f32 %v14623_v15, %v1630_v55  ;;  %v2310_v37 = vadd.f32 1.0, %v9988_v35  ;;  %14632 = vst [vmem:[#allocation57_spill] sm:$0xff] %v10213_v9  ;;  %14633 = vst [vmem:[#allocation51_spill] sm:$0xff] %v10215_v63  ;;  %v10224_v48 = vpop.f32.mrb[53].mxu1  ;;  %v10226_v12 = vpop.f32.mrb[55].mxu0 }
 0x228   :  { %v10218_v20 = vmul.f32 %v2325_v49, %v10062_v6  ;;  %v10220_v51 = vadd.f32 1.0, %v6582_v56  ;;  %6593 = vtanh.f32 %v10184_v7  ;;  %v1632_v25 = vadd.f32 %v14634_v21, %v1195_v32  ;;  %14635 = vst [vmem:[#allocation10_spill] sm:$0xff] %v10224_v48  ;;  %14636 = vst [vmem:[#allocation60_spill] sm:$0xff] %v10226_v12  ;;  %v10232_v6 = vpop.f32.mrb[54].mxu1  ;;  %v14642_v12 = vld [vmem:[#allocation143_spill] sm:$0xff]  ;;  %v14644_v63 = vld [vmem:[#allocation144_spill] sm:$0xff] }
 0x229   :  { %6595 = vtanh.f32 %v10187_v14  ;;  %v2434_v35 = vmul.f32 %v2306_v52, %v9796_v34  ;;  %v2438_v55 = vmul.f32 %v2310_v37, %v9850_v33  ;;  %v2308_v42 = vadd.f32 1.0, %v9949_v31  ;;  %14637 = vst [vmem:[#allocation100_spill] sm:$0xff] %v10232_v6  ;;  %v10239_v21 = vpop.f32.mrb[55].mxu1  ;;  %v7249_v34 = vld [vmem:[%s14008_s11 + $0x10] sm:$0xff]  ;;  %v14643_v6 = vld [vmem:[#allocation77_spill] sm:$0xff] }
 0x22a   :  { %6597 = vtanh.f32 %v10196_v26  ;;  %v1952_v56 = vadd.f32 %v14623_v15, %v1632_v25  ;;  %v2312_v49 = vadd.f32 1.0, %v10000_v22  ;;  %v2545_v32 = vpack.c.bf16 %v9974_v36, %v9961_v58  ;;  %14638 = vst [vmem:[#allocation101_spill] sm:$0xff] %v10239_v21  ;;  %v14639_v22 = vld [vmem:[#allocation72_spill] sm:$0xff]  ;;  %v14640_v58 = vld [vmem:[#allocation141_spill] sm:$0xff]  ;;  %v14641_v25 = vld [vmem:[#allocation118_spill] sm:$0xff] }
 0x22b   :  { %5698 = vperm.xlu1 %6298, %v7249_v34   ;;  %6599 = vtanh.f32 %v10209_v61  ;;  %v10245_v33 = vmul.f32 0.5, %v1950_v57  ;;  %v2546_v31 = vpack.c.bf16 %v2438_v55, %v2434_v35  ;;  %v2547_v15 = vpack.c.bf16 %v10048_v1, %v9964_v54  ;;  %v10249_v52 = vpop.eup %6585  ;;  %v14645_v57 = vld [vmem:[#allocation76_spill] sm:$0xff]  ;;  %v14646_v35 = vld [vmem:[#allocation145_spill] sm:$0xff]  ;;  %v14647_v55 = vld [vmem:[#allocation79_spill] sm:$0xff] }
 0x22c   :  { %v2436_v37 = vmul.f32 %v2308_v42, %v14639_v22  ;;  %v2440_v36 = vmul.f32 %v2312_v49, %v9874_v19  ;;  %v1006_v21 = vadd.f32 %v14641_v25, %v14640_v58  ;;  %v1199_v34 = vadd.f32 %v14643_v6, %v14642_v12  ;;  %v14648_v54 = vld [vmem:[#allocation146_spill] sm:$0xff]  ;;  %v14651_v42 = vld [vmem:[#allocation132_spill] sm:$0xff]  ;;  %v10265_v19 = vpop.f32.mrb[56].mxu0  ;;  %v10271_v6 = vpop.permute.xlu1 %2694 }
 0x22d   :  { %2985 = vmatprep.subr.bf16.mxu0 %v2546_v31  ;;  %v1008_v48 = vadd.f32 %v14645_v57, %v14644_v63  ;;  %v1201_v28 = vadd.f32 %v14647_v55, %v14646_v35  ;;  %v14649_v1 = vld [vmem:[#allocation78_spill] sm:$0xff]  ;;  %v1203_v22 = vadd.f32 %v14651_v42, %v14650_v30  ;;  %14652 = vst [vmem:[#allocation102_spill] sm:$0xff] %v10265_v19  ;;  %v10269_v58 = vmul.f32 0.5, %v1952_v56  ;;  %v14654_v63 = vld [vmem:[#allocation159_spill] sm:$0xff]  ;;  %v14655_v25 = vld [vmem:[#allocation164_spill] sm:$0xff]  ;;  %v10275_v35 = vpop.f32.mrb[57].mxu0 }
 0x22e   :  { %v1010_v9 = vadd.f32 %v14649_v1, %v14648_v54  ;;  %v10267_v49 = vpop.eup %6587  ;;  %v2548_v12 = vpack.c.bf16 %v2440_v36, %v2436_v37  ;;  %2986 = vmatpush1.bf16.msra.mxu0 %v2545_v32  ;;  %14653 = vst [vmem:[#allocation103_spill] sm:$0xff] %v10271_v6  ;;  %v1633_v31 = vadd.f32 %v14654_v63, %v1006_v21  ;;  %14656 = vst [vmem:[#allocation104_spill] sm:$0xff] %v10275_v35  ;;  %v7250_v30 = vld [vmem:[%s14008_s11 + $0x20] sm:$0xff]  ;;  %v14657_v54 = vld [vmem:[#allocation165_spill] sm:$0xff]  ;;  %v10284_v19 = vpop.f32.mrb[56].mxu1 }
 0x22f   :  { %v1635_v57 = vadd.f32 %v14655_v25, %v1199_v34  ;;  %5706 = vperm.xlu1 %6298, %v7250_v30   ;;  %v6590_v55 = vpop.eup %6589  ;;  %v1634_v1 = vadd.f32 %v14657_v54, %v1008_v48  ;;  %v14658_v56 = vld [vmem:[#allocation166_spill] sm:$0xff]  ;;  %v14660_v36 = vld [vmem:[#allocation160_spill] sm:$0xff]  ;;  %14661 = vst [vmem:[#allocation147_spill] sm:$0xff] %v10284_v19  ;;  %v10286_v21 = vpop.f32.mrb[58].mxu0  ;;  %v1012_v48 = vadd.f32 %v14665_v39, %v14664_v45  ;;  %6601 = vtanh.f32 %v10245_v33  ;;  %v14694_v19 = vld [vmem:[#allocation177_spill] sm:$0xff] }
 0x230   :  { %v1636_v42 = vadd.f32 %v14658_v56, %v1201_v28  ;;  %v14659_v37 = vld [vmem:[#allocation158_spill] sm:$0xff]  ;;  %v1639_v6 = vadd.f32 %v14660_v36, %v1203_v22  ;;  %14662 = vst [vmem:[#allocation105_spill] sm:$0xff] %v10286_v21  ;;  %v6592_v34 = vpop.eup %6591  ;;  %v2329_v63 = vadd.f32 1.0, %v6590_v55  ;;  %3178 = vmatprep.subr.bf16.mxu1 %v2548_v12  ;;  %v14663_v25 = vld [vmem:[#allocation28_spill] sm:$0xff]  ;;  %v10292_v54 = vpop.f32.mrb[57].mxu1  ;;  %v14668_v56 = vld [vmem:[#allocation31_spill] sm:$0xff]  ;;  %6603 = vtanh.f32 %v10269_v58 }
 0x231   :  { %v1637_v32 = vadd.f32 %v14659_v37, %v1010_v9  ;;  %v1953_v35 = vadd.f32 %v14663_v25, %v1633_v31  ;;  %v1955_v30 = vadd.f32 %v14663_v25, %v1635_v57  ;;  %14666 = vst [vmem:[#allocation73_spill] sm:$0xff] %v10292_v54  ;;  %v10294_v28 = vpop.f32.mrb[59].mxu0  ;;  %v2331_v9 = vadd.f32 1.0, %v6592_v34  ;;  %3179 = vmatpush1.bf16.msra.mxu1 %v2547_v15  ;;  %v10299_v12 = vpop.f32.mrb[58].mxu1  ;;  %v7251_v15 = vld [vmem:[%s14008_s11 + $0x30] sm:$0xff]  ;;  %v14693_v21 = vld [vmem:[#allocation84_spill] sm:$0xff] }
 0x232   :  { %14667 = vst [vmem:[#allocation106_spill] sm:$0xff] %v10294_v28  ;;  %v1954_v22 = vadd.f32 %v14663_v25, %v1634_v1  ;;  %14669 = vst [vmem:[#allocation68_spill] sm:$0xff] %v10299_v12  ;;  %v10301_v31 = vpop.eup %6593  ;;  %v1956_v45 = vadd.f32 %v14663_v25, %v1636_v42  ;;  %v1959_v39 = vadd.f32 %v14668_v56, %v1639_v6  ;;  %v10309_v36 = vpop.f32.mrb[59].mxu1 }
 0x233   :  { %v1957_v55 = vadd.f32 %v14668_v56, %v1637_v32  ;;  %v10303_v57 = vmul.f32 0.5, %v1953_v35  ;;  %v10305_v37 = vmul.f32 0.5, %v1955_v30  ;;  %14670 = vst [vmem:[#allocation151_spill] sm:$0xff] %v10309_v36  ;;  %5714 = vperm.xlu1 %6298, %v7251_v15   ;;  %v6596_v1 = vpop.eup %6595  ;;  %v10316_v32 = vmul.f32 %v10220_v51, %v10072_v59  ;;  %v14671_v30 = vld [vmem:[#allocation161_spill] sm:$0xff]  ;;  %v14673_v51 = vld [vmem:[#allocation134_spill] sm:$0xff]  ;;  %v10336_v28 = vpop.f32.mrb[60].mxu0 }
 0x234   :  { %v10319_v35 = vmul.f32 %v2329_v63, %v10170_v16  ;;  %v10322_v42 = vmul.f32 0.5, %v1954_v22  ;;  %v6598_v6 = vpop.eup %6597  ;;  %v2333_v34 = vadd.f32 1.0, %v6596_v1  ;;  %v1638_v15 = vadd.f32 %v14671_v30, %v1012_v48  ;;  %v14672_v16 = vld [vmem:[#allocation150_spill] sm:$0xff]  ;;  %14674 = vst [vmem:[#allocation152_spill] sm:$0xff] %v10336_v28  ;;  %v10343_v12 = vpop.permute.xlu1 %2704 }
 0x235   :  { %6605 = vtanh.f32 %v10303_v57  ;;  %v10325_v25 = vmul.f32 0.5, %v1957_v55  ;;  %v10328_v36 = vpop.eup %6599  ;;  %v10331_v59 = vmul.f32 0.5, %v1959_v39  ;;  %v1205_v63 = vadd.f32 %v14673_v51, %v14672_v16  ;;  %14675 = vst [vmem:[#allocation153_spill] sm:$0xff] %v10343_v12  ;;  %v10347_v39 = vpop.f32.mrb[61].mxu0  ;;  %v7252_v16 = vld [vmem:[%s14008_s11 + $0x40] sm:$0xff] }
 0x236   :  { %6607 = vtanh.f32 %v10305_v37  ;;  %v2314_v22 = vadd.f32 1.0, %v10035_v29  ;;  %v10339_v1 = vmul.f32 %v2331_v9, %v10172_v13  ;;  %v10341_v55 = vmul.f32 0.5, %v1956_v45  ;;  %14676 = vst [vmem:[#allocation107_spill] sm:$0xff] %v10347_v39  ;;  %v14677_v9 = vld [vmem:[#allocation162_spill] sm:$0xff]  ;;  %v10359_v51 = vpop.f32.mrb[60].mxu1 }
 0x237   :  { %v1958_v48 = vadd.f32 %v14668_v56, %v1638_v15  ;;  %v2318_v30 = vadd.f32 1.0, %v10110_v60  ;;  %5722 = vperm.xlu1 %6298, %v7252_v16   ;;  %v10353_v29 = vmul.f32 %v2333_v34, %v10187_v14  ;;  %v10355_v13 = vadd.f32 1.0, %v6598_v6  ;;  %14678 = vst [vmem:[#allocation58_spill] sm:$0xff] %v10359_v51  ;;  %v10361_v15 = vpop.f32.mrb[62].mxu0  ;;  %v14680_v60 = vld [vmem:[#allocation82_spill] sm:$0xff]  ;;  %v10367_v14 = vpop.f32.mrb[61].mxu1 }
 0x238   :  { %6609 = vtanh.f32 %v10322_v42  ;;  %v1640_v45 = vadd.f32 %v14677_v9, %v1205_v63  ;;  %14679 = vst [vmem:[#allocation20_spill] sm:$0xff] %v10361_v15  ;;  %v2442_v12 = vmul.f32 %v2314_v22, %v14680_v60  ;;  %v2316_v16 = vadd.f32 1.0, %v10040_v24  ;;  %14681 = vst [vmem:[#allocation108_spill] sm:$0xff] %v10367_v14  ;;  %v10379_v24 = vpop.f32.mrb[62].mxu1  ;;  %v14690_v14 = vld [vmem:[#allocation172_spill] sm:$0xff]  ;;  %v14691_v51 = vld [vmem:[#allocation85_spill] sm:$0xff] }
 0x239   :  { %6611 = vtanh.f32 %v10325_v25  ;;  %v2446_v39 = vmul.f32 %v2318_v30, %v9980_v46  ;;  %v2320_v34 = vadd.f32 1.0, %v10138_v47  ;;  %v2549_v63 = vpack.c.bf16 %v10090_v10, %v10059_v5  ;;  %14682 = vst [vmem:[#allocation111_spill] sm:$0xff] %v10379_v24  ;;  %v7253_v30 = vld [vmem:[%s14008_s11 + $0x50] sm:$0xff]  ;;  %v14683_v47 = vld [vmem:[#allocation83_spill] sm:$0xff]  ;;  %v10414_v27 = vpop.f32.mrb[63].mxu1 }
 0x23a   :  { %6613 = vtanh.f32 %v10331_v59  ;;  %v1960_v6 = vadd.f32 %v14668_v56, %v1640_v45  ;;  %v10375_v9 = vmul.f32 0.5, %v1958_v48  ;;  %v2551_v46 = vpack.c.bf16 %v10178_v40, %v10069_v11  ;;  %v10384_v56 = vpop.eup %6601  ;;  %v14684_v10 = vld [vmem:[#allocation167_spill] sm:$0xff]  ;;  %v14685_v48 = vld [vmem:[#allocation136_spill] sm:$0xff]  ;;  %14704 = vst [vmem:[#allocation109_spill] sm:$0xff] %v10414_v27 }
 0x23b   :  { %6615 = vtanh.f32 %v10341_v55  ;;  %v2550_v22 = vpack.c.bf16 %v2446_v39, %v2442_v12  ;;  %5730 = vperm.xlu1 %6298, %v7253_v30   ;;  %v2444_v45 = vmul.f32 %v2316_v16, %v14683_v47  ;;  %v2448_v5 = vmul.f32 %v2320_v34, %v9990_v17  ;;  %v14686_v12 = vld [vmem:[#allocation170_spill] sm:$0xff]  ;;  %v14687_v39 = vld [vmem:[#allocation25_spill] sm:$0xff]  ;;  %v14688_v11 = vld [vmem:[#allocation171_spill] sm:$0xff]  ;;  %v10400_v17 = vpop.eup %6603 }
 0x23c   :  { %v1016_v60 = vadd.f32 %v14685_v48, %v14684_v10  ;;  %v1209_v15 = vadd.f32 %v14687_v39, %v14686_v12  ;;  %v14689_v40 = vld [vmem:[#allocation15_spill] sm:$0xff]  ;;  %v1211_v28 = vadd.f32 %v14691_v51, %v14690_v14  ;;  %v14692_v30 = vld [vmem:[#allocation176_spill] sm:$0xff]  ;;  %v10402_v34 = vmul.f32 0.5, %v1960_v6  ;;  %v10404_v48 = vpop.permute.xlu1 %2714  ;;  %v14698_v39 = vld [vmem:[#allocation173_spill] sm:$0xff] }
 0x23d   :  { %2987 = vmatprep.subr.bf16.mxu0 %v2550_v22  ;;  %v1018_v24 = vadd.f32 %v14689_v40, %v14688_v11  ;;  %v1020_v54 = vadd.f32 %v14693_v21, %v14692_v30  ;;  %v14695_v16 = vld [vmem:[#allocation59_spill] sm:$0xff]  ;;  %v2552_v10 = vpack.c.bf16 %v2448_v5, %v2444_v45  ;;  %14696 = vst [vmem:[#allocation27_spill] sm:$0xff] %v10404_v48  ;;  %v14697_v22 = vld [vmem:[#allocation169_spill] sm:$0xff]  ;;  %v10408_v40 = vpop.f32.mrb[63].mxu0  ;;  %v14700_v14 = vld [vmem:[#allocation174_spill] sm:$0xff]  ;;  %6617 = vtanh.f32 %v10375_v9 }
 0x23e   :  { %v1213_v47 = vadd.f32 %v14695_v16, %v14694_v19  ;;  %2988 = vmatpush1.bf16.msra.mxu0 %v2549_v63  ;;  %v1641_v12 = vadd.f32 %v14697_v22, %v1016_v60  ;;  %v1643_v11 = vadd.f32 %v14698_v39, %v1209_v15  ;;  %14699 = vst [vmem:[#allocation22_spill] sm:$0xff] %v10408_v40  ;;  %v14701_v30 = vld [vmem:[#allocation175_spill] sm:$0xff]  ;;  %v14702_v19 = vld [vmem:[#allocation181_spill] sm:$0xff]  ;;  %v7254_v63 = vld [vmem:[%s14008_s11 + $0x60] sm:$0xff]  ;;  %6619 = vtanh.f32 %v10402_v34 }
 0x23f   :  { %v6606_v51 = vpop.eup %6605  ;;  %v1642_v21 = vadd.f32 %v14700_v14, %v1018_v24  ;;  %v1644_v3 = vadd.f32 %v14701_v30, %v1211_v28  ;;  %v1645_v16 = vadd.f32 %v14702_v19, %v1020_v54  ;;  %5738 = vperm.xlu1 %6298, %v7254_v63   ;;  %3180 = vmatprep.subr.bf16.mxu1 %v2552_v10  ;;  %v14705_v5 = vld [vmem:[#allocation35_spill] sm:$0xff]  ;;  %v14706_v22 = vld [vmem:[#allocation178_spill] sm:$0xff] }
 0x240   :  { %v1647_v6 = vadd.f32 %v14703_v41, %v1213_v47  ;;  %v6608_v45 = vpop.eup %6607  ;;  %v2337_v15 = vadd.f32 1.0, %v6606_v51  ;;  %v1961_v60 = vadd.f32 %v14705_v5, %v1641_v12  ;;  %v1963_v24 = vadd.f32 %v14705_v5, %v1643_v11  ;;  %v14707_v28 = vld [vmem:[#allocation87_spill] sm:$0xff]  ;;  %3181 = vmatpush1.bf16.msra.mxu1 %v2551_v46  ;;  %v14708_v47 = vld [vmem:[#allocation33_spill] sm:$0xff]  ;;  %v14730_v48 = vld [vmem:[#allocation34_spill] sm:$0xff] }
 0x241   :  { %v1022_v39 = vadd.f32 %v14707_v28, %v14706_v22  ;;  %v2339_v54 = vadd.f32 1.0, %v6608_v45  ;;  %v1962_v41 = vadd.f32 %v14705_v5, %v1642_v21  ;;  %v1965_v14 = vadd.f32 %v14708_v47, %v1645_v16  ;;  %v7255_v16 = vld [vmem:[%s14008_s11 + $0x70] sm:$0xff] }
 0x242   :  { %v10426_v30 = vpop.eup %6609  ;;  %v10428_v19 = vmul.f32 0.5, %v1961_v60  ;;  %v10430_v10 = vmul.f32 0.5, %v1963_v24  ;;  %v1964_v12 = vadd.f32 %v14705_v5, %v1644_v3  ;;  %v1967_v11 = vadd.f32 %v14708_v47, %v1647_v6  ;;  %v14711_v60 = vld [vmem:[#allocation179_spill] sm:$0xff] }
 0x243   :  { %v6612_v51 = vpop.eup %6611  ;;  %v10436_v63 = vmul.f32 %v10355_v13, %v10196_v26  ;;  %v10439_v46 = vmul.f32 %v2337_v15, %v10303_v57  ;;  %v10442_v21 = vmul.f32 0.5, %v1962_v41  ;;  %5746 = vperm.xlu1 %6298, %v7255_v16   ;;  %v10448_v6 = vmul.f32 0.5, %v1965_v14  ;;  %v10450_v26 = vpop.permute.xlu1 %2724  ;;  %v14710_v13 = vld [vmem:[#allocation186_spill] sm:$0xff]  ;;  %v14712_v24 = vld [vmem:[#allocation19_spill] sm:$0xff] }
 0x244   :  { %v6614_v3 = vpop.eup %6613  ;;  %v2341_v45 = vadd.f32 1.0, %v6612_v51  ;;  %6621 = vtanh.f32 %v10428_v19  ;;  %14709 = vst [vmem:[#allocation23_spill] sm:$0xff] %v10450_v26  ;;  %v1646_v57 = vadd.f32 %v14710_v13, %v1022_v39  ;;  %v10456_v5 = vmul.f32 0.5, %v1967_v11  ;;  %v14713_v11 = vld [vmem:[#allocation187_spill] sm:$0xff] }
 0x245   :  { %v10453_v15 = vpop.eup %6615  ;;  %6623 = vtanh.f32 %v10430_v10  ;;  %v1215_v22 = vadd.f32 %v14712_v24, %v14711_v60  ;;  %v2322_v28 = vadd.f32 1.0, %v10168_v43  ;;  %v10462_v41 = vmul.f32 %v2339_v54, %v10305_v37  ;;  %v6319_v43 = vld [vmem:[%s14004_s7 + $0x4] ss:$8 sps:$4 sm:$0xff]  }
 0x246   :  { %v10464_v14 = vmul.f32 0.5, %v1964_v12  ;;  %v1966_v51 = vadd.f32 %v14708_v47, %v1646_v57  ;;  %v2326_v39 = vadd.f32 1.0, %v10249_v52  ;;  %v10469_v16 = vmul.f32 %v2341_v45, %v10325_v25  ;;  %v7256_v37 = vld [vmem:[%s14008_s11 + $0x80] sm:$0xff]  ;;  %3009 = vmatprep.mubr.bf16.mxu0 %v6319_v43  ;;  %3202 = vmatprep.mubr.bf16.mxu1 %v6319_v43 }
 0x247   :  { %v10471_v13 = vadd.f32 1.0, %v6614_v3  ;;  %6625 = vtanh.f32 %v10442_v21  ;;  %v1648_v60 = vadd.f32 %v14713_v11, %v1215_v22  ;;  %5754 = vperm.xlu1 %6298, %v7256_v37   ;;  %v2450_v52 = vmul.f32 %v2322_v28, %v10053_v2  ;;  %v10497_v24 = vpop.eup %6617  ;;  %v14715_v22 = vld [vmem:[#allocation30_spill] sm:$0xff]  ;;  %v14717_v28 = vld [vmem:[#allocation193_spill] sm:$0xff]  ;;  %v14721_v43 = vld [vmem:[#allocation196_spill] sm:$0xff] }
 0x248   :  { %6627 = vtanh.f32 %v10448_v6  ;;  %v2454_v25 = vmul.f32 %v2326_v39, %v10113_v18  ;;  %v2324_v54 = vadd.f32 1.0, %v10193_v23  ;;  %v2328_v3 = vadd.f32 1.0, %v10267_v49  ;;  %v10495_v23 = vpop.permute.xlu1 %2734  ;;  %v14718_v39 = vld [vmem:[#allocation114_spill] sm:$0xff]  ;;  %v14722_v37 = vld [vmem:[#allocation115_spill] sm:$0xff] }
 0x249   :  { %6629 = vtanh.f32 %v10456_v5  ;;  %v1968_v12 = vadd.f32 %v14708_v47, %v1648_v60  ;;  %v2553_v45 = vpack.c.bf16 %v10218_v20, %v10181_v0  ;;  %v10491_v57 = vmul.f32 0.5, %v1966_v51  ;;  %14714 = vst [vmem:[#allocation112_spill] sm:$0xff] %v10495_v23  ;;  %v14716_v0 = vld [vmem:[#allocation88_spill] sm:$0xff]  ;;  %v7257_v51 = vld [vmem:[%s14008_s11 + $0x90] sm:$0xff] }
 0x24a   :  { %6631 = vtanh.f32 %v10464_v14  ;;  %v2554_v2 = vpack.c.bf16 %v2454_v25, %v2450_v52  ;;  %v2555_v18 = vpack.c.bf16 %v10316_v32, %v10207_v53  ;;  %v2452_v47 = vmul.f32 %v2324_v54, %v10080_v50  ;;  %v14719_v53 = vld [vmem:[#allocation194_spill] sm:$0xff]  ;;  %v14723_v52 = vld [vmem:[#allocation32_spill] sm:$0xff]  ;;  %v14725_v54 = vld [vmem:[#allocation197_spill] sm:$0xff] }
 0x24b   :  { %v2456_v49 = vmul.f32 %v2328_v3, %v10140_v4  ;;  %v1026_v20 = vadd.f32 %v14716_v0, %v14715_v22  ;;  %v1219_v11 = vadd.f32 %v14718_v39, %v14717_v28  ;;  %5762 = vperm.xlu1 %6298, %v7257_v51   ;;  %v14720_v32 = vld [vmem:[#allocation90_spill] sm:$0xff]  ;;  %v1221_v50 = vadd.f32 %v14722_v37, %v14721_v43  ;;  %v14724_v4 = vld [vmem:[#allocation91_spill] sm:$0xff]  ;;  %v10516_v22 = vpop.eup %6619  ;;  %v14726_v39 = vld [vmem:[#allocation180_spill] sm:$0xff] }
 0x24c   :  { %2989 = vmatprep.subr.bf16.mxu0 %v2554_v2  ;;  %v1028_v60 = vadd.f32 %v14720_v32, %v14719_v53  ;;  %v1030_v25 = vadd.f32 %v14724_v4, %v14723_v52  ;;  %v1223_v3 = vadd.f32 %v10027_v62, %v14725_v54  ;;  %v10518_v0 = vmul.f32 0.5, %v1968_v12  ;;  %v14727_v51 = vld [vmem:[#allocation182_spill] sm:$0xff]  ;;  %v14728_v32 = vld [vmem:[#allocation183_spill] sm:$0xff]  ;;  %v14729_v43 = vld [vmem:[#allocation184_spill] sm:$0xff] }
 0x24d   :  { %v2556_v28 = vpack.c.bf16 %v2456_v49, %v2452_v47  ;;  %2990 = vmatpush1.bf16.msra.mxu0 %v2553_v45  ;;  %v1649_v2 = vadd.f32 %v14726_v39, %v1026_v20  ;;  %v1651_v23 = vadd.f32 %v14727_v51, %v1219_v11  ;;  %v1652_v37 = vadd.f32 %v14729_v43, %v1221_v50  ;;  %v14731_v4 = vld [vmem:[#allocation199_spill] sm:$0xff]  ;;  %v14733_v47 = vld [vmem:[#allocation198_spill] sm:$0xff]  ;;  %v14734_v49 = vld [vmem:[#allocation92_spill] sm:$0xff] }
 0x24e   :  { %v6622_v53 = vpop.eup %6621  ;;  %v1650_v26 = vadd.f32 %v14728_v32, %v1028_v60  ;;  %v1653_v52 = vadd.f32 %v14730_v48, %v1030_v25  ;;  %v1655_v27 = vadd.f32 %v14731_v4, %v1223_v3  ;;  %v14732_v12 = vld [vmem:[#allocation55_spill] sm:$0xff]  ;;  %v1032_v20 = vadd.f32 %v14734_v49, %v14733_v47  ;;  %v7258_v11 = vld [vmem:[%s14008_s11 + $0xa0] sm:$0xff]  ;;  %v10536_v3 = vpop.permute.xlu1 %2744  ;;  %v14738_v4 = vld [vmem:[#allocation201_spill] sm:$0xff] }
 0x24f   :  { %v6624_v62 = vpop.eup %6623  ;;  %v2345_v54 = vadd.f32 1.0, %v6622_v53  ;;  %3182 = vmatprep.subr.bf16.mxu1 %v2556_v28  ;;  %v1969_v40 = vadd.f32 %v14732_v12, %v1649_v2  ;;  %v1971_v45 = vadd.f32 %v14732_v12, %v1651_v23  ;;  %5770 = vperm.xlu1 %6298, %v7258_v11   ;;  %6633 = vtanh.f32 %v10491_v57  ;;  %v14735_v50 = vld [vmem:[#allocation36_spill] sm:$0xff]  ;;  %14736 = vst [vmem:[#allocation67_spill] sm:$0xff] %v10536_v3 }
 0x250   :  { %v2347_v60 = vadd.f32 1.0, %v6624_v62  ;;  %3183 = vmatpush1.bf16.msra.mxu1 %v2555_v18  ;;  %v1970_v48 = vadd.f32 %v14732_v12, %v1650_v26  ;;  %v1973_v25 = vadd.f32 %v14735_v50, %v1653_v52  ;;  %v1972_v2 = vadd.f32 %v14732_v12, %v1652_v37  ;;  %v14737_v37 = vld [vmem:[#allocation200_spill] sm:$0xff] }
 0x251   :  { %v10538_v28 = vpop.eup %6625  ;;  %v10540_v23 = vmul.f32 0.5, %v1969_v40  ;;  %v10542_v39 = vmul.f32 0.5, %v1971_v45  ;;  %v1975_v51 = vadd.f32 %v14735_v50, %v1655_v27  ;;  %v10548_v18 = vmul.f32 %v10471_v13, %v10331_v59  ;;  %v7259_v59 = vld [vmem:[%s14008_s11 + $0xb0] sm:$0xff] }
 0x252   :  { %v6628_v53 = vpop.eup %6627  ;;  %v10551_v26 = vmul.f32 %v2345_v54, %v10428_v19  ;;  %6635 = vtanh.f32 %v10518_v0  ;;  %v10554_v32 = vmul.f32 0.5, %v1970_v48  ;;  %v10557_v52 = vmul.f32 0.5, %v1973_v25  ;;  %v14739_v48 = vld [vmem:[#allocation202_spill] sm:$0xff] }
 0x253   :  { %v6630_v40 = vpop.eup %6629  ;;  %v2349_v43 = vadd.f32 1.0, %v6628_v53  ;;  %6637 = vtanh.f32 %v10540_v23  ;;  %v1654_v27 = vadd.f32 %v14737_v37, %v1032_v20  ;;  %5778 = vperm.xlu1 %6298, %v7259_v59   ;;  %v10566_v19 = vmul.f32 0.5, %v1975_v51  ;;  %v14742_v37 = vld [vmem:[#allocation203_spill] sm:$0xff] }
 0x254   :  { %v10563_v13 = vpop.eup %6631  ;;  %6639 = vtanh.f32 %v10542_v39  ;;  %v1225_v62 = vadd.f32 %v10033_v38, %v14738_v4  ;;  %v2330_v54 = vadd.f32 1.0, %v10301_v31  ;;  %v10572_v12 = vmul.f32 %v2347_v60, %v10430_v10  ;;  %v10583_v38 = vpop.permute.xlu1 %2754  ;;  %v14745_v4 = vld [vmem:[#allocation205_spill] sm:$0xff] }
 0x255   :  { %v10574_v45 = vmul.f32 0.5, %v1972_v2  ;;  %v1974_v47 = vadd.f32 %v14735_v50, %v1654_v27  ;;  %v2334_v49 = vadd.f32 1.0, %v10384_v56  ;;  %v10579_v20 = vmul.f32 %v2349_v43, %v10448_v6  ;;  %14740 = vst [vmem:[#allocation64_spill] sm:$0xff] %v10583_v38  ;;  %v7260_v56 = vld [vmem:[%s14008_s11 + $0xc0] sm:$0xff]  ;;  %v14744_v27 = vld [vmem:[#allocation137_spill] sm:$0xff] }
 0x256   :  { %v2351_v11 = vadd.f32 1.0, %v6630_v40  ;;  %6641 = vtanh.f32 %v10554_v32  ;;  %v1656_v25 = vadd.f32 %v14739_v48, %v1225_v62  ;;  %v2458_v31 = vmul.f32 %v2330_v54, %v10184_v7  ;;  %v14746_v62 = vld [vmem:[#allocation93_spill] sm:$0xff] }
 0x257   :  { %6643 = vtanh.f32 %v10557_v52  ;;  %v2462_v10 = vmul.f32 %v2334_v49, %v10245_v33  ;;  %v2332_v60 = vadd.f32 1.0, %v10328_v36  ;;  %5786 = vperm.xlu1 %6298, %v7260_v56   ;;  %v2336_v2 = vadd.f32 1.0, %v10400_v17  ;;  %v14749_v49 = vld [vmem:[#allocation207_spill] sm:$0xff] }
 0x258   :  { %6645 = vtanh.f32 %v10566_v19  ;;  %v1976_v6 = vadd.f32 %v14735_v50, %v1656_v25  ;;  %v2557_v51 = vpack.c.bf16 %v10353_v29, %v10319_v35  ;;  %v10598_v7 = vmul.f32 0.5, %v1974_v47  ;;  %v14741_v50 = vld [vmem:[#allocation37_spill] sm:$0xff]  ;;  %v14743_v29 = vld [vmem:[#allocation204_spill] sm:$0xff]  ;;  %v10624_v56 = vpop.permute.xlu1 %2764 }
 0x259   :  { %6647 = vtanh.f32 %v10574_v45  ;;  %v2558_v33 = vpack.c.bf16 %v2462_v10, %v2458_v31  ;;  %v2559_v36 = vpack.c.bf16 %v10436_v63, %v10339_v1  ;;  %v10602_v53 = vpop.eup %6633  ;;  %v2460_v40 = vmul.f32 %v2332_v60, %v10209_v61  ;;  %v14747_v1 = vld [vmem:[#allocation206_spill] sm:$0xff]  ;;  %v14750_v61 = vld [vmem:[#allocation140_spill] sm:$0xff]  ;;  %v14752_v10 = vld [vmem:[#allocation189_spill] sm:$0xff]  ;;  %14753 = vst [vmem:[#allocation65_spill] sm:$0xff] %v10624_v56 }
 0x25a   :  { %v2464_v43 = vmul.f32 %v2336_v2, %v10269_v58  ;;  %v1036_v17 = vadd.f32 %v10055_v8, %v14741_v50  ;;  %v1229_v35 = vadd.f32 %v10076_v44, %v14742_v37  ;;  %v1038_v59 = vadd.f32 %v14744_v27, %v14743_v29  ;;  %v14748_v63 = vld [vmem:[#allocation138_spill] sm:$0xff]  ;;  %v14751_v44 = vld [vmem:[#allocation12_spill] sm:$0xff]  ;;  %v14755_v29 = vld [vmem:[#allocation191_spill] sm:$0xff] }
 0x25b   :  { %2991 = vmatprep.subr.bf16.mxu0 %v2558_v33  ;;  %v1231_v54 = vadd.f32 %v14746_v62, %v14745_v4  ;;  %v1040_v47 = vadd.f32 %v14748_v63, %v14747_v1  ;;  %v1233_v48 = vadd.f32 %v14750_v61, %v14749_v49  ;;  %v10620_v25 = vmul.f32 0.5, %v1976_v6  ;;  %v7261_v2 = vld [vmem:[%s14008_s11 + $0xd0] sm:$0xff]  ;;  %v14759_v63 = vld [vmem:[#allocation208_spill] sm:$0xff]  ;;  %v14760_v49 = vld [vmem:[#allocation139_spill] sm:$0xff] }
 0x25c   :  { %v10618_v58 = vpop.eup %6635  ;;  %v2560_v8 = vpack.c.bf16 %v2464_v43, %v2460_v40  ;;  %2992 = vmatpush1.bf16.msra.mxu0 %v2557_v51  ;;  %v1657_v31 = vadd.f32 %v14751_v44, %v1036_v17  ;;  %v1659_v60 = vadd.f32 %v14752_v10, %v1229_v35  ;;  %5794 = vperm.xlu1 %6298, %v7261_v2   ;;  %v14754_v50 = vld [vmem:[#allocation190_spill] sm:$0xff]  ;;  %v14757_v40 = vld [vmem:[#allocation211_spill] sm:$0xff]  ;;  %v14758_v35 = vld [vmem:[#allocation125_spill] sm:$0xff]  ;;  %6649 = vtanh.f32 %v10598_v7 }
 0x25d   :  { %v6638_v33 = vpop.eup %6637  ;;  %v1658_v37 = vadd.f32 %v14754_v50, %v1038_v59  ;;  %v1660_v27 = vadd.f32 %v14755_v29, %v1231_v54  ;;  %v14756_v6 = vld [vmem:[#allocation210_spill] sm:$0xff]  ;;  %v1663_v51 = vadd.f32 %v14757_v40, %v1233_v48  ;;  %v1042_v61 = vadd.f32 %v14760_v49, %v14759_v63  ;;  %v14767_v49 = vld [vmem:[#allocation215_spill] sm:$0xff] }
 0x25e   :  { %v1661_v4 = vadd.f32 %v14756_v6, %v1040_v47  ;;  %v6640_v43 = vpop.eup %6639  ;;  %v2353_v17 = vadd.f32 1.0, %v6638_v33  ;;  %3184 = vmatprep.subr.bf16.mxu1 %v2560_v8  ;;  %v1977_v62 = vadd.f32 %v14758_v35, %v1657_v31  ;;  %v1979_v1 = vadd.f32 %v14758_v35, %v1659_v60  ;;  %v14761_v54 = vld [vmem:[#allocation38_spill] sm:$0xff] }
 0x25f   :  { %v2355_v44 = vadd.f32 1.0, %v6640_v43  ;;  %3185 = vmatpush1.bf16.msra.mxu1 %v2559_v36  ;;  %v1978_v59 = vadd.f32 %v14758_v35, %v1658_v37  ;;  %v1980_v31 = vadd.f32 %v14758_v35, %v1660_v27  ;;  %v1983_v60 = vadd.f32 %v14761_v54, %v1663_v51 }
 0x260   :  { %v1981_v47 = vadd.f32 %v14761_v54, %v1661_v4  ;;  %v10640_v10 = vpop.eup %6641  ;;  %v10642_v48 = vmul.f32 0.5, %v1977_v62  ;;  %v10644_v8 = vmul.f32 0.5, %v1979_v1  ;;  %v14762_v2 = vmov 0   ;;  %v14763_v4 = vld [vmem:[#allocation212_spill] sm:$0xff] }
 0x261   :  { %6299 = vset.pattern.permute.xlu1 %v14762_v2  ;;  %v6644_v33 = vpop.eup %6643  ;;  %v10650_v50 = vmul.f32 %v2351_v11, %v10456_v5  ;;  %v10653_v36 = vmul.f32 %v2353_v17, %v10540_v23  ;;  %6651 = vtanh.f32 %v10620_v25  ;;  %v10656_v37 = vmul.f32 0.5, %v1978_v59  ;;  %v14764_v23 = vld [vmem:[#allocation213_spill] sm:$0xff]  ;;  %v14765_v11 = vld [vmem:[#allocation95_spill] sm:$0xff] }
 0x262   :  { %v6646_v29 = vpop.eup %6645  ;;  %v10659_v6 = vmul.f32 %v2355_v44, %v10542_v39  ;;  %6653 = vtanh.f32 %v10642_v48  ;;  %v10662_v27 = vmul.f32 0.5, %v1981_v47  ;;  %v1662_v40 = vadd.f32 %v14763_v4, %v1042_v61  ;;  %v14768_v4 = vld [vmem:[#allocation9_spill] sm:$0xff] }
 0x263   :  { %v10665_v51 = vpop.eup %6647  ;;  %6655 = vtanh.f32 %v10644_v8  ;;  %v10668_v5 = vmul.f32 0.5, %v1983_v60  ;;  %v1235_v43 = vadd.f32 %v14765_v11, %v14764_v23  ;;  %v2338_v17 = vadd.f32 1.0, %v10426_v30  ;;  %v14770_v23 = vld [vmem:[#allocation52_spill] sm:$0xff]  ;;  %v14773_v11 = vld [vmem:[#allocation6_spill] sm:$0xff]  ;;  %v14783_v2 = vld [vmem:[#allocation41_spill] sm:$0xff] }
 0x264   :  { %v2357_v35 = vadd.f32 1.0, %v6644_v33  ;;  %v10673_v39 = vmul.f32 0.5, %v1980_v31  ;;  %v1982_v62 = vadd.f32 %v14761_v54, %v1662_v40  ;;  %v2342_v1 = vadd.f32 1.0, %v10497_v24 }
 0x265   :  { %v2359_v63 = vadd.f32 1.0, %v6646_v29  ;;  %6657 = vtanh.f32 %v10656_v37  ;;  %v1664_v61 = vadd.f32 %v14767_v49, %v1235_v43  ;;  %v2466_v44 = vmul.f32 %v2338_v17, %v10322_v42  ;;  %v14775_v17 = vld [vmem:[#allocation86_spill] sm:$0xff]  ;;  %v14777_v49 = vld [vmem:[#allocation13_spill] sm:$0xff] }
 0x266   :  { %14766 = vst [vmem:[#allocation119_spill] sm:$0xff] %v10673_v39  ;;  %6659 = vtanh.f32 %v10662_v27  ;;  %v10681_v59 = vmul.f32 0.5, %v1982_v62  ;;  %v2470_v30 = vmul.f32 %v2342_v1, %v10375_v9  ;;  %v2340_v47 = vadd.f32 1.0, %v10453_v15  ;;  %v10696_v29 = vpop.eup %6649 }
 0x267   :  { %6661 = vtanh.f32 %v10668_v5  ;;  %v1984_v31 = vadd.f32 %v14761_v54, %v1664_v61  ;;  %v2344_v24 = vadd.f32 1.0, %v10516_v22  ;;  %v2561_v60 = vpack.c.bf16 %v10469_v16, %v10439_v46  ;;  %v14769_v22 = vld [vmem:[#allocation94_spill] sm:$0xff]  ;;  %v14771_v46 = vld [vmem:[#allocation96_spill] sm:$0xff] }
 0x268   :  { %v10691_v33 = vmul.f32 %v2357_v35, %v10557_v52  ;;  %6663 = vtanh.f32 %v10673_v39  ;;  %v2562_v42 = vpack.c.bf16 %v2470_v30, %v2466_v44  ;;  %v2563_v9 = vpack.c.bf16 %v10548_v18, %v10462_v41  ;;  %v14772_v52 = vld [vmem:[#allocation69_spill] sm:$0xff]  ;;  %v14774_v41 = vld [vmem:[#allocation42_spill] sm:$0xff]  ;;  %v14776_v35 = vld [vmem:[#allocation39_spill] sm:$0xff] }
 0x269   :  { %v2468_v15 = vmul.f32 %v2340_v47, %v10341_v55  ;;  %v2472_v54 = vmul.f32 %v2344_v24, %v10402_v34  ;;  %v1046_v40 = vadd.f32 %v14769_v22, %v14768_v4  ;;  %v1239_v16 = vadd.f32 %v14771_v46, %v14770_v23  ;;  %v14778_v44 = vld [vmem:[#allocation195_spill] sm:$0xff]  ;;  %v14779_v24 = vld [vmem:[#allocation18_spill] sm:$0xff] }
 0x26a   :  { %6665 = vtanh.f32 %v10681_v59  ;;  %2993 = vmatprep.subr.bf16.mxu0 %v2562_v42  ;;  %v731_v43 = vmul.f32 %v14773_v11, %v14772_v52  ;;  %v733_v18 = vmul.f32 %v14774_v41, %v14772_v52  ;;  %v734_v55 = vmul.f32 %v14776_v35, %v14775_v17  ;;  %v14780_v4 = vld [vmem:[#allocation26_spill] sm:$0xff] }
 0x26b   :  { %v10711_v62 = vpop.eup %6651  ;;  %v10713_v34 = vmul.f32 0.5, %v1984_v31  ;;  %v2564_v1 = vpack.c.bf16 %v2472_v54, %v2468_v15  ;;  %2994 = vmatpush1.bf16.msra.mxu0 %v2561_v60  ;;  %v1665_v61 = vadd.f32 %v14777_v49, %v1046_v40  ;;  %v1667_v30 = vadd.f32 %v14778_v44, %v1239_v16  ;;  %v14781_v23 = vld [vmem:[#allocation98_spill] sm:$0xff]  ;;  %v14785_v54 = vld [vmem:[#allocation40_spill] sm:$0xff] }
 0x26c   :  { %v6654_v47 = vpop.eup %6653  ;;  %v1048_v42 = vadd.f32 %v14779_v24, %v731_v43  ;;  %v1241_v22 = vadd.f32 %v14780_v4, %v733_v18  ;;  %v1050_v46 = vadd.f32 %v14781_v23, %v734_v55  ;;  %v14782_v52 = vld [vmem:[#allocation110_spill] sm:$0xff]  ;;  %v736_v40 = vmul.f32 %v14785_v54, %v14775_v17  ;;  %v14786_v43 = vld [vmem:[#allocation216_spill] sm:$0xff]  ;;  %v14787_v18 = vld [vmem:[#allocation217_spill] sm:$0xff] }
 0x26d   :  { %v1541_v56 = vmul.f32 %v14783_v2, %v14782_v52  ;;  %v6656_v38 = vpop.eup %6655  ;;  %v2361_v3 = vadd.f32 1.0, %v6654_v47  ;;  %3186 = vmatprep.subr.bf16.mxu1 %v2564_v1  ;;  %v14784_v31 = vld [vmem:[#allocation214_spill] sm:$0xff]  ;;  %v14788_v1 = vld [vmem:[#allocation97_spill] sm:$0xff]  ;;  %6667 = vtanh.f32 %v10713_v34 }
 0x26e   :  { %v1985_v15 = vadd.f32 %v14784_v31, %v1665_v61  ;;  %v1987_v60 = vadd.f32 %v14784_v31, %v1667_v30  ;;  %v2363_v16 = vadd.f32 1.0, %v6656_v38  ;;  %3187 = vmatpush1.bf16.msra.mxu1 %v2563_v9  ;;  %v1666_v49 = vadd.f32 %v14786_v43, %v1048_v42  ;;  %v14789_v30 = vld [vmem:[#allocation43_spill] sm:$0xff]  ;;  %v14790_v42 = vld [vmem:[#allocation45_spill] sm:$0xff] }
 0x26f   :  { %v1668_v44 = vadd.f32 %v14787_v18, %v1241_v22  ;;  %v1669_v55 = vadd.f32 %v1541_v56, %v1050_v46  ;;  %v10728_v24 = vpop.eup %6657  ;;  %v1243_v61 = vadd.f32 %v14788_v1, %v736_v40  ;;  %v1543_v23 = vmul.f32 %v14789_v30, %v14782_v52 }
 0x270   :  { %v10730_v4 = vmul.f32 0.5, %v1985_v15  ;;  %v10732_v47 = vmul.f32 0.5, %v1987_v60  ;;  %v6660_v39 = vpop.eup %6659  ;;  %v1986_v38 = vadd.f32 %v14784_v31, %v1666_v49  ;;  %v10742_v46 = vmul.f32 %v2359_v63, %v10566_v19 }
 0x271   :  { %v1988_v9 = vadd.f32 %v14784_v31, %v1668_v44  ;;  %v1989_v56 = vadd.f32 %v14790_v42, %v1669_v55  ;;  %v6662_v22 = vpop.eup %6661  ;;  %v1671_v15 = vadd.f32 %v1543_v23, %v1243_v61  ;;  %v735_v60 = vmul.f32 %v14773_v11, %v14775_v17  ;;  %v14792_v44 = vld [vmem:[#allocation223_spill] sm:$0xff] }
 0x272   :  { %6669 = vtanh.f32 %v10730_v4  ;;  %v10747_v40 = vpop.eup %6663  ;;  %v10750_v43 = vmul.f32 %v2361_v3, %v10642_v48  ;;  %v10753_v49 = vmul.f32 %v2363_v16, %v10644_v8  ;;  %v10756_v31 = vmul.f32 0.5, %v1986_v38  ;;  %v14793_v3 = vld [vmem:[#allocation7_spill] sm:$0xff]  ;;  %v14794_v16 = vld [vmem:[#allocation44_spill] sm:$0xff] }
 0x273   :  { %6671 = vtanh.f32 %v10732_v47  ;;  %v2365_v19 = vadd.f32 1.0, %v6660_v39  ;;  %v10758_v63 = vmul.f32 0.5, %v1989_v56  ;;  %v1991_v18 = vadd.f32 %v14790_v42, %v1671_v15 }
 0x274   :  { %14791 = vst [vmem:[#allocation120_spill] sm:$0xff] %v10756_v31  ;;  %v1052_v55 = vadd.f32 %v14792_v44, %v735_v60  ;;  %v10762_v1 = vpop.eup %6665  ;;  %v2367_v61 = vadd.f32 1.0, %v6662_v22  ;;  %v10764_v23 = vmul.f32 0.5, %v1988_v9  ;;  %v1542_v48 = vmul.f32 %v14793_v3, %v14782_v52  ;;  %v14795_v9 = vld [vmem:[#allocation99_spill] sm:$0xff] }
 0x275   :  { %v737_v8 = vmul.f32 %v14774_v41, %v14775_v17  ;;  %6673 = vtanh.f32 %v10756_v31  ;;  %v10771_v39 = vmul.f32 0.5, %v1991_v18  ;;  %v1544_v38 = vmul.f32 %v14794_v16, %v14782_v52 }
 0x276   :  { %v2346_v56 = vadd.f32 1.0, %v10538_v28  ;;  %6675 = vtanh.f32 %v10758_v63  ;;  %v1670_v22 = vadd.f32 %v1542_v48, %v1052_v55  ;;  %v2350_v60 = vadd.f32 1.0, %v10602_v53 }
 0x277   :  { %v1245_v15 = vadd.f32 %v14795_v9, %v737_v8  ;;  %6677 = vtanh.f32 %v10771_v39  ;;  %v2348_v44 = vadd.f32 1.0, %v10563_v13  ;;  %v2352_v18 = vadd.f32 1.0, %v10618_v58 }
 0x278   :  { %v2474_v17 = vmul.f32 %v2346_v56, %v10442_v21  ;;  %v1990_v31 = vadd.f32 %v14790_v42, %v1670_v22  ;;  %v2478_v28 = vmul.f32 %v2350_v60, %v10491_v57  ;;  %v2565_v55 = vpack.c.bf16 %v10579_v20, %v10551_v26  ;;  %v14796_v21 = vld [vmem:[#allocation142_spill] sm:$0xff]  ;;  %v10793_v56 = vpop.eup %6667  ;;  %v14797_v22 = vld [vmem:[#allocation117_spill] sm:$0xff] }
 0x279   :  { %v1672_v52 = vadd.f32 %v1544_v38, %v1245_v15  ;;  %v2476_v48 = vmul.f32 %v2348_v44, %v10464_v14  ;;  %v2480_v53 = vmul.f32 %v2352_v18, %v10518_v0  ;;  %v2567_v8 = vpack.c.bf16 %v10650_v50, %v10572_v12  ;;  %v14798_v15 = vld [vmem:[#allocation57_spill] sm:$0xff]  ;;  %v14799_v44 = vld [vmem:[#allocation14_spill] sm:$0xff] }
 0x27a   :  { %v738_v13 = vmul.f32 %v14776_v35, %v14796_v21  ;;  %v10795_v58 = vmul.f32 0.5, %v1990_v31  ;;  %v2566_v57 = vpack.c.bf16 %v2478_v28, %v2474_v17  ;;  %v740_v26 = vmul.f32 %v14785_v54, %v14796_v21 }
 0x27b   :  { %v1992_v38 = vadd.f32 %v14790_v42, %v1672_v52  ;;  %v2568_v14 = vpack.c.bf16 %v2480_v53, %v2476_v48  ;;  %v739_v12 = vmul.f32 %v14773_v11, %v14796_v21  ;;  %v741_v50 = vmul.f32 %v14774_v41, %v14796_v21  ;;  %v14800_v52 = vld [vmem:[#allocation54_spill] sm:$0xff] }
 0x27c   :  { %v6670_v20 = vpop.eup %6669  ;;  %v1056_v0 = vadd.f32 %v14797_v22, %v738_v13  ;;  %v10806_v31 = vmul.f32 %v2365_v19, %v10662_v27  ;;  %v10809_v42 = vmul.f32 %v2367_v61, %v10668_v5  ;;  %6679 = vtanh.f32 %v10764_v23  ;;  %2995 = vmatprep.subr.bf16.mxu0 %v2566_v57  ;;  %v14801_v48 = vld [vmem:[#allocation10_spill] sm:$0xff]  ;;  %v14803_v61 = vld [vmem:[#allocation168_spill] sm:$0xff] }
 0x27d   :  { %v6672_v9 = vpop.eup %6671  ;;  %v1249_v60 = vadd.f32 %v14798_v15, %v740_v26  ;;  %v2369_v17 = vadd.f32 1.0, %v6670_v20  ;;  %3188 = vmatprep.subr.bf16.mxu1 %v2568_v14  ;;  %2996 = vmatpush1.bf16.msra.mxu0 %v2565_v55  ;;  %v1058_v28 = vadd.f32 %v14800_v52, %v739_v12  ;;  %v1251_v53 = vadd.f32 %v14801_v48, %v741_v50  ;;  %v14802_v5 = vld [vmem:[#allocation218_spill] sm:$0xff]  ;;  %v14804_v55 = vld [vmem:[#allocation56_spill] sm:$0xff]  ;;  %v14805_v20 = vld [vmem:[#allocation219_spill] sm:$0xff] }
 0x27e   :  { %v1673_v18 = vadd.f32 %v14799_v44, %v1056_v0  ;;  %6681 = vtanh.f32 %v10795_v58  ;;  %v10817_v27 = vmul.f32 0.5, %v1992_v38  ;;  %3189 = vmatpush1.bf16.msra.mxu1 %v2567_v8  ;;  %v742_v21 = vmul.f32 %v14776_v35, %v14803_v61  ;;  %v14806_v22 = vld [vmem:[#allocation220_spill] sm:$0xff]  ;;  %v14807_v38 = vld [vmem:[#allocation51_spill] sm:$0xff] }
 0x27f   :  { %v1675_v19 = vadd.f32 %v14802_v5, %v1249_v60  ;;  %v10822_v13 = vpop.eup %6673  ;;  %v2371_v57 = vadd.f32 1.0, %v6672_v9  ;;  %v1674_v14 = vadd.f32 %v14805_v20, %v1058_v28  ;;  %v1676_v0 = vadd.f32 %v14806_v22, %v1251_v53  ;;  %v14808_v8 = vld [vmem:[#allocation192_spill] sm:$0xff] }
 0x280   :  { %v1993_v26 = vadd.f32 %v14804_v55, %v1673_v18  ;;  %v6676_v12 = vpop.eup %6675  ;;  %v1060_v15 = vadd.f32 %v14807_v38, %v742_v21  ;;  %v1549_v60 = vmul.f32 %v14783_v2, %v14808_v8  ;;  %v744_v44 = vmul.f32 %v14785_v54, %v14803_v61 }
 0x281   :  { %v1995_v50 = vadd.f32 %v14804_v55, %v1675_v19  ;;  %v6678_v52 = vpop.eup %6677  ;;  %v2373_v48 = vadd.f32 1.0, %v6676_v12  ;;  %v1994_v18 = vadd.f32 %v14804_v55, %v1674_v14  ;;  %v1996_v28 = vadd.f32 %v14804_v55, %v1676_v0  ;;  %v14809_v19 = vld [vmem:[#allocation100_spill] sm:$0xff]  ;;  %v14810_v55 = vld [vmem:[#allocation113_spill] sm:$0xff] }
 0x282   :  { %v10833_v9 = vmul.f32 0.5, %v1993_v26  ;;  %6683 = vtanh.f32 %v10817_v27  ;;  %v1677_v5 = vadd.f32 %v1549_v60, %v1060_v15  ;;  %v1253_v21 = vadd.f32 %v14809_v19, %v744_v44  ;;  %v14811_v44 = vld [vmem:[#allocation60_spill] sm:$0xff] }
 0x283   :  { %v10838_v53 = vmul.f32 0.5, %v1995_v50  ;;  %v10842_v20 = vmul.f32 %v2369_v17, %v10730_v4  ;;  %v10845_v22 = vmul.f32 %v2371_v57, %v10732_v47  ;;  %v2375_v12 = vadd.f32 1.0, %v6678_v52 }
 0x284   :  { %6685 = vtanh.f32 %v10833_v9  ;;  %v10849_v26 = vmul.f32 %v2373_v48, %v10758_v63  ;;  %v1997_v14 = vadd.f32 %v14810_v55, %v1677_v5  ;;  %v1551_v0 = vmul.f32 %v14789_v30, %v14808_v8  ;;  %v14812_v48 = vld [vmem:[#allocation101_spill] sm:$0xff] }
 0x285   :  { %6687 = vtanh.f32 %v10838_v53  ;;  %v10855_v50 = vmul.f32 0.5, %v1994_v18  ;;  %v10857_v4 = vmul.f32 0.5, %v1996_v28  ;;  %v743_v47 = vmul.f32 %v14773_v11, %v14803_v61 }
 0x286   :  { %v745_v17 = vmul.f32 %v14774_v41, %v14803_v61  ;;  %v10863_v57 = vpop.eup %6679  ;;  %v10865_v63 = vmul.f32 0.5, %v1997_v14  ;;  %v1679_v38 = vadd.f32 %v1551_v0, %v1253_v21  ;;  %v1550_v15 = vmul.f32 %v14793_v3, %v14808_v8 }
 0x287   :  { %v1552_v60 = vmul.f32 %v14794_v16, %v14808_v8  ;;  %v1062_v52 = vadd.f32 %v14811_v44, %v743_v47  ;;  %v2354_v28 = vadd.f32 1.0, %v10640_v10  ;;  %v2358_v5 = vadd.f32 1.0, %v10696_v29 }
 0x288   :  { %v1255_v18 = vadd.f32 %v14812_v48, %v745_v17  ;;  %v10875_v61 = vpop.eup %6681  ;;  %6689 = vtanh.f32 %v10865_v63  ;;  %v1999_v19 = vadd.f32 %v14810_v55, %v1679_v38  ;;  %v2356_v21 = vadd.f32 1.0, %v10665_v51 }
 0x289   :  { %v2360_v14 = vadd.f32 1.0, %v10711_v62  ;;  %v1678_v0 = vadd.f32 %v1550_v15, %v1062_v52  ;;  %v2482_v47 = vmul.f32 %v2354_v28, %v10554_v32  ;;  %v2486_v17 = vmul.f32 %v2358_v5, %v10598_v7  ;;  %v14815_v5 = vld [vmem:[#allocation147_spill] sm:$0xff] }
 0x28a   :  { %v1680_v8 = vadd.f32 %v1552_v60, %v1255_v18  ;;  %v10883_v44 = vmul.f32 0.5, %v1999_v19  ;;  %v2484_v10 = vmul.f32 %v2356_v21, %v10574_v45  ;;  %v2569_v48 = vpack.c.bf16 %v10691_v33, %v10653_v36  ;;  %v14813_v60 = vld [vmem:[#allocation222_spill] sm:$0xff]  ;;  %v14816_v19 = vld [vmem:[#allocation104_spill] sm:$0xff] }
 0x28b   :  { %v2488_v29 = vmul.f32 %v2360_v14, %v10620_v25  ;;  %v1998_v38 = vadd.f32 %v14810_v55, %v1678_v0  ;;  %v2570_v62 = vpack.c.bf16 %v2486_v17, %v2482_v47  ;;  %v2571_v15 = vpack.c.bf16 %v10742_v46, %v10659_v6  ;;  %v14814_v18 = vld [vmem:[#allocation102_spill] sm:$0xff]  ;;  %v14817_v14 = vld [vmem:[#allocation16_spill] sm:$0xff]  ;;  %v14818_v17 = vld [vmem:[#allocation221_spill] sm:$0xff] }
 0x28c   :  { %v2000_v51 = vadd.f32 %v14810_v55, %v1680_v8  ;;  %v10893_v32 = vpop.eup %6683  ;;  %6691 = vtanh.f32 %v10883_v44  ;;  %v746_v45 = vmul.f32 %v14776_v35, %v14813_v60  ;;  %v748_v25 = vmul.f32 %v14785_v54, %v14813_v60 }
 0x28d   :  { %v2572_v7 = vpack.c.bf16 %v2488_v29, %v2484_v10  ;;  %v10901_v33 = vmul.f32 %v2375_v12, %v10771_v39  ;;  %6693 = vtanh.f32 %v10855_v50  ;;  %v10904_v55 = vmul.f32 0.5, %v1998_v38  ;;  %2997 = vmatprep.subr.bf16.mxu0 %v2570_v62  ;;  %v14819_v29 = vld [vmem:[#allocation48_spill] sm:$0xff] }
 0x28e   :  { %v6686_v36 = vpop.eup %6685  ;;  %v747_v6 = vmul.f32 %v14773_v11, %v14813_v60  ;;  %6695 = vtanh.f32 %v10857_v4  ;;  %v10909_v52 = vmul.f32 0.5, %v2000_v51  ;;  %2998 = vmatpush1.bf16.msra.mxu0 %v2569_v48  ;;  %v1066_v28 = vadd.f32 %v14814_v18, %v746_v45  ;;  %v14820_v51 = vld [vmem:[#allocation73_spill] sm:$0xff] }
 0x28f   :  { %v6688_v46 = vpop.eup %6687  ;;  %3190 = vmatprep.subr.bf16.mxu1 %v2572_v7  ;;  %v1259_v39 = vadd.f32 %v14815_v5, %v748_v25  ;;  %v2377_v12 = vadd.f32 1.0, %v6686_v36  ;;  %v1554_v0 = vmul.f32 %v14793_v3, %v14817_v14  ;;  %v749_v8 = vmul.f32 %v14774_v41, %v14813_v60  ;;  %v14821_v7 = vld [vmem:[#allocation49_spill] sm:$0xff]  ;;  %v14822_v36 = vld [vmem:[#allocation75_spill] sm:$0xff] }
 0x290   :  { %3191 = vmatpush1.bf16.msra.mxu1 %v2571_v15  ;;  %v1068_v21 = vadd.f32 %v14816_v19, %v747_v6  ;;  %v2379_v47 = vadd.f32 1.0, %v6688_v46  ;;  %6697 = vtanh.f32 %v10904_v55  ;;  %v1681_v10 = vadd.f32 %v14818_v17, %v1066_v28  ;;  %v14823_v46 = vld [vmem:[#allocation53_spill] sm:$0xff]  ;;  %v14825_v17 = vld [vmem:[#allocation68_spill] sm:$0xff] }
 0x291   :  { %v1683_v48 = vadd.f32 %v14819_v29, %v1259_v39  ;;  %v1261_v62 = vadd.f32 %v14820_v51, %v749_v8  ;;  %v1556_v15 = vmul.f32 %v14794_v16, %v14817_v14  ;;  %v750_v45 = vmul.f32 %v14776_v35, %v14821_v7 }
 0x292   :  { %v1682_v38 = vadd.f32 %v1554_v0, %v1068_v21  ;;  %v6690_v25 = vpop.eup %6689  ;;  %v2001_v6 = vadd.f32 %v14822_v36, %v1681_v10  ;;  %v1557_v18 = vmul.f32 %v14783_v2, %v14823_v46  ;;  %v752_v28 = vmul.f32 %v14785_v54, %v14821_v7  ;;  %v14824_v21 = vld [vmem:[#allocation105_spill] sm:$0xff] }
 0x293   :  { %v2003_v60 = vadd.f32 %v14822_v36, %v1683_v48  ;;  %v2381_v5 = vadd.f32 1.0, %v6690_v25  ;;  %v1684_v19 = vadd.f32 %v1556_v15, %v1261_v62  ;;  %v1070_v14 = vadd.f32 %v14824_v21, %v750_v45 }
 0x294   :  { %v2002_v39 = vadd.f32 %v14822_v36, %v1682_v38  ;;  %v10934_v0 = vmul.f32 0.5, %v2001_v6  ;;  %v1263_v10 = vadd.f32 %v14825_v17, %v752_v28  ;;  %v1559_v29 = vmul.f32 %v14789_v30, %v14823_v46 }
 0x295   :  { %v10936_v8 = vmul.f32 0.5, %v2003_v60  ;;  %v10942_v48 = vmul.f32 %v2377_v12, %v10833_v9  ;;  %6699 = vtanh.f32 %v10909_v52  ;;  %v2004_v51 = vadd.f32 %v14822_v36, %v1684_v19  ;;  %v14826_v36 = vld [vmem:[#allocation133_spill] sm:$0xff] }
 0x296   :  { %v1685_v38 = vadd.f32 %v1557_v18, %v1070_v14  ;;  %v6692_v62 = vpop.eup %6691  ;;  %v10947_v15 = vmul.f32 %v2379_v47, %v10838_v53  ;;  %6701 = vtanh.f32 %v10934_v0  ;;  %v1687_v45 = vadd.f32 %v1559_v29, %v1263_v10  ;;  %v14827_v47 = vld [vmem:[#allocation106_spill] sm:$0xff] }
 0x297   :  { %v751_v25 = vmul.f32 %v14773_v11, %v14821_v7  ;;  %v10952_v6 = vpop.eup %6693  ;;  %v10955_v9 = vmul.f32 %v2381_v5, %v10865_v63  ;;  %6703 = vtanh.f32 %v10936_v8  ;;  %v10958_v12 = vmul.f32 0.5, %v2002_v39 }
 0x298   :  { %v2005_v60 = vadd.f32 %v14826_v36, %v1685_v38  ;;  %v10961_v18 = vpop.eup %6695  ;;  %v2007_v53 = vadd.f32 %v14826_v36, %v1687_v45  ;;  %v1558_v19 = vmul.f32 %v14793_v3, %v14823_v46  ;;  %v753_v21 = vmul.f32 %v14774_v41, %v14821_v7  ;;  %v14828_v38 = vld [vmem:[#allocation151_spill] sm:$0xff] }
 0x299   :  { %v1072_v28 = vadd.f32 %v14827_v47, %v751_v25  ;;  %v2383_v63 = vadd.f32 1.0, %v6692_v62  ;;  %v10969_v5 = vmul.f32 0.5, %v2004_v51  ;;  %v1560_v39 = vmul.f32 %v14794_v16, %v14823_v46 }
 0x29a   :  { %v10971_v14 = vmul.f32 0.5, %v2005_v60  ;;  %v10975_v17 = vpop.eup %6697  ;;  %v10977_v10 = vmul.f32 0.5, %v2007_v53  ;;  %v1265_v45 = vadd.f32 %v14828_v38, %v753_v21  ;;  %v2362_v25 = vadd.f32 1.0, %v10728_v24 }
 0x29b   :  { %v1686_v29 = vadd.f32 %v1558_v19, %v1072_v28  ;;  %v2366_v7 = vadd.f32 1.0, %v10762_v1  ;;  %v2364_v51 = vadd.f32 1.0, %v10747_v40  ;;  %v2368_v62 = vadd.f32 1.0, %v10793_v56  ;;  %v14829_v28 = vld [vmem:[#allocation119_spill] sm:$0xff] }
 0x29c   :  { %6705 = vtanh.f32 %v10971_v14  ;;  %v1688_v60 = vadd.f32 %v1560_v39, %v1265_v45  ;;  %v2490_v53 = vmul.f32 %v2362_v25, %v10656_v37  ;;  %v2573_v1 = vpack.c.bf16 %v10806_v31, %v10750_v43 }
 0x29d   :  { %6707 = vtanh.f32 %v10977_v10  ;;  %v2006_v46 = vadd.f32 %v14826_v36, %v1686_v29  ;;  %v2494_v47 = vmul.f32 %v2366_v7, %v10681_v59  ;;  %v2492_v19 = vmul.f32 %v2364_v51, %v14829_v28  ;;  %v14830_v29 = vld [vmem:[#allocation62_spill] sm:$0xff] }
 0x29e   :  { %v2496_v24 = vmul.f32 %v2368_v62, %v10713_v34  ;;  %v2008_v40 = vadd.f32 %v14826_v36, %v1688_v60  ;;  %v2575_v56 = vpack.c.bf16 %v10809_v42, %v10753_v49  ;;  %v754_v39 = vmul.f32 %v14776_v35, %v14830_v29  ;;  %v14831_v36 = vld [vmem:[#allocation152_spill] sm:$0xff]  ;;  %v14832_v42 = vld [vmem:[#allocation17_spill] sm:$0xff]  ;;  %v14833_v51 = vld [vmem:[#allocation58_spill] sm:$0xff] }
 0x29f   :  { %v10993_v21 = vmul.f32 0.5, %v2006_v46  ;;  %v11000_v37 = vpop.eup %6699  ;;  %6709 = vtanh.f32 %v10958_v12  ;;  %v2574_v59 = vpack.c.bf16 %v2494_v47, %v2490_v53  ;;  %v756_v34 = vmul.f32 %v14785_v54, %v14830_v29 }
 0x2a0   :  { %v2576_v38 = vpack.c.bf16 %v2496_v24, %v2492_v19  ;;  %v6702_v43 = vpop.eup %6701  ;;  %v11006_v31 = vmul.f32 %v2383_v63, %v10883_v44  ;;  %6711 = vtanh.f32 %v10969_v5  ;;  %v1076_v49 = vadd.f32 %v14831_v36, %v754_v39  ;;  %v14834_v19 = vld [vmem:[#allocation107_spill] sm:$0xff]  ;;  %v14835_v39 = vld [vmem:[#allocation81_spill] sm:$0xff] }
 0x2a1   :  { %v1561_v45 = vmul.f32 %v14783_v2, %v14832_v42  ;;  %v6704_v25 = vpop.eup %6703  ;;  %v11012_v7 = vmul.f32 0.5, %v2008_v40  ;;  %2999 = vmatprep.subr.bf16.mxu0 %v2574_v59  ;;  %v1269_v62 = vadd.f32 %v14833_v51, %v756_v34  ;;  %v1563_v46 = vmul.f32 %v14789_v30, %v14832_v42 }
 0x2a2   :  { %3192 = vmatprep.subr.bf16.mxu1 %v2576_v38  ;;  %v755_v44 = vmul.f32 %v14773_v11, %v14830_v29  ;;  %v2385_v63 = vadd.f32 1.0, %v6702_v43  ;;  %6713 = vtanh.f32 %v10993_v21  ;;  %3000 = vmatpush1.bf16.msra.mxu0 %v2573_v1  ;;  %v757_v53 = vmul.f32 %v14774_v41, %v14830_v29  ;;  %v14836_v38 = vld [vmem:[#allocation108_spill] sm:$0xff] }
 0x2a3   :  { %3193 = vmatpush1.bf16.msra.mxu1 %v2575_v56  ;;  %v1689_v60 = vadd.f32 %v1561_v45, %v1076_v49  ;;  %v11022_v47 = vadd.f32 1.0, %v6704_v25  ;;  %v1691_v28 = vadd.f32 %v1563_v46, %v1269_v62  ;;  %v1562_v40 = vmul.f32 %v14793_v3, %v14832_v42  ;;  %v14837_v56 = vld [vmem:[#allocation70_spill] sm:$0xff]  ;;  %v14838_v46 = vld [vmem:[#allocation20_spill] sm:$0xff] }
 0x2a4   :  { %v1078_v24 = vadd.f32 %v14834_v19, %v755_v44  ;;  %v1271_v34 = vadd.f32 %v14836_v38, %v757_v53  ;;  %v1564_v1 = vmul.f32 %v14794_v16, %v14832_v42  ;;  %v758_v43 = vmul.f32 %v14776_v35, %v14837_v56  ;;  %v14840_v19 = vld [vmem:[#allocation111_spill] sm:$0xff] }
 0x2a5   :  { %v2009_v59 = vadd.f32 %v14835_v39, %v1689_v60  ;;  %6715 = vtanh.f32 %v11012_v7  ;;  %v2011_v29 = vadd.f32 %v14835_v39, %v1691_v28  ;;  %v760_v45 = vmul.f32 %v14785_v54, %v14837_v56  ;;  %v14839_v60 = vld [vmem:[#allocation71_spill] sm:$0xff] }
 0x2a6   :  { %v6706_v36 = vpop.eup %6705  ;;  %v1690_v49 = vadd.f32 %v1562_v40, %v1078_v24  ;;  %v1692_v62 = vadd.f32 %v1564_v1, %v1271_v34  ;;  %v1080_v44 = vadd.f32 %v14838_v46, %v758_v43  ;;  %v1565_v42 = vmul.f32 %v14783_v2, %v14839_v60  ;;  %v14841_v43 = vld [vmem:[#allocation89_spill] sm:$0xff]  ;;  %v14842_v46 = vld [vmem:[#allocation22_spill] sm:$0xff] }
 0x2a7   :  { %v6708_v25 = vpop.eup %6707  ;;  %v11037_v51 = vmul.f32 0.5, %v2009_v59  ;;  %v11043_v35 = vmul.f32 %v2385_v63, %v10934_v0  ;;  %v11045_v53 = vmul.f32 0.5, %v2011_v29  ;;  %v1273_v24 = vadd.f32 %v14840_v19, %v760_v45 }
 0x2a8   :  { %v2010_v28 = vadd.f32 %v14835_v39, %v1690_v49  ;;  %v2389_v40 = vadd.f32 1.0, %v6706_v36  ;;  %v2012_v54 = vadd.f32 %v14835_v39, %v1692_v62  ;;  %v1693_v59 = vadd.f32 %v1565_v42, %v1080_v44  ;;  %v14843_v42 = vld [vmem:[#allocation109_spill] sm:$0xff] }
 0x2a9   :  { %6717 = vtanh.f32 %v11037_v51  ;;  %v11051_v38 = vpop.eup %6709  ;;  %v2391_v34 = vadd.f32 1.0, %v6708_v25  ;;  %v1567_v0 = vmul.f32 %v14789_v30, %v14839_v60  ;;  %v759_v39 = vmul.f32 %v14773_v11, %v14837_v56 }
 0x2aa   :  { %6719 = vtanh.f32 %v11045_v53  ;;  %v11054_v2 = vmul.f32 0.5, %v2010_v28  ;;  %v11058_v63 = vpop.eup %6711  ;;  %v11060_v1 = vmul.f32 0.5, %v2012_v54  ;;  %v2013_v36 = vadd.f32 %v14841_v43, %v1693_v59 }
 0x2ab   :  { %v1566_v29 = vmul.f32 %v14793_v3, %v14839_v60  ;;  %v1695_v49 = vadd.f32 %v1567_v0, %v1273_v24  ;;  %v761_v45 = vmul.f32 %v14774_v41, %v14837_v56  ;;  %v1568_v30 = vmul.f32 %v14794_v16, %v14839_v60  ;;  %v14844_v56 = vld [vmem:[#allocation120_spill] sm:$0xff] }
 0x2ac   :  { %6721 = vtanh.f32 %v11054_v2  ;;  %v6714_v25 = vpop.eup %6713  ;;  %v11073_v62 = vmul.f32 0.5, %v2013_v36  ;;  %v1082_v44 = vadd.f32 %v14842_v46, %v759_v39  ;;  %v2370_v11 = vadd.f32 1.0, %v10822_v13 }
 0x2ad   :  { %6723 = vtanh.f32 %v11060_v1  ;;  %v2015_v3 = vadd.f32 %v14841_v43, %v1695_v49  ;;  %v1275_v28 = vadd.f32 %v14843_v42, %v761_v45  ;;  %v2374_v19 = vadd.f32 1.0, %v10875_v61 }
 0x2ae   :  { %v2372_v41 = vadd.f32 1.0, %v10863_v57  ;;  %6725 = vtanh.f32 %v11073_v62  ;;  %v1694_v16 = vadd.f32 %v1566_v29, %v1082_v44  ;;  %v2498_v60 = vmul.f32 %v2370_v11, %v14844_v56 }
 0x2af   :  { %v2376_v24 = vadd.f32 1.0, %v10893_v32  ;;  %v6716_v54 = vpop.eup %6715  ;;  %v11084_v59 = vmul.f32 0.5, %v2015_v3  ;;  %v1696_v0 = vadd.f32 %v1568_v30, %v1275_v28  ;;  %v2502_v13 = vmul.f32 %v2374_v19, %v10795_v58 }
 0x2b0   :  { %v2500_v36 = vmul.f32 %v2372_v41, %v10764_v23  ;;  %v2014_v39 = vadd.f32 %v14841_v43, %v1694_v16  ;;  %v2577_v57 = vpack.c.bf16 %v10849_v26, %v10842_v20  ;;  %v2579_v29 = vpack.c.bf16 %v10901_v33, %v10845_v22 }
 0x2b1   :  { %v2504_v61 = vmul.f32 %v2376_v24, %v10817_v27  ;;  %6727 = vtanh.f32 %v11084_v59  ;;  %v2016_v32 = vadd.f32 %v14841_v43, %v1696_v0  ;;  %v2578_v49 = vpack.c.bf16 %v2502_v13, %v2498_v60 }
 0x2b2   :  { %v2378_v45 = vadd.f32 1.0, %v10952_v6  ;;  %v11097_v30 = vmul.f32 0.5, %v2014_v39  ;;  %v2382_v46 = vadd.f32 1.0, %v10975_v17  ;;  %v2380_v27 = vadd.f32 1.0, %v10961_v18 }
 0x2b3   :  { %v6718_v58 = vpop.eup %6717  ;;  %v2580_v23 = vpack.c.bf16 %v2504_v61, %v2500_v36  ;;  %v2515_v20 = vmul.f32 %v11022_v47, %v10936_v8  ;;  %v2517_v22 = vmul.f32 %v2389_v40, %v10971_v14  ;;  %v2144_v26 = vmul.f32 0.5, %v2016_v32  ;;  %3001 = vmatprep.subr.bf16.mxu0 %v2578_v49  ;;  %v6325_v32 = vld [vmem:[%s14004_s7 + $0x20] ss:$8 sps:$4 sm:$0xff]   ;;  %v6326_v49 = vld [vmem:[%s14004_s7 + $0x34] ss:$8 sps:$4 sm:$0xff]  }
 0x2b4   :  { %v6720_v44 = vpop.eup %6719  ;;  %v2384_v33 = vadd.f32 1.0, %v11000_v37  ;;  %v2519_v6 = vmul.f32 %v2391_v34, %v10977_v10  ;;  %6729 = vtanh.f32 %v11097_v30  ;;  %3002 = vmatpush1.bf16.msra.mxu0 %v2577_v57  ;;  %v2506_v17 = vmul.f32 %v2378_v45, %v10855_v50  ;;  %v6328_v45 = vld [vmem:[%s14004_s7 + $0x30] ss:$8 sps:$4 sm:$0xff]  }
 0x2b5   :  { %3194 = vmatprep.subr.bf16.mxu1 %v2580_v23  ;;  %v2510_v18 = vmul.f32 %v2382_v46, %v10904_v55  ;;  %6731 = vtanh.f32 %v2144_v26  ;;  %v2508_v8 = vmul.f32 %v2380_v27, %v10857_v4  ;;  %v2581_v37 = vpack.c.bf16 %v10955_v9, %v10942_v48  ;;  %v6332_v23 = vld [vmem:[%s14004_s7 + $0x54] ss:$8 sps:$4 sm:$0xff]   ;;  %v6334_v46 = vld [vmem:[%s14004_s7 + $0x50] ss:$8 sps:$4 sm:$0xff]   ;;  %v6335_v27 = vld [vmem:[%s14004_s7 + $0x64] ss:$8 sps:$4 sm:$0xff]  }
 0x2b6   :  { %v6722_v43 = vpop.eup %6721  ;;  %3195 = vmatpush1.bf16.msra.mxu1 %v2579_v29  ;;  %v2512_v14 = vmul.f32 %v2384_v33, %v10909_v52  ;;  %v2393_v10 = vadd.f32 1.0, %v6718_v58  ;;  %v2583_v34 = vpack.c.bf16 %v11006_v31, %v10947_v15  ;;  %v2386_v50 = vadd.f32 1.0, %v11051_v38  ;;  %v6329_v58 = vld [vmem:[%s14004_s7 + $0x44] ss:$8 sps:$4 sm:$0xff]   ;;  %v6343_v33 = vld [vmem:[%s14004_s7 + $0x80] ss:$8 sps:$4 sm:$0xff]  }
 0x2b7   :  { %v6724_v47 = vpop.eup %6723  ;;  %v2582_v40 = vpack.c.bf16 %v2510_v18, %v2506_v17  ;;  %v2390_v55 = vadd.f32 1.0, %v6714_v25  ;;  %v2388_v3 = vadd.f32 1.0, %v11058_v63  ;;  %v2392_v42 = vadd.f32 1.0, %v6716_v54  ;;  %v6346_v17 = vld [vmem:[%s14004_s7 + $0x90] ss:$8 sps:$4 sm:$0xff]  }
 0x2b8   :  { %v2584_v11 = vpack.c.bf16 %v2512_v14, %v2508_v8  ;;  %v6726_v28 = vpop.eup %6725  ;;  %v2514_v4 = vmul.f32 %v2386_v50, %v10958_v12  ;;  %v2585_v52 = vpack.c.bf16 %v2517_v22, %v11043_v35  ;;  %v2587_v48 = vpack.c.bf16 %v2519_v6, %v2515_v20  ;;  %v6338_v20 = vld [vmem:[%s14004_s7 + $0x74] ss:$8 sps:$4 sm:$0xff]   ;;  %v6340_v22 = vld [vmem:[%s14004_s7 + $0x70] ss:$8 sps:$4 sm:$0xff]   ;;  %v6347_v18 = vld [vmem:[%s14004_s7 + $0xa4] ss:$8 sps:$4 sm:$0xff]  }
 0x2b9   :  { %3003 = vmatprep.subr.bf16.mxu0 %v2582_v40  ;;  %v2397_v9 = vadd.f32 1.0, %v6726_v28  ;;  %v2518_v19 = vmul.f32 %v2390_v55, %v10993_v21  ;;  %v2516_v15 = vmul.f32 %v2388_v3, %v10969_v5  ;;  %v2520_v31 = vmul.f32 %v2392_v42, %v11012_v7  ;;  %v6344_v6 = vld [vmem:[%s14004_s7 + $0x94] ss:$8 sps:$4 sm:$0xff]   ;;  %v6352_v14 = vld [vmem:[%s14004_s7 + $0xb0] ss:$8 sps:$4 sm:$0xff]  }
 0x2ba   :  { %3196 = vmatprep.subr.bf16.mxu1 %v2584_v11  ;;  %3004 = vmatpush1.bf16.msra.mxu0 %v2581_v37  ;;  %v2395_v38 = vadd.f32 1.0, %v6720_v44  ;;  %v2521_v25 = vmul.f32 %v2393_v10, %v11037_v51  ;;  %v2394_v56 = vadd.f32 1.0, %v6722_v43  ;;  %v2396_v7 = vadd.f32 1.0, %v6724_v47  ;;  %v6337_v44 = vld [vmem:[%s14004_s7 + $0x60] ss:$8 sps:$4 sm:$0xff]   ;;  %v14845_v42 = vld [vmem:[#allocation163_spill] sm:$0xff] }
 0x2bb   :  { %3197 = vmatpush1.bf16.msra.mxu1 %v2583_v34  ;;  %v6728_v63 = vpop.eup %6727  ;;  %v2525_v41 = vmul.f32 %v2397_v9, %v11073_v62  ;;  %v2586_v12 = vpack.c.bf16 %v2518_v19, %v2514_v4  ;;  %v2588_v16 = vpack.c.bf16 %v2520_v31, %v2516_v15  ;;  %v6349_v43 = vld [vmem:[%s14004_s7 + $0xa0] ss:$8 sps:$4 sm:$0xff]   ;;  %v6350_v8 = vld [vmem:[%s14004_s7 + $0xb4] ss:$8 sps:$4 sm:$0xff]   ;;  %v6353_v37 = vld [vmem:[%s14004_s7 + $0xc4] ss:$8 sps:$4 sm:$0xff]  }
 0x2bc   :  { %v2399_v35 = vadd.f32 1.0, %v6728_v63  ;;  %v2523_v21 = vmul.f32 %v2395_v38, %v11045_v53  ;;  %v2522_v62 = vmul.f32 %v2394_v56, %v11054_v2  ;;  %v2524_v39 = vmul.f32 %v2396_v7, %v11060_v1  ;;  %v6317_v53 = vld [vmem:[%s14004_s7] ss:$8 sps:$4 sm:$0xff]   ;;  %v6322_v2 = vld [vmem:[%s14004_s7 + $0x10] ss:$8 sps:$4 sm:$0xff]  }
 0x2bd   :  { %3005 = vmatprep.subr.bf16.mxu0 %v2586_v12  ;;  %3198 = vmatprep.subr.bf16.mxu1 %v2588_v16  ;;  %v2589_v60 = vpack.c.bf16 %v2525_v41, %v2521_v25  ;;  %v6323_v1 = vld [vmem:[%s14004_s7 + $0x24] ss:$8 sps:$4 sm:$0xff]   ;;  %v6355_v47 = vld [vmem:[%s14004_s7 + $0xc0] ss:$8 sps:$4 sm:$0xff]   ;;  %v6356_v10 = vld [vmem:[%s14004_s7 + $0xd4] ss:$8 sps:$4 sm:$0xff]  }
 0x2be   :  { %v6730_v24 = vpop.eup %6729  ;;  %v2527_v5 = vmul.f32 %v2399_v35, %v11084_v59  ;;  %3006 = vmatpush1.bf16.msra.mxu0 %v2585_v52  ;;  %v6320_v59 = vld [vmem:[%s14004_s7 + $0x14] ss:$8 sps:$4 sm:$0xff]   ;;  %v6358_v40 = vld [vmem:[%s14004_s7 + $0xd0] ss:$8 sps:$4 sm:$0xff]   ;;  %v6359_v34 = vld [vmem:[%s14004_s7 + $0xe4] ss:$8 sps:$4 sm:$0xff]  }
 0x2bf   :  { %3199 = vmatpush1.bf16.msra.mxu1 %v2587_v48  ;;  %v6732_v54 = vpop.eup %6731  ;;  %v2398_v0 = vadd.f32 1.0, %v6730_v24  ;;  %v6361_v50 = vld [vmem:[%s14004_s7 + $0xe0] ss:$8 sps:$4 sm:$0xff]   ;;  %v6362_v11 = vld [vmem:[%s14004_s7 + $0xf4] ss:$8 sps:$4 sm:$0xff]  }
 0x2c0   :  { %v2400_v51 = vadd.f32 1.0, %v6732_v54  ;;  %v2591_v13 = vpack.c.bf16 %v2527_v5, %v2523_v21  ;;  %v6364_v55 = vld [vmem:[%s14004_s7 + $0xf0] ss:$8 sps:$4 sm:$0xff]  }
 0x2c1   :  { %v2526_v36 = vmul.f32 %v2398_v0, %v11097_v30  ;;  %v6331_v30 = vld [vmem:[%s14004_s7 + $0x40] ss:$8 sps:$4 sm:$0xff]   ;;  %v14846_v63 = vld [vmem:[#allocation63_spill] sm:$0xff] }
 0x2c2   :  { %v2528_v61 = vmul.f32 %v2400_v51, %v2144_v26  ;;  %v6341_v26 = vld [vmem:[%s14004_s7 + $0x84] ss:$8 sps:$4 sm:$0xff]  }
 0x2c3   :  { %v2590_v57 = vpack.c.bf16 %v2526_v36, %v2522_v62  ;;  %v14847_v62 = vld [vmem:[#allocation188_spill] sm:$0xff] }
 0x2c4   :  { %v2592_v29 = vpack.c.bf16 %v2528_v61, %v2524_v39 }
 0x2c5   :  { %3007 = vmatprep.subr.bf16.mxu0 %v2590_v57 }
 0x2c6   :  { %3200 = vmatprep.subr.bf16.mxu1 %v2592_v29  ;;  %3008 = vmatpush1.bf16.msra.mxu0 %v2589_v60 }
 0x2c7   :  { %3201 = vmatpush1.bf16.msra.mxu1 %v2591_v13 }
 0x2c9   :  { %3010 = vmatmul.mubr.bf16.vlgmr.msra.gmra.mrb[64].mxu0 %v6317_v53 }
 0x2ca   :  { %3203 = vmatmul.mubr.bf16.vlgmr.msra.gmra.mrb[64].mxu1 %v6317_v53  ;;  %3019 = vmatprep.mubr.bf16.mxu0 %v6320_v59 }
 0x2cb   :  { %3212 = vmatprep.mubr.bf16.mxu1 %v6320_v59 }
 0x2d1   :  { %3020 = vmatmul.mubr.bf16.gmra.mrb[68].mxu0 %v6322_v2 }
 0x2d2   :  { %3213 = vmatmul.mubr.bf16.gmra.mrb[68].mxu1 %v6322_v2  ;;  %3029 = vmatprep.mubr.bf16.mxu0 %v6323_v1 }
 0x2d3   :  { %3222 = vmatprep.mubr.bf16.mxu1 %v6323_v1 }
 0x2d9   :  { %3030 = vmatmul.mubr.bf16.gmra.mrb[72].mxu0 %v6325_v32 }
 0x2da   :  { %3223 = vmatmul.mubr.bf16.gmra.mrb[72].mxu1 %v6325_v32  ;;  %3039 = vmatprep.mubr.bf16.mxu0 %v6326_v49  ;;  %v14848_v32 = vld [vmem:[#allocation116_spill] sm:$0xff] }
 0x2db   :  { %3232 = vmatprep.mubr.bf16.mxu1 %v6326_v49 }
 0x2e1   :  { %3040 = vmatmul.mubr.bf16.gmra.mrb[76].mxu0 %v6328_v45 }
 0x2e2   :  { %3233 = vmatmul.mubr.bf16.gmra.mrb[76].mxu1 %v6328_v45  ;;  %3049 = vmatprep.mubr.bf16.mxu0 %v6329_v58 }
 0x2e3   :  { %3242 = vmatprep.mubr.bf16.mxu1 %v6329_v58 }
 0x2e9   :  { %3050 = vmatmul.mubr.bf16.gmra.mrb[80].mxu0 %v6331_v30 }
 0x2ea   :  { %3243 = vmatmul.mubr.bf16.gmra.mrb[80].mxu1 %v6331_v30  ;;  %3059 = vmatprep.mubr.bf16.mxu0 %v6332_v23 }
 0x2eb   :  { %3252 = vmatprep.mubr.bf16.mxu1 %v6332_v23 }
 0x2f1   :  { %3060 = vmatmul.mubr.bf16.gmra.mrb[84].mxu0 %v6334_v46 }
 0x2f2   :  { %3253 = vmatmul.mubr.bf16.gmra.mrb[84].mxu1 %v6334_v46  ;;  %3069 = vmatprep.mubr.bf16.mxu0 %v6335_v27 }
 0x2f3   :  { %3262 = vmatprep.mubr.bf16.mxu1 %v6335_v27 }
 0x2f9   :  { %3070 = vmatmul.mubr.bf16.gmra.mrb[88].mxu0 %v6337_v44 }
 0x2fa   :  { %3263 = vmatmul.mubr.bf16.gmra.mrb[88].mxu1 %v6337_v44  ;;  %3079 = vmatprep.mubr.bf16.mxu0 %v6338_v20 }
 0x2fb   :  { %3272 = vmatprep.mubr.bf16.mxu1 %v6338_v20 }
 0x301   :  { %3080 = vmatmul.mubr.bf16.gmra.mrb[92].mxu0 %v6340_v22 }
 0x302   :  { %3273 = vmatmul.mubr.bf16.gmra.mrb[92].mxu1 %v6340_v22  ;;  %3089 = vmatprep.mubr.bf16.mxu0 %v6341_v26 }
 0x303   :  { %3282 = vmatprep.mubr.bf16.mxu1 %v6341_v26 }
 0x309   :  { %3090 = vmatmul.mubr.bf16.gmra.mrb[96].mxu0 %v6343_v33 }
 0x30a   :  { %3283 = vmatmul.mubr.bf16.gmra.mrb[96].mxu1 %v6343_v33  ;;  %3099 = vmatprep.mubr.bf16.mxu0 %v6344_v6 }
 0x30b   :  { %3292 = vmatprep.mubr.bf16.mxu1 %v6344_v6 }
 0x311   :  { %3100 = vmatmul.mubr.bf16.gmra.mrb[100].mxu0 %v6346_v17 }
 0x312   :  { %3293 = vmatmul.mubr.bf16.gmra.mrb[100].mxu1 %v6346_v17  ;;  %3109 = vmatprep.mubr.bf16.mxu0 %v6347_v18 }
 0x313   :  { %3302 = vmatprep.mubr.bf16.mxu1 %v6347_v18 }
 0x319   :  { %3110 = vmatmul.mubr.bf16.gmra.mrb[104].mxu0 %v6349_v43 }
 0x31a   :  { %3303 = vmatmul.mubr.bf16.gmra.mrb[104].mxu1 %v6349_v43  ;;  %3119 = vmatprep.mubr.bf16.mxu0 %v6350_v8 }
 0x31b   :  { %3312 = vmatprep.mubr.bf16.mxu1 %v6350_v8 }
 0x321   :  { %3120 = vmatmul.mubr.bf16.gmra.mrb[108].mxu0 %v6352_v14 }
 0x322   :  { %3313 = vmatmul.mubr.bf16.gmra.mrb[108].mxu1 %v6352_v14  ;;  %3129 = vmatprep.mubr.bf16.mxu0 %v6353_v37 }
 0x323   :  { %3322 = vmatprep.mubr.bf16.mxu1 %v6353_v37 }
 0x329   :  { %3130 = vmatmul.mubr.bf16.gmra.mrb[112].mxu0 %v6355_v47 }
 0x32a   :  { %3323 = vmatmul.mubr.bf16.gmra.mrb[112].mxu1 %v6355_v47  ;;  %3139 = vmatprep.mubr.bf16.mxu0 %v6356_v10  ;;  %v14849_v47 = vld [vmem:[#allocation209_spill] sm:$0xff] }
 0x32b   :  { %3332 = vmatprep.mubr.bf16.mxu1 %v6356_v10 }
 0x331   :  { %3140 = vmatmul.mubr.bf16.gmra.mrb[116].mxu0 %v6358_v40 }
 0x332   :  { %3333 = vmatmul.mubr.bf16.gmra.mrb[116].mxu1 %v6358_v40  ;;  %3149 = vmatprep.mubr.bf16.mxu0 %v6359_v34 }
 0x333   :  { %3342 = vmatprep.mubr.bf16.mxu1 %v6359_v34 }
 0x339   :  { %3150 = vmatmul.mubr.bf16.gmra.mrb[120].mxu0 %v6361_v50 }
 0x33a   :  { %3343 = vmatmul.mubr.bf16.gmra.mrb[120].mxu1 %v6361_v50  ;;  %3159 = vmatprep.mubr.bf16.mxu0 %v6362_v11 }
 0x33b   :  { %3352 = vmatprep.mubr.bf16.mxu1 %v6362_v11 }
 0x341   :  { %3160 = vmatmul.mubr.bf16.gmra.mrb[124].mxu0 %v6364_v55 }
 0x342   :  { %3353 = vmatmul.mubr.bf16.gmra.mrb[124].mxu1 %v6364_v55 }
 0x39c   :  { %v3011_v3 = vpop.f32.mrb[64].mxu0 }
 0x39d   :  { %v3012_v28 = vadd.f32 %v3011_v3, %v14845_v42  ;;  %v3204_v4 = vpop.f32.mrb[64].mxu1  ;;  %v3013_v52 = vpop.f32.mrb[65].mxu0 }
 0x39e   :  { %v3205_v48 = vadd.f32 %v3204_v4, %v14845_v42  ;;  %v3014_v9 = vadd.f32 %v3013_v52, %v14845_v42  ;;  %v3206_v19 = vpop.f32.mrb[65].mxu1  ;;  %v3015_v15 = vpop.f32.mrb[66].mxu0 }
 0x39f   :  { %v11225_v31 = vmul.f32 0.5, %v3012_v28  ;;  %v3207_v38 = vadd.f32 %v3206_v19, %v14845_v42  ;;  %v3016_v25 = vadd.f32 %v3015_v15, %v14846_v63  ;;  %v3208_v41 = vpop.f32.mrb[66].mxu1  ;;  %v3017_v12 = vpop.f32.mrb[67].mxu0 }
 0x3a0   :  { %v11229_v16 = vmul.f32 0.5, %v3205_v48  ;;  %v11231_v35 = vmul.f32 0.5, %v3014_v9  ;;  %v3209_v56 = vadd.f32 %v3208_v41, %v14846_v63  ;;  %v3018_v60 = vadd.f32 %v3017_v12, %v14846_v63  ;;  %v3210_v24 = vpop.f32.mrb[67].mxu1 }
 0x3a1   :  { %6733 = vtanh.f32 %v11225_v31  ;;  %v11236_v21 = vmul.f32 0.5, %v3207_v38  ;;  %v11238_v5 = vmul.f32 0.5, %v3016_v25  ;;  %v3211_v7 = vadd.f32 %v3210_v24, %v14846_v63 }
 0x3a2   :  { %6735 = vtanh.f32 %v11229_v16  ;;  %v11242_v54 = vmul.f32 0.5, %v3209_v56  ;;  %v11245_v0 = vmul.f32 0.5, %v3018_v60 }
 0x3a3   :  { %6737 = vtanh.f32 %v11231_v35  ;;  %v11248_v51 = vmul.f32 0.5, %v3211_v7 }
 0x3a4   :  { %6739 = vtanh.f32 %v11236_v21  ;;  %v3021_v13 = vpop.f32.mrb[68].mxu0 }
 0x3a5   :  { %6741 = vtanh.f32 %v11238_v5  ;;  %v3022_v36 = vadd.f32 %v3021_v13, %v14847_v62  ;;  %v3214_v39 = vpop.f32.mrb[68].mxu1  ;;  %v3023_v61 = vpop.f32.mrb[69].mxu0 }
 0x3a6   :  { %6743 = vtanh.f32 %v11242_v54  ;;  %v3215_v57 = vadd.f32 %v3214_v39, %v14847_v62  ;;  %v3024_v29 = vadd.f32 %v3023_v61, %v14847_v62  ;;  %v3216_v53 = vpop.f32.mrb[69].mxu1  ;;  %v3025_v59 = vpop.f32.mrb[70].mxu0 }
 0x3a7   :  { %6745 = vtanh.f32 %v11245_v0  ;;  %v11256_v2 = vmul.f32 0.5, %v3022_v36  ;;  %v3217_v1 = vadd.f32 %v3216_v53, %v14847_v62  ;;  %v3026_v49 = vadd.f32 %v3025_v59, %v14848_v32  ;;  %v3218_v45 = vpop.f32.mrb[70].mxu1  ;;  %v3027_v58 = vpop.f32.mrb[71].mxu0 }
 0x3a8   :  { %6747 = vtanh.f32 %v11248_v51  ;;  %v11261_v30 = vmul.f32 0.5, %v3215_v57  ;;  %v11263_v23 = vmul.f32 0.5, %v3024_v29  ;;  %v3219_v46 = vadd.f32 %v3218_v45, %v14848_v32  ;;  %v3220_v27 = vpop.f32.mrb[71].mxu1  ;;  %v14850_v57 = vld [vmem:[#allocation47_spill] sm:$0xff] }
 0x3a9   :  { %6749 = vtanh.f32 %v11256_v2  ;;  %v11267_v44 = vmul.f32 0.5, %v3217_v1  ;;  %v11269_v20 = vmul.f32 0.5, %v3026_v49  ;;  %v3028_v22 = vadd.f32 %v3027_v58, %v14848_v32 }
 0x3aa   :  { %6751 = vtanh.f32 %v11261_v30  ;;  %v11273_v26 = vmul.f32 0.5, %v3219_v46  ;;  %v3221_v33 = vadd.f32 %v3220_v27, %v14848_v32 }
 0x3ab   :  { %v6734_v6 = vpop.eup %6733  ;;  %6753 = vtanh.f32 %v11263_v23  ;;  %v11277_v17 = vmul.f32 0.5, %v3028_v22 }
 0x3ac   :  { %v6736_v18 = vpop.eup %6735  ;;  %v3619_v43 = vadd.f32 1.0, %v6734_v6  ;;  %6755 = vtanh.f32 %v11267_v44  ;;  %v11280_v8 = vmul.f32 0.5, %v3221_v33  ;;  %v3031_v14 = vpop.f32.mrb[72].mxu0 }
 0x3ad   :  { %v6738_v37 = vpop.eup %6737  ;;  %6757 = vtanh.f32 %v11269_v20  ;;  %v3032_v10 = vadd.f32 %v3031_v14, %v14849_v47  ;;  %v3224_v40 = vpop.f32.mrb[72].mxu1  ;;  %v3621_v11 = vadd.f32 1.0, %v6736_v18 }
 0x3ae   :  { %v3033_v34 = vpop.f32.mrb[73].mxu0  ;;  %v6740_v50 = vpop.eup %6739  ;;  %6759 = vtanh.f32 %v11273_v26  ;;  %v3225_v55 = vadd.f32 %v3224_v40, %v14849_v47  ;;  %v11290_v19 = vmul.f32 %v3619_v43, %v11225_v31  ;;  %v3620_v15 = vadd.f32 1.0, %v6738_v37 }
 0x3af   :  { %v3226_v3 = vpop.f32.mrb[73].mxu1  ;;  %v3035_v42 = vpop.f32.mrb[74].mxu0  ;;  %6761 = vtanh.f32 %v11277_v17  ;;  %v11287_v4 = vmul.f32 0.5, %v3032_v10  ;;  %v3034_v56 = vadd.f32 %v3033_v34, %v14849_v47  ;;  %v11298_v24 = vmul.f32 %v3621_v11, %v11229_v16 }
 0x3b0   :  { %v6742_v28 = vpop.eup %6741  ;;  %v3228_v52 = vpop.f32.mrb[74].mxu1  ;;  %6763 = vtanh.f32 %v11280_v8  ;;  %v11294_v12 = vmul.f32 0.5, %v3225_v55  ;;  %v3227_v13 = vadd.f32 %v3226_v3, %v14849_v47  ;;  %v3036_v29 = vadd.f32 %v3035_v42, %v14850_v57 }
 0x3b1   :  { %v3037_v48 = vpop.f32.mrb[75].mxu0  ;;  %v6744_v9 = vpop.eup %6743  ;;  %v3623_v38 = vadd.f32 1.0, %v6742_v28  ;;  %6765 = vtanh.f32 %v11287_v4  ;;  %v11307_v61 = vmul.f32 0.5, %v3034_v56  ;;  %v11313_v32 = vmul.f32 %v3620_v15, %v11231_v35  ;;  %v14851_v15 = vld [vmem:[#allocation8_spill] sm:$0xff] }
 0x3b2   :  { %v3230_v63 = vpop.f32.mrb[75].mxu1  ;;  %v6746_v25 = vpop.eup %6745  ;;  %v3625_v41 = vadd.f32 1.0, %v6744_v9  ;;  %v3622_v49 = vadd.f32 1.0, %v6740_v50  ;;  %6767 = vtanh.f32 %v11294_v12  ;;  %v11324_v33 = vmul.f32 0.5, %v3227_v13 }
 0x3b3   :  { %v6748_v60 = vpop.eup %6747  ;;  %v11301_v31 = vmul.f32 %v3623_v38, %v11238_v5  ;;  %v3624_v7 = vadd.f32 1.0, %v6746_v25  ;;  %v11326_v6 = vmul.f32 0.5, %v3036_v29  ;;  %6769 = vtanh.f32 %v11307_v61 }
 0x3b4   :  { %v6750_v62 = vpop.eup %6749  ;;  %v11305_v36 = vmul.f32 %v3625_v41, %v11242_v54  ;;  %v3626_v39 = vadd.f32 1.0, %v6748_v60  ;;  %v3041_v1 = vpop.f32.mrb[76].mxu0  ;;  %v3229_v37 = vadd.f32 %v3228_v52, %v14850_v57  ;;  %v3038_v47 = vadd.f32 %v3037_v48, %v14850_v57 }
 0x3b5   :  { %v6752_v53 = vpop.eup %6751  ;;  %v3875_v16 = vpack.c.bf16 %v11301_v31, %v11290_v19  ;;  %v3627_v59 = vadd.f32 1.0, %v6750_v62  ;;  %v3234_v45 = vpop.f32.mrb[76].mxu1  ;;  %v11319_v27 = vmul.f32 %v3624_v7, %v11245_v0  ;;  %6771 = vtanh.f32 %v11326_v6 }
 0x3b6   :  { %v6754_v5 = vpop.eup %6753  ;;  %v3877_v54 = vpack.c.bf16 %v11305_v36, %v11298_v24  ;;  %v3043_v58 = vpop.f32.mrb[77].mxu0  ;;  %v11322_v22 = vmul.f32 %v3626_v39, %v11248_v51  ;;  %v3629_v14 = vadd.f32 1.0, %v6752_v53  ;;  %v3231_v50 = vadd.f32 %v3230_v63, %v14850_v57  ;;  %v14853_v24 = vld [vmem:[#allocation46_spill] sm:$0xff] }
 0x3b7   :  { %v6756_v46 = vpop.eup %6755  ;;  %v3236_v35 = vpop.f32.mrb[77].mxu1  ;;  %v11334_v51 = vmul.f32 %v3627_v59, %v11256_v2  ;;  %v3628_v3 = vadd.f32 1.0, %v6754_v5  ;;  %v11340_v28 = vmul.f32 0.5, %v3229_v37  ;;  %v11342_v52 = vmul.f32 0.5, %v3038_v47 }
 0x3b8   :  { %v3045_v18 = vpop.f32.mrb[78].mxu0  ;;  %v6758_v43 = vpop.eup %6757  ;;  %6773 = vtanh.f32 %v11324_v33  ;;  %v11348_v2 = vmul.f32 0.5, %v3231_v50  ;;  %v3042_v38 = vadd.f32 %v3041_v1, %v14851_v15  ;;  %v11352_v25 = vmul.f32 %v3629_v14, %v11261_v30 }
 0x3b9   :  { %v3238_v10 = vpop.f32.mrb[78].mxu1  ;;  %v11331_v0 = vpop.f32.mrb[79].mxu0  ;;  %v3631_v34 = vadd.f32 1.0, %v6758_v43  ;;  %6775 = vtanh.f32 %v11340_v28  ;;  %v3235_v56 = vadd.f32 %v3234_v45, %v14851_v15  ;;  %v3630_v60 = vadd.f32 1.0, %v6756_v46 }
 0x3ba   :  { %v6760_v40 = vpop.eup %6759  ;;  %v11338_v11 = vpop.f32.mrb[79].mxu1  ;;  %6777 = vtanh.f32 %v11342_v52  ;;  %v11366_v53 = vmul.f32 0.5, %v3042_v38  ;;  %v3044_v59 = vadd.f32 %v3043_v58, %v14851_v15  ;;  %v11374_v45 = vmul.f32 %v3628_v3, %v11263_v23  ;;  %v14852_v23 = vld [vmem:[#allocation103_spill] sm:$0xff] }
 0x3bb   :  { %v6762_v55 = vpop.eup %6761  ;;  %v3633_v42 = vadd.f32 1.0, %v6760_v40  ;;  %v11345_v9 = vmul.f32 %v3631_v34, %v11269_v20  ;;  %v3750_v20 = vmul.f32 %v3622_v49, %v11236_v21  ;;  %6779 = vtanh.f32 %v11348_v2 }
 0x3bc   :  { %v6764_v48 = vpop.eup %6763  ;;  %v3051_v13 = vpop.f32.mrb[80].mxu0  ;;  %v3632_v62 = vadd.f32 1.0, %v6762_v55  ;;  %v11368_v21 = vmul.f32 0.5, %v3235_v56  ;;  %v3237_v46 = vadd.f32 %v3236_v35, %v14851_v15  ;;  %v3876_v43 = vpack.c.bf16 %v11319_v27, %v11313_v32 }
 0x3bd   :  { %v6766_v63 = vpop.eup %6765  ;;  %v11355_v41 = vmul.f32 %v3633_v42, %v11273_v26  ;;  %v3879_v7 = vpack.c.bf16 %v11345_v9, %v11334_v51  ;;  %v3634_v39 = vadd.f32 1.0, %v6764_v48  ;;  %v3244_v26 = vpop.f32.mrb[80].mxu1  ;;  %v3878_v14 = vpack.c.bf16 %v11322_v22, %v3750_v20 }
 0x3be   :  { %v3053_v57 = vpop.f32.mrb[81].mxu0  ;;  %v3635_v29 = vadd.f32 1.0, %v6766_v63  ;;  %v3246_v1 = vpop.f32.mrb[81].mxu1  ;;  %v11385_v58 = vmul.f32 %v3630_v60, %v11267_v44  ;;  %6781 = vtanh.f32 %v11366_v53  ;;  %v11388_v40 = vmul.f32 0.5, %v3044_v59  ;;  %4323 = vmatprep.subr.bf16.mxu0 %v3876_v43 }
 0x3bf   :  { %v3881_v30 = vpack.c.bf16 %v11355_v41, %v11352_v25  ;;  %v11371_v5 = vpop.f32.mrb[82].mxu0  ;;  %v6768_v49 = vpop.eup %6767  ;;  %v3046_v34 = vadd.f32 %v3045_v18, %v14852_v23  ;;  %v3760_v32 = vmul.f32 %v3632_v62, %v11277_v17  ;;  %v3762_v27 = vmul.f32 %v3634_v39, %v11280_v8  ;;  %4516 = vmatprep.subr.bf16.mxu1 %v3878_v14 }
 0x3c0   :  { %v11380_v37 = vpop.f32.mrb[82].mxu1  ;;  %v11382_v47 = vpop.f32.mrb[83].mxu0  ;;  %6783 = vtanh.f32 %v11368_v21  ;;  %v3239_v44 = vadd.f32 %v3238_v10, %v14852_v23  ;;  %v11400_v55 = vmul.f32 %v3635_v29, %v11287_v4  ;;  %v3637_v3 = vadd.f32 1.0, %v6768_v49  ;;  %4324 = vmatpush1.bf16.msra.mxu0 %v3875_v16  ;;  %4517 = vmatpush1.bf16.msra.mxu1 %v3877_v54 }
 0x3c1   :  { %v11391_v50 = vpop.f32.mrb[83].mxu1  ;;  %v11393_v35 = vpop.eup %6769  ;;  %v11402_v18 = vmul.f32 0.5, %v3046_v34  ;;  %v3048_v17 = vadd.f32 %v11331_v0, %v14852_v23  ;;  %6785 = vtanh.f32 %v11388_v40  ;;  %v11413_v10 = vmul.f32 0.5, %v3237_v46 }
 0x3c2   :  { %v6772_v22 = vpop.eup %6771  ;;  %v11415_v4 = vmul.f32 0.5, %v3239_v44  ;;  %v3241_v19 = vadd.f32 %v11338_v11, %v14852_v23  ;;  %v3052_v31 = vadd.f32 %v3051_v13, %v14853_v24  ;;  %v3245_v0 = vadd.f32 %v3244_v26, %v14853_v24 }
 0x3c3   :  { %v3639_v8 = vadd.f32 1.0, %v6772_v22  ;;  %v6774_v42 = vpop.eup %6773  ;;  %6787 = vtanh.f32 %v11402_v18  ;;  %v11418_v48 = vmul.f32 0.5, %v3048_v17  ;;  %v3054_v15 = vadd.f32 %v3053_v57, %v14853_v24 }
 0x3c4   :  { %v11423_v36 = vpop.f32.mrb[84].mxu0  ;;  %v6776_v16 = vpop.eup %6775  ;;  %6789 = vtanh.f32 %v11415_v4  ;;  %v11436_v20 = vmul.f32 0.5, %v3241_v19  ;;  %v11438_v60 = vmul.f32 0.5, %v3052_v31  ;;  %v11447_v26 = vmul.f32 0.5, %v3245_v0 }
 0x3c5   :  { %v11426_v54 = vmul.f32 %v3639_v8, %v11326_v6  ;;  %v11431_v38 = vpop.f32.mrb[84].mxu1  ;;  %v11433_v63 = vpop.f32.mrb[85].mxu0  ;;  %v3641_v11 = vadd.f32 1.0, %v6776_v16  ;;  %6791 = vtanh.f32 %v11418_v48  ;;  %v11449_v57 = vmul.f32 0.5, %v3054_v15  ;;  %v14854_v8 = vld [vmem:[#allocation153_spill] sm:$0xff] }
 0x3c6   :  { %v6778_v56 = vpop.eup %6777  ;;  %v11440_v6 = vpop.f32.mrb[85].mxu1  ;;  %6793 = vtanh.f32 %v11413_v10  ;;  %v11456_v49 = vmul.f32 %v3637_v3, %v11294_v12  ;;  %v3247_v43 = vadd.f32 %v3246_v1, %v14853_v24  ;;  %v3880_v34 = vpack.c.bf16 %v3760_v32, %v11374_v45 }
 0x3c7   :  { %v11442_v13 = vpop.f32.mrb[86].mxu0  ;;  %v6780_v62 = vpop.eup %6779  ;;  %v3883_v39 = vpack.c.bf16 %v11426_v54, %v11400_v55  ;;  %v11459_v46 = vmul.f32 %v3641_v11, %v11340_v28  ;;  %6795 = vtanh.f32 %v11436_v20  ;;  %v3640_v23 = vadd.f32 1.0, %v6778_v56  ;;  %v14855_v56 = vld [vmem:[#allocation50_spill] sm:$0xff] }
 0x3c8   :  { %v11451_v29 = vpop.f32.mrb[86].mxu1  ;;  %v11453_v59 = vpop.f32.mrb[87].mxu0  ;;  %6797 = vtanh.f32 %v11438_v60  ;;  %v3882_v44 = vpack.c.bf16 %v3762_v27, %v11385_v58  ;;  %v3642_v3 = vadd.f32 1.0, %v6780_v62  ;;  %v11471_v28 = vmul.f32 0.5, %v3247_v43  ;;  %4325 = vmatprep.subr.bf16.mxu0 %v3880_v34 }
 0x3c9   :  { %v11463_v14 = vpop.f32.mrb[87].mxu1  ;;  %v6782_v22 = vpop.eup %6781  ;;  %v3885_v12 = vpack.c.bf16 %v11459_v46, %v11456_v49  ;;  %6799 = vtanh.f32 %v11447_v26  ;;  %v3056_v45 = vadd.f32 %v11371_v5, %v14854_v8  ;;  %v3249_v58 = vadd.f32 %v11380_v37, %v14854_v8  ;;  %4326 = vmatpush1.bf16.msra.mxu0 %v3879_v7 }
 0x3ca   :  { %v6784_v17 = vpop.eup %6783  ;;  %v3643_v1 = vadd.f32 1.0, %v6782_v22  ;;  %6801 = vtanh.f32 %v11449_v57  ;;  %4518 = vmatprep.subr.bf16.mxu1 %v3882_v44  ;;  %v3636_v32 = vadd.f32 1.0, %v11393_v35  ;;  %v3058_v19 = vadd.f32 %v11382_v47, %v14854_v8 }
 0x3cb   :  { %v3645_v27 = vadd.f32 1.0, %v6784_v17  ;;  %4519 = vmatpush1.bf16.msra.mxu1 %v3881_v30  ;;  %v3251_v5 = vadd.f32 %v11391_v50, %v14854_v8  ;;  %v6786_v37 = vpop.eup %6785  ;;  %v3638_v31 = vadd.f32 1.0, %v6774_v42  ;;  %v3768_v35 = vmul.f32 %v3640_v23, %v11342_v52 }
 0x3cc   :  { %v11489_v24 = vpop.f32.mrb[88].mxu0  ;;  %v11492_v16 = vmul.f32 0.5, %v3056_v45  ;;  %v11494_v51 = vmul.f32 0.5, %v3249_v58  ;;  %v11501_v7 = vmul.f32 %v3642_v3, %v11348_v2  ;;  %6803 = vtanh.f32 %v11471_v28 }
 0x3cd   :  { %v11496_v9 = vpop.f32.mrb[88].mxu1  ;;  %v11498_v25 = vpop.f32.mrb[89].mxu0  ;;  %v11504_v30 = vmul.f32 0.5, %v3058_v19  ;;  %v11506_v47 = vmul.f32 0.5, %v3251_v5  ;;  %v11513_v0 = vmul.f32 %v3643_v1, %v11366_v53  ;;  %v3062_v2 = vadd.f32 %v11423_v36, %v14855_v56 }
 0x3ce   :  { %v6788_v41 = vpop.eup %6787  ;;  %v11508_v50 = vpop.f32.mrb[89].mxu1  ;;  %6805 = vtanh.f32 %v11492_v16  ;;  %v11523_v23 = vmul.f32 %v3645_v27, %v11368_v21  ;;  %v3255_v53 = vadd.f32 %v11431_v38, %v14855_v56  ;;  %v3064_v38 = vadd.f32 %v11433_v63, %v14855_v56 }
 0x3cf   :  { %v11510_v52 = vpop.f32.mrb[90].mxu0  ;;  %v6790_v42 = vpop.eup %6789  ;;  %v3647_v15 = vadd.f32 1.0, %v6788_v41  ;;  %6807 = vtanh.f32 %v11494_v51  ;;  %v11534_v17 = vmul.f32 0.5, %v3062_v2  ;;  %v3766_v58 = vmul.f32 %v3638_v31, %v11324_v33 }
 0x3d0   :  { %v11518_v11 = vpop.f32.mrb[90].mxu1  ;;  %v11520_v62 = vpop.f32.mrb[91].mxu0  ;;  %v3649_v34 = vadd.f32 1.0, %v6790_v42  ;;  %6809 = vtanh.f32 %v11504_v30  ;;  %v11540_v8 = vmul.f32 0.5, %v3255_v53  ;;  %v3644_v41 = vadd.f32 1.0, %v6786_v37 }
 0x3d1   :  { %v6792_v43 = vpop.eup %6791  ;;  %v11528_v44 = vpop.f32.mrb[91].mxu1  ;;  %v11531_v3 = vmul.f32 %v3647_v15, %v11402_v18  ;;  %6811 = vtanh.f32 %v11506_v47  ;;  %v3764_v18 = vmul.f32 %v3636_v32, %v11307_v61  ;;  %v11550_v15 = vmul.f32 0.5, %v3064_v38 }
 0x3d2   :  { %v6794_v22 = vpop.eup %6793  ;;  %v3648_v36 = vadd.f32 1.0, %v6792_v43  ;;  %v11537_v21 = vmul.f32 %v3649_v34, %v11415_v4  ;;  %6813 = vtanh.f32 %v11534_v17  ;;  %v3257_v61 = vadd.f32 %v11440_v6, %v14855_v56  ;;  %v14856_v56 = vld [vmem:[#allocation27_spill] sm:$0xff] }
 0x3d3   :  { %v6796_v1 = vpop.eup %6795  ;;  %v3887_v27 = vpack.c.bf16 %v11531_v3, %v11513_v0  ;;  %v3884_v33 = vpack.c.bf16 %v3768_v35, %v3764_v18  ;;  %v3646_v37 = vadd.f32 1.0, %v6794_v22  ;;  %6815 = vtanh.f32 %v11540_v8 }
 0x3d4   :  { %v6798_v45 = vpop.eup %6797  ;;  %v3650_v19 = vadd.f32 1.0, %v6796_v1  ;;  %v11552_v2 = vpop.f32.mrb[92].mxu0  ;;  %v11562_v34 = vmul.f32 %v3648_v36, %v11418_v48  ;;  %v3886_v53 = vpack.c.bf16 %v11501_v7, %v3766_v58  ;;  %v11576_v35 = vmul.f32 0.5, %v3257_v61 }
 0x3d5   :  { %v6800_v5 = vpop.eup %6799  ;;  %v3651_v42 = vadd.f32 1.0, %v6798_v45  ;;  %v11557_v32 = vpop.f32.mrb[92].mxu1  ;;  %4327 = vmatprep.subr.bf16.mxu0 %v3884_v33  ;;  %v3066_v48 = vadd.f32 %v11442_v13, %v14856_v56  ;;  %6817 = vtanh.f32 %v11550_v15  ;;  %v3261_v55 = vadd.f32 %v11463_v14, %v14856_v56 }
 0x3d6   :  { %v6802_v63 = vpop.eup %6801  ;;  %v3653_v43 = vadd.f32 1.0, %v6800_v5  ;;  %v11559_v31 = vpop.f32.mrb[93].mxu0  ;;  %v11571_v45 = vmul.f32 %v3650_v19, %v11436_v20  ;;  %4520 = vmatprep.subr.bf16.mxu1 %v3886_v53  ;;  %v3259_v20 = vadd.f32 %v11451_v29, %v14856_v56  ;;  %4328 = vmatpush1.bf16.msra.mxu0 %v3883_v39  ;;  %6819 = vtanh.f32 %v11576_v35 }
 0x3d7   :  { %v11566_v1 = vpop.f32.mrb[93].mxu1  ;;  %v11568_v38 = vpop.f32.mrb[94].mxu0  ;;  %v11574_v6 = vmul.f32 %v3651_v42, %v11438_v60  ;;  %v3652_v18 = vadd.f32 1.0, %v6802_v63  ;;  %v3068_v60 = vadd.f32 %v11453_v59, %v14856_v56  ;;  %v11598_v5 = vmul.f32 0.5, %v3066_v48  ;;  %4521 = vmatpush1.bf16.msra.mxu1 %v3885_v12  ;;  %v14857_v42 = vld [vmem:[#allocation21_spill] sm:$0xff] }
 0x3d8   :  { %v11580_v22 = vpop.f32.mrb[94].mxu1  ;;  %v11582_v36 = vpop.f32.mrb[95].mxu0  ;;  %v11595_v19 = vmul.f32 %v3653_v43, %v11447_v26  ;;  %v11605_v29 = vmul.f32 0.5, %v3259_v20  ;;  %v3072_v26 = vadd.f32 %v11489_v24, %v14857_v42  ;;  %v11612_v61 = vmul.f32 0.5, %v3261_v55 }
 0x3d9   :  { %v6804_v7 = vpop.eup %6803  ;;  %v11592_v13 = vpop.f32.mrb[95].mxu1  ;;  %v11607_v59 = vmul.f32 0.5, %v3068_v60  ;;  %6821 = vtanh.f32 %v11598_v5  ;;  %v3265_v49 = vadd.f32 %v11496_v9, %v14857_v42  ;;  %v3774_v20 = vmul.f32 %v3646_v37, %v11413_v10 }
 0x3da   :  { %v6806_v58 = vpop.eup %6805  ;;  %v3654_v14 = vadd.f32 1.0, %v6804_v7  ;;  %6823 = vtanh.f32 %v11605_v29  ;;  %v11620_v33 = vmul.f32 0.5, %v3072_v26 }
 0x3db   :  { %v6808_v54 = vpop.eup %6807  ;;  %v3655_v39 = vadd.f32 1.0, %v6806_v58  ;;  %6825 = vtanh.f32 %v11607_v59  ;;  %v11628_v48 = vmul.f32 0.5, %v3265_v49 }
 0x3dc   :  { %v6810_v63 = vpop.eup %6809  ;;  %v3657_v43 = vadd.f32 1.0, %v6808_v54  ;;  %v11622_v53 = vpop.f32.mrb[96].mxu0  ;;  %6827 = vtanh.f32 %v11612_v61  ;;  %v11644_v54 = vmul.f32 %v3652_v18, %v11449_v57  ;;  %v3074_v57 = vadd.f32 %v11498_v25, %v14857_v42  ;;  %v14858_v25 = vld [vmem:[#allocation23_spill] sm:$0xff] }
 0x3dd   :  { %v6812_v46 = vpop.eup %6811  ;;  %v11617_v12 = vmul.f32 %v3655_v39, %v11492_v16  ;;  %v3656_v56 = vadd.f32 1.0, %v6810_v63  ;;  %v11630_v9 = vpop.f32.mrb[96].mxu1  ;;  %v3772_v16 = vmul.f32 %v3644_v41, %v11388_v40  ;;  %6829 = vtanh.f32 %v11620_v33  ;;  %v6367_v41 = vld [vmem:[%s14006_s9 + $0x4] ss:$8 sps:$4 sm:$0xff]  }
 0x3de   :  { %v11625_v24 = vmul.f32 %v3657_v43, %v11494_v51  ;;  %v11632_v7 = vpop.f32.mrb[97].mxu0  ;;  %v11639_v51 = vpop.f32.mrb[97].mxu1  ;;  %v3658_v26 = vadd.f32 1.0, %v6812_v46  ;;  %v11657_v63 = vmul.f32 %v3654_v14, %v11471_v28  ;;  %6831 = vtanh.f32 %v11628_v48  ;;  %4355 = vmatprep.mubr.bf16.mxu0 %v6367_v41  ;;  %4548 = vmatprep.mubr.bf16.mxu1 %v6367_v41 }
 0x3df   :  { %v11641_v58 = vpop.f32.mrb[98].mxu0  ;;  %v6814_v55 = vpop.eup %6813  ;;  %v3267_v18 = vadd.f32 %v11508_v50, %v14857_v42  ;;  %v11667_v49 = vmul.f32 %v3656_v56, %v11504_v30  ;;  %v3888_v46 = vpack.c.bf16 %v11562_v34, %v3772_v16  ;;  %v3890_v39 = vpack.c.bf16 %v11571_v45, %v3774_v20 }
 0x3e0   :  { %v11649_v40 = vpop.f32.mrb[98].mxu1  ;;  %v11651_v10 = vpop.f32.mrb[99].mxu0  ;;  %v11671_v14 = vmul.f32 0.5, %v3074_v57  ;;  %v3076_v4 = vadd.f32 %v11510_v52, %v14858_v25  ;;  %v3269_v50 = vadd.f32 %v11518_v11, %v14858_v25  ;;  %v11680_v30 = vmul.f32 %v3658_v26, %v11506_v47 }
 0x3e1   :  { %v6816_v37 = vpop.eup %6815  ;;  %v11664_v43 = vpop.f32.mrb[99].mxu1  ;;  %v11673_v60 = vmul.f32 0.5, %v3267_v18  ;;  %v3659_v34 = vadd.f32 1.0, %v6814_v55  ;;  %4329 = vmatprep.subr.bf16.mxu0 %v3888_v46  ;;  %4522 = vmatprep.subr.bf16.mxu1 %v3890_v39  ;;  %v3078_v45 = vadd.f32 %v11520_v62, %v14858_v25  ;;  %v3271_v56 = vadd.f32 %v11528_v44, %v14858_v25 }
 0x3e2   :  { %v6818_v28 = vpop.eup %6817  ;;  %v3661_v16 = vadd.f32 1.0, %v6816_v37  ;;  %6833 = vtanh.f32 %v11671_v14  ;;  %v11687_v52 = vmul.f32 0.5, %v3076_v4  ;;  %v11689_v20 = vmul.f32 0.5, %v3269_v50  ;;  %4330 = vmatpush1.bf16.msra.mxu0 %v3887_v27  ;;  %v14860_v4 = vld [vmem:[#allocation61_spill] sm:$0xff] }
 0x3e3   :  { %v6820_v42 = vpop.eup %6819  ;;  %v14859_v47 = vpack.c.bf16 %v11537_v21, %v11523_v23  ;;  %6835 = vtanh.f32 %v11673_v60  ;;  %v11700_v44 = vmul.f32 0.5, %v3078_v45  ;;  %v11702_v55 = vmul.f32 0.5, %v3271_v56 }
 0x3e4   :  { %v11697_v11 = vpop.f32.mrb[100].mxu0  ;;  %v6822_v62 = vpop.eup %6821  ;;  %v3082_v39 = vadd.f32 %v11552_v2, %v14860_v4  ;;  %v3660_v27 = vadd.f32 1.0, %v6818_v28  ;;  %6837 = vtanh.f32 %v11687_v52  ;;  %v3275_v21 = vadd.f32 %v11557_v32, %v14860_v4 }
 0x3e5   :  { %4523 = vmatpush1.bf16.msra.mxu1 %v14859_v47  ;;  %v11706_v26 = vpop.f32.mrb[100].mxu1  ;;  %v11708_v0 = vpop.f32.mrb[101].mxu0  ;;  %v3663_v23 = vadd.f32 1.0, %v6822_v62  ;;  %6839 = vtanh.f32 %v11689_v20  ;;  %v3084_v46 = vadd.f32 %v11559_v31, %v14860_v4  ;;  %v11727_v32 = vmul.f32 %v3659_v34, %v11534_v17 }
 0x3e6   :  { %v6824_v3 = vpop.eup %6823  ;;  %v11713_v41 = vpop.f32.mrb[101].mxu1  ;;  %v11718_v2 = vmul.f32 0.5, %v3082_v39  ;;  %6841 = vtanh.f32 %v11700_v44  ;;  %v11733_v56 = vmul.f32 0.5, %v3275_v21  ;;  %v11738_v31 = vmul.f32 %v3661_v16, %v11540_v8  ;;  %v14861_v8 = vld [vmem:[#allocation112_spill] sm:$0xff] }
 0x3e7   :  { %v11715_v37 = vpop.f32.mrb[102].mxu0  ;;  %v6826_v57 = vpop.eup %6825  ;;  %v3665_v18 = vadd.f32 1.0, %v6824_v3  ;;  %v11730_v45 = vmul.f32 %v3663_v23, %v11598_v5  ;;  %6843 = vtanh.f32 %v11702_v55  ;;  %v11744_v17 = vmul.f32 0.5, %v3084_v46 }
 0x3e8   :  { %v11722_v28 = vpop.f32.mrb[102].mxu1  ;;  %v11724_v25 = vpop.f32.mrb[103].mxu0  ;;  %v11747_v5 = vmul.f32 %v3660_v27, %v11550_v15  ;;  %v11749_v3 = vadd.f32 1.0, %v6820_v42  ;;  %6845 = vtanh.f32 %v11718_v2  ;;  %v3277_v15 = vadd.f32 %v11566_v1, %v14860_v4 }
 0x3e9   :  { %v6828_v50 = vpop.eup %6827  ;;  %v11735_v47 = vpop.f32.mrb[103].mxu1  ;;  %v11741_v39 = vmul.f32 %v3665_v18, %v11605_v29  ;;  %v3664_v29 = vadd.f32 1.0, %v6826_v57  ;;  %6847 = vtanh.f32 %v11733_v56  ;;  %v3892_v42 = vpack.c.bf16 %v11667_v49, %v11644_v54  ;;  %v14863_v49 = vld [vmem:[#allocation66_spill] sm:$0xff] }
 0x3ea   :  { %v6830_v62 = vpop.eup %6829  ;;  %v3666_v16 = vadd.f32 1.0, %v6828_v50  ;;  %6849 = vtanh.f32 %v11744_v17  ;;  %v3894_v46 = vpack.c.bf16 %v11680_v30, %v11657_v63  ;;  %v3086_v57 = vadd.f32 %v11568_v38, %v14861_v8 }
 0x3eb   :  { %v6832_v34 = vpop.eup %6831  ;;  %v3667_v21 = vadd.f32 1.0, %v6830_v62  ;;  %v3279_v50 = vadd.f32 %v11580_v22, %v14861_v8  ;;  %v11774_v4 = vmul.f32 0.5, %v3277_v15  ;;  %4331 = vmatprep.subr.bf16.mxu0 %v3892_v42  ;;  %v3088_v54 = vadd.f32 %v11582_v36, %v14861_v8 }
 0x3ec   :  { %v11762_v27 = vpop.f32.mrb[104].mxu0  ;;  %v3669_v18 = vadd.f32 1.0, %v6832_v34  ;;  %v6834_v1 = vpop.eup %6833  ;;  %v3281_v63 = vadd.f32 %v11592_v13, %v14861_v8  ;;  %v3092_v38 = vadd.f32 %v11622_v53, %v14863_v49  ;;  %4524 = vmatprep.subr.bf16.mxu1 %v3894_v46  ;;  %v11789_v15 = vmul.f32 0.5, %v3086_v57 }
 0x3ed   :  { %v11770_v62 = vpop.f32.mrb[104].mxu1  ;;  %v11772_v23 = vpop.f32.mrb[105].mxu0  ;;  %v11791_v42 = vmul.f32 0.5, %v3279_v50  ;;  %v14865_v36 = vpack.c.bf16 %v11617_v12, %v11574_v6  ;;  %v3285_v13 = vadd.f32 %v11630_v9, %v14863_v49  ;;  %6851 = vtanh.f32 %v11774_v4 }
 0x3ee   :  { %14862 = vst [vmem:[#allocation121_spill] sm:$0xff] %v11772_v23  ;;  %v11782_v30 = vpop.f32.mrb[105].mxu1  ;;  %v11784_v22 = vpop.f32.mrb[106].mxu0  ;;  %v11787_v23 = vmul.f32 %v3664_v29, %v11607_v59  ;;  %v3794_v59 = vmul.f32 %v3666_v16, %v11612_v61  ;;  %v14866_v29 = vpack.c.bf16 %v11625_v24, %v11595_v19  ;;  %v11807_v46 = vmul.f32 0.5, %v3088_v54 }
 0x3ef   :  { %14864 = vst [vmem:[#allocation122_spill] sm:$0xff] %v11784_v22  ;;  %v6836_v34 = vpop.eup %6835  ;;  %4332 = vmatpush1.bf16.msra.mxu0 %v14865_v36  ;;  %v11798_v53 = vpop.f32.mrb[106].mxu1  ;;  %v11809_v6 = vmul.f32 0.5, %v3281_v63  ;;  %v11814_v57 = vmul.f32 %v3667_v21, %v11620_v33  ;;  %v11817_v50 = vmul.f32 %v3669_v18, %v11628_v48  ;;  %6853 = vtanh.f32 %v11789_v15 }
 0x3f0   :  { %v11800_v8 = vpop.f32.mrb[107].mxu0  ;;  %v6838_v22 = vpop.eup %6837  ;;  %4525 = vmatpush1.bf16.msra.mxu1 %v14866_v29  ;;  %6855 = vtanh.f32 %v11791_v42  ;;  %v11821_v19 = vmul.f32 0.5, %v3092_v38  ;;  %v11823_v24 = vmul.f32 0.5, %v3285_v13  ;;  %v3094_v48 = vadd.f32 %v11632_v7, %v14863_v49 }
 0x3f1   :  { %v11811_v12 = vpop.f32.mrb[107].mxu1  ;;  %v6840_v9 = vpop.eup %6839  ;;  %v3671_v61 = vadd.f32 1.0, %v6838_v22  ;;  %6857 = vtanh.f32 %v11807_v46  ;;  %v3287_v38 = vadd.f32 %v11639_v51, %v14863_v49  ;;  %v3790_v29 = vmul.f32 %v11749_v3, %v11576_v35 }
 0x3f2   :  { %v6842_v16 = vpop.eup %6841  ;;  %v3673_v36 = vadd.f32 1.0, %v6840_v9  ;;  %6859 = vtanh.f32 %v11809_v6  ;;  %v11841_v9 = vadd.f32 1.0, %v6834_v1  ;;  %v11864_v7 = vmul.f32 0.5, %v3094_v48 }
 0x3f3   :  { %v6844_v54 = vpop.eup %6843  ;;  %v11826_v63 = vmul.f32 %v3671_v61, %v11687_v52  ;;  %v3672_v33 = vadd.f32 1.0, %v6842_v16  ;;  %6861 = vtanh.f32 %v11821_v19 }
 0x3f4   :  { %v6846_v21 = vpop.eup %6845  ;;  %v11832_v18 = vmul.f32 %v3673_v36, %v11689_v20  ;;  %v3674_v22 = vadd.f32 1.0, %v6844_v54  ;;  %v11837_v13 = vpop.f32.mrb[108].mxu0  ;;  %v11849_v54 = vadd.f32 1.0, %v6836_v34  ;;  %v11866_v34 = vmul.f32 0.5, %v3287_v38 }
 0x3f5   :  { %v6848_v52 = vpop.eup %6847  ;;  %v3675_v61 = vadd.f32 1.0, %v6846_v21  ;;  %v11845_v20 = vpop.f32.mrb[108].mxu1  ;;  %v11854_v49 = vmul.f32 %v3672_v33, %v11700_v44  ;;  %6863 = vtanh.f32 %v11823_v24  ;;  %v3896_v44 = vpack.c.bf16 %v11787_v23, %v11747_v5  ;;  %v14872_v23 = vld [vmem:[#allocation74_spill] sm:$0xff] }
 0x3f6   :  { %v11847_v16 = vpop.f32.mrb[109].mxu0  ;;  %v6850_v36 = vpop.eup %6849  ;;  %v11862_v1 = vmul.f32 %v3674_v22, %v11702_v55  ;;  %v3677_v21 = vadd.f32 1.0, %v6848_v52  ;;  %v3898_v33 = vpack.c.bf16 %v3794_v59, %v3790_v29  ;;  %6865 = vtanh.f32 %v11864_v7 }
 0x3f7   :  { %14867 = vst [vmem:[#allocation123_spill] sm:$0xff] %v11847_v16  ;;  %v11857_v35 = vpop.f32.mrb[109].mxu1  ;;  %v11859_v3 = vpop.f32.mrb[110].mxu0  ;;  %v11880_v48 = vmul.f32 %v3675_v61, %v11718_v2  ;;  %v3676_v22 = vadd.f32 1.0, %v6850_v36  ;;  %4333 = vmatprep.subr.bf16.mxu0 %v3896_v44  ;;  %v3102_v2 = vadd.f32 %v11697_v11, %v14872_v23  ;;  %6867 = vtanh.f32 %v11866_v34 }
 0x3f8   :  { %14868 = vst [vmem:[#allocation124_spill] sm:$0xff] %v11857_v35  ;;  %14869 = vst [vmem:[#allocation154_spill] sm:$0xff] %v11859_v3  ;;  %v11868_v16 = vpop.f32.mrb[110].mxu1  ;;  %v11870_v51 = vpop.f32.mrb[111].mxu0  ;;  %v14871_v35 = vld [vmem:[#allocation67_spill] sm:$0xff]  ;;  %4526 = vmatprep.subr.bf16.mxu1 %v3898_v33  ;;  %v14874_v29 = vpack.c.bf16 %v11741_v39, %v11738_v31 }
 0x3f9   :  { %14870 = vst [vmem:[#allocation155_spill] sm:$0xff] %v11870_v51  ;;  %v3096_v3 = vadd.f32 %v11641_v58, %v14871_v35  ;;  %v11877_v55 = vpop.f32.mrb[111].mxu1  ;;  %v3289_v38 = vadd.f32 %v11649_v40, %v14871_v35  ;;  %v3098_v52 = vadd.f32 %v11651_v10, %v14871_v35  ;;  %v6852_v51 = vpop.eup %6851  ;;  %v3291_v58 = vadd.f32 %v11664_v43, %v14871_v35 }
 0x3fa   :  { %v6854_v59 = vpop.eup %6853  ;;  %v14873_v10 = vpack.c.bf16 %v11730_v45, %v11727_v32  ;;  %4527 = vmatpush1.bf16.msra.mxu1 %v14874_v29  ;;  %v3295_v43 = vadd.f32 %v11706_v26, %v14872_v23  ;;  %v11914_v45 = vmul.f32 %v3677_v21, %v11733_v56  ;;  %v3104_v56 = vadd.f32 %v11708_v0, %v14872_v23 }
 0x3fb   :  { %v11887_v5 = vmul.f32 0.5, %v3096_v3  ;;  %v11894_v40 = vmul.f32 0.5, %v3289_v38  ;;  %v11902_v61 = vmul.f32 0.5, %v3098_v52  ;;  %v6856_v36 = vpop.eup %6855  ;;  %v3679_v11 = vadd.f32 1.0, %v6854_v59 }
 0x3fc   :  { %4334 = vmatpush1.bf16.msra.mxu0 %v14873_v10  ;;  %v11907_v35 = vmul.f32 0.5, %v3291_v58  ;;  %v11909_v3 = vmul.f32 0.5, %v3102_v2  ;;  %v11911_v44 = vpop.f32.mrb[112].mxu0  ;;  %v6858_v32 = vpop.eup %6857  ;;  %v3681_v31 = vadd.f32 1.0, %v6856_v36  ;;  %v11917_v39 = vmul.f32 0.5, %v3295_v43 }
 0x3fd   :  { %6869 = vtanh.f32 %v11887_v5  ;;  %v11919_v26 = vpop.f32.mrb[112].mxu1  ;;  %v11921_v33 = vpop.f32.mrb[113].mxu0  ;;  %v3678_v52 = vadd.f32 1.0, %v6852_v51  ;;  %v11924_v58 = vmul.f32 %v3679_v11, %v11789_v15  ;;  %v3680_v10 = vadd.f32 1.0, %v6858_v32 }
 0x3fe   :  { %6871 = vtanh.f32 %v11894_v40  ;;  %v6860_v38 = vpop.eup %6859  ;;  %v11929_v21 = vpop.f32.mrb[113].mxu1  ;;  %v11934_v59 = vmul.f32 %v3681_v31, %v11791_v42  ;;  %v3297_v51 = vadd.f32 %v11713_v41, %v14872_v23  ;;  %v3796_v0 = vmul.f32 %v11841_v9, %v11671_v14 }
 0x3ff   :  { %6873 = vtanh.f32 %v11902_v61  ;;  %v11931_v2 = vpop.f32.mrb[114].mxu0  ;;  %v11939_v15 = vpop.f32.mrb[114].mxu1  ;;  %v3682_v11 = vadd.f32 1.0, %v6860_v38  ;;  %v3798_v32 = vmul.f32 %v11849_v54, %v11673_v60  ;;  %v11953_v41 = vmul.f32 %v3676_v22, %v11744_v17  ;;  %v14876_v54 = vld [vmem:[#allocation64_spill] sm:$0xff] }
 0x400   :  { %6875 = vtanh.f32 %v11907_v35  ;;  %v11941_v29 = vpop.f32.mrb[115].mxu0  ;;  %v6862_v43 = vpop.eup %6861  ;;  %v11959_v9 = vmul.f32 %v3678_v52, %v11774_v4  ;;  %v11961_v31 = vmul.f32 0.5, %v3104_v56  ;;  %v11963_v38 = vmul.f32 0.5, %v3297_v51 }
 0x401   :  { %6877 = vtanh.f32 %v11909_v3  ;;  %v11948_v42 = vpop.f32.mrb[115].mxu1  ;;  %v6864_v14 = vpop.eup %6863  ;;  %v3900_v36 = vpack.c.bf16 %v11854_v49, %v3796_v0  ;;  %v11967_v60 = vmul.f32 %v3680_v10, %v11807_v46  ;;  %v3902_v17 = vpack.c.bf16 %v11862_v1, %v3798_v32 }
 0x402   :  { %14875 = vst [vmem:[#allocation156_spill] sm:$0xff] %v11948_v42  ;;  %6879 = vtanh.f32 %v11917_v39  ;;  %v3106_v22 = vadd.f32 %v11715_v37, %v14876_v54  ;;  %v3299_v23 = vadd.f32 %v11722_v28, %v14876_v54  ;;  %v6866_v42 = vpop.eup %6865  ;;  %v11975_v4 = vmul.f32 %v3682_v11, %v11809_v6  ;;  %v14879_v11 = vld [vmem:[#allocation135_spill] sm:$0xff] }
 0x403   :  { %v3683_v52 = vadd.f32 1.0, %v6862_v43  ;;  %4335 = vmatprep.subr.bf16.mxu0 %v3900_v36  ;;  %v3108_v49 = vadd.f32 %v11724_v25, %v14876_v54  ;;  %v3301_v46 = vadd.f32 %v11735_v47, %v14876_v54  ;;  %v6868_v1 = vpop.eup %6867  ;;  %v3685_v10 = vadd.f32 1.0, %v6864_v14  ;;  %4528 = vmatprep.subr.bf16.mxu1 %v3902_v17 }
 0x404   :  { %v11981_v56 = vpop.f32.mrb[116].mxu0  ;;  %6881 = vtanh.f32 %v11961_v31  ;;  %v11984_v37 = vmul.f32 0.5, %v3106_v22  ;;  %v11986_v28 = vmul.f32 0.5, %v3299_v23  ;;  %v14877_v6 = vpack.c.bf16 %v11826_v63, %v11814_v57 }
 0x405   :  { %v11991_v51 = vpop.f32.mrb[116].mxu1  ;;  %v11993_v25 = vpop.f32.mrb[117].mxu0  ;;  %6883 = vtanh.f32 %v11963_v38  ;;  %v14878_v43 = vpack.c.bf16 %v11832_v18, %v11817_v50  ;;  %v11999_v0 = vmul.f32 0.5, %v3108_v49  ;;  %v12001_v36 = vmul.f32 0.5, %v3301_v46  ;;  %v14883_v46 = vld [vmem:[#allocation121_spill] sm:$0xff] }
 0x406   :  { %4336 = vmatpush1.bf16.msra.mxu0 %v14877_v6  ;;  %v3112_v32 = vadd.f32 %v11762_v27, %v14879_v11  ;;  %v12005_v57 = vpop.f32.mrb[117].mxu1  ;;  %v12007_v63 = vpop.f32.mrb[118].mxu0  ;;  %v3684_v14 = vadd.f32 1.0, %v6866_v42  ;;  %6885 = vtanh.f32 %v11984_v37  ;;  %v3305_v50 = vadd.f32 %v11770_v62, %v14879_v11 }
 0x407   :  { %v6870_v47 = vpop.eup %6869  ;;  %4529 = vmatpush1.bf16.msra.mxu1 %v14878_v43  ;;  %14880 = vst [vmem:[#allocation157_spill] sm:$0xff] %v12007_v63  ;;  %v12012_v18 = vpop.f32.mrb[118].mxu1  ;;  %6887 = vtanh.f32 %v11986_v28  ;;  %v3114_v6 = vadd.f32 %v14883_v46, %v14879_v11  ;;  %v12024_v43 = vmul.f32 %v3683_v52, %v11821_v19  ;;  %v12041_v52 = vadd.f32 1.0, %v6868_v1 }
 0x408   :  { %v6872_v23 = vpop.eup %6871  ;;  %v3687_v17 = vadd.f32 1.0, %v6870_v47  ;;  %14881 = vst [vmem:[#allocation128_spill] sm:$0xff] %v12012_v18  ;;  %v12014_v54 = vpop.f32.mrb[119].mxu0  ;;  %v12017_v27 = vmul.f32 0.5, %v3112_v32  ;;  %6889 = vtanh.f32 %v11999_v0  ;;  %v12033_v32 = vmul.f32 %v3685_v10, %v11823_v24 }
 0x409   :  { %14882 = vst [vmem:[#allocation129_spill] sm:$0xff] %v12014_v54  ;;  %v6874_v22 = vpop.eup %6873  ;;  %v3689_v49 = vadd.f32 1.0, %v6872_v23  ;;  %v12021_v42 = vpop.f32.mrb[119].mxu1  ;;  %v12030_v54 = vmul.f32 0.5, %v3305_v50  ;;  %6891 = vtanh.f32 %v12001_v36  ;;  %v12039_v46 = vmul.f32 0.5, %v3114_v6 }
 0x40a   :  { %14884 = vst [vmem:[#allocation24_spill] sm:$0xff] %v12021_v42  ;;  %v6876_v47 = vpop.eup %6875  ;;  %v12027_v62 = vmul.f32 %v3687_v17, %v11887_v5  ;;  %v3688_v17 = vadd.f32 1.0, %v6874_v22  ;;  %6893 = vtanh.f32 %v12017_v27  ;;  %v2770_v50 = vpop.permute.xlu0 %2769  ;;  %v12047_v24 = vmul.f32 %v3684_v14, %v11864_v7  ;;  %v14887_v42 = vld [vmem:[#allocation122_spill] sm:$0xff] }
 0x40b   :  { %v6878_v23 = vpop.eup %6877  ;;  %v12036_v18 = vmul.f32 %v3689_v49, %v11894_v40  ;;  %v3690_v10 = vadd.f32 1.0, %v6876_v47  ;;  %6895 = vtanh.f32 %v12030_v54  ;;  %v3307_v22 = vadd.f32 %v11782_v30, %v14879_v11  ;;  %v14886_v40 = vld [vmem:[#allocation65_spill] sm:$0xff] }
 0x40c   :  { %v6880_v19 = vpop.eup %6879  ;;  %v12052_v49 = vpop.f32.mrb[120].mxu0  ;;  %v3691_v1 = vadd.f32 1.0, %v6878_v23  ;;  %6897 = vtanh.f32 %v12039_v46  ;;  %v3904_v6 = vpack.c.bf16 %v11967_v60, %v11953_v41  ;;  %v3906_v47 = vpack.c.bf16 %v11975_v4, %v11959_v9 }
 0x40d   :  { %14885 = vst [vmem:[#allocation126_spill] sm:$0xff] %v12052_v49  ;;  %v12059_v5 = vpop.f32.mrb[120].mxu1  ;;  %v12061_v7 = vpop.f32.mrb[121].mxu0  ;;  %v3693_v14 = vadd.f32 1.0, %v6880_v19  ;;  %v3116_v49 = vadd.f32 %v14887_v42, %v14886_v40  ;;  %v3309_v23 = vadd.f32 %v11798_v53, %v14886_v40  ;;  %v12074_v41 = vmul.f32 %v3688_v17, %v11902_v61 }
 0x40e   :  { %v12069_v63 = vpop.f32.mrb[121].mxu1  ;;  %v12071_v30 = vpop.f32.mrb[122].mxu0  ;;  %v12076_v60 = vmul.f32 0.5, %v3307_v22  ;;  %4337 = vmatprep.subr.bf16.mxu0 %v3904_v6  ;;  %v3118_v9 = vadd.f32 %v11800_v8, %v14886_v40  ;;  %v3311_v4 = vadd.f32 %v11811_v12, %v14886_v40  ;;  %4530 = vmatprep.subr.bf16.mxu1 %v3906_v47  ;;  %v14889_v22 = vpack.c.bf16 %v11924_v58, %v11880_v48 }
 0x40f   :  { %14888 = vst [vmem:[#allocation29_spill] sm:$0xff] %v12071_v30  ;;  %v6882_v11 = vpop.eup %6881  ;;  %v12082_v42 = vpop.f32.mrb[122].mxu1  ;;  %v12087_v30 = vmul.f32 %v3690_v10, %v11907_v35  ;;  %v12089_v61 = vmul.f32 0.5, %v3116_v49  ;;  %v12091_v17 = vmul.f32 0.5, %v3309_v23  ;;  %v3122_v8 = vadd.f32 %v11837_v13, %v2770_v50 }
 0x410   :  { %v12084_v53 = vpop.f32.mrb[123].mxu0  ;;  %v6884_v19 = vpop.eup %6883  ;;  %4338 = vmatpush1.bf16.msra.mxu0 %v14889_v22  ;;  %v12100_v6 = vmul.f32 %v3691_v1, %v11909_v3  ;;  %6899 = vtanh.f32 %v12076_v60  ;;  %v14891_v35 = vpack.c.bf16 %v11934_v59, %v11914_v45  ;;  %v12106_v10 = vmul.f32 0.5, %v3118_v9  ;;  %v14892_v59 = vld [vmem:[#allocation123_spill] sm:$0xff] }
 0x411   :  { %v12097_v12 = vpop.f32.mrb[123].mxu1  ;;  %v6886_v40 = vpop.eup %6885  ;;  %v12108_v49 = vmul.f32 0.5, %v3311_v4  ;;  %v12111_v58 = vmul.f32 %v3693_v14, %v11917_v39  ;;  %6901 = vtanh.f32 %v12089_v61  ;;  %v12114_v47 = vmul.f32 0.5, %v3122_v8  ;;  %v14893_v39 = vld [vmem:[#allocation124_spill] sm:$0xff] }
 0x412   :  { %14890 = vst [vmem:[#allocation130_spill] sm:$0xff] %v12097_v12  ;;  %4531 = vmatpush1.bf16.msra.mxu1 %v14891_v35  ;;  %v6888_v48 = vpop.eup %6887  ;;  %v3695_v13 = vadd.f32 1.0, %v6886_v40  ;;  %6903 = vtanh.f32 %v12091_v17  ;;  %v3315_v45 = vadd.f32 %v11845_v20, %v2770_v50  ;;  %v3124_v23 = vadd.f32 %v14892_v59, %v2770_v50 }
 0x413   :  { %v6890_v3 = vpop.eup %6889  ;;  %v3697_v1 = vadd.f32 1.0, %v6888_v48  ;;  %6905 = vtanh.f32 %v12106_v10  ;;  %v3317_v14 = vadd.f32 %v14893_v39, %v2770_v50  ;;  %v3692_v50 = vadd.f32 1.0, %v6882_v11  ;;  %v2775_v11 = vpop.permute.xlu1 %2774 }
 0x414   :  { %v6892_v9 = vpop.eup %6891  ;;  %v12120_v4 = vmul.f32 %v3695_v13, %v11984_v37  ;;  %v3696_v22 = vadd.f32 1.0, %v6890_v3  ;;  %v12124_v40 = vpop.f32.mrb[124].mxu0  ;;  %6907 = vtanh.f32 %v12108_v49  ;;  %v12130_v20 = vmul.f32 0.5, %v3315_v45 }
 0x415   :  { %14894 = vst [vmem:[#allocation127_spill] sm:$0xff] %v12124_v40  ;;  %v6894_v8 = vpop.eup %6893  ;;  %v12127_v35 = vmul.f32 %v3697_v1, %v11986_v28  ;;  %v3698_v48 = vadd.f32 1.0, %v6892_v9  ;;  %v12132_v59 = vpop.f32.mrb[124].mxu1  ;;  %v3814_v3 = vmul.f32 %v12041_v52, %v11866_v34  ;;  %v3694_v45 = vadd.f32 1.0, %v6884_v19 }
 0x416   :  { %14895 = vst [vmem:[#allocation11_spill] sm:$0xff] %v12132_v59  ;;  %v12134_v37 = vpop.f32.mrb[125].mxu0  ;;  %v6896_v13 = vpop.eup %6895  ;;  %v3699_v40 = vadd.f32 1.0, %v6894_v8  ;;  %6909 = vtanh.f32 %v12114_v47  ;;  %v12159_v19 = vmul.f32 0.5, %v3317_v14  ;;  %v14902_v59 = vld [vmem:[#allocation154_spill] sm:$0xff]  ;;  %v14903_v14 = vld [vmem:[#allocation155_spill] sm:$0xff] }
 0x417   :  { %14896 = vst [vmem:[#allocation131_spill] sm:$0xff] %v12134_v37  ;;  %v12140_v28 = vpop.f32.mrb[125].mxu1  ;;  %v12142_v1 = vpop.f32.mrb[126].mxu0  ;;  %v12147_v37 = vmul.f32 %v3696_v22, %v11999_v0  ;;  %v12155_v8 = vmul.f32 %v3698_v48, %v12001_v36  ;;  %v3701_v39 = vadd.f32 1.0, %v6896_v13  ;;  %6911 = vtanh.f32 %v12130_v20 }
 0x418   :  { %14897 = vst [vmem:[#allocation72_spill] sm:$0xff] %v12140_v28  ;;  %14898 = vst [vmem:[#allocation141_spill] sm:$0xff] %v12142_v1  ;;  %v6898_v9 = vpop.eup %6897  ;;  %v12150_v34 = vpop.f32.mrb[126].mxu1  ;;  %v12157_v1 = vmul.f32 0.5, %v3124_v23  ;;  %v3908_v0 = vpack.c.bf16 %v12074_v41, %v12047_v24  ;;  %v3910_v22 = vpack.c.bf16 %v12087_v30, %v3814_v3  ;;  %v12169_v36 = vmul.f32 %v3699_v40, %v12017_v27 }
 0x419   :  { %14899 = vst [vmem:[#allocation118_spill] sm:$0xff] %v12150_v34  ;;  %v12152_v52 = vpop.f32.mrb[127].mxu0  ;;  %v12161_v28 = vpop.f32.mrb[127].mxu1  ;;  %v3700_v48 = vadd.f32 1.0, %v6898_v9  ;;  %v3319_v23 = vadd.f32 %v11868_v16, %v2775_v11  ;;  %v3128_v13 = vadd.f32 %v14903_v14, %v2775_v11  ;;  %v3321_v24 = vadd.f32 %v11877_v55, %v2775_v11 }
 0x41a   :  { %14900 = vst [vmem:[#allocation143_spill] sm:$0xff] %v12152_v52  ;;  %14901 = vst [vmem:[#allocation77_spill] sm:$0xff] %v12161_v28  ;;  %v3126_v52 = vadd.f32 %v14902_v59, %v2775_v11  ;;  %v2780_v34 = vpop.permute.xlu0 %2779  ;;  %v6900_v12 = vpop.eup %6899  ;;  %6913 = vtanh.f32 %v12157_v1  ;;  %4339 = vmatprep.subr.bf16.mxu0 %v3908_v0  ;;  %4532 = vmatprep.subr.bf16.mxu1 %v3910_v22  ;;  %v14904_v16 = vpack.c.bf16 %v12027_v62, %v12024_v43 }
 0x41b   :  { %v3132_v30 = vadd.f32 %v11911_v44, %v2780_v34  ;;  %v6902_v41 = vpop.eup %6901  ;;  %6915 = vtanh.f32 %v12159_v19  ;;  %v12179_v27 = vmul.f32 0.5, %v3319_v23  ;;  %v14905_v40 = vpack.c.bf16 %v12036_v18, %v12033_v32 }
 0x41c   :  { %v12174_v28 = vmul.f32 0.5, %v3126_v52  ;;  %4340 = vmatpush1.bf16.msra.mxu0 %v14904_v16  ;;  %v12187_v59 = vmul.f32 0.5, %v3128_v13  ;;  %v3325_v3 = vadd.f32 %v11919_v26, %v2780_v34  ;;  %v6904_v55 = vpop.eup %6903  ;;  %v3703_v9 = vadd.f32 1.0, %v6902_v41 }
 0x41d   :  { %4533 = vmatpush1.bf16.msra.mxu1 %v14905_v40  ;;  %v12191_v44 = vmul.f32 0.5, %v3321_v24  ;;  %v12193_v52 = vmul.f32 0.5, %v3132_v30  ;;  %v6906_v11 = vpop.eup %6905  ;;  %v12196_v43 = vmul.f32 %v3701_v39, %v12030_v54  ;;  %v3705_v62 = vadd.f32 1.0, %v6904_v55  ;;  %v14906_v55 = vld [vmem:[#allocation156_spill] sm:$0xff] }
 0x41e   :  { %6917 = vtanh.f32 %v12174_v28  ;;  %v12199_v18 = vmul.f32 0.5, %v3325_v3  ;;  %v6908_v32 = vpop.eup %6907  ;;  %v3702_v0 = vadd.f32 1.0, %v6900_v12  ;;  %v12202_v26 = vmul.f32 %v3703_v9, %v12089_v61 }
 0x41f   :  { %6919 = vtanh.f32 %v12179_v27  ;;  %v3134_v22 = vadd.f32 %v11921_v33, %v2780_v34  ;;  %v12207_v23 = vmul.f32 %v3705_v62, %v12091_v17  ;;  %v3704_v14 = vadd.f32 1.0, %v6906_v11  ;;  %v2790_v11 = vpop.permute.xlu0 %2789 }
 0x420   :  { %6921 = vtanh.f32 %v12187_v59  ;;  %v3327_v54 = vadd.f32 %v11929_v21, %v2780_v34  ;;  %v6910_v39 = vpop.eup %6909  ;;  %v3820_v13 = vmul.f32 %v3692_v50, %v11961_v31  ;;  %v3915_v12 = vpack.c.bf16 %v12202_v26, %v12169_v36  ;;  %v2785_v34 = vpop.permute.xlu1 %2784 }
 0x421   :  { %6923 = vtanh.f32 %v12191_v44  ;;  %v3706_v61 = vadd.f32 1.0, %v6908_v32  ;;  %v3822_v24 = vmul.f32 %v3694_v45, %v11963_v38  ;;  %v12217_v33 = vmul.f32 %v3700_v48, %v12039_v46  ;;  %v6912_v21 = vpop.eup %6911 }
 0x422   :  { %6925 = vtanh.f32 %v12193_v52  ;;  %v3917_v17 = vpack.c.bf16 %v12207_v23, %v12196_v43  ;;  %v12223_v31 = vmul.f32 %v3702_v0, %v12076_v60  ;;  %v12225_v50 = vmul.f32 0.5, %v3134_v22 }
 0x423   :  { %6927 = vtanh.f32 %v12199_v18  ;;  %v12227_v30 = vmul.f32 0.5, %v3327_v54  ;;  %v3912_v41 = vpack.c.bf16 %v12147_v37, %v3820_v13  ;;  %v12231_v38 = vmul.f32 %v3704_v14, %v12106_v10 }
 0x424   :  { %v3914_v46 = vpack.c.bf16 %v12155_v8, %v3822_v24  ;;  %v3136_v45 = vadd.f32 %v11931_v2, %v2785_v34  ;;  %v3329_v48 = vadd.f32 %v11939_v15, %v2785_v34  ;;  %v6914_v16 = vpop.eup %6913  ;;  %v12237_v40 = vmul.f32 %v3706_v61, %v12108_v49 }
 0x425   :  { %v3707_v60 = vadd.f32 1.0, %v6910_v39  ;;  %4341 = vmatprep.subr.bf16.mxu0 %v3912_v41  ;;  %v3138_v3 = vadd.f32 %v11941_v29, %v2785_v34  ;;  %v3331_v9 = vadd.f32 %v14906_v55, %v2785_v34  ;;  %v6916_v37 = vpop.eup %6915  ;;  %v3709_v10 = vadd.f32 1.0, %v6912_v21 }
 0x426   :  { %6929 = vtanh.f32 %v12225_v50  ;;  %4534 = vmatprep.subr.bf16.mxu1 %v3914_v46  ;;  %v12242_v8 = vmul.f32 0.5, %v3136_v45  ;;  %v12244_v2 = vmul.f32 0.5, %v3329_v48  ;;  %v14907_v15 = vpack.c.bf16 %v12120_v4, %v12100_v6  ;;  %v2795_v48 = vpop.permute.xlu1 %2794 }
 0x427   :  { %6931 = vtanh.f32 %v12227_v30  ;;  %v14908_v29 = vpack.c.bf16 %v12127_v35, %v12111_v58  ;;  %v12253_v62 = vmul.f32 0.5, %v3138_v3  ;;  %v12255_v32 = vmul.f32 0.5, %v3331_v9  ;;  %v14909_v9 = vld [vmem:[#allocation157_spill] sm:$0xff] }
 0x428   :  { %4342 = vmatpush1.bf16.msra.mxu0 %v14907_v15  ;;  %v6918_v49 = vpop.eup %6917  ;;  %v3142_v0 = vadd.f32 %v11981_v56, %v2790_v11  ;;  %v3708_v14 = vadd.f32 1.0, %v6914_v16  ;;  %6933 = vtanh.f32 %v12242_v8  ;;  %v3335_v6 = vadd.f32 %v11991_v51, %v2790_v11 }
 0x429   :  { %4535 = vmatpush1.bf16.msra.mxu1 %v14908_v29  ;;  %v6920_v22 = vpop.eup %6919  ;;  %v3711_v54 = vadd.f32 1.0, %v6918_v49  ;;  %6935 = vtanh.f32 %v12244_v2  ;;  %v3144_v58 = vadd.f32 %v11993_v25, %v2790_v11  ;;  %v12265_v61 = vmul.f32 %v3707_v60, %v12114_v47  ;;  %v2800_v29 = vpop.permute.xlu0 %2799 }
 0x42a   :  { %v6922_v4 = vpop.eup %6921  ;;  %v3713_v39 = vadd.f32 1.0, %v6920_v22  ;;  %v12261_v13 = vmul.f32 0.5, %v3142_v0  ;;  %6937 = vtanh.f32 %v12253_v62  ;;  %v12271_v24 = vmul.f32 0.5, %v3335_v6 }
 0x42b   :  { %v6924_v35 = vpop.eup %6923  ;;  %v12268_v56 = vmul.f32 %v3711_v54, %v12174_v28  ;;  %v12274_v21 = vmul.f32 %v3709_v10, %v12130_v20  ;;  %6939 = vtanh.f32 %v12255_v32  ;;  %v12280_v25 = vmul.f32 0.5, %v3144_v58  ;;  %v14910_v10 = vld [vmem:[#allocation128_spill] sm:$0xff] }
 0x42c   :  { %v6926_v51 = vpop.eup %6925  ;;  %v12277_v34 = vmul.f32 %v3713_v39, %v12179_v27  ;;  %v3710_v41 = vadd.f32 1.0, %v6916_v37  ;;  %v3712_v46 = vadd.f32 1.0, %v6922_v4  ;;  %6941 = vtanh.f32 %v12261_v13 }
 0x42d   :  { %v6928_v47 = vpop.eup %6927  ;;  %v3919_v28 = vpack.c.bf16 %v12268_v56, %v12265_v61  ;;  %v12286_v45 = vmul.f32 %v3708_v14, %v12157_v1  ;;  %v3714_v27 = vadd.f32 1.0, %v6924_v35  ;;  %6943 = vtanh.f32 %v12271_v24  ;;  %v14912_v14 = vld [vmem:[#allocation24_spill] sm:$0xff] }
 0x42e   :  { %v3921_v20 = vpack.c.bf16 %v12277_v34, %v12274_v21  ;;  %v3715_v16 = vadd.f32 1.0, %v6926_v51  ;;  %6945 = vtanh.f32 %v12280_v25  ;;  %v3337_v60 = vadd.f32 %v12005_v57, %v2790_v11  ;;  %v14911_v57 = vld [vmem:[#allocation129_spill] sm:$0xff] }
 0x42f   :  { %v3916_v3 = vpack.c.bf16 %v12231_v38, %v12217_v33  ;;  %v3717_v55 = vadd.f32 1.0, %v6928_v47  ;;  %v3918_v1 = vpack.c.bf16 %v12237_v40, %v12223_v31  ;;  %v3146_v37 = vadd.f32 %v14909_v9, %v2795_v48 }
 0x430   :  { %v3339_v15 = vadd.f32 %v14910_v10, %v2795_v48  ;;  %v6930_v49 = vpop.eup %6929  ;;  %v12300_v0 = vmul.f32 %v3712_v46, %v12187_v59  ;;  %v12302_v22 = vmul.f32 0.5, %v3337_v60  ;;  %v3148_v11 = vadd.f32 %v14911_v57, %v2795_v48  ;;  %v14913_v59 = vld [vmem:[#allocation126_spill] sm:$0xff]  ;;  %v14914_v57 = vld [vmem:[#allocation29_spill] sm:$0xff] }
 0x431   :  { %4343 = vmatprep.subr.bf16.mxu0 %v3916_v3  ;;  %v3341_v33 = vadd.f32 %v14912_v14, %v2795_v48  ;;  %v6932_v38 = vpop.eup %6931  ;;  %v3842_v54 = vmul.f32 %v3714_v27, %v12191_v44  ;;  %4536 = vmatprep.subr.bf16.mxu1 %v3918_v1  ;;  %v12307_v31 = vmul.f32 0.5, %v3146_v37  ;;  %v3152_v6 = vadd.f32 %v14913_v59, %v2800_v29  ;;  %v2805_v37 = vpop.permute.xlu1 %2804 }
 0x432   :  { %v12309_v40 = vmul.f32 0.5, %v3339_v15  ;;  %4344 = vmatpush1.bf16.msra.mxu0 %v3915_v12  ;;  %v6934_v4 = vpop.eup %6933  ;;  %v12316_v39 = vmul.f32 %v3715_v16, %v12193_v52  ;;  %6947 = vtanh.f32 %v12302_v22  ;;  %4537 = vmatpush1.bf16.msra.mxu1 %v3917_v17  ;;  %v12322_v44 = vmul.f32 0.5, %v3148_v11  ;;  %v2810_v11 = vpop.permute.xlu0 %2809 }
 0x433   :  { %v12324_v58 = vmul.f32 0.5, %v3341_v33  ;;  %v6936_v35 = vpop.eup %6935  ;;  %v12327_v36 = vmul.f32 %v3717_v55, %v12199_v18  ;;  %v3719_v26 = vadd.f32 1.0, %v6934_v4  ;;  %6949 = vtanh.f32 %v12307_v31 }
 0x434   :  { %v12330_v12 = vmul.f32 0.5, %v3152_v6  ;;  %v6938_v52 = vpop.eup %6937  ;;  %v3721_v51 = vadd.f32 1.0, %v6936_v35  ;;  %6951 = vtanh.f32 %v12309_v40  ;;  %v3345_v43 = vadd.f32 %v12059_v5, %v2800_v29 }
 0x435   :  { %v3154_v23 = vadd.f32 %v12061_v7, %v2800_v29  ;;  %v6940_v17 = vpop.eup %6939  ;;  %v12336_v47 = vmul.f32 %v3719_v26, %v12242_v8  ;;  %v3720_v46 = vadd.f32 1.0, %v6938_v52  ;;  %6953 = vtanh.f32 %v12322_v44 }
 0x436   :  { %v3347_v18 = vadd.f32 %v12069_v63, %v2800_v29  ;;  %v6942_v27 = vpop.eup %6941  ;;  %v12341_v48 = vmul.f32 %v3721_v51, %v12244_v2  ;;  %v3722_v16 = vadd.f32 1.0, %v6940_v17  ;;  %6955 = vtanh.f32 %v12324_v58  ;;  %v14917_v51 = vld [vmem:[#allocation11_spill] sm:$0xff] }
 0x437   :  { %v12344_v60 = vmul.f32 0.5, %v3345_v43  ;;  %v6944_v5 = vpop.eup %6943  ;;  %v3838_v7 = vmul.f32 %v3710_v41, %v12159_v19  ;;  %v3716_v3 = vadd.f32 1.0, %v6930_v49  ;;  %v3923_v8 = vpack.c.bf16 %v12336_v47, %v12316_v39 }
 0x438   :  { %v3723_v55 = vadd.f32 1.0, %v6942_v27  ;;  %v6946_v1 = vpop.eup %6945  ;;  %v3718_v9 = vadd.f32 1.0, %v6932_v38  ;;  %v3925_v63 = vpack.c.bf16 %v12341_v48, %v12327_v36  ;;  %v12352_v2 = vmul.f32 %v3720_v46, %v12253_v62 }
 0x439   :  { %6957 = vtanh.f32 %v12330_v12  ;;  %v12356_v10 = vmul.f32 %v3722_v16, %v12255_v32  ;;  %v3725_v19 = vadd.f32 1.0, %v6944_v5  ;;  %v12358_v41 = vmul.f32 0.5, %v3154_v23  ;;  %v14919_v16 = vld [vmem:[#allocation72_spill] sm:$0xff] }
 0x43a   :  { %v12360_v15 = vmul.f32 0.5, %v3347_v18  ;;  %6959 = vtanh.f32 %v12344_v60  ;;  %v3920_v49 = vpack.c.bf16 %v12300_v0, %v12286_v45  ;;  %v3922_v29 = vpack.c.bf16 %v3842_v54, %v3838_v7  ;;  %v14915_v45 = vld [vmem:[#allocation130_spill] sm:$0xff]  ;;  %v14916_v54 = vld [vmem:[#allocation127_spill] sm:$0xff] }
 0x43b   :  { %v3156_v62 = vadd.f32 %v14914_v57, %v2805_v37  ;;  %v12367_v14 = vmul.f32 %v3723_v55, %v12261_v13  ;;  %v3724_v33 = vadd.f32 1.0, %v6946_v1  ;;  %v3349_v32 = vadd.f32 %v12082_v42, %v2805_v37 }
 0x43c   :  { %v3158_v38 = vadd.f32 %v12084_v53, %v2805_v37  ;;  %v6948_v59 = vpop.eup %6947  ;;  %6961 = vtanh.f32 %v12358_v41  ;;  %4345 = vmatprep.subr.bf16.mxu0 %v3920_v49  ;;  %4538 = vmatprep.subr.bf16.mxu1 %v3922_v29  ;;  %v3351_v0 = vadd.f32 %v14915_v45, %v2805_v37  ;;  %v3162_v4 = vadd.f32 %v14916_v54, %v2810_v11  ;;  %v14923_v45 = vld [vmem:[#allocation77_spill] sm:$0xff] }
 0x43d   :  { %v12372_v6 = vmul.f32 0.5, %v3156_v62  ;;  %v6950_v35 = vpop.eup %6949  ;;  %v12377_v13 = vmul.f32 %v3725_v19, %v12271_v24  ;;  %6963 = vtanh.f32 %v12360_v15  ;;  %v12380_v42 = vmul.f32 0.5, %v3349_v32  ;;  %4346 = vmatpush1.bf16.msra.mxu0 %v3919_v28  ;;  %4539 = vmatpush1.bf16.msra.mxu1 %v3921_v20  ;;  %v14918_v28 = vld [vmem:[#allocation131_spill] sm:$0xff]  ;;  %v2815_v62 = vpop.permute.xlu1 %2814 }
 0x43e   :  { %v12388_v53 = vmul.f32 0.5, %v3158_v38  ;;  %v6952_v26 = vpop.eup %6951  ;;  %v3727_v52 = vadd.f32 1.0, %v6950_v35  ;;  %v12391_v24 = vmul.f32 0.5, %v3351_v0  ;;  %v3355_v43 = vadd.f32 %v14917_v51, %v2810_v11  ;;  %v14922_v38 = vld [vmem:[#allocation143_spill] sm:$0xff] }
 0x43f   :  { %6965 = vtanh.f32 %v12372_v6  ;;  %v6954_v23 = vpop.eup %6953  ;;  %v3726_v17 = vadd.f32 1.0, %v6948_v59  ;;  %v3729_v46 = vadd.f32 1.0, %v6952_v26  ;;  %v12395_v61 = vmul.f32 0.5, %v3162_v4 }
 0x440   :  { %6967 = vtanh.f32 %v12380_v42  ;;  %v6956_v56 = vpop.eup %6955  ;;  %v3855_v21 = vmul.f32 %v3727_v52, %v12307_v31  ;;  %v3728_v34 = vadd.f32 1.0, %v6954_v23  ;;  %v3164_v20 = vadd.f32 %v14918_v28, %v2810_v11 }
 0x441   :  { %6969 = vtanh.f32 %v12388_v53  ;;  %v12401_v18 = vmul.f32 %v3729_v46, %v12309_v40  ;;  %v3730_v27 = vadd.f32 1.0, %v6956_v56  ;;  %v3357_v5 = vadd.f32 %v14919_v16, %v2810_v11 }
 0x442   :  { %6971 = vtanh.f32 %v12391_v24  ;;  %v3844_v55 = vmul.f32 %v3716_v3, %v12225_v50  ;;  %v3846_v1 = vmul.f32 %v3718_v9, %v12227_v30  ;;  %v3927_v31 = vpack.c.bf16 %v3855_v21, %v12367_v14  ;;  %v14921_v14 = vld [vmem:[#allocation118_spill] sm:$0xff] }
 0x443   :  { %v6958_v7 = vpop.eup %6957  ;;  %v12408_v37 = vmul.f32 0.5, %v3355_v43  ;;  %v3852_v19 = vmul.f32 %v3724_v33, %v12280_v25  ;;  %v3854_v49 = vmul.f32 %v3726_v17, %v12302_v22  ;;  %v3929_v40 = vpack.c.bf16 %v12401_v18, %v12377_v13  ;;  %v14920_v22 = vld [vmem:[#allocation141_spill] sm:$0xff] }
 0x444   :  { %v3856_v29 = vmul.f32 %v3728_v34, %v12322_v44  ;;  %v6960_v57 = vpop.eup %6959  ;;  %6973 = vtanh.f32 %v12395_v61  ;;  %v12416_v50 = vmul.f32 0.5, %v3164_v20  ;;  %v12418_v30 = vmul.f32 0.5, %v3357_v5 }
 0x445   :  { %v3924_v3 = vpack.c.bf16 %v12352_v2, %v3844_v55  ;;  %v3858_v9 = vmul.f32 %v3730_v27, %v12324_v58  ;;  %v3926_v25 = vpack.c.bf16 %v12356_v10, %v3846_v1  ;;  %v3166_v11 = vadd.f32 %v14920_v22, %v2815_v62 }
 0x446   :  { %v3359_v33 = vadd.f32 %v14921_v14, %v2815_v62  ;;  %v6962_v32 = vpop.eup %6961  ;;  %v3731_v44 = vadd.f32 1.0, %v6958_v7  ;;  %6975 = vtanh.f32 %v12408_v37  ;;  %v3168_v59 = vadd.f32 %v14922_v38, %v2815_v62  ;;  %v5249_v38 = vld [vmem:[%s14008_s11 + $0xe0] sm:$0xff] }
 0x447   :  { %4347 = vmatprep.subr.bf16.mxu0 %v3924_v3  ;;  %v3361_v0 = vadd.f32 %v14923_v45, %v2815_v62  ;;  %v6964_v54 = vpop.eup %6963  ;;  %v3733_v4 = vadd.f32 1.0, %v6960_v57  ;;  %6977 = vtanh.f32 %v12416_v50  ;;  %4540 = vmatprep.subr.bf16.mxu1 %v3926_v25  ;;  %v3487_v58 = vmul.f32 0.5, %v3166_v11  ;;  %v5251_v45 = vld [vmem:[%s14008_s11 + $0xf0] sm:$0xff] }
 0x448   :  { %v3489_v2 = vmul.f32 0.5, %v3359_v33  ;;  %4348 = vmatpush1.bf16.msra.mxu0 %v3923_v8  ;;  %6979 = vtanh.f32 %v12418_v30  ;;  %4541 = vmatpush1.bf16.msra.mxu1 %v3925_v63  ;;  %v3488_v35 = vmul.f32 0.5, %v3168_v59  ;;  %v3928_v26 = vpack.c.bf16 %v3856_v29, %v3852_v19 }
 0x449   :  { %v6966_v10 = vpop.eup %6965  ;;  %v3490_v13 = vmul.f32 0.5, %v3361_v0  ;;  %v3732_v51 = vadd.f32 1.0, %v6962_v32  ;;  %6981 = vtanh.f32 %v3487_v58  ;;  %v3930_v23 = vpack.c.bf16 %v3858_v9, %v3854_v49  ;;  %5802 = vperm.xlu0 %6297, %v5249_v38   ;;  %5395 = vperm.xlu1 %6299, %v5249_v38   ;;  %v5252_v0 = vld [vmem:[%s14008_s11 + $0xf8] sm:$0xff] }
 0x44a   :  { %v6968_v52 = vpop.eup %6967  ;;  %v3735_v43 = vadd.f32 1.0, %v6966_v10  ;;  %v3734_v46 = vadd.f32 1.0, %v6964_v54  ;;  %6983 = vtanh.f32 %v3489_v2  ;;  %4349 = vmatprep.subr.bf16.mxu0 %v3928_v26  ;;  %v3859_v47 = vmul.f32 %v3731_v44, %v12330_v12  ;;  %v6370_v54 = vld [vmem:[%s14006_s9 + $0x10] ss:$8 sps:$4 sm:$0xff]   ;;  %v6374_v10 = vld [vmem:[%s14006_s9 + $0x34] ss:$8 sps:$4 sm:$0xff]  }
 0x44b   :  { %v6970_v17 = vpop.eup %6969  ;;  %v3737_v56 = vadd.f32 1.0, %v6968_v52  ;;  %6985 = vtanh.f32 %v3488_v35  ;;  %4542 = vmatprep.subr.bf16.mxu1 %v3930_v23  ;;  %v3861_v48 = vmul.f32 %v3733_v4, %v12344_v60  ;;  %v3860_v34 = vmul.f32 %v3732_v51, %v12358_v41  ;;  %v6371_v4 = vld [vmem:[%s14006_s9 + $0x24] ss:$8 sps:$4 sm:$0xff]   ;;  %v6379_v26 = vld [vmem:[%s14006_s9 + $0x40] ss:$8 sps:$4 sm:$0xff]  }
 0x44c   :  { %v6972_v39 = vpop.eup %6971  ;;  %v3863_v8 = vmul.f32 %v3735_v43, %v12372_v6  ;;  %v3736_v36 = vadd.f32 1.0, %v6970_v17  ;;  %4350 = vmatpush1.bf16.msra.mxu0 %v3927_v31  ;;  %6987 = vtanh.f32 %v3490_v13  ;;  %4543 = vmatpush1.bf16.msra.mxu1 %v3929_v40  ;;  %v3862_v12 = vmul.f32 %v3734_v46, %v12360_v15  ;;  %v6380_v52 = vld [vmem:[%s14006_s9 + $0x54] ss:$8 sps:$4 sm:$0xff]   ;;  %v6382_v51 = vld [vmem:[%s14006_s9 + $0x50] ss:$8 sps:$4 sm:$0xff]   ;;  %v12503_v46 = vpop.permute.xlu0 %4005 }
 0x44d   :  { %v3865_v63 = vmul.f32 %v3737_v56, %v12380_v42  ;;  %v3738_v21 = vadd.f32 1.0, %v6972_v39  ;;  %v6383_v43 = vld [vmem:[%s14006_s9 + $0x64] ss:$8 sps:$4 sm:$0xff]   ;;  %v6385_v23 = vld [vmem:[%s14006_s9 + $0x60] ss:$8 sps:$4 sm:$0xff]  }
 0x44e   :  { %v3931_v28 = vpack.c.bf16 %v3863_v8, %v3859_v47  ;;  %v3864_v20 = vmul.f32 %v3736_v36, %v12388_v53  ;;  %v6974_v18 = vpop.eup %6973  ;;  %v6386_v17 = vld [vmem:[%s14006_s9 + $0x74] ss:$8 sps:$4 sm:$0xff]   ;;  %v6388_v56 = vld [vmem:[%s14006_s9 + $0x70] ss:$8 sps:$4 sm:$0xff]   ;;  %v6389_v39 = vld [vmem:[%s14006_s9 + $0x84] ss:$8 sps:$4 sm:$0xff]  }
 0x44f   :  { %v3933_v6 = vpack.c.bf16 %v3865_v63, %v3861_v48  ;;  %v3866_v27 = vmul.f32 %v3738_v21, %v12391_v24  ;;  %v3739_v55 = vadd.f32 1.0, %v6974_v18  ;;  %v6391_v36 = vld [vmem:[%s14006_s9 + $0x80] ss:$8 sps:$4 sm:$0xff]   ;;  %v12518_v48 = vpop.permute.xlu1 %4010  ;;  %v6392_v63 = vld [vmem:[%s14006_s9 + $0x94] ss:$8 sps:$4 sm:$0xff]  }
 0x450   :  { %v3932_v16 = vpack.c.bf16 %v3864_v20, %v3860_v34  ;;  %v6976_v5 = vpop.eup %6975  ;;  %v12511_v47 = vpop.permute.xlu0 %4015  ;;  %v6395_v20 = vld [vmem:[%s14006_s9 + $0xa4] ss:$8 sps:$4 sm:$0xff]  }
 0x451   :  { %v3934_v7 = vpack.c.bf16 %v3866_v27, %v3862_v12  ;;  %v6978_v60 = vpop.eup %6977  ;;  %v3741_v41 = vadd.f32 1.0, %v6976_v5  ;;  %v3867_v24 = vmul.f32 %v3739_v55, %v12395_v61  ;;  %v6398_v27 = vld [vmem:[%s14006_s9 + $0xb4] ss:$8 sps:$4 sm:$0xff]   ;;  %v6401_v55 = vld [vmem:[%s14006_s9 + $0xc4] ss:$8 sps:$4 sm:$0xff]  }
 0x452   :  { %4351 = vmatprep.subr.bf16.mxu0 %v3932_v16  ;;  %v6980_v42 = vpop.eup %6979  ;;  %v3740_v53 = vadd.f32 1.0, %v6978_v60  ;;  %v6400_v60 = vld [vmem:[%s14006_s9 + $0xb0] ss:$8 sps:$4 sm:$0xff]  }
 0x453   :  { %4544 = vmatprep.subr.bf16.mxu1 %v3934_v7  ;;  %4352 = vmatpush1.bf16.msra.mxu0 %v3931_v28  ;;  %v6982_v1 = vpop.eup %6981  ;;  %v3742_v15 = vadd.f32 1.0, %v6980_v42  ;;  %v3869_v3 = vmul.f32 %v3741_v41, %v12408_v37  ;;  %v5250_v37 = vld [vmem:[%s14008_s11 + $0xe8] sm:$0xff]  ;;  %v12525_v34 = vpop.permute.xlu1 %4020  ;;  %v6394_v28 = vld [vmem:[%s14006_s9 + $0x90] ss:$8 sps:$4 sm:$0xff]  }
 0x454   :  { %4545 = vmatpush1.bf16.msra.mxu1 %v3933_v6  ;;  %v6984_v31 = vpop.eup %6983  ;;  %v3743_v19 = vadd.f32 1.0, %v6982_v1  ;;  %v3868_v22 = vmul.f32 %v3740_v53, %v12416_v50  ;;  %v6365_v50 = vld [vmem:[%s14006_s9] ss:$8 sps:$4 sm:$0xff]   ;;  %5806 = vperm.xlu0 %6297, %v5250_v37   ;;  %v12513_v8 = vpop.permute.xlu0 %4025  ;;  %v6404_v53 = vld [vmem:[%s14006_s9 + $0xd4] ss:$8 sps:$4 sm:$0xff]  }
 0x455   :  { %v6986_v49 = vpop.eup %6985  ;;  %v3745_v40 = vadd.f32 1.0, %v6984_v31  ;;  %v3870_v33 = vmul.f32 %v3742_v15, %v12418_v30  ;;  %v6368_v30 = vld [vmem:[%s14006_s9 + $0x14] ss:$8 sps:$4 sm:$0xff]   ;;  %5400 = vperm.xlu1 %6299, %v5250_v37   ;;  %v6397_v6 = vld [vmem:[%s14006_s9 + $0xa0] ss:$8 sps:$4 sm:$0xff]  }
 0x456   :  { %v6988_v29 = vpop.eup %6987  ;;  %v3871_v57 = vmul.f32 %v3743_v19, %v3487_v58  ;;  %v3744_v62 = vadd.f32 1.0, %v6986_v49  ;;  %v14924_v58 = vmov 0   ;;  %v6403_v31 = vld [vmem:[%s14006_s9 + $0xc0] ss:$8 sps:$4 sm:$0xff]   ;;  %v6406_v15 = vld [vmem:[%s14006_s9 + $0xd0] ss:$8 sps:$4 sm:$0xff]  }
 0x457   :  { %v3873_v9 = vmul.f32 %v3745_v40, %v3489_v2  ;;  %v3746_v25 = vadd.f32 1.0, %v6988_v29  ;;  %v6373_v2 = vld [vmem:[%s14006_s9 + $0x20] ss:$8 sps:$4 sm:$0xff]   ;;  %v12535_v12 = vpop.permute.xlu1 %4030  ;;  %v6407_v40 = vld [vmem:[%s14006_s9 + $0xe4] ss:$8 sps:$4 sm:$0xff]  }
 0x458   :  { %v3935_v11 = vpack.c.bf16 %v3871_v57, %v3867_v24  ;;  %v3872_v14 = vmul.f32 %v3744_v62, %v3488_v35  ;;  %5810 = vperm.xlu0 %6297, %v5251_v45   ;;  %v6376_v35 = vld [vmem:[%s14006_s9 + $0x30] ss:$8 sps:$4 sm:$0xff]   ;;  %v12523_v21 = vpop.permute.xlu0 %4035  ;;  %v6409_v62 = vld [vmem:[%s14006_s9 + $0xe0] ss:$8 sps:$4 sm:$0xff]  }
 0x459   :  { %v3937_v32 = vpack.c.bf16 %v3873_v9, %v3869_v3  ;;  %v3874_v44 = vmul.f32 %v3746_v25, %v3490_v13  ;;  %5405 = vperm.xlu1 %6299, %v5251_v45   ;;  %v6377_v13 = vld [vmem:[%s14006_s9 + $0x44] ss:$8 sps:$4 sm:$0xff]   ;;  %v6410_v9 = vld [vmem:[%s14006_s9 + $0xf4] ss:$8 sps:$4 sm:$0xff]   ;;  %v6098_v25 = vld [vmem:[%s14009_s12] sm:$0x3] }
 0x45a   :  { %v3936_v59 = vpack.c.bf16 %v3872_v14, %v3868_v22  ;;  %v6412_v14 = vld [vmem:[%s14006_s9 + $0xf0] ss:$8 sps:$4 sm:$0xff]   ;;  %s7289_s9 = smov [#allocation2]  }
 0x45b   :  { %v3938_v61 = vpack.c.bf16 %v3874_v44, %v3870_v33  ;;  %v12545_v5 = vpop.permute.xlu1 %4040  ;;  %s6137_s12 = sshll.u32 %s7289_s9, 4  ;;  %s6138_s12 = int_to_ptr.vmem [resolvable:$true] %s6137_s12 }
 0x45c   :  { %4353 = vmatprep.subr.bf16.mxu0 %v3936_v59  ;;  %5814 = vperm.xlu0 %6297, %v5252_v0   ;;  %v12533_v18 = vpop.permute.xlu0 %4045  ;;  %s7262_s21 = scalar_lea.vmem %s6138_s12, 128  ;;  %p7267_p1 = scmp.lt.s32.totalorder %s6138_s12, %s6138_s12 }
 0x45d   :  { %4546 = vmatprep.subr.bf16.mxu1 %v3938_v61  ;;  %4354 = vmatpush1.bf16.msra.mxu0 %v3935_v11  ;;  %p7263_p0 = scmp.ne.s32.totalorder %s6138_s12, %s7262_s21  ;;  %p7268_p2 = scmp.lt.s32.totalorder %s7262_s21, %s7262_s21 }
 0x45e   :  { %4547 = vmatpush1.bf16.msra.mxu1 %v3937_v32  ;;  %5410 = vperm.xlu1 %6299, %v5252_v0  }
 0x45f   :  { %v12552_v42 = vpop.permute.xlu1 %4050  ;;  %p7269_p3 = por %p7268_p2, %p7267_p1 }
 0x460   :  { %4356 = vmatmul.mubr.bf16.vlgmr.msra.gmra.mrb[128].mxu0 %v6365_v50  ;;  %6300 = vset.pattern.permute.xlu0 %v14924_v58  ;;  %v12543_v16 = vpop.permute.xlu0 %4055  ;;  %14927 = vst [vmem:[#allocation145_spill] sm:$0xff] %v12552_v42 }
 0x461   :  { %4549 = vmatmul.mubr.bf16.vlgmr.msra.gmra.mrb[128].mxu1 %v6365_v50  ;;  %4365 = vmatprep.mubr.bf16.mxu0 %v6368_v30  ;;  %14925 = vst [vmem:[#allocation144_spill] sm:$0xff] %v12543_v16  ;;  %p7270_p4 = pnand %p7269_p3, %p7263_p0 }
 0x462   :  { %4558 = vmatprep.mubr.bf16.mxu1 %v6368_v30  ;;  %6101 = vperm.xlu1 %6299, %v6098_v25  }
 0x463   :  { %v12559_v41 = vpop.permute.xlu1 %4060 }
 0x464   :  { %v12547_v7 = vpop.permute.xlu0 %4065  ;;  %14929 = vst [vmem:[#allocation146_spill] sm:$0xff] %v12559_v41 }
 0x465   :  { %14926 = vst [vmem:[#allocation76_spill] sm:$0xff] %v12547_v7 }
 0x467   :  { %v12569_v49 = vpop.permute.xlu1 %4070 }
 0x468   :  { %4366 = vmatmul.mubr.bf16.gmra.mrb[132].mxu0 %v6370_v54  ;;  %v12557_v1 = vpop.permute.xlu0 %4075  ;;  %14931 = vst [vmem:[#allocation148_spill] sm:$0xff] %v12569_v49 }
 0x469   :  { %4559 = vmatmul.mubr.bf16.gmra.mrb[132].mxu1 %v6370_v54  ;;  %4375 = vmatprep.mubr.bf16.mxu0 %v6371_v4  ;;  %14928 = vst [vmem:[#allocation79_spill] sm:$0xff] %v12557_v1 }
 0x46a   :  { %4568 = vmatprep.mubr.bf16.mxu1 %v6371_v4 }
 0x46b   :  { %v12579_v24 = vpop.permute.xlu1 %4080 }
 0x46c   :  { %v12567_v19 = vpop.permute.xlu0 %4085  ;;  %14933 = vst [vmem:[#allocation159_spill] sm:$0xff] %v12579_v24 }
 0x46d   :  { %14930 = vst [vmem:[#allocation78_spill] sm:$0xff] %v12567_v19 }
 0x46f   :  { %v12586_v3 = vpop.permute.xlu1 %4090 }
 0x470   :  { %4376 = vmatmul.mubr.bf16.gmra.mrb[136].mxu0 %v6373_v2  ;;  %v12577_v29 = vpop.permute.xlu0 %4095  ;;  %14935 = vst [vmem:[#allocation165_spill] sm:$0xff] %v12586_v3 }
 0x471   :  { %4569 = vmatmul.mubr.bf16.gmra.mrb[136].mxu1 %v6373_v2  ;;  %4385 = vmatprep.mubr.bf16.mxu0 %v6374_v10  ;;  %14932 = vst [vmem:[#allocation132_spill] sm:$0xff] %v12577_v29 }
 0x472   :  { %4578 = vmatprep.mubr.bf16.mxu1 %v6374_v10 }
 0x473   :  { %v12596_v11 = vpop.permute.xlu1 %4100 }
 0x474   :  { %v12581_v57 = vpop.permute.xlu0 %4105  ;;  %14937 = vst [vmem:[#allocation158_spill] sm:$0xff] %v12596_v11 }
 0x475   :  { %14934 = vst [vmem:[#allocation164_spill] sm:$0xff] %v12581_v57 }
 0x477   :  { %v12603_v32 = vpop.permute.xlu1 %4110 }
 0x478   :  { %4386 = vmatmul.mubr.bf16.gmra.mrb[140].mxu0 %v6376_v35  ;;  %v12594_v22 = vpop.permute.xlu0 %4115  ;;  %14939 = vst [vmem:[#allocation28_spill] sm:$0xff] %v12603_v32 }
 0x479   :  { %4579 = vmatmul.mubr.bf16.gmra.mrb[140].mxu1 %v6376_v35  ;;  %4395 = vmatprep.mubr.bf16.mxu0 %v6377_v13  ;;  %14936 = vst [vmem:[#allocation166_spill] sm:$0xff] %v12594_v22 }
 0x47a   :  { %4588 = vmatprep.mubr.bf16.mxu1 %v6377_v13 }
 0x47b   :  { %v12607_v38 = vpop.permute.xlu1 %4120 }
 0x47c   :  { %v12601_v33 = vpop.permute.xlu0 %4125  ;;  %14941 = vst [vmem:[#allocation80_spill] sm:$0xff] %v12607_v38 }
 0x47d   :  { %14938 = vst [vmem:[#allocation160_spill] sm:$0xff] %v12601_v33 }
 0x47f   :  { %v12611_v61 = vpop.permute.xlu1 %4130 }
 0x480   :  { %4396 = vmatmul.mubr.bf16.gmra.mrb[144].mxu0 %v6379_v26  ;;  %v12605_v44 = vpop.permute.xlu0 %4135  ;;  %14943 = vst [vmem:[#allocation161_spill] sm:$0xff] %v12611_v61 }
 0x481   :  { %4589 = vmatmul.mubr.bf16.gmra.mrb[144].mxu1 %v6379_v26  ;;  %4405 = vmatprep.mubr.bf16.mxu0 %v6380_v52  ;;  %14940 = vst [vmem:[#allocation149_spill] sm:$0xff] %v12605_v44 }
 0x482   :  { %4598 = vmatprep.mubr.bf16.mxu1 %v6380_v52 }
 0x483   :  { %v12615_v50 = vpop.permute.xlu1 %4140 }
 0x484   :  { %v12609_v59 = vpop.permute.xlu0 %4145  ;;  %14945 = vst [vmem:[#allocation134_spill] sm:$0xff] %v12615_v50 }
 0x485   :  { %14942 = vst [vmem:[#allocation31_spill] sm:$0xff] %v12609_v59 }
 0x487   :  { %v12619_v45 = vpop.permute.xlu1 %4150 }
 0x488   :  { %4406 = vmatmul.mubr.bf16.gmra.mrb[148].mxu0 %v6382_v51  ;;  %v12613_v37 = vpop.permute.xlu0 %4155  ;;  %14946 = vst [vmem:[#allocation162_spill] sm:$0xff] %v12619_v45 }
 0x489   :  { %4599 = vmatmul.mubr.bf16.gmra.mrb[148].mxu1 %v6382_v51  ;;  %4415 = vmatprep.mubr.bf16.mxu0 %v6383_v43  ;;  %14944 = vst [vmem:[#allocation150_spill] sm:$0xff] %v12613_v37 }
 0x48a   :  { %4608 = vmatprep.mubr.bf16.mxu1 %v6383_v43 }
 0x48b   :  { %v12623_v54 = vpop.permute.xlu1 %4160 }
 0x48c   :  { %v12617_v30 = vpop.permute.xlu0 %5255  ;;  %14947 = vst [vmem:[#allocation82_spill] sm:$0xff] %v12623_v54 }
 0x48f   :  { %v12627_v58 = vpop.permute.xlu1 %5260 }
 0x490   :  { %4416 = vmatmul.mubr.bf16.gmra.mrb[152].mxu0 %v6385_v23  ;;  %v12621_v0 = vpop.permute.xlu0 %5265 }
 0x491   :  { %4609 = vmatmul.mubr.bf16.gmra.mrb[152].mxu1 %v6385_v23  ;;  %4425 = vmatprep.mubr.bf16.mxu0 %v6386_v17 }
 0x492   :  { %4618 = vmatprep.mubr.bf16.mxu1 %v6386_v17 }
 0x493   :  { %v12631_v10 = vpop.permute.xlu1 %5270 }
 0x494   :  { %v12625_v4 = vpop.permute.xlu0 %5275 }
 0x497   :  { %v12635_v13 = vpop.permute.xlu1 %5280 }
 0x498   :  { %4426 = vmatmul.mubr.bf16.gmra.mrb[156].mxu0 %v6388_v56  ;;  %v12629_v2 = vpop.permute.xlu0 %5285 }
 0x499   :  { %4619 = vmatmul.mubr.bf16.gmra.mrb[156].mxu1 %v6388_v56  ;;  %4435 = vmatprep.mubr.bf16.mxu0 %v6389_v39 }
 0x49a   :  { %4628 = vmatprep.mubr.bf16.mxu1 %v6389_v39 }
 0x49b   :  { %v12639_v52 = vpop.permute.xlu1 %5290 }
 0x49c   :  { %v12633_v35 = vpop.permute.xlu0 %5295 }
 0x49d   :  { %14948 = vst [vmem:[#allocation83_spill] sm:$0xff] %v12633_v35 }
 0x49f   :  { %v12643_v43 = vpop.permute.xlu1 %5300 }
 0x4a0   :  { %4436 = vmatmul.mubr.bf16.gmra.mrb[160].mxu0 %v6391_v36  ;;  %v12637_v26 = vpop.permute.xlu0 %5305  ;;  %14951 = vst [vmem:[#allocation170_spill] sm:$0xff] %v12643_v43 }
 0x4a1   :  { %4629 = vmatmul.mubr.bf16.gmra.mrb[160].mxu1 %v6391_v36  ;;  %4445 = vmatprep.mubr.bf16.mxu0 %v6392_v63  ;;  %14949 = vst [vmem:[#allocation167_spill] sm:$0xff] %v12637_v26 }
 0x4a2   :  { %4638 = vmatprep.mubr.bf16.mxu1 %v6392_v63 }
 0x4a3   :  { %v12647_v17 = vpop.permute.xlu1 %5310 }
 0x4a4   :  { %v12641_v51 = vpop.permute.xlu0 %5315  ;;  %14953 = vst [vmem:[#allocation171_spill] sm:$0xff] %v12647_v17 }
 0x4a5   :  { %14950 = vst [vmem:[#allocation136_spill] sm:$0xff] %v12641_v51 }
 0x4a7   :  { %v12651_v39 = vpop.permute.xlu1 %5320 }
 0x4a8   :  { %4446 = vmatmul.mubr.bf16.gmra.mrb[164].mxu0 %v6394_v28  ;;  %v12645_v23 = vpop.permute.xlu0 %5325  ;;  %14955 = vst [vmem:[#allocation172_spill] sm:$0xff] %v12651_v39 }
 0x4a9   :  { %4639 = vmatmul.mubr.bf16.gmra.mrb[164].mxu1 %v6394_v28  ;;  %4455 = vmatprep.mubr.bf16.mxu0 %v6395_v20  ;;  %14952 = vst [vmem:[#allocation25_spill] sm:$0xff] %v12645_v23 }
 0x4aa   :  { %4648 = vmatprep.mubr.bf16.mxu1 %v6395_v20 }
 0x4ab   :  { %v12655_v63 = vpop.permute.xlu1 %5330 }
 0x4ac   :  { %v12649_v56 = vpop.permute.xlu0 %5335  ;;  %14957 = vst [vmem:[#allocation176_spill] sm:$0xff] %v12655_v63 }
 0x4ad   :  { %14954 = vst [vmem:[#allocation15_spill] sm:$0xff] %v12649_v56 }
 0x4af   :  { %v12659_v20 = vpop.permute.xlu1 %5340 }
 0x4b0   :  { %4456 = vmatmul.mubr.bf16.gmra.mrb[168].mxu0 %v6397_v6  ;;  %v12653_v36 = vpop.permute.xlu0 %5345  ;;  %14959 = vst [vmem:[#allocation177_spill] sm:$0xff] %v12659_v20 }
 0x4b1   :  { %4649 = vmatmul.mubr.bf16.gmra.mrb[168].mxu1 %v6397_v6  ;;  %4465 = vmatprep.mubr.bf16.mxu0 %v6398_v27  ;;  %14956 = vst [vmem:[#allocation85_spill] sm:$0xff] %v12653_v36 }
 0x4b2   :  { %4658 = vmatprep.mubr.bf16.mxu1 %v6398_v27 }
 0x4b3   :  { %v12663_v27 = vpop.permute.xlu1 %5350 }
 0x4b4   :  { %v12657_v28 = vpop.permute.xlu0 %5355  ;;  %14961 = vst [vmem:[#allocation169_spill] sm:$0xff] %v12663_v27 }
 0x4b5   :  { %14958 = vst [vmem:[#allocation84_spill] sm:$0xff] %v12657_v28 }
 0x4b8   :  { %4466 = vmatmul.mubr.bf16.gmra.mrb[172].mxu0 %v6400_v60  ;;  %v12661_v6 = vpop.permute.xlu0 %5365 }
 0x4b9   :  { %4659 = vmatmul.mubr.bf16.gmra.mrb[172].mxu1 %v6400_v60  ;;  %4475 = vmatprep.mubr.bf16.mxu0 %v6401_v55  ;;  %14960 = vst [vmem:[#allocation59_spill] sm:$0xff] %v12661_v6 }
 0x4ba   :  { %4668 = vmatprep.mubr.bf16.mxu1 %v6401_v55 }
 0x4c0   :  { %4476 = vmatmul.mubr.bf16.gmra.mrb[176].mxu0 %v6403_v31 }
 0x4c1   :  { %4669 = vmatmul.mubr.bf16.gmra.mrb[176].mxu1 %v6403_v31  ;;  %4485 = vmatprep.mubr.bf16.mxu0 %v6404_v53 }
 0x4c2   :  { %4678 = vmatprep.mubr.bf16.mxu1 %v6404_v53 }
 0x4c8   :  { %4486 = vmatmul.mubr.bf16.gmra.mrb[180].mxu0 %v6406_v15 }
 0x4c9   :  { %4679 = vmatmul.mubr.bf16.gmra.mrb[180].mxu1 %v6406_v15  ;;  %4495 = vmatprep.mubr.bf16.mxu0 %v6407_v40 }
 0x4ca   :  { %4688 = vmatprep.mubr.bf16.mxu1 %v6407_v40 }
 0x4d0   :  { %4496 = vmatmul.mubr.bf16.gmra.mrb[184].mxu0 %v6409_v62 }
 0x4d1   :  { %4689 = vmatmul.mubr.bf16.gmra.mrb[184].mxu1 %v6409_v62  ;;  %4505 = vmatprep.mubr.bf16.mxu0 %v6410_v9 }
 0x4d2   :  { %4698 = vmatprep.mubr.bf16.mxu1 %v6410_v9 }
 0x4d8   :  { %4506 = vmatmul.mubr.bf16.gmra.mrb[188].mxu0 %v6412_v14 }
 0x4d9   :  { %4699 = vmatmul.mubr.bf16.gmra.mrb[188].mxu1 %v6412_v14 }
 0x533   :  { %v4357_v60 = vpop.f32.mrb[128].mxu0 }
 0x534   :  { %v4358_v55 = vadd.f32 %v4357_v60, %v12503_v46  ;;  %v4550_v31 = vpop.f32.mrb[128].mxu1  ;;  %v4359_v53 = vpop.f32.mrb[129].mxu0 }
 0x535   :  { %v4551_v15 = vadd.f32 %v4550_v31, %v12503_v46  ;;  %v4360_v40 = vadd.f32 %v4359_v53, %v12503_v46  ;;  %v4552_v62 = vpop.f32.mrb[129].mxu1  ;;  %v4361_v9 = vpop.f32.mrb[130].mxu0 }
 0x536   :  { %v12668_v25 = vmul.f32 0.5, %v4358_v55  ;;  %v4553_v14 = vadd.f32 %v4552_v62, %v12503_v46  ;;  %v4362_v54 = vadd.f32 %v4361_v9, %v12518_v48  ;;  %v4554_v37 = vpop.f32.mrb[130].mxu1  ;;  %v4363_v45 = vpop.f32.mrb[131].mxu0 }
 0x537   :  { %v12672_v59 = vmul.f32 0.5, %v4551_v15  ;;  %v12674_v50 = vmul.f32 0.5, %v4360_v40  ;;  %v4555_v60 = vadd.f32 %v4554_v37, %v12518_v48  ;;  %v4364_v31 = vadd.f32 %v4363_v45, %v12518_v48  ;;  %v4556_v44 = vpop.f32.mrb[131].mxu1  ;;  %v12684_v62 = vpop.permute.xlu0 %5375 }
 0x538   :  { %6989 = vtanh.f32 %v12668_v25  ;;  %v12679_v53 = vmul.f32 0.5, %v4553_v14  ;;  %v12681_v55 = vmul.f32 0.5, %v4362_v54  ;;  %v4557_v46 = vadd.f32 %v4556_v44, %v12518_v48  ;;  %14962 = vst [vmem:[#allocation173_spill] sm:$0xff] %v12684_v62  ;;  %v12692_v45 = vpop.permute.xlu1 %5360 }
 0x539   :  { %6991 = vtanh.f32 %v12672_v59  ;;  %v12687_v15 = vmul.f32 0.5, %v4555_v60  ;;  %v12690_v37 = vmul.f32 0.5, %v4364_v31  ;;  %14963 = vst [vmem:[#allocation174_spill] sm:$0xff] %v12692_v45 }
 0x53a   :  { %6993 = vtanh.f32 %v12674_v50  ;;  %v12695_v40 = vmul.f32 0.5, %v4557_v46 }
 0x53b   :  { %6995 = vtanh.f32 %v12679_v53  ;;  %v4367_v54 = vpop.f32.mrb[132].mxu0  ;;  %v12707_v38 = vpop.permute.xlu0 %5385 }
 0x53c   :  { %6997 = vtanh.f32 %v12681_v55  ;;  %v4368_v48 = vadd.f32 %v4367_v54, %v12511_v47  ;;  %v4560_v44 = vpop.f32.mrb[132].mxu1  ;;  %v4369_v9 = vpop.f32.mrb[133].mxu0  ;;  %14964 = vst [vmem:[#allocation175_spill] sm:$0xff] %v12707_v38 }
 0x53d   :  { %6999 = vtanh.f32 %v12687_v15  ;;  %v4561_v14 = vadd.f32 %v4560_v44, %v12511_v47  ;;  %v4370_v60 = vadd.f32 %v4369_v9, %v12511_v47  ;;  %v4562_v31 = vpop.f32.mrb[133].mxu1  ;;  %v4371_v62 = vpop.f32.mrb[134].mxu0 }
 0x53e   :  { %7001 = vtanh.f32 %v12690_v37  ;;  %v12703_v61 = vmul.f32 0.5, %v4368_v48  ;;  %v4563_v46 = vadd.f32 %v4562_v31, %v12511_v47  ;;  %v4372_v33 = vadd.f32 %v4371_v62, %v12525_v34  ;;  %v4564_v6 = vpop.f32.mrb[134].mxu1  ;;  %v4373_v54 = vpop.f32.mrb[135].mxu0 }
 0x53f   :  { %7003 = vtanh.f32 %v12695_v40  ;;  %v12710_v45 = vmul.f32 0.5, %v4561_v14  ;;  %v12712_v44 = vmul.f32 0.5, %v4370_v60  ;;  %v4565_v9 = vadd.f32 %v4564_v6, %v12525_v34  ;;  %v4566_v28 = vpop.f32.mrb[135].mxu1  ;;  %v12725_v60 = vpop.permute.xlu1 %5370 }
 0x540   :  { %7005 = vtanh.f32 %v12703_v61  ;;  %v12716_v48 = vmul.f32 0.5, %v4563_v46  ;;  %v12718_v47 = vmul.f32 0.5, %v4372_v33  ;;  %v4374_v62 = vadd.f32 %v4373_v54, %v12525_v34  ;;  %14965 = vst [vmem:[#allocation181_spill] sm:$0xff] %v12725_v60  ;;  %v5691_v33 = vpop.permute.xlu0 %5690 }
 0x541   :  { %7007 = vtanh.f32 %v12710_v45  ;;  %v12722_v31 = vmul.f32 0.5, %v4565_v9  ;;  %v4567_v14 = vadd.f32 %v4566_v28, %v12525_v34 }
 0x542   :  { %v6990_v38 = vpop.eup %6989  ;;  %7009 = vtanh.f32 %v12712_v44  ;;  %v12728_v6 = vmul.f32 0.5, %v4374_v62 }
 0x543   :  { %v6992_v27 = vpop.eup %6991  ;;  %v4965_v46 = vadd.f32 1.0, %v6990_v38  ;;  %7011 = vtanh.f32 %v12716_v48  ;;  %v4377_v22 = vpop.f32.mrb[136].mxu0  ;;  %v12732_v9 = vmul.f32 0.5, %v4567_v14 }
 0x544   :  { %v6994_v54 = vpop.eup %6993  ;;  %v4967_v32 = vadd.f32 1.0, %v6992_v27  ;;  %7013 = vtanh.f32 %v12718_v47  ;;  %v4378_v34 = vadd.f32 %v4377_v22, %v12513_v8  ;;  %v4570_v28 = vpop.f32.mrb[136].mxu1 }
 0x545   :  { %v12735_v60 = vpop.f32.mrb[137].mxu0  ;;  %v6996_v36 = vpop.eup %6995  ;;  %v5093_v62 = vmul.f32 %v4965_v46, %v12668_v25  ;;  %v4966_v57 = vadd.f32 1.0, %v6994_v54  ;;  %7015 = vtanh.f32 %v12722_v31  ;;  %v12740_v38 = vadd.f32 %v4570_v28, %v12513_v8 }
 0x546   :  { %v12742_v20 = vpop.f32.mrb[137].mxu1  ;;  %v12744_v27 = vpop.f32.mrb[138].mxu0  ;;  %v5095_v11 = vmul.f32 %v4967_v32, %v12672_v59  ;;  %v4968_v22 = vadd.f32 1.0, %v6996_v36  ;;  %7017 = vtanh.f32 %v12728_v6  ;;  %v12748_v56 = vmul.f32 0.5, %v4378_v34 }
 0x547   :  { %v6998_v14 = vpop.eup %6997  ;;  %v12750_v63 = vpop.f32.mrb[138].mxu1  ;;  %v5413_v54 = vmul.f32 %v12617_v30, %v5093_v62  ;;  %v5094_v28 = vmul.f32 %v4966_v57, %v12674_v50  ;;  %v12756_v3 = vmul.f32 %v5691_v33, %v5093_v62  ;;  %7019 = vtanh.f32 %v12732_v9 }
 0x548   :  { %v12752_v25 = vpop.f32.mrb[139].mxu0  ;;  %v7000_v46 = vpop.eup %6999  ;;  %v4969_v29 = vadd.f32 1.0, %v6998_v14  ;;  %v5415_v59 = vmul.f32 %v12617_v30, %v5095_v11  ;;  %v5096_v36 = vmul.f32 %v4968_v22, %v12679_v53  ;;  %v12762_v19 = vmul.f32 %v5691_v33, %v5095_v11 }
 0x549   :  { %v12758_v23 = vpop.f32.mrb[139].mxu1  ;;  %v7002_v32 = vpop.eup %7001  ;;  %v4971_v34 = vadd.f32 1.0, %v7000_v46  ;;  %v5414_v39 = vmul.f32 %v12617_v30, %v5094_v28  ;;  %v12768_v50 = vmul.f32 %v5691_v33, %v5094_v28  ;;  %7021 = vtanh.f32 %v12748_v56 }
 0x54a   :  { %v7004_v24 = vpop.eup %7003  ;;  %v12766_v51 = vmul.f32 %v4969_v29, %v12681_v55  ;;  %v4970_v57 = vadd.f32 1.0, %v7002_v32  ;;  %v5416_v14 = vmul.f32 %v12617_v30, %v5096_v36  ;;  %v12774_v53 = vmul.f32 %v5691_v33, %v5096_v36  ;;  %v12776_v22 = vpop.permute.xlu1 %5380 }
 0x54b   :  { %v7006_v62 = vpop.eup %7005  ;;  %v12772_v17 = vmul.f32 %v4971_v34, %v12687_v15  ;;  %v4972_v1 = vadd.f32 1.0, %v7004_v24  ;;  %14966 = vst [vmem:[#allocation185_spill] sm:$0xff] %v12776_v22  ;;  %v12784_v28 = vpop.f32.mrb[140].mxu0  ;;  %v12833_v42 = vmul.f32 0.5, %v12740_v38 }
 0x54c   :  { %v7008_v11 = vpop.eup %7007  ;;  %v5417_v46 = vmul.f32 %v12627_v58, %v12766_v51  ;;  %v12781_v29 = vmul.f32 %v4970_v57, %v12690_v37  ;;  %v4973_v55 = vadd.f32 1.0, %v7006_v62  ;;  %v12792_v32 = vpop.f32.mrb[140].mxu1 }
 0x54d   :  { %v7010_v30 = vpop.eup %7009  ;;  %v5419_v24 = vmul.f32 %v12627_v58, %v12772_v17  ;;  %v12789_v15 = vmul.f32 %v4972_v1, %v12695_v40  ;;  %v4975_v33 = vadd.f32 1.0, %v7008_v11  ;;  %v12794_v36 = vpop.f32.mrb[141].mxu0  ;;  %7023 = vtanh.f32 %v12833_v42 }
 0x54e   :  { %v7012_v37 = vpop.eup %7011  ;;  %v5541_v34 = vadd.f32 %v5417_v46, %v5413_v54  ;;  %v5418_v57 = vmul.f32 %v12627_v58, %v12781_v29  ;;  %v12799_v62 = vmul.f32 %v4973_v55, %v12703_v61  ;;  %v4974_v22 = vadd.f32 1.0, %v7010_v30  ;;  %v12801_v49 = vpop.f32.mrb[141].mxu1 }
 0x54f   :  { %v12803_v1 = vpop.f32.mrb[142].mxu0  ;;  %v7014_v40 = vpop.eup %7013  ;;  %v5615_v11 = vadd.f32 %v5419_v24, %v5415_v59  ;;  %v5420_v26 = vmul.f32 %v12627_v58, %v12789_v15  ;;  %v12808_v7 = vmul.f32 %v4975_v33, %v12710_v45  ;;  %v4976_v54 = vadd.f32 1.0, %v7012_v37 }
 0x550   :  { %v12810_v46 = vpop.f32.mrb[142].mxu1  ;;  %v12812_v41 = vpop.f32.mrb[143].mxu0  ;;  %v5578_v55 = vadd.f32 %v5418_v57, %v5414_v39  ;;  %v5421_v30 = vmul.f32 %v12621_v0, %v12799_v62  ;;  %v12817_v43 = vmul.f32 %v4974_v22, %v12712_v44  ;;  %v4977_v59 = vadd.f32 1.0, %v7014_v40 }
 0x551   :  { %v7016_v61 = vpop.eup %7015  ;;  %v12819_v24 = vpop.f32.mrb[143].mxu1  ;;  %v5652_v16 = vadd.f32 %v5420_v26, %v5416_v14  ;;  %v5423_v45 = vmul.f32 %v12621_v0, %v12808_v7  ;;  %v12824_v33 = vmul.f32 %v4976_v54, %v12716_v48 }
 0x552   :  { %v7018_v58 = vpop.eup %7017  ;;  %v4979_v37 = vadd.f32 1.0, %v7016_v61  ;;  %v5542_v35 = vadd.f32 %v5541_v34, %v5421_v30  ;;  %v5422_v39 = vmul.f32 %v12621_v0, %v12817_v43  ;;  %v5105_v57 = vmul.f32 %v4977_v59, %v12718_v47  ;;  %v5703_v14 = vpop.permute.xlu0 %5702 }
 0x553   :  { %v4978_v44 = vadd.f32 1.0, %v7018_v58  ;;  %v5616_v22 = vadd.f32 %v5615_v11, %v5423_v45  ;;  %v5424_v40 = vmul.f32 %v12621_v0, %v12824_v33  ;;  %v12835_v48 = vpop.permute.xlu1 %5390  ;;  %v12841_v47 = vpop.f32.mrb[144].mxu0 }
 0x554   :  { %v5107_v26 = vmul.f32 %v4979_v37, %v12722_v31  ;;  %14967 = vst [vmem:[#allocation35_spill] sm:$0xff] %v12835_v48  ;;  %v5579_v54 = vadd.f32 %v5578_v55, %v5422_v39  ;;  %v5425_v34 = vmul.f32 %v12631_v10, %v5105_v57  ;;  %v12839_v30 = vmul.f32 %v5703_v14, %v5105_v57  ;;  %v12847_v31 = vpop.f32.mrb[144].mxu1  ;;  %v12849_v38 = vpop.f32.mrb[145].mxu0 }
 0x555   :  { %v5106_v61 = vmul.f32 %v4978_v44, %v12728_v6  ;;  %v5653_v11 = vadd.f32 %v5652_v16, %v5424_v40  ;;  %v7020_v55 = vpop.eup %7019  ;;  %v4380_v37 = vadd.f32 %v12735_v60, %v12513_v8  ;;  %v12856_v16 = vpop.f32.mrb[145].mxu1 }
 0x556   :  { %v5427_v0 = vmul.f32 %v12631_v10, %v5107_v26  ;;  %v12844_v59 = vmul.f32 %v5703_v14, %v5107_v26  ;;  %v5543_v58 = vadd.f32 %v5542_v35, %v5425_v34  ;;  %v12858_v39 = vpop.f32.mrb[146].mxu0  ;;  %v7022_v57 = vpop.eup %7021  ;;  %v4980_v40 = vadd.f32 1.0, %v7020_v55 }
 0x557   :  { %v5426_v45 = vmul.f32 %v12631_v10, %v5106_v61  ;;  %v12852_v6 = vmul.f32 %v5703_v14, %v5106_v61  ;;  %v4573_v26 = vadd.f32 %v12742_v20, %v12513_v8  ;;  %v4382_v35 = vadd.f32 %v12744_v27, %v12535_v12  ;;  %v12866_v34 = vpop.f32.mrb[146].mxu1  ;;  %v12868_v61 = vpop.f32.mrb[147].mxu0 }
 0x558   :  { %14968 = vst [vmem:[#allocation178_spill] sm:$0xff] %v12844_v59  ;;  %v12860_v44 = vadd.f32 %v5616_v22, %v5427_v0  ;;  %14969 = vst [vmem:[#allocation87_spill] sm:$0xff] %v12868_v61  ;;  %v4981_v60 = vadd.f32 1.0, %v7022_v57  ;;  %v12872_v59 = vmul.f32 0.5, %v4380_v37  ;;  %v4575_v22 = vadd.f32 %v12750_v63, %v12535_v12  ;;  %v12876_v0 = vpop.f32.mrb[147].mxu1  ;;  %v5695_v61 = vpop.permute.xlu1 %5694 }
 0x559   :  { %v12870_v48 = vadd.f32 %v5579_v54, %v5426_v45  ;;  %v5108_v55 = vmul.f32 %v4980_v40, %v12732_v9  ;;  %v12879_v8 = vmul.f32 0.5, %v4573_v26  ;;  %v12881_v20 = vmul.f32 0.5, %v4382_v35 }
 0x55a   :  { %v4384_v27 = vadd.f32 %v12752_v25, %v12535_v12  ;;  %v12886_v54 = vmul.f32 %v4981_v60, %v12748_v56  ;;  %7025 = vtanh.f32 %v12872_v59  ;;  %v12889_v45 = vmul.f32 0.5, %v4575_v22 }
 0x55b   :  { %v4577_v63 = vadd.f32 %v12758_v23, %v12535_v12  ;;  %v5428_v9 = vmul.f32 %v12631_v10, %v5108_v55  ;;  %v12894_v37 = vmul.f32 %v5703_v14, %v5108_v55  ;;  %7027 = vtanh.f32 %v12879_v8  ;;  %v12905_v26 = vpop.f32.mrb[148].mxu0 }
 0x55c   :  { %v12897_v57 = vmul.f32 0.5, %v4384_v27  ;;  %v5429_v25 = vmul.f32 %v12625_v4, %v12886_v54  ;;  %7029 = vtanh.f32 %v12881_v20  ;;  %v5821_v40 = vmul.f32 %v5695_v61, %v12766_v51  ;;  %v12912_v14 = vpop.f32.mrb[148].mxu1  ;;  %v12914_v35 = vpop.f32.mrb[149].mxu0 }
 0x55d   :  { %v12902_v56 = vmul.f32 0.5, %v4577_v63  ;;  %v12907_v12 = vadd.f32 %v5653_v11, %v5428_v9  ;;  %7031 = vtanh.f32 %v12889_v45  ;;  %v5822_v10 = vmul.f32 %v5695_v61, %v12781_v29  ;;  %v12921_v11 = vpop.f32.mrb[149].mxu1  ;;  %v12923_v55 = vpop.f32.mrb[150].mxu0 }
 0x55e   :  { %v5823_v23 = vmul.f32 %v5695_v61, %v12772_v17  ;;  %v12916_v60 = vadd.f32 %v5543_v58, %v5429_v25  ;;  %7033 = vtanh.f32 %v12897_v57  ;;  %v5824_v51 = vmul.f32 %v5695_v61, %v12789_v15  ;;  %v7024_v27 = vpop.eup %7023  ;;  %v12930_v63 = vpop.f32.mrb[150].mxu1 }
 0x55f   :  { %v5945_v22 = vadd.f32 %v5821_v40, %v12756_v3  ;;  %7035 = vtanh.f32 %v12902_v56  ;;  %v5982_v17 = vadd.f32 %v5822_v10, %v12768_v50  ;;  %v4388_v58 = vadd.f32 %v12784_v28, %v12523_v21  ;;  %14970 = vst [vmem:[#allocation33_spill] sm:$0xff] %v12930_v63  ;;  %v12932_v9 = vpop.f32.mrb[151].mxu0  ;;  %v12939_v40 = vpop.f32.mrb[151].mxu1 }
 0x560   :  { %v6019_v29 = vadd.f32 %v5823_v23, %v12762_v19  ;;  %14971 = vst [vmem:[#allocation186_spill] sm:$0xff] %v12932_v9  ;;  %v4983_v15 = vadd.f32 1.0, %v7024_v27  ;;  %v6056_v3 = vadd.f32 %v5824_v51, %v12774_v53  ;;  %v4581_v61 = vadd.f32 %v12792_v32, %v12523_v21  ;;  %14972 = vst [vmem:[#allocation179_spill] sm:$0xff] %v12939_v40  ;;  %v5699_v53 = vpop.permute.xlu1 %5698 }
 0x561   :  { %v4390_v25 = vadd.f32 %v12794_v36, %v12523_v21  ;;  %v12941_v50 = vmul.f32 0.5, %v4388_v58  ;;  %v4583_v19 = vadd.f32 %v12801_v49, %v12523_v21  ;;  %v4392_v28 = vadd.f32 %v12803_v1, %v12545_v5 }
 0x562   :  { %v4585_v10 = vadd.f32 %v12810_v46, %v12545_v5  ;;  %v12950_v23 = vmul.f32 %v4983_v15, %v12833_v42  ;;  %v12952_v32 = vmul.f32 0.5, %v4581_v61  ;;  %v5825_v51 = vmul.f32 %v5699_v53, %v12799_v62 }
 0x563   :  { %v12954_v36 = vmul.f32 0.5, %v4390_v25  ;;  %7037 = vtanh.f32 %v12941_v50  ;;  %v12958_v27 = vmul.f32 0.5, %v4583_v19  ;;  %v12960_v21 = vmul.f32 0.5, %v4392_v28  ;;  %v12969_v15 = vpop.f32.mrb[152].mxu0 }
 0x564   :  { %v12962_v49 = vmul.f32 0.5, %v4585_v10  ;;  %v7026_v1 = vpop.eup %7025  ;;  %v5431_v46 = vmul.f32 %v12625_v4, %v12950_v23  ;;  %7039 = vtanh.f32 %v12952_v32  ;;  %v5826_v42 = vmul.f32 %v5699_v53, %v12817_v43  ;;  %14973 = vst [vmem:[#allocation19_spill] sm:$0xff] %v12969_v15  ;;  %v12975_v28 = vpop.f32.mrb[152].mxu1 }
 0x565   :  { %v5827_v58 = vmul.f32 %v5699_v53, %v12808_v7  ;;  %v7028_v62 = vpop.eup %7027  ;;  %v4982_v61 = vadd.f32 1.0, %v7026_v1  ;;  %7041 = vtanh.f32 %v12954_v36  ;;  %v5828_v25 = vmul.f32 %v5699_v53, %v12824_v33  ;;  %v12977_v10 = vpop.f32.mrb[153].mxu0 }
 0x566   :  { %v12973_v19 = vadd.f32 %v5945_v22, %v5825_v51  ;;  %v7030_v40 = vpop.eup %7029  ;;  %v5618_v9 = vadd.f32 %v12860_v44, %v5431_v46  ;;  %v4984_v43 = vadd.f32 1.0, %v7028_v62  ;;  %7043 = vtanh.f32 %v12958_v27  ;;  %v12983_v15 = vpop.f32.mrb[153].mxu1 }
 0x567   :  { %v12981_v7 = vadd.f32 %v5982_v17, %v5826_v42  ;;  %v12985_v1 = vpop.f32.mrb[154].mxu0  ;;  %v7032_v63 = vpop.eup %7031  ;;  %v12988_v33 = vmul.f32 %v4982_v61, %v12872_v59  ;;  %v4985_v22 = vadd.f32 1.0, %v7030_v40  ;;  %7045 = vtanh.f32 %v12960_v21 }
 0x568   :  { %14974 = vst [vmem:[#allocation187_spill] sm:$0xff] %v12985_v1  ;;  %v12991_v53 = vadd.f32 %v6019_v29, %v5827_v58  ;;  %v12993_v51 = vpop.f32.mrb[154].mxu1  ;;  %v12995_v44 = vpop.f32.mrb[155].mxu0  ;;  %v12998_v17 = vmul.f32 %v4984_v43, %v12879_v8  ;;  %v4987_v42 = vadd.f32 1.0, %v7032_v63  ;;  %7047 = vtanh.f32 %v12962_v49 }
 0x569   :  { %14975 = vst [vmem:[#allocation30_spill] sm:$0xff] %v12993_v51  ;;  %14976 = vst [vmem:[#allocation88_spill] sm:$0xff] %v12995_v44  ;;  %v7034_v46 = vpop.eup %7033  ;;  %v13001_v62 = vadd.f32 %v6056_v3, %v5828_v25  ;;  %v13003_v59 = vpop.f32.mrb[155].mxu1  ;;  %v5430_v29 = vmul.f32 %v12625_v4, %v12988_v33  ;;  %v5113_v58 = vmul.f32 %v4985_v22, %v12881_v20 }
 0x56a   :  { %14977 = vst [vmem:[#allocation193_spill] sm:$0xff] %v13003_v59  ;;  %v7036_v40 = vpop.eup %7035  ;;  %v4986_v61 = vadd.f32 1.0, %v7034_v46  ;;  %v4394_v44 = vadd.f32 %v12812_v41, %v12545_v5  ;;  %v5432_v8 = vmul.f32 %v12625_v4, %v12998_v17  ;;  %v5115_v63 = vmul.f32 %v4987_v42, %v12889_v45  ;;  %v5711_v43 = vpop.permute.xlu0 %5710 }
 0x56b   :  { %v4988_v3 = vadd.f32 1.0, %v7036_v40  ;;  %v4587_v25 = vadd.f32 %v12819_v24, %v12545_v5  ;;  %v5581_v59 = vadd.f32 %v12870_v48, %v5430_v29  ;;  %v5433_v51 = vmul.f32 %v12635_v13, %v5113_v58  ;;  %v13025_v46 = vpop.f32.mrb[156].mxu0 }
 0x56c   :  { %v13017_v1 = vmul.f32 %v5711_v43, %v5113_v58  ;;  %v5114_v20 = vmul.f32 %v4986_v61, %v12897_v57  ;;  %v5655_v41 = vadd.f32 %v12907_v12, %v5432_v8  ;;  %v5435_v22 = vmul.f32 %v12635_v13, %v5115_v63  ;;  %v13033_v57 = vpop.f32.mrb[156].mxu1  ;;  %v13035_v12 = vpop.f32.mrb[157].mxu0 }
 0x56d   :  { %v13022_v4 = vmul.f32 %v5711_v43, %v5115_v63  ;;  %v5116_v45 = vmul.f32 %v4988_v3, %v12902_v56  ;;  %v7038_v42 = vpop.eup %7037  ;;  %v5545_v5 = vadd.f32 %v12916_v60, %v5433_v51  ;;  %v13031_v40 = vmul.f32 0.5, %v4394_v44  ;;  %14978 = vst [vmem:[#allocation114_spill] sm:$0xff] %v13033_v57  ;;  %14979 = vst [vmem:[#allocation194_spill] sm:$0xff] %v13035_v12  ;;  %v13040_v63 = vpop.f32.mrb[157].mxu1 }
 0x56e   :  { %v5434_v24 = vmul.f32 %v12635_v13, %v5114_v20  ;;  %v13029_v48 = vmul.f32 %v5711_v43, %v5114_v20  ;;  %v7040_v29 = vpop.eup %7039  ;;  %v5619_v58 = vadd.f32 %v5618_v9, %v5435_v22  ;;  %v4989_v8 = vadd.f32 1.0, %v7038_v42  ;;  %v13042_v60 = vpop.f32.mrb[158].mxu0 }
 0x56f   :  { %v5436_v61 = vmul.f32 %v12635_v13, %v5116_v45  ;;  %v13038_v56 = vmul.f32 %v5711_v43, %v5116_v45  ;;  %v7042_v51 = vpop.eup %7041  ;;  %v4991_v20 = vadd.f32 1.0, %v7040_v29  ;;  %7049 = vtanh.f32 %v13031_v40  ;;  %v13047_v57 = vpop.f32.mrb[158].mxu1 }
 0x570   :  { %v5582_v3 = vadd.f32 %v5581_v59, %v5434_v24  ;;  %v13045_v44 = vmul.f32 0.5, %v4587_v25  ;;  %14980 = vst [vmem:[#allocation90_spill] sm:$0xff] %v13047_v57  ;;  %v13049_v12 = vpop.f32.mrb[159].mxu0  ;;  %v7044_v9 = vpop.eup %7043  ;;  %v13052_v43 = vmul.f32 %v4989_v8, %v12941_v50  ;;  %v4990_v22 = vadd.f32 1.0, %v7042_v51 }
 0x571   :  { %14981 = vst [vmem:[#allocation196_spill] sm:$0xff] %v13049_v12  ;;  %v5656_v13 = vadd.f32 %v5655_v41, %v5436_v61  ;;  %v4398_v45 = vadd.f32 %v12841_v47, %v12533_v18  ;;  %v13056_v42 = vpop.f32.mrb[159].mxu1  ;;  %v7046_v59 = vpop.eup %7045  ;;  %v13059_v24 = vmul.f32 %v4991_v20, %v12952_v32  ;;  %v4992_v25 = vadd.f32 1.0, %v7044_v9 }
 0x572   :  { %14982 = vst [vmem:[#allocation115_spill] sm:$0xff] %v13056_v42  ;;  %7051 = vtanh.f32 %v13045_v44  ;;  %v4591_v29 = vadd.f32 %v12847_v31, %v12533_v18  ;;  %v7048_v41 = vpop.eup %7047  ;;  %v5437_v50 = vmul.f32 %v12629_v2, %v13052_v43  ;;  %v13067_v61 = vmul.f32 %v4990_v22, %v12954_v36  ;;  %v13071_v51 = vpop.permute.xlu0 %5718 }
 0x573   :  { %v4993_v47 = vadd.f32 1.0, %v7046_v59  ;;  %v13069_v8 = vmul.f32 0.5, %v4398_v45  ;;  %v5439_v32 = vmul.f32 %v12629_v2, %v13059_v24  ;;  %v13076_v20 = vmul.f32 %v4992_v25, %v12958_v27  ;;  %v5707_v22 = vpop.permute.xlu1 %5706  ;;  %v13084_v45 = vpop.f32.mrb[160].mxu0 }
 0x574   :  { %v4995_v9 = vadd.f32 1.0, %v7048_v41  ;;  %v13078_v31 = vmul.f32 0.5, %v4591_v29  ;;  %v5546_v42 = vadd.f32 %v5545_v5, %v5437_v50  ;;  %v5438_v12 = vmul.f32 %v12629_v2, %v13067_v61  ;;  %v13090_v25 = vpop.f32.mrb[160].mxu1  ;;  %v13092_v5 = vpop.f32.mrb[161].mxu0 }
 0x575   :  { %v5121_v36 = vmul.f32 %v4993_v47, %v12960_v21  ;;  %7053 = vtanh.f32 %v13069_v8  ;;  %v5620_v59 = vadd.f32 %v5619_v58, %v5439_v32  ;;  %v5440_v57 = vmul.f32 %v12629_v2, %v13076_v20  ;;  %14983 = vst [vmem:[#allocation32_spill] sm:$0xff] %v13092_v5  ;;  %v13100_v50 = vpop.f32.mrb[161].mxu1  ;;  %v13102_v2 = vpop.f32.mrb[162].mxu0 }
 0x576   :  { %v5123_v27 = vmul.f32 %v4995_v9, %v12962_v49  ;;  %7055 = vtanh.f32 %v13078_v31  ;;  %v5583_v29 = vadd.f32 %v5582_v3, %v5438_v12  ;;  %v4400_v58 = vadd.f32 %v12849_v38, %v12533_v18  ;;  %14984 = vst [vmem:[#allocation91_spill] sm:$0xff] %v13100_v50  ;;  %14985 = vst [vmem:[#allocation197_spill] sm:$0xff] %v13102_v2  ;;  %v13110_v3 = vpop.f32.mrb[162].mxu1  ;;  %v13112_v9 = vpop.f32.mrb[163].mxu0 }
 0x577   :  { %v5441_v21 = vmul.f32 %v12639_v52, %v5121_v36  ;;  %v13096_v41 = vmul.f32 %v13071_v51, %v5121_v36  ;;  %v5657_v49 = vadd.f32 %v5656_v13, %v5440_v57  ;;  %v4593_v12 = vadd.f32 %v12856_v16, %v12533_v18  ;;  %14986 = vst [vmem:[#allocation180_spill] sm:$0xff] %v13112_v9  ;;  %v13120_v13 = vpop.f32.mrb[163].mxu1 }
 0x578   :  { %v5443_v47 = vmul.f32 %v12639_v52, %v5123_v27  ;;  %v13106_v32 = vmul.f32 %v13071_v51, %v5123_v27  ;;  %v13116_v38 = vmul.f32 0.5, %v4400_v58  ;;  %v5833_v50 = vmul.f32 %v5707_v22, %v12886_v54  ;;  %v14988_v58 = vld [vmem:[#allocation145_spill] sm:$0xff] }
 0x579   :  { %v13114_v36 = vadd.f32 %v5546_v42, %v5441_v21  ;;  %v5834_v57 = vmul.f32 %v5707_v22, %v12988_v33  ;;  %v7050_v2 = vpop.eup %7049  ;;  %v13124_v5 = vmul.f32 0.5, %v4593_v12  ;;  %v5835_v18 = vmul.f32 %v5707_v22, %v12950_v23 }
 0x57a   :  { %v13122_v27 = vadd.f32 %v5620_v59, %v5443_v47  ;;  %v5836_v16 = vmul.f32 %v5707_v22, %v12998_v17  ;;  %v4994_v9 = vadd.f32 1.0, %v7050_v2  ;;  %7057 = vtanh.f32 %v13116_v38  ;;  %v14987_v59 = vld [vmem:[#allocation178_spill] sm:$0xff] }
 0x57b   :  { %v5947_v42 = vadd.f32 %v12973_v19, %v12839_v30  ;;  %v5984_v54 = vadd.f32 %v12981_v7, %v12852_v6  ;;  %7059 = vtanh.f32 %v13124_v5  ;;  %v6021_v21 = vadd.f32 %v12991_v53, %v14987_v59  ;;  %v13141_v19 = vpop.f32.mrb[164].mxu0 }
 0x57c   :  { %v7052_v33 = vpop.eup %7051  ;;  %v6058_v23 = vadd.f32 %v13001_v62, %v12894_v37  ;;  %v4402_v17 = vadd.f32 %v12858_v39, %v14988_v58  ;;  %v5122_v22 = vmul.f32 %v4994_v9, %v13031_v40  ;;  %v4595_v53 = vadd.f32 %v12866_v34, %v14988_v58  ;;  %v13147_v59 = vpop.f32.mrb[164].mxu1  ;;  %v14989_v9 = vld [vmem:[#allocation87_spill] sm:$0xff] }
 0x57d   :  { %v4996_v2 = vadd.f32 1.0, %v7052_v33  ;;  %v5948_v47 = vadd.f32 %v5947_v42, %v5833_v50  ;;  %v5985_v30 = vadd.f32 %v5984_v54, %v5834_v57  ;;  %v6022_v6 = vadd.f32 %v6021_v21, %v5835_v18  ;;  %v13149_v37 = vpop.f32.mrb[165].mxu0  ;;  %v13158_v18 = vpop.f32.mrb[165].mxu1 }
 0x57e   :  { %v6059_v7 = vadd.f32 %v6058_v23, %v5836_v16  ;;  %v13143_v12 = vmul.f32 0.5, %v4402_v17  ;;  %v5442_v39 = vmul.f32 %v12639_v52, %v5122_v22  ;;  %v13153_v40 = vmul.f32 %v13071_v51, %v5122_v22  ;;  %v13160_v16 = vpop.f32.mrb[166].mxu0  ;;  %v13167_v21 = vpop.f32.mrb[166].mxu1 }
 0x57f   :  { %v7054_v62 = vpop.eup %7053  ;;  %v5124_v50 = vmul.f32 %v4996_v2, %v13045_v44  ;;  %v4404_v57 = vadd.f32 %v14989_v9, %v14988_v58  ;;  %v13163_v54 = vmul.f32 0.5, %v4595_v53  ;;  %v4597_v33 = vadd.f32 %v12876_v0, %v14988_v58  ;;  %14990 = vst [vmem:[#allocation182_spill] sm:$0xff] %v13167_v21  ;;  %v13169_v23 = vpop.f32.mrb[167].mxu0 }
 0x580   :  { %v7056_v34 = vpop.eup %7055  ;;  %v4997_v42 = vadd.f32 1.0, %v7054_v62  ;;  %7061 = vtanh.f32 %v13143_v12  ;;  %v5584_v44 = vadd.f32 %v5583_v29, %v5442_v39  ;;  %v13175_v9 = vpop.f32.mrb[167].mxu1  ;;  %v14992_v39 = vld [vmem:[#allocation83_spill] sm:$0xff] }
 0x581   :  { %v5444_v17 = vmul.f32 %v12639_v52, %v5124_v50  ;;  %v13173_v22 = vmul.f32 %v13071_v51, %v5124_v50  ;;  %v4999_v2 = vadd.f32 1.0, %v7056_v34  ;;  %14991 = vst [vmem:[#allocation183_spill] sm:$0xff] %v13175_v9  ;;  %7063 = vtanh.f32 %v13163_v54  ;;  %v5715_v58 = vpop.permute.xlu1 %5714 }
 0x582   :  { %v5125_v62 = vmul.f32 %v4997_v42, %v13069_v8  ;;  %v13179_v53 = vmul.f32 0.5, %v4404_v57  ;;  %v13181_v0 = vmul.f32 0.5, %v4597_v33  ;;  %v5841_v52 = vmul.f32 %v5715_v58, %v13052_v43 }
 0x583   :  { %v5658_v21 = vadd.f32 %v5657_v49, %v5444_v17  ;;  %v5127_v29 = vmul.f32 %v4999_v2, %v13078_v31  ;;  %v5842_v51 = vmul.f32 %v5715_v58, %v13067_v61  ;;  %v5843_v8 = vmul.f32 %v5715_v58, %v13059_v24  ;;  %v13194_v43 = vpop.f32.mrb[168].mxu0 }
 0x584   :  { %v5445_v50 = vmul.f32 %v14992_v39, %v5125_v62  ;;  %7065 = vtanh.f32 %v13179_v53  ;;  %v5844_v34 = vmul.f32 %v5715_v58, %v13076_v20  ;;  %v7058_v57 = vpop.eup %7057  ;;  %v5949_v49 = vadd.f32 %v5948_v47, %v13017_v1  ;;  %14993 = vst [vmem:[#allocation184_spill] sm:$0xff] %v13194_v43  ;;  %v13201_v2 = vpop.f32.mrb[168].mxu1 }
 0x585   :  { %v5447_v42 = vmul.f32 %v14992_v39, %v5127_v29  ;;  %7067 = vtanh.f32 %v13181_v0  ;;  %v5986_v31 = vadd.f32 %v5985_v30, %v13029_v48  ;;  %v7060_v61 = vpop.eup %7059  ;;  %v4998_v17 = vadd.f32 1.0, %v7058_v57  ;;  %v13203_v58 = vpop.f32.mrb[169].mxu0 }
 0x586   :  { %v13197_v33 = vadd.f32 %v13114_v36, %v5445_v50  ;;  %v6023_v24 = vadd.f32 %v6022_v6, %v13022_v4  ;;  %v6060_v20 = vadd.f32 %v6059_v7, %v13038_v56  ;;  %v5000_v1 = vadd.f32 1.0, %v7060_v61  ;;  %v13208_v30 = vpop.f32.mrb[169].mxu1  ;;  %v13210_v43 = vpop.f32.mrb[170].mxu0  ;;  %v14994_v6 = vld [vmem:[#allocation144_spill] sm:$0xff] }
 0x587   :  { %v13206_v9 = vadd.f32 %v13122_v27, %v5447_v42  ;;  %v5950_v48 = vadd.f32 %v5949_v49, %v5841_v52  ;;  %v5987_v47 = vadd.f32 %v5986_v31, %v5842_v51  ;;  %v5126_v36 = vmul.f32 %v4998_v17, %v13116_v38  ;;  %v13215_v7 = vpop.f32.mrb[170].mxu1  ;;  %v13217_v57 = vpop.f32.mrb[171].mxu0 }
 0x588   :  { %v6024_v50 = vadd.f32 %v6023_v24, %v5843_v8  ;;  %v6061_v4 = vadd.f32 %v6060_v20, %v5844_v34  ;;  %v4408_v56 = vadd.f32 %v12905_v26, %v14994_v6  ;;  %v5128_v27 = vmul.f32 %v5000_v1, %v13124_v5  ;;  %v5723_v8 = vpop.permute.xlu1 %5722  ;;  %v13226_v34 = vpop.f32.mrb[171].mxu1 }
 0x589   :  { %v4601_v52 = vadd.f32 %v12912_v14, %v14994_v6  ;;  %v4410_v51 = vadd.f32 %v12914_v35, %v14994_v6  ;;  %v4603_v38 = vadd.f32 %v12921_v11, %v14994_v6  ;;  %14995 = vst [vmem:[#allocation34_spill] sm:$0xff] %v13226_v34  ;;  %v5446_v26 = vmul.f32 %v14992_v39, %v5126_v36  ;;  %v5727_v6 = vpop.permute.xlu0 %5726 }
 0x58a   :  { %v7062_v42 = vpop.eup %7061  ;;  %v13229_v49 = vmul.f32 0.5, %v4408_v56  ;;  %v5849_v31 = vmul.f32 %v5723_v8, %v5125_v62  ;;  %v5850_v61 = vmul.f32 %v5723_v8, %v5126_v36  ;;  %v5448_v5 = vmul.f32 %v14992_v39, %v5128_v27 }
 0x58b   :  { %v5001_v17 = vadd.f32 1.0, %v7062_v42  ;;  %v13232_v14 = vmul.f32 0.5, %v4601_v52  ;;  %v13234_v24 = vmul.f32 0.5, %v4410_v51  ;;  %v7064_v35 = vpop.eup %7063  ;;  %v5585_v20 = vadd.f32 %v5584_v44, %v5446_v26  ;;  %v13241_v39 = vpop.f32.mrb[172].mxu0  ;;  %v14998_v42 = vld [vmem:[#allocation170_spill] sm:$0xff] }
 0x58c   :  { %7069 = vtanh.f32 %v13229_v49  ;;  %v13237_v11 = vmul.f32 0.5, %v4603_v38  ;;  %v5851_v1 = vmul.f32 %v5723_v8, %v5127_v29  ;;  %v5659_v34 = vadd.f32 %v5658_v21, %v5448_v5  ;;  %14996 = vst [vmem:[#allocation199_spill] sm:$0xff] %v13241_v39  ;;  %v13246_v38 = vpop.f32.mrb[172].mxu1  ;;  %v13248_v29 = vpop.f32.mrb[173].mxu0 }
 0x58d   :  { %v5129_v56 = vmul.f32 %v5001_v17, %v13143_v12  ;;  %v5003_v62 = vadd.f32 1.0, %v7064_v35  ;;  %7071 = vtanh.f32 %v13232_v14  ;;  %v5852_v52 = vmul.f32 %v5723_v8, %v5128_v27  ;;  %14997 = vst [vmem:[#allocation55_spill] sm:$0xff] %v13248_v29  ;;  %v13252_v35 = vpop.f32.mrb[173].mxu1  ;;  %v13254_v39 = vpop.f32.mrb[174].mxu0 }
 0x58e   :  { %v7066_v36 = vpop.eup %7065  ;;  %7073 = vtanh.f32 %v13234_v24  ;;  %v5951_v44 = vadd.f32 %v5950_v48, %v13096_v41  ;;  %v5988_v51 = vadd.f32 %v5987_v47, %v13153_v40  ;;  %v13257_v48 = vpop.f32.mrb[174].mxu1 }
 0x58f   :  { %v7068_v21 = vpop.eup %7067  ;;  %v5449_v12 = vmul.f32 %v14998_v42, %v5129_v56  ;;  %v5853_v26 = vmul.f32 %v5727_v6, %v5129_v56  ;;  %v5131_v5 = vmul.f32 %v5003_v62, %v13163_v54  ;;  %v5002_v17 = vadd.f32 1.0, %v7066_v36  ;;  %14999 = vst [vmem:[#allocation198_spill] sm:$0xff] %v13257_v48  ;;  %v13259_v47 = vpop.f32.mrb[175].mxu0 }
 0x590   :  { %v5004_v27 = vadd.f32 1.0, %v7068_v21  ;;  %7075 = vtanh.f32 %v13237_v11  ;;  %v5952_v41 = vadd.f32 %v5951_v44, %v5849_v31  ;;  %v5989_v40 = vadd.f32 %v5988_v51, %v5850_v61  ;;  %15000 = vst [vmem:[#allocation92_spill] sm:$0xff] %v13259_v47  ;;  %v13264_v62 = vpop.f32.mrb[175].mxu1  ;;  %v15002_v61 = vld [vmem:[#allocation146_spill] sm:$0xff] }
 0x591   :  { %v5549_v8 = vadd.f32 %v13197_v33, %v5449_v12  ;;  %v5451_v56 = vmul.f32 %v14998_v42, %v5131_v5  ;;  %v5855_v29 = vmul.f32 %v5727_v6, %v5131_v5  ;;  %v5130_v54 = vmul.f32 %v5002_v17, %v13179_v53  ;;  %15001 = vst [vmem:[#allocation36_spill] sm:$0xff] %v13264_v62  ;;  %v15003_v5 = vld [vmem:[#allocation33_spill] sm:$0xff] }
 0x592   :  { %v5132_v36 = vmul.f32 %v5004_v27, %v13181_v0  ;;  %v6025_v21 = vadd.f32 %v6024_v50, %v13106_v32  ;;  %v6062_v31 = vadd.f32 %v6061_v4, %v13173_v22  ;;  %v4412_v44 = vadd.f32 %v12923_v55, %v15002_v61  ;;  %v15004_v55 = vld [vmem:[#allocation186_spill] sm:$0xff] }
 0x593   :  { %v5623_v51 = vadd.f32 %v13206_v9, %v5451_v56  ;;  %v5450_v33 = vmul.f32 %v14998_v42, %v5130_v54  ;;  %v5854_v12 = vmul.f32 %v5727_v6, %v5130_v54  ;;  %v4605_v47 = vadd.f32 %v15003_v5, %v15002_v61  ;;  %v13282_v9 = vpop.f32.mrb[176].mxu0  ;;  %v15006_v54 = vld [vmem:[#allocation179_spill] sm:$0xff] }
 0x594   :  { %v5452_v53 = vmul.f32 %v14998_v42, %v5132_v36  ;;  %v5856_v17 = vmul.f32 %v5727_v6, %v5132_v36  ;;  %v6026_v62 = vadd.f32 %v6025_v21, %v5851_v1  ;;  %v6063_v0 = vadd.f32 %v6062_v31, %v5852_v52  ;;  %15005 = vst [vmem:[#allocation200_spill] sm:$0xff] %v13282_v9  ;;  %v13286_v6 = vpop.f32.mrb[176].mxu1  ;;  %v13288_v1 = vpop.f32.mrb[177].mxu0 }
 0x595   :  { %v5586_v27 = vadd.f32 %v5585_v20, %v5450_v33  ;;  %v13276_v32 = vmul.f32 0.5, %v4412_v44  ;;  %v13278_v22 = vmul.f32 0.5, %v4605_v47  ;;  %v4414_v50 = vadd.f32 %v15004_v55, %v15002_v61  ;;  %15007 = vst [vmem:[#allocation201_spill] sm:$0xff] %v13286_v6  ;;  %15008 = vst [vmem:[#allocation202_spill] sm:$0xff] %v13288_v1  ;;  %v13293_v21 = vpop.f32.mrb[177].mxu1  ;;  %v13295_v31 = vpop.f32.mrb[178].mxu0 }
 0x596   :  { %v7070_v4 = vpop.eup %7069  ;;  %v5660_v56 = vadd.f32 %v5659_v34, %v5452_v53  ;;  %v4607_v5 = vadd.f32 %v15006_v54, %v15002_v61  ;;  %v5953_v48 = vadd.f32 %v5952_v41, %v5853_v26  ;;  %v5990_v42 = vadd.f32 %v5989_v40, %v5854_v12  ;;  %15009 = vst [vmem:[#allocation37_spill] sm:$0xff] %v13293_v21  ;;  %v13300_v40 = vpop.f32.mrb[178].mxu1  ;;  %v15016_v54 = vld [vmem:[#allocation167_spill] sm:$0xff] }
 0x597   :  { %v7072_v20 = vpop.eup %7071  ;;  %v5005_v52 = vadd.f32 1.0, %v7070_v4  ;;  %7077 = vtanh.f32 %v13276_v32  ;;  %v13291_v47 = vmul.f32 0.5, %v4414_v50  ;;  %v6027_v36 = vadd.f32 %v6026_v62, %v5855_v29  ;;  %15010 = vst [vmem:[#allocation203_spill] sm:$0xff] %v13295_v31  ;;  %15011 = vst [vmem:[#allocation204_spill] sm:$0xff] %v13300_v40  ;;  %v13302_v61 = vpop.f32.mrb[179].mxu0  ;;  %v15013_v29 = vld [vmem:[#allocation76_spill] sm:$0xff] }
 0x598   :  { %v7074_v34 = vpop.eup %7073  ;;  %v5007_v44 = vadd.f32 1.0, %v7072_v20  ;;  %7079 = vtanh.f32 %v13278_v22  ;;  %v13298_v26 = vmul.f32 0.5, %v4607_v5  ;;  %v6064_v41 = vadd.f32 %v6063_v0, %v5856_v17  ;;  %15012 = vst [vmem:[#allocation137_spill] sm:$0xff] %v13302_v61  ;;  %v15014_v62 = vld [vmem:[#allocation19_spill] sm:$0xff]  ;;  %v13308_v55 = vpop.f32.mrb[179].mxu1 }
 0x599   :  { %v5133_v33 = vmul.f32 %v5005_v52, %v13229_v49  ;;  %v5006_v12 = vadd.f32 1.0, %v7074_v34  ;;  %7081 = vtanh.f32 %v13291_v47  ;;  %v4418_v53 = vadd.f32 %v15014_v62, %v15013_v29  ;;  %15015 = vst [vmem:[#allocation205_spill] sm:$0xff] %v13308_v55  ;;  %v5731_v17 = vpop.permute.xlu1 %5730 }
 0x59a   :  { %v7076_v50 = vpop.eup %7075  ;;  %v5135_v4 = vmul.f32 %v5007_v44, %v13232_v14  ;;  %7083 = vtanh.f32 %v13298_v26  ;;  %v4611_v0 = vadd.f32 %v12975_v28, %v15013_v29  ;;  %v4420_v49 = vadd.f32 %v12977_v10, %v15013_v29 }
 0x59b   :  { %v5453_v5 = vmul.f32 %v15016_v54, %v5133_v33  ;;  %v5134_v20 = vmul.f32 %v5006_v12, %v13234_v24  ;;  %v5008_v52 = vadd.f32 1.0, %v7076_v50  ;;  %v5857_v34 = vmul.f32 %v5731_v17, %v5133_v33  ;;  %v13325_v10 = vpop.f32.mrb[180].mxu0 }
 0x59c   :  { %v5455_v62 = vmul.f32 %v15016_v54, %v5135_v4  ;;  %v5859_v55 = vmul.f32 %v5731_v17, %v5135_v4  ;;  %v13319_v61 = vmul.f32 0.5, %v4418_v53  ;;  %v13321_v14 = vmul.f32 0.5, %v4611_v0  ;;  %15017 = vst [vmem:[#allocation93_spill] sm:$0xff] %v13325_v10  ;;  %v13328_v33 = vpop.f32.mrb[180].mxu1  ;;  %v15019_v0 = vld [vmem:[#allocation148_spill] sm:$0xff] }
 0x59d   :  { %v5550_v44 = vadd.f32 %v5549_v8, %v5453_v5  ;;  %v5454_v40 = vmul.f32 %v15016_v54, %v5134_v20  ;;  %v5136_v28 = vmul.f32 %v5008_v52, %v13237_v11  ;;  %v5858_v31 = vmul.f32 %v5731_v17, %v5134_v20  ;;  %15018 = vst [vmem:[#allocation206_spill] sm:$0xff] %v13328_v33  ;;  %v5739_v9 = vpop.permute.xlu1 %5738 }
 0x59e   :  { %v5624_v21 = vadd.f32 %v5623_v51, %v5455_v62  ;;  %v5954_v1 = vadd.f32 %v5953_v48, %v5857_v34  ;;  %v6028_v24 = vadd.f32 %v6027_v36, %v5859_v55  ;;  %7085 = vtanh.f32 %v13319_v61  ;;  %v15020_v51 = vld [vmem:[#allocation187_spill] sm:$0xff]  ;;  %v13338_v36 = vpop.f32.mrb[181].mxu0  ;;  %v15025_v62 = vld [vmem:[#allocation193_spill] sm:$0xff] }
 0x59f   :  { %v5587_v12 = vadd.f32 %v5586_v27, %v5454_v40  ;;  %v5456_v53 = vmul.f32 %v15016_v54, %v5136_v28  ;;  %v5860_v50 = vmul.f32 %v5731_v17, %v5136_v28  ;;  %v5991_v4 = vadd.f32 %v5990_v42, %v5858_v31  ;;  %15021 = vst [vmem:[#allocation138_spill] sm:$0xff] %v13338_v36  ;;  %v15022_v27 = vld [vmem:[#allocation30_spill] sm:$0xff]  ;;  %v15023_v42 = vld [vmem:[#allocation88_spill] sm:$0xff]  ;;  %v13344_v17 = vpop.f32.mrb[181].mxu1 }
 0x5a0   :  { %7087 = vtanh.f32 %v13321_v14  ;;  %v13332_v8 = vmul.f32 0.5, %v4420_v49  ;;  %v4613_v11 = vadd.f32 %v12983_v15, %v15013_v29  ;;  %v4422_v48 = vadd.f32 %v15020_v51, %v15019_v0  ;;  %15024 = vst [vmem:[#allocation207_spill] sm:$0xff] %v13344_v17 }
 0x5a1   :  { %v7078_v55 = vpop.eup %7077  ;;  %v5661_v5 = vadd.f32 %v5660_v56, %v5456_v53  ;;  %v6065_v20 = vadd.f32 %v6064_v41, %v5860_v50  ;;  %v4615_v40 = vadd.f32 %v15022_v27, %v15019_v0  ;;  %v4424_v31 = vadd.f32 %v15023_v42, %v15019_v0  ;;  %v13357_v53 = vpop.f32.mrb[182].mxu0 }
 0x5a2   :  { %v7080_v49 = vpop.eup %7079  ;;  %v5009_v54 = vadd.f32 1.0, %v7078_v55  ;;  %7089 = vtanh.f32 %v13332_v8  ;;  %v13347_v15 = vmul.f32 0.5, %v4613_v11  ;;  %v13349_v29 = vmul.f32 0.5, %v4422_v48  ;;  %15026 = vst [vmem:[#allocation140_spill] sm:$0xff] %v13357_v53  ;;  %v15027_v11 = vld [vmem:[#allocation79_spill] sm:$0xff]  ;;  %v13363_v27 = vpop.f32.mrb[182].mxu1 }
 0x5a3   :  { %v7082_v52 = vpop.eup %7081  ;;  %v5011_v34 = vadd.f32 1.0, %v7080_v49  ;;  %v13351_v56 = vmul.f32 0.5, %v4615_v40  ;;  %v13353_v41 = vmul.f32 0.5, %v4424_v31  ;;  %v4617_v28 = vadd.f32 %v15025_v62, %v15019_v0  ;;  %15028 = vst [vmem:[#allocation12_spill] sm:$0xff] %v13363_v27  ;;  %v5735_v40 = vpop.permute.xlu0 %5734  ;;  %v15029_v49 = vld [vmem:[#allocation171_spill] sm:$0xff] }
 0x5a4   :  { %v7084_v50 = vpop.eup %7083  ;;  %v5137_v51 = vmul.f32 %v5009_v54, %v13276_v32  ;;  %v5010_v55 = vadd.f32 1.0, %v7082_v52  ;;  %7091 = vtanh.f32 %v13347_v15  ;;  %v4428_v48 = vadd.f32 %v13025_v46, %v15027_v11  ;;  %v13372_v54 = vpop.f32.mrb[183].mxu0 }
 0x5a5   :  { %v5139_v42 = vmul.f32 %v5011_v34, %v13278_v22  ;;  %v5012_v31 = vadd.f32 1.0, %v7084_v50  ;;  %7093 = vtanh.f32 %v13349_v29  ;;  %v13367_v0 = vmul.f32 0.5, %v4617_v28  ;;  %15030 = vst [vmem:[#allocation189_spill] sm:$0xff] %v13372_v54  ;;  %v13377_v22 = vpop.f32.mrb[183].mxu1 }
 0x5a6   :  { %v5457_v62 = vmul.f32 %v15029_v49, %v5137_v51  ;;  %v5861_v53 = vmul.f32 %v5735_v40, %v5137_v51  ;;  %v5138_v32 = vmul.f32 %v5010_v55, %v13291_v47  ;;  %7095 = vtanh.f32 %v13351_v56  ;;  %15031 = vst [vmem:[#allocation190_spill] sm:$0xff] %v13377_v22 }
 0x5a7   :  { %v5459_v46 = vmul.f32 %v15029_v49, %v5139_v42  ;;  %v5863_v52 = vmul.f32 %v5735_v40, %v5139_v42  ;;  %v5140_v27 = vmul.f32 %v5012_v31, %v13298_v26  ;;  %7097 = vtanh.f32 %v13353_v41 }
 0x5a8   :  { %v7086_v34 = vpop.eup %7085  ;;  %v5551_v28 = vadd.f32 %v5550_v44, %v5457_v62  ;;  %v5458_v50 = vmul.f32 %v15029_v49, %v5138_v32  ;;  %v5862_v51 = vmul.f32 %v5735_v40, %v5138_v32  ;;  %v5955_v17 = vadd.f32 %v5954_v1, %v5861_v53  ;;  %v15032_v1 = vld [vmem:[#allocation114_spill] sm:$0xff] }
 0x5a9   :  { %v5625_v47 = vadd.f32 %v5624_v21, %v5459_v46  ;;  %v5460_v55 = vmul.f32 %v15029_v49, %v5140_v27  ;;  %v5864_v36 = vmul.f32 %v5735_v40, %v5140_v27  ;;  %v5013_v54 = vadd.f32 1.0, %v7086_v34  ;;  %v15033_v53 = vld [vmem:[#allocation194_spill] sm:$0xff] }
 0x5aa   :  { %v7088_v33 = vpop.eup %7087  ;;  %v5588_v10 = vadd.f32 %v5587_v12, %v5458_v50  ;;  %v5992_v42 = vadd.f32 %v5991_v4, %v5862_v51  ;;  %v6029_v6 = vadd.f32 %v6028_v24, %v5863_v52  ;;  %7099 = vtanh.f32 %v13367_v0  ;;  %v15034_v12 = vld [vmem:[#allocation136_spill] sm:$0xff] }
 0x5ab   :  { %v5662_v26 = vadd.f32 %v5661_v5, %v5460_v55  ;;  %v5141_v31 = vmul.f32 %v5013_v54, %v13319_v61  ;;  %v5015_v22 = vadd.f32 1.0, %v7088_v33  ;;  %v6066_v44 = vadd.f32 %v6065_v20, %v5864_v36  ;;  %v13393_v36 = vpop.f32.mrb[184].mxu0  ;;  %v13395_v20 = vpop.f32.mrb[184].mxu1 }
 0x5ac   :  { %v7090_v62 = vpop.eup %7089  ;;  %v13383_v32 = vmul.f32 0.5, %v4428_v48  ;;  %v4621_v21 = vadd.f32 %v15032_v1, %v15027_v11  ;;  %v4430_v27 = vadd.f32 %v15033_v53, %v15027_v11  ;;  %v4623_v24 = vadd.f32 %v13040_v63, %v15027_v11  ;;  %v13404_v63 = vpop.f32.mrb[185].mxu0 }
 0x5ad   :  { %v5461_v4 = vmul.f32 %v15034_v12, %v5141_v31  ;;  %v5143_v5 = vmul.f32 %v5015_v22, %v13321_v14  ;;  %v5014_v61 = vadd.f32 1.0, %v7090_v62  ;;  %v5865_v33 = vmul.f32 %v5739_v9, %v5141_v31  ;;  %15035 = vst [vmem:[#allocation191_spill] sm:$0xff] %v13404_v63  ;;  %v13406_v11 = vpop.f32.mrb[185].mxu1  ;;  %v13410_v50 = vpop.f32.mrb[186].mxu0 }
 0x5ae   :  { %v7092_v48 = vpop.eup %7091  ;;  %7101 = vtanh.f32 %v13383_v32  ;;  %v13398_v40 = vmul.f32 0.5, %v4621_v21  ;;  %v13400_v49 = vmul.f32 0.5, %v4430_v27  ;;  %v13402_v54 = vmul.f32 0.5, %v4623_v24  ;;  %15036 = vst [vmem:[#allocation210_spill] sm:$0xff] %v13406_v11  ;;  %15037 = vst [vmem:[#allocation211_spill] sm:$0xff] %v13410_v50  ;;  %v13412_v51 = vpop.f32.mrb[186].mxu1 }
 0x5af   :  { %v7094_v14 = vpop.eup %7093  ;;  %v5552_v46 = vadd.f32 %v5551_v28, %v5461_v4  ;;  %v5463_v52 = vmul.f32 %v15034_v12, %v5143_v5  ;;  %v5142_v22 = vmul.f32 %v5014_v61, %v13332_v8  ;;  %v5016_v34 = vadd.f32 1.0, %v7092_v48  ;;  %15038 = vst [vmem:[#allocation125_spill] sm:$0xff] %v13412_v51  ;;  %v13415_v21 = vpop.f32.mrb[187].mxu0 }
 0x5b0   :  { %v7096_v55 = vpop.eup %7095  ;;  %v5867_v31 = vmul.f32 %v5739_v9, %v5143_v5  ;;  %v5956_v62 = vadd.f32 %v5955_v17, %v5865_v33  ;;  %v5017_v1 = vadd.f32 1.0, %v7094_v14  ;;  %7103 = vtanh.f32 %v13398_v40  ;;  %15039 = vst [vmem:[#allocation208_spill] sm:$0xff] %v13415_v21  ;;  %v13417_v53 = vpop.f32.mrb[187].mxu1 }
 0x5b1   :  { %15040 = vst [vmem:[#allocation139_spill] sm:$0xff] %v13417_v53  ;;  %v7098_v28 = vpop.eup %7097  ;;  %v5626_v27 = vadd.f32 %v5625_v47, %v5463_v52  ;;  %v5462_v24 = vmul.f32 %v15034_v12, %v5142_v22  ;;  %v5144_v8 = vmul.f32 %v5016_v34, %v13347_v15  ;;  %v5866_v4 = vmul.f32 %v5739_v9, %v5142_v22  ;;  %v5743_v17 = vpop.permute.xlu0 %5742  ;;  %v15041_v53 = vld [vmem:[#allocation172_spill] sm:$0xff] }
 0x5b2   :  { %v6030_v61 = vadd.f32 %v6029_v6, %v5867_v31  ;;  %v5145_v48 = vmul.f32 %v5017_v1, %v13349_v29  ;;  %v5019_v51 = vadd.f32 1.0, %v7096_v55  ;;  %v5018_v5 = vadd.f32 1.0, %v7098_v28 }
 0x5b3   :  { %v5589_v33 = vadd.f32 %v5588_v10, %v5462_v24  ;;  %v5464_v14 = vmul.f32 %v15034_v12, %v5144_v8  ;;  %v5868_v50 = vmul.f32 %v5739_v9, %v5144_v8  ;;  %v5993_v21 = vadd.f32 %v5992_v42, %v5866_v4 }
 0x5b4   :  { %v7100_v11 = vpop.eup %7099  ;;  %v5465_v63 = vmul.f32 %v15041_v53, %v5145_v48  ;;  %v5869_v47 = vmul.f32 %v5743_v17, %v5145_v48  ;;  %v5147_v52 = vmul.f32 %v5019_v51, %v13351_v56  ;;  %v5146_v15 = vmul.f32 %v5018_v5, %v13353_v41 }
 0x5b5   :  { %v5663_v22 = vadd.f32 %v5662_v26, %v5464_v14  ;;  %v6067_v6 = vadd.f32 %v6066_v44, %v5868_v50  ;;  %v5020_v34 = vadd.f32 1.0, %v7100_v11  ;;  %7105 = vtanh.f32 %v13400_v49  ;;  %v15042_v26 = vld [vmem:[#allocation159_spill] sm:$0xff]  ;;  %v15043_v11 = vld [vmem:[#allocation90_spill] sm:$0xff] }
 0x5b6   :  { %v5553_v29 = vadd.f32 %v5552_v46, %v5465_v63  ;;  %v5957_v55 = vadd.f32 %v5956_v62, %v5869_v47  ;;  %v5467_v10 = vmul.f32 %v15041_v53, %v5147_v52  ;;  %v5871_v12 = vmul.f32 %v5743_v17, %v5147_v52  ;;  %v13435_v46 = vpop.f32.mrb[188].mxu0  ;;  %v15046_v14 = vld [vmem:[#allocation78_spill] sm:$0xff]  ;;  %v5747_v52 = vpop.permute.xlu1 %5746 }
 0x5b7   :  { %v5466_v9 = vmul.f32 %v15041_v53, %v5146_v15  ;;  %v5870_v42 = vmul.f32 %v5743_v17, %v5146_v15  ;;  %v5148_v31 = vmul.f32 %v5020_v34, %v13367_v0  ;;  %7107 = vtanh.f32 %v13402_v54  ;;  %v15047_v34 = vld [vmem:[#allocation25_spill] sm:$0xff] }
 0x5b8   :  { %v7102_v56 = vpop.eup %7101  ;;  %v5627_v51 = vadd.f32 %v5626_v27, %v5467_v10  ;;  %v6031_v41 = vadd.f32 %v6030_v61, %v5871_v12  ;;  %v4432_v44 = vadd.f32 %v13042_v60, %v15042_v26  ;;  %v4625_v63 = vadd.f32 %v15043_v11, %v15042_v26  ;;  %v15044_v27 = vld [vmem:[#allocation196_spill] sm:$0xff] }
 0x5b9   :  { %v5590_v50 = vadd.f32 %v5589_v33, %v5466_v9  ;;  %v5994_v62 = vadd.f32 %v5993_v21, %v5870_v42  ;;  %v5468_v1 = vmul.f32 %v15041_v53, %v5148_v31  ;;  %v5872_v28 = vmul.f32 %v5743_v17, %v5148_v31  ;;  %v15045_v33 = vld [vmem:[#allocation115_spill] sm:$0xff] }
 0x5ba   :  { %v7104_v24 = vpop.eup %7103  ;;  %v5021_v0 = vadd.f32 1.0, %v7102_v56  ;;  %v13438_v8 = vmul.f32 0.5, %v4432_v44  ;;  %v13440_v4 = vmul.f32 0.5, %v4625_v63  ;;  %v4434_v61 = vadd.f32 %v15044_v27, %v15042_v26  ;;  %v15048_v63 = vld [vmem:[#allocation32_spill] sm:$0xff]  ;;  %v15051_v27 = vld [vmem:[#allocation197_spill] sm:$0xff] }
 0x5bb   :  { %v13444_v60 = vadd.f32 %v5663_v22, %v5468_v1  ;;  %v13446_v48 = vadd.f32 %v6067_v6, %v5872_v28  ;;  %v5023_v5 = vadd.f32 1.0, %v7104_v24  ;;  %v4627_v21 = vadd.f32 %v15045_v33, %v15042_v26  ;;  %v15052_v33 = vld [vmem:[#allocation180_spill] sm:$0xff] }
 0x5bc   :  { %v5149_v53 = vmul.f32 %v5021_v0, %v13383_v32  ;;  %7109 = vtanh.f32 %v13438_v8  ;;  %v13452_v17 = vmul.f32 0.5, %v4434_v61  ;;  %v4438_v47 = vadd.f32 %v13084_v45, %v15046_v14  ;;  %v15050_v0 = vld [vmem:[#allocation165_spill] sm:$0xff] }
 0x5bd   :  { %v5151_v15 = vmul.f32 %v5023_v5, %v13398_v40  ;;  %7111 = vtanh.f32 %v13440_v4  ;;  %v13458_v22 = vmul.f32 0.5, %v4627_v21  ;;  %v4631_v6 = vadd.f32 %v13090_v25, %v15046_v14  ;;  %v13487_v5 = vpop.f32.mrb[188].mxu1 }
 0x5be   :  { %v5469_v10 = vmul.f32 %v15047_v34, %v5149_v53  ;;  %v5873_v32 = vmul.f32 %v5747_v52, %v5149_v53  ;;  %7113 = vtanh.f32 %v13452_v17  ;;  %v13464_v12 = vmul.f32 0.5, %v4438_v47 }
 0x5bf   :  { %v7106_v9 = vpop.eup %7105  ;;  %v5471_v45 = vmul.f32 %v15047_v34, %v5151_v15  ;;  %v5875_v42 = vmul.f32 %v5747_v52, %v5151_v15  ;;  %7115 = vtanh.f32 %v13458_v22  ;;  %v13468_v40 = vmul.f32 0.5, %v4631_v6  ;;  %v13501_v6 = vpop.f32.mrb[189].mxu0 }
 0x5c0   :  { %v13470_v31 = vadd.f32 %v5553_v29, %v5469_v10  ;;  %v13472_v56 = vadd.f32 %v5957_v55, %v5873_v32  ;;  %v5022_v25 = vadd.f32 1.0, %v7106_v9  ;;  %7117 = vtanh.f32 %v13464_v12  ;;  %v15049_v29 = vld [vmem:[#allocation91_spill] sm:$0xff]  ;;  %v13503_v10 = vpop.f32.mrb[189].mxu1 }
 0x5c1   :  { %v7108_v26 = vpop.eup %7107  ;;  %v13475_v44 = vadd.f32 %v5627_v51, %v5471_v45  ;;  %v13477_v11 = vadd.f32 %v6031_v41, %v5875_v42  ;;  %7119 = vtanh.f32 %v13468_v40  ;;  %v4440_v1 = vadd.f32 %v15048_v63, %v15046_v14  ;;  %v13515_v63 = vpop.f32.mrb[190].mxu1 }
 0x5c2   :  { %v5150_v28 = vmul.f32 %v5022_v25, %v13400_v49  ;;  %v5024_v24 = vadd.f32 1.0, %v7108_v26  ;;  %v4633_v55 = vadd.f32 %v15049_v29, %v15046_v14  ;;  %v4442_v61 = vadd.f32 %v15051_v27, %v15050_v0  ;;  %v13513_v26 = vpop.f32.mrb[190].mxu0  ;;  %v15053_v29 = vld [vmem:[#allocation132_spill] sm:$0xff] }
 0x5c3   :  { %v13489_v51 = vmul.f32 0.5, %v4440_v1  ;;  %v4635_v41 = vadd.f32 %v13110_v3, %v15050_v0  ;;  %v4444_v21 = vadd.f32 %v15052_v33, %v15050_v0  ;;  %v4637_v49 = vadd.f32 %v13120_v13, %v15050_v0 }
 0x5c4   :  { %v5470_v53 = vmul.f32 %v15047_v34, %v5150_v28  ;;  %v5874_v47 = vmul.f32 %v5747_v52, %v5150_v28  ;;  %v5152_v14 = vmul.f32 %v5024_v24, %v13402_v54  ;;  %v13499_v15 = vmul.f32 0.5, %v4633_v55 }
 0x5c5   :  { %7121 = vtanh.f32 %v13489_v51  ;;  %v13506_v3 = vmul.f32 0.5, %v4442_v61  ;;  %v13508_v32 = vmul.f32 0.5, %v4635_v41  ;;  %v13510_v9 = vmul.f32 0.5, %v4444_v21 }
 0x5c6   :  { %v7110_v13 = vpop.eup %7109  ;;  %v5591_v45 = vadd.f32 %v5590_v50, %v5470_v53  ;;  %v5995_v42 = vadd.f32 %v5994_v62, %v5874_v47  ;;  %v5472_v25 = vmul.f32 %v15047_v34, %v5152_v14  ;;  %v5876_v54 = vmul.f32 %v5747_v52, %v5152_v14  ;;  %v13525_v52 = vpop.f32.mrb[191].mxu0  ;;  %v15056_v14 = vld [vmem:[#allocation176_spill] sm:$0xff] }
 0x5c7   :  { %v7112_v1 = vpop.eup %7111  ;;  %v5025_v28 = vadd.f32 1.0, %v7110_v13  ;;  %7123 = vtanh.f32 %v13499_v15  ;;  %v13518_v24 = vmul.f32 0.5, %v4637_v49  ;;  %v4448_v55 = vadd.f32 %v13141_v19, %v15053_v29  ;;  %15054 = vst [vmem:[#allocation38_spill] sm:$0xff] %v13525_v52  ;;  %v5751_v19 = vpop.permute.xlu0 %5750 }
 0x5c8   :  { %v7114_v0 = vpop.eup %7113  ;;  %v5665_v50 = vadd.f32 %v13444_v60, %v5472_v25  ;;  %v6069_v62 = vadd.f32 %v13446_v48, %v5876_v54  ;;  %v5027_v34 = vadd.f32 1.0, %v7112_v1  ;;  %7125 = vtanh.f32 %v13506_v3  ;;  %v13535_v53 = vpop.f32.mrb[191].mxu1 }
 0x5c9   :  { %v7116_v27 = vpop.eup %7115  ;;  %v5153_v61 = vmul.f32 %v5025_v28, %v13438_v8  ;;  %v5026_v41 = vadd.f32 1.0, %v7114_v0  ;;  %7127 = vtanh.f32 %v13508_v32  ;;  %v13529_v33 = vmul.f32 0.5, %v4448_v55  ;;  %15055 = vst [vmem:[#allocation212_spill] sm:$0xff] %v13535_v53 }
 0x5ca   :  { %v7118_v21 = vpop.eup %7117  ;;  %v5155_v49 = vmul.f32 %v5027_v34, %v13440_v4  ;;  %v5028_v60 = vadd.f32 1.0, %v7116_v27  ;;  %7129 = vtanh.f32 %v13510_v9  ;;  %v4641_v48 = vadd.f32 %v13147_v59, %v15053_v29 }
 0x5cb   :  { %v7120_v47 = vpop.eup %7119  ;;  %v5473_v8 = vmul.f32 %v15056_v14, %v5153_v61  ;;  %v5877_v13 = vmul.f32 %v5751_v19, %v5153_v61  ;;  %v5154_v25 = vmul.f32 %v5026_v41, %v13452_v17  ;;  %v5029_v54 = vadd.f32 1.0, %v7118_v21 }
 0x5cc   :  { %v5475_v1 = vmul.f32 %v15056_v14, %v5155_v49  ;;  %v5879_v28 = vmul.f32 %v5751_v19, %v5155_v49  ;;  %v5156_v4 = vmul.f32 %v5028_v60, %v13458_v22  ;;  %v5031_v55 = vadd.f32 1.0, %v7120_v47 }
 0x5cd   :  { %v5555_v0 = vadd.f32 %v13470_v31, %v5473_v8  ;;  %v5959_v34 = vadd.f32 %v13472_v56, %v5877_v13  ;;  %v5474_v59 = vmul.f32 %v15056_v14, %v5154_v25  ;;  %v5878_v27 = vmul.f32 %v5751_v19, %v5154_v25  ;;  %v5755_v31 = vpop.permute.xlu1 %5754 }
 0x5ce   :  { %v5629_v53 = vadd.f32 %v13475_v44, %v5475_v1  ;;  %v6033_v61 = vadd.f32 %v13477_v11, %v5879_v28  ;;  %v5476_v17 = vmul.f32 %v15056_v14, %v5156_v4  ;;  %v5880_v41 = vmul.f32 %v5751_v19, %v5156_v4  ;;  %v15057_v44 = vld [vmem:[#allocation15_spill] sm:$0xff] }
 0x5cf   :  { %v7122_v21 = vpop.eup %7121  ;;  %v5592_v52 = vadd.f32 %v5591_v45, %v5474_v59  ;;  %v5996_v49 = vadd.f32 %v5995_v42, %v5878_v27  ;;  %v5157_v22 = vmul.f32 %v5029_v54, %v13464_v12  ;;  %v5159_v60 = vmul.f32 %v5031_v55, %v13468_v40 }
 0x5d0   :  { %v5666_v47 = vadd.f32 %v5665_v50, %v5476_v17  ;;  %v6070_v56 = vadd.f32 %v6069_v62, %v5880_v41  ;;  %v5030_v8 = vadd.f32 1.0, %v7122_v21  ;;  %7131 = vtanh.f32 %v13518_v24 }
 0x5d1   :  { %v7124_v13 = vpop.eup %7123  ;;  %v5477_v25 = vmul.f32 %v15057_v44, %v5157_v22  ;;  %v5881_v11 = vmul.f32 %v5755_v31, %v5157_v22  ;;  %v5479_v14 = vmul.f32 %v15057_v44, %v5159_v60  ;;  %v5883_v19 = vmul.f32 %v5755_v31, %v5159_v60 }
 0x5d2   :  { %v7126_v1 = vpop.eup %7125  ;;  %v5158_v45 = vmul.f32 %v5030_v8, %v13489_v51  ;;  %v5032_v42 = vadd.f32 1.0, %v7124_v13  ;;  %7133 = vtanh.f32 %v13529_v33  ;;  %v13554_v12 = vmul.f32 0.5, %v4641_v48  ;;  %v5759_v8 = vpop.permute.xlu0 %5758 }
 0x5d3   :  { %v7128_v40 = vpop.eup %7127  ;;  %v5556_v50 = vadd.f32 %v5555_v0, %v5477_v25  ;;  %v5960_v62 = vadd.f32 %v5959_v34, %v5881_v11  ;;  %v5630_v54 = vadd.f32 %v5629_v53, %v5479_v14  ;;  %v6034_v28 = vadd.f32 %v6033_v61, %v5883_v19 }
 0x5d4   :  { %v7130_v4 = vpop.eup %7129  ;;  %v5478_v55 = vmul.f32 %v15057_v44, %v5158_v45  ;;  %v5882_v59 = vmul.f32 %v5755_v31, %v5158_v45  ;;  %v5160_v27 = vmul.f32 %v5032_v42, %v13499_v15  ;;  %v5033_v17 = vadd.f32 1.0, %v7126_v1 }
 0x5d5   :  { %v5035_v41 = vadd.f32 1.0, %v7128_v40  ;;  %v5034_v21 = vadd.f32 1.0, %v7130_v4  ;;  %7135 = vtanh.f32 %v13554_v12  ;;  %v4450_v51 = vadd.f32 %v13149_v37, %v15053_v29  ;;  %v15058_v37 = vld [vmem:[#allocation158_spill] sm:$0xff] }
 0x5d6   :  { %v5593_v48 = vadd.f32 %v5592_v52, %v5478_v55  ;;  %v5997_v22 = vadd.f32 %v5996_v49, %v5882_v59  ;;  %v5480_v0 = vmul.f32 %v15057_v44, %v5160_v27  ;;  %v5884_v53 = vmul.f32 %v5755_v31, %v5160_v27  ;;  %v15059_v49 = vld [vmem:[#allocation177_spill] sm:$0xff]  ;;  %v15060_v59 = vld [vmem:[#allocation182_spill] sm:$0xff] }
 0x5d7   :  { %v5161_v34 = vmul.f32 %v5033_v17, %v13506_v3  ;;  %v5163_v61 = vmul.f32 %v5035_v41, %v13508_v32  ;;  %v5162_v60 = vmul.f32 %v5034_v21, %v13510_v9  ;;  %v13565_v15 = vmul.f32 0.5, %v4450_v51  ;;  %v15062_v17 = vld [vmem:[#allocation164_spill] sm:$0xff] }
 0x5d8   :  { %v5667_v13 = vadd.f32 %v5666_v47, %v5480_v0  ;;  %v6071_v25 = vadd.f32 %v6070_v56, %v5884_v53  ;;  %v4643_v11 = vadd.f32 %v13158_v18, %v15053_v29  ;;  %v4452_v52 = vadd.f32 %v13160_v16, %v15058_v37  ;;  %v15063_v41 = vld [vmem:[#allocation184_spill] sm:$0xff] }
 0x5d9   :  { %v5481_v44 = vmul.f32 %v15059_v49, %v5161_v34  ;;  %v5885_v31 = vmul.f32 %v5759_v8, %v5161_v34  ;;  %v5483_v3 = vmul.f32 %v15059_v49, %v5163_v61  ;;  %v5887_v14 = vmul.f32 %v5759_v8, %v5163_v61 }
 0x5da   :  { %v7132_v32 = vpop.eup %7131  ;;  %v5482_v9 = vmul.f32 %v15059_v49, %v5162_v60  ;;  %v5886_v19 = vmul.f32 %v5759_v8, %v5162_v60  ;;  %7137 = vtanh.f32 %v13565_v15  ;;  %v13575_v47 = vmul.f32 0.5, %v4643_v11  ;;  %v15064_v11 = vld [vmem:[#allocation85_spill] sm:$0xff] }
 0x5db   :  { %v5557_v56 = vadd.f32 %v5556_v50, %v5481_v44  ;;  %v5961_v1 = vadd.f32 %v5960_v62, %v5885_v31  ;;  %v5631_v18 = vadd.f32 %v5630_v54, %v5483_v3  ;;  %v6035_v29 = vadd.f32 %v6034_v28, %v5887_v14  ;;  %v15061_v54 = vld [vmem:[#allocation183_spill] sm:$0xff] }
 0x5dc   :  { %v7134_v45 = vpop.eup %7133  ;;  %v13577_v16 = vadd.f32 %v5593_v48, %v5482_v9  ;;  %v13579_v42 = vadd.f32 %v5997_v22, %v5886_v19  ;;  %v5036_v40 = vadd.f32 1.0, %v7132_v32  ;;  %7139 = vtanh.f32 %v13575_v47  ;;  %v15065_v19 = vld [vmem:[#allocation28_spill] sm:$0xff] }
 0x5dd   :  { %v5037_v4 = vadd.f32 1.0, %v7134_v45  ;;  %v13582_v55 = vmul.f32 0.5, %v4452_v52  ;;  %v4645_v27 = vadd.f32 %v15060_v59, %v15058_v37  ;;  %v4454_v50 = vadd.f32 %v13169_v23, %v15058_v37  ;;  %v5763_v23 = vpop.permute.xlu1 %5762 }
 0x5de   :  { %v5164_v62 = vmul.f32 %v5036_v40, %v13518_v24  ;;  %v4647_v28 = vadd.f32 %v15061_v54, %v15058_v37  ;;  %v4458_v21 = vadd.f32 %v15063_v41, %v15062_v17  ;;  %v4651_v51 = vadd.f32 %v13201_v2, %v15062_v17 }
 0x5df   :  { %v7136_v48 = vpop.eup %7135  ;;  %v5165_v22 = vmul.f32 %v5037_v4, %v13529_v33  ;;  %7141 = vtanh.f32 %v13582_v55  ;;  %v13597_v0 = vmul.f32 0.5, %v4645_v27  ;;  %v13599_v53 = vmul.f32 0.5, %v4454_v50 }
 0x5e0   :  { %v5484_v24 = vmul.f32 %v15059_v49, %v5164_v62  ;;  %v5888_v34 = vmul.f32 %v5759_v8, %v5164_v62  ;;  %v5039_v61 = vadd.f32 1.0, %v7136_v48  ;;  %v13602_v60 = vmul.f32 0.5, %v4647_v28 }
 0x5e1   :  { %v5485_v37 = vmul.f32 %v15064_v11, %v5165_v22  ;;  %v5889_v52 = vmul.f32 %v5763_v23, %v5165_v22  ;;  %7143 = vtanh.f32 %v13597_v0  ;;  %v13606_v2 = vmul.f32 0.5, %v4458_v21 }
 0x5e2   :  { %v5668_v33 = vadd.f32 %v5667_v13, %v5484_v24  ;;  %v6072_v44 = vadd.f32 %v6071_v25, %v5888_v34  ;;  %v5167_v31 = vmul.f32 %v5039_v61, %v13554_v12  ;;  %7145 = vtanh.f32 %v13599_v53 }
 0x5e3   :  { %v5558_v3 = vadd.f32 %v5557_v56, %v5485_v37  ;;  %v5962_v14 = vadd.f32 %v5961_v1, %v5889_v52  ;;  %7147 = vtanh.f32 %v13602_v60  ;;  %v13611_v8 = vmul.f32 0.5, %v4651_v51  ;;  %v15067_v37 = vld [vmem:[#allocation166_spill] sm:$0xff]  ;;  %v15068_v52 = vld [vmem:[#allocation199_spill] sm:$0xff] }
 0x5e4   :  { %v7138_v49 = vpop.eup %7137  ;;  %v5487_v32 = vmul.f32 %v15064_v11, %v5167_v31  ;;  %v5891_v9 = vmul.f32 %v5763_v23, %v5167_v31  ;;  %7149 = vtanh.f32 %v13606_v2  ;;  %v4460_v13 = vadd.f32 %v13203_v58, %v15062_v17 }
 0x5e5   :  { %v5038_v25 = vadd.f32 1.0, %v7138_v49  ;;  %7151 = vtanh.f32 %v13611_v8  ;;  %v4653_v12 = vadd.f32 %v13208_v30, %v15062_v17  ;;  %v4462_v56 = vadd.f32 %v13210_v43, %v15065_v19 }
 0x5e6   :  { %v7140_v1 = vpop.eup %7139  ;;  %v5632_v45 = vadd.f32 %v5631_v18, %v5487_v32  ;;  %v6036_v40 = vadd.f32 %v6035_v29, %v5891_v9  ;;  %v13622_v4 = vmul.f32 0.5, %v4460_v13  ;;  %v4655_v59 = vadd.f32 %v13215_v7, %v15065_v19  ;;  %v15066_v18 = vld [vmem:[#allocation34_spill] sm:$0xff]  ;;  %v5767_v32 = vpop.permute.xlu0 %5766 }
 0x5e7   :  { %v5166_v27 = vmul.f32 %v5038_v25, %v13565_v15  ;;  %v5040_v58 = vadd.f32 1.0, %v7140_v1  ;;  %v13627_v50 = vmul.f32 0.5, %v4653_v12  ;;  %v13629_v62 = vmul.f32 0.5, %v4462_v56 }
 0x5e8   :  { %7153 = vtanh.f32 %v13622_v4  ;;  %v13632_v30 = vmul.f32 0.5, %v4655_v59  ;;  %v4464_v43 = vadd.f32 %v13217_v57, %v15065_v19  ;;  %v4657_v29 = vadd.f32 %v15066_v18, %v15065_v19 }
 0x5e9   :  { %v7142_v54 = vpop.eup %7141  ;;  %v5486_v7 = vmul.f32 %v15064_v11, %v5166_v27  ;;  %v5890_v28 = vmul.f32 %v5763_v23, %v5166_v27  ;;  %v5168_v15 = vmul.f32 %v5040_v58, %v13575_v47  ;;  %7155 = vtanh.f32 %v13627_v50 }
 0x5ea   :  { %v5041_v17 = vadd.f32 1.0, %v7142_v54  ;;  %7157 = vtanh.f32 %v13629_v62  ;;  %v13642_v41 = vmul.f32 0.5, %v4464_v43  ;;  %v13644_v21 = vmul.f32 0.5, %v4657_v29 }
 0x5eb   :  { %v7144_v51 = vpop.eup %7143  ;;  %v5595_v57 = vadd.f32 %v13577_v16, %v5486_v7  ;;  %v5999_v48 = vadd.f32 %v13579_v42, %v5890_v28  ;;  %v5488_v22 = vmul.f32 %v15064_v11, %v5168_v15  ;;  %v5892_v24 = vmul.f32 %v5763_v23, %v5168_v15  ;;  %v15069_v42 = vld [vmem:[#allocation169_spill] sm:$0xff] }
 0x5ec   :  { %v7146_v34 = vpop.eup %7145  ;;  %v5169_v47 = vmul.f32 %v5041_v17, %v13582_v55  ;;  %v5043_v61 = vadd.f32 1.0, %v7144_v51  ;;  %7159 = vtanh.f32 %v13632_v30  ;;  %v4468_v31 = vadd.f32 %v15068_v52, %v15067_v37  ;;  %v5771_v17 = vpop.permute.xlu1 %5770 }
 0x5ed   :  { %v7148_v49 = vpop.eup %7147  ;;  %v5669_v9 = vadd.f32 %v5668_v33, %v5488_v22  ;;  %v6073_v13 = vadd.f32 %v6072_v44, %v5892_v24  ;;  %v5042_v25 = vadd.f32 1.0, %v7146_v34  ;;  %7161 = vtanh.f32 %v13642_v41  ;;  %v15070_v34 = vld [vmem:[#allocation84_spill] sm:$0xff] }
 0x5ee   :  { %v7150_v16 = vpop.eup %7149  ;;  %v5489_v11 = vmul.f32 %v15069_v42, %v5169_v47  ;;  %v5893_v23 = vmul.f32 %v5767_v32, %v5169_v47  ;;  %v5171_v12 = vmul.f32 %v5043_v61, %v13597_v0  ;;  %v5044_v55 = vadd.f32 1.0, %v7148_v49 }
 0x5ef   :  { %v7152_v19 = vpop.eup %7151  ;;  %v5170_v56 = vmul.f32 %v5042_v25, %v13599_v53  ;;  %v5045_v1 = vadd.f32 1.0, %v7150_v16  ;;  %7163 = vtanh.f32 %v13644_v21  ;;  %v13658_v59 = vmul.f32 0.5, %v4468_v31 }
 0x5f0   :  { %v5559_v33 = vadd.f32 %v5558_v3, %v5489_v11  ;;  %v5963_v44 = vadd.f32 %v5962_v14, %v5893_v23  ;;  %v5491_v27 = vmul.f32 %v15069_v42, %v5171_v12  ;;  %v5895_v58 = vmul.f32 %v5767_v32, %v5171_v12 }
 0x5f1   :  { %v5490_v43 = vmul.f32 %v15069_v42, %v5170_v56  ;;  %v5894_v18 = vmul.f32 %v5767_v32, %v5170_v56  ;;  %v5172_v29 = vmul.f32 %v5044_v55, %v13602_v60  ;;  %v5173_v0 = vmul.f32 %v5045_v1, %v13606_v2  ;;  %v5775_v56 = vpop.permute.xlu0 %5774 }
 0x5f2   :  { %v7154_v54 = vpop.eup %7153  ;;  %v5633_v7 = vadd.f32 %v5632_v45, %v5491_v27  ;;  %v6037_v53 = vadd.f32 %v6036_v40, %v5895_v58  ;;  %v5047_v28 = vadd.f32 1.0, %v7152_v19  ;;  %7165 = vtanh.f32 %v13658_v59 }
 0x5f3   :  { %v7156_v15 = vpop.eup %7155  ;;  %v5596_v3 = vadd.f32 %v5595_v57, %v5490_v43  ;;  %v6000_v14 = vadd.f32 %v5999_v48, %v5894_v18  ;;  %v5492_v51 = vmul.f32 %v15069_v42, %v5172_v29  ;;  %v5896_v22 = vmul.f32 %v5767_v32, %v5172_v29 }
 0x5f4   :  { %v7158_v24 = vpop.eup %7157  ;;  %v5493_v47 = vmul.f32 %v15070_v34, %v5173_v0  ;;  %v5897_v61 = vmul.f32 %v5771_v17, %v5173_v0  ;;  %v5175_v60 = vmul.f32 %v5047_v28, %v13611_v8  ;;  %v5046_v2 = vadd.f32 1.0, %v7154_v54 }
 0x5f5   :  { %v5670_v52 = vadd.f32 %v5669_v9, %v5492_v51  ;;  %v6074_v45 = vadd.f32 %v6073_v13, %v5896_v22  ;;  %v5048_v40 = vadd.f32 1.0, %v7156_v15  ;;  %v5049_v31 = vadd.f32 1.0, %v7158_v24 }
 0x5f6   :  { %v7160_v49 = vpop.eup %7159  ;;  %v5560_v25 = vadd.f32 %v5559_v33, %v5493_v47  ;;  %v5964_v16 = vadd.f32 %v5963_v44, %v5897_v61  ;;  %v5495_v57 = vmul.f32 %v15070_v34, %v5175_v60  ;;  %v5899_v48 = vmul.f32 %v5771_v17, %v5175_v60 }
 0x5f7   :  { %v7162_v11 = vpop.eup %7161  ;;  %v5174_v32 = vmul.f32 %v5046_v2, %v13622_v4  ;;  %v5176_v42 = vmul.f32 %v5048_v40, %v13627_v50  ;;  %v5177_v23 = vmul.f32 %v5049_v31, %v13629_v62  ;;  %v5051_v12 = vadd.f32 1.0, %v7160_v49  ;;  %v15071_v4 = vld [vmem:[#allocation174_spill] sm:$0xff]  ;;  %v15073_v31 = vld [vmem:[#allocation80_spill] sm:$0xff] }
 0x5f8   :  { %v5634_v8 = vadd.f32 %v5633_v7, %v5495_v57  ;;  %v6038_v55 = vadd.f32 %v6037_v53, %v5899_v48  ;;  %v5050_v9 = vadd.f32 1.0, %v7162_v11  ;;  %v4661_v13 = vadd.f32 %v13246_v38, %v15067_v37  ;;  %v15074_v57 = vld [vmem:[#allocation59_spill] sm:$0xff] }
 0x5f9   :  { %v7164_v19 = vpop.eup %7163  ;;  %v5494_v1 = vmul.f32 %v15070_v34, %v5174_v32  ;;  %v5898_v33 = vmul.f32 %v5771_v17, %v5174_v32  ;;  %v5496_v44 = vmul.f32 %v15070_v34, %v5176_v42  ;;  %v5900_v27 = vmul.f32 %v5771_v17, %v5176_v42  ;;  %v15075_v32 = vld [vmem:[#allocation198_spill] sm:$0xff] }
 0x5fa   :  { %v5497_v58 = vmul.f32 %v15071_v4, %v5177_v23  ;;  %v5901_v50 = vmul.f32 %v5775_v56, %v5177_v23  ;;  %v5179_v62 = vmul.f32 %v5051_v12, %v13632_v30  ;;  %v5178_v43 = vmul.f32 %v5050_v9, %v13642_v41  ;;  %v15077_v9 = vld [vmem:[#allocation36_spill] sm:$0xff] }
 0x5fb   :  { %v5597_v18 = vadd.f32 %v5596_v3, %v5494_v1  ;;  %v6001_v29 = vadd.f32 %v6000_v14, %v5898_v33  ;;  %v5671_v0 = vadd.f32 %v5670_v52, %v5496_v44  ;;  %v6075_v54 = vadd.f32 %v6074_v45, %v5900_v27  ;;  %v15072_v3 = vld [vmem:[#allocation55_spill] sm:$0xff]  ;;  %v13693_v52 = vpop.permute.xlu1 %5778  ;;  %v15080_v33 = vld [vmem:[#allocation201_spill] sm:$0xff]  ;;  %v15081_v27 = vld [vmem:[#allocation202_spill] sm:$0xff] }
 0x5fc   :  { %v7166_v38 = vpop.eup %7165  ;;  %v5561_v7 = vadd.f32 %v5560_v25, %v5497_v58  ;;  %v5965_v53 = vadd.f32 %v5964_v16, %v5901_v50  ;;  %v5499_v28 = vmul.f32 %v15071_v4, %v5179_v62  ;;  %v5903_v15 = vmul.f32 %v5775_v56, %v5179_v62  ;;  %v15082_v62 = vld [vmem:[#allocation37_spill] sm:$0xff] }
 0x5fd   :  { %v5498_v51 = vmul.f32 %v15071_v4, %v5178_v43  ;;  %v5902_v17 = vmul.f32 %v5775_v56, %v5178_v43  ;;  %v5052_v22 = vadd.f32 1.0, %v7164_v19  ;;  %v5053_v24 = vadd.f32 1.0, %v7166_v38  ;;  %v15078_v19 = vld [vmem:[#allocation160_spill] sm:$0xff]  ;;  %v15084_v38 = vld [vmem:[#allocation203_spill] sm:$0xff] }
 0x5fe   :  { %v13681_v34 = vadd.f32 %v5634_v8, %v5499_v28  ;;  %v13683_v30 = vadd.f32 %v6038_v55, %v5903_v15  ;;  %v4799_v41 = vmul.f32 0.5, %v4661_v13  ;;  %v4470_v14 = vadd.f32 %v15072_v3, %v15067_v37  ;;  %v15076_v8 = vld [vmem:[#allocation92_spill] sm:$0xff] }
 0x5ff   :  { %v13687_v47 = vadd.f32 %v5597_v18, %v5498_v51  ;;  %v13689_v61 = vadd.f32 %v6001_v29, %v5902_v17  ;;  %v5180_v60 = vmul.f32 %v5052_v22, %v13644_v21  ;;  %v5181_v2 = vmul.f32 %v5053_v24, %v13658_v59  ;;  %v15085_v28 = vld [vmem:[#allocation204_spill] sm:$0xff]  ;;  %v15086_v51 = vld [vmem:[#allocation137_spill] sm:$0xff] }
 0x600   :  { %7167 = vtanh.f32 %v4799_v41  ;;  %v13695_v45 = vmul.f32 0.5, %v4470_v14  ;;  %v4663_v40 = vadd.f32 %v13252_v35, %v15067_v37  ;;  %v4472_v49 = vadd.f32 %v13254_v39, %v15073_v31  ;;  %v15087_v24 = vld [vmem:[#allocation205_spill] sm:$0xff] }
 0x601   :  { %v5500_v25 = vmul.f32 %v15071_v4, %v5180_v60  ;;  %v5904_v16 = vmul.f32 %v5775_v56, %v5180_v60  ;;  %v5501_v48 = vmul.f32 %v15074_v57, %v5181_v2  ;;  %v5905_v21 = vmul.f32 %v13693_v52, %v5181_v2  ;;  %v15079_v56 = vld [vmem:[#allocation200_spill] sm:$0xff]  ;;  %v15088_v14 = vld [vmem:[#allocation149_spill] sm:$0xff] }
 0x602   :  { %7169 = vtanh.f32 %v13695_v45  ;;  %v13705_v59 = vmul.f32 0.5, %v4663_v40  ;;  %v13707_v11 = vmul.f32 0.5, %v4472_v49  ;;  %v4665_v42 = vadd.f32 %v15075_v32, %v15073_v31  ;;  %v15089_v60 = vld [vmem:[#allocation93_spill] sm:$0xff] }
 0x603   :  { %v13711_v35 = vadd.f32 %v5671_v0, %v5500_v25  ;;  %v13713_v37 = vadd.f32 %v6075_v54, %v5904_v16  ;;  %v13715_v39 = vadd.f32 %v5561_v7, %v5501_v48  ;;  %v13717_v23 = vadd.f32 %v5965_v53, %v5905_v21  ;;  %v15083_v54 = vld [vmem:[#allocation161_spill] sm:$0xff]  ;;  %v15090_v25 = vld [vmem:[#allocation206_spill] sm:$0xff] }
 0x604   :  { %7171 = vtanh.f32 %v13705_v59  ;;  %v13720_v12 = vmul.f32 0.5, %v4665_v42  ;;  %v4474_v55 = vadd.f32 %v15076_v8, %v15073_v31  ;;  %v4667_v13 = vadd.f32 %v15077_v9, %v15073_v31 }
 0x605   :  { %7173 = vtanh.f32 %v13707_v11  ;;  %v4478_v1 = vadd.f32 %v15079_v56, %v15078_v19  ;;  %v4671_v44 = vadd.f32 %v15080_v33, %v15078_v19  ;;  %v4480_v4 = vadd.f32 %v15081_v27, %v15078_v19  ;;  %v15093_v33 = vld [vmem:[#allocation134_spill] sm:$0xff] }
 0x606   :  { %7175 = vtanh.f32 %v13720_v12  ;;  %v13734_v58 = vmul.f32 0.5, %v4474_v55  ;;  %v13736_v50 = vmul.f32 0.5, %v4667_v13  ;;  %v4673_v43 = vadd.f32 %v15082_v62, %v15078_v19  ;;  %v15091_v55 = vld [vmem:[#allocation138_spill] sm:$0xff]  ;;  %v15092_v13 = vld [vmem:[#allocation207_spill] sm:$0xff] }
 0x607   :  { %v13740_v18 = vmul.f32 0.5, %v4478_v1  ;;  %v13742_v29 = vmul.f32 0.5, %v4671_v44  ;;  %v13744_v0 = vmul.f32 0.5, %v4480_v4  ;;  %v4482_v7 = vadd.f32 %v15084_v38, %v15083_v54  ;;  %v15094_v44 = vld [vmem:[#allocation140_spill] sm:$0xff] }
 0x608   :  { %7177 = vtanh.f32 %v13734_v58  ;;  %v13749_v53 = vmul.f32 0.5, %v4673_v43  ;;  %v4675_v15 = vadd.f32 %v15085_v28, %v15083_v54  ;;  %v4484_v17 = vadd.f32 %v15086_v51, %v15083_v54 }
 0x609   :  { %7179 = vtanh.f32 %v13736_v50  ;;  %v13756_v22 = vmul.f32 0.5, %v4482_v7  ;;  %v4677_v3 = vadd.f32 %v15087_v24, %v15083_v54  ;;  %v4488_v2 = vadd.f32 %v15089_v60, %v15088_v14  ;;  %v15095_v54 = vld [vmem:[#allocation12_spill] sm:$0xff] }
 0x60a   :  { %v7168_v40 = vpop.eup %7167  ;;  %7181 = vtanh.f32 %v13740_v18  ;;  %v13763_v31 = vmul.f32 0.5, %v4675_v15  ;;  %v13765_v49 = vmul.f32 0.5, %v4484_v17  ;;  %v4681_v16 = vadd.f32 %v15090_v25, %v15088_v14 }
 0x60b   :  { %v5055_v48 = vadd.f32 1.0, %v7168_v40  ;;  %7183 = vtanh.f32 %v13742_v29  ;;  %v13770_v21 = vmul.f32 0.5, %v4677_v3  ;;  %v13772_v32 = vmul.f32 0.5, %v4488_v2 }
 0x60c   :  { %v7170_v42 = vpop.eup %7169  ;;  %7185 = vtanh.f32 %v13744_v0  ;;  %v13775_v8 = vmul.f32 0.5, %v4681_v16  ;;  %v4490_v9 = vadd.f32 %v15091_v55, %v15088_v14  ;;  %v4683_v19 = vadd.f32 %v15092_v13, %v15088_v14 }
 0x60d   :  { %v5183_v56 = vmul.f32 %v5055_v48, %v4799_v41  ;;  %v5054_v1 = vadd.f32 1.0, %v7170_v42  ;;  %7187 = vtanh.f32 %v13749_v53  ;;  %v4492_v27 = vadd.f32 %v15094_v44, %v15093_v33 }
 0x60e   :  { %v7172_v4 = vpop.eup %7171  ;;  %7189 = vtanh.f32 %v13756_v22  ;;  %v13785_v62 = vmul.f32 0.5, %v4490_v9  ;;  %v13787_v43 = vmul.f32 0.5, %v4683_v19  ;;  %v4685_v38 = vadd.f32 %v15095_v54, %v15093_v33  ;;  %v5783_v9 = vpop.permute.xlu0 %5782 }
 0x60f   :  { %v7174_v7 = vpop.eup %7173  ;;  %v5503_v28 = vmul.f32 %v15074_v57, %v5183_v56  ;;  %v5907_v41 = vmul.f32 %v13693_v52, %v5183_v56  ;;  %v5182_v15 = vmul.f32 %v5054_v1, %v13695_v45  ;;  %v5056_v51 = vadd.f32 1.0, %v7172_v4 }
 0x610   :  { %v7176_v17 = vpop.eup %7175  ;;  %v5057_v24 = vadd.f32 1.0, %v7174_v7  ;;  %7191 = vtanh.f32 %v13763_v31  ;;  %v13795_v3 = vmul.f32 0.5, %v4492_v27  ;;  %v13797_v14 = vmul.f32 0.5, %v4685_v38 }
 0x611   :  { %v5636_v60 = vadd.f32 %v13681_v34, %v5503_v28  ;;  %v6040_v2 = vadd.f32 %v13683_v30, %v5907_v41  ;;  %v5502_v40 = vmul.f32 %v15074_v57, %v5182_v15  ;;  %v5906_v25 = vmul.f32 %v13693_v52, %v5182_v15 }
 0x612   :  { %v7178_v16 = vpop.eup %7177  ;;  %v5184_v45 = vmul.f32 %v5056_v51, %v13705_v59  ;;  %v5185_v48 = vmul.f32 %v5057_v24, %v13707_v11  ;;  %v5059_v42 = vadd.f32 1.0, %v7176_v17  ;;  %7193 = vtanh.f32 %v13765_v49  ;;  %v15096_v59 = vld [vmem:[#allocation181_spill] sm:$0xff] }
 0x613   :  { %v7180_v55 = vpop.eup %7179  ;;  %v5599_v13 = vadd.f32 %v13687_v47, %v5502_v40  ;;  %v6003_v34 = vadd.f32 %v13689_v61, %v5906_v25  ;;  %v5058_v19 = vadd.f32 1.0, %v7178_v16  ;;  %7195 = vtanh.f32 %v13770_v21  ;;  %v5787_v16 = vpop.permute.xlu1 %5786 }
 0x614   :  { %v7182_v30 = vpop.eup %7181  ;;  %v5504_v56 = vmul.f32 %v15074_v57, %v5184_v45  ;;  %v5908_v1 = vmul.f32 %v13693_v52, %v5184_v45  ;;  %v5505_v44 = vmul.f32 %v15096_v59, %v5185_v48  ;;  %v5909_v11 = vmul.f32 %v5783_v9, %v5185_v48 }
 0x615   :  { %v7184_v27 = vpop.eup %7183  ;;  %v5187_v4 = vmul.f32 %v5059_v42, %v13720_v12  ;;  %v5186_v54 = vmul.f32 %v5058_v19, %v13734_v58  ;;  %v5060_v38 = vadd.f32 1.0, %v7180_v55  ;;  %v5061_v47 = vadd.f32 1.0, %v7182_v30  ;;  %v15097_v19 = vld [vmem:[#allocation173_spill] sm:$0xff] }
 0x616   :  { %v7186_v7 = vpop.eup %7185  ;;  %v5673_v61 = vadd.f32 %v13711_v35, %v5504_v56  ;;  %v6077_v28 = vadd.f32 %v13713_v37, %v5908_v1  ;;  %v5563_v41 = vadd.f32 %v13715_v39, %v5505_v44  ;;  %v5967_v57 = vadd.f32 %v13717_v23, %v5909_v11 }
 0x617   :  { %v7188_v52 = vpop.eup %7187  ;;  %v5507_v15 = vmul.f32 %v15096_v59, %v5187_v4  ;;  %v5911_v51 = vmul.f32 %v5783_v9, %v5187_v4  ;;  %v5506_v17 = vmul.f32 %v15096_v59, %v5186_v54  ;;  %v5910_v12 = vmul.f32 %v5783_v9, %v5186_v54 }
 0x618   :  { %v7190_v24 = vpop.eup %7189  ;;  %v5188_v58 = vmul.f32 %v5060_v38, %v13736_v50  ;;  %v5189_v40 = vmul.f32 %v5061_v47, %v13740_v18  ;;  %v5063_v25 = vadd.f32 1.0, %v7184_v27  ;;  %v5062_v35 = vadd.f32 1.0, %v7186_v7  ;;  %v5791_v7 = vpop.permute.xlu0 %5790 }
 0x619   :  { %v5637_v37 = vadd.f32 %v5636_v60, %v5507_v15  ;;  %v6041_v45 = vadd.f32 %v6040_v2, %v5911_v51  ;;  %v5600_v39 = vadd.f32 %v5599_v13, %v5506_v17  ;;  %v6004_v48 = vadd.f32 %v6003_v34, %v5910_v12  ;;  %v15098_v51 = vld [vmem:[#allocation185_spill] sm:$0xff] }
 0x61a   :  { %v7192_v23 = vpop.eup %7191  ;;  %v5508_v42 = vmul.f32 %v15096_v59, %v5188_v58  ;;  %v5912_v55 = vmul.f32 %v5783_v9, %v5188_v58  ;;  %v5509_v30 = vmul.f32 %v15097_v19, %v5189_v40  ;;  %v5913_v56 = vmul.f32 %v5787_v16, %v5189_v40 }
 0x61b   :  { %v5191_v1 = vmul.f32 %v5063_v25, %v13742_v29  ;;  %v5190_v50 = vmul.f32 %v5062_v35, %v13744_v0  ;;  %v5064_v44 = vadd.f32 1.0, %v7188_v52  ;;  %v5065_v18 = vadd.f32 1.0, %v7190_v24 }
 0x61c   :  { %v7194_v11 = vpop.eup %7193  ;;  %v5674_v27 = vadd.f32 %v5673_v61, %v5508_v42  ;;  %v6078_v4 = vadd.f32 %v6077_v28, %v5912_v55  ;;  %v5564_v60 = vadd.f32 %v5563_v41, %v5509_v30  ;;  %v5968_v2 = vadd.f32 %v5967_v57, %v5913_v56 }
 0x61d   :  { %v7196_v13 = vpop.eup %7195  ;;  %v5511_v34 = vmul.f32 %v15097_v19, %v5191_v1  ;;  %v5915_v54 = vmul.f32 %v5787_v16, %v5191_v1  ;;  %v5510_v9 = vmul.f32 %v15097_v19, %v5190_v50  ;;  %v5914_v59 = vmul.f32 %v5787_v16, %v5190_v50 }
 0x61e   :  { %v5192_v38 = vmul.f32 %v5064_v44, %v13749_v53  ;;  %v5193_v29 = vmul.f32 %v5065_v18, %v13756_v22  ;;  %v5067_v47 = vadd.f32 1.0, %v7192_v23  ;;  %v5066_v0 = vadd.f32 1.0, %v7194_v11  ;;  %v15100_v23 = vld [vmem:[#allocation190_spill] sm:$0xff] }
 0x61f   :  { %v5638_v52 = vadd.f32 %v5637_v37, %v5511_v34  ;;  %v6042_v15 = vadd.f32 %v6041_v45, %v5915_v54  ;;  %v5601_v61 = vadd.f32 %v5600_v39, %v5510_v9  ;;  %v6005_v28 = vadd.f32 %v6004_v48, %v5914_v59  ;;  %v15104_v9 = vld [vmem:[#allocation162_spill] sm:$0xff]  ;;  %v15105_v59 = vld [vmem:[#allocation211_spill] sm:$0xff] }
 0x620   :  { %v5512_v41 = vmul.f32 %v15097_v19, %v5192_v38  ;;  %v5916_v57 = vmul.f32 %v5787_v16, %v5192_v38  ;;  %v5513_v17 = vmul.f32 %v15098_v51, %v5193_v29  ;;  %v5917_v12 = vmul.f32 %v5791_v7, %v5193_v29  ;;  %v15106_v29 = vld [vmem:[#allocation125_spill] sm:$0xff] }
 0x621   :  { %v5195_v24 = vmul.f32 %v5067_v47, %v13763_v31  ;;  %v5194_v58 = vmul.f32 %v5066_v0, %v13765_v49  ;;  %v5068_v53 = vadd.f32 1.0, %v7196_v13  ;;  %7197 = vtanh.f32 %v13772_v32  ;;  %v15099_v31 = vld [vmem:[#allocation189_spill] sm:$0xff] }
 0x622   :  { %v5675_v22 = vadd.f32 %v5674_v27, %v5512_v41  ;;  %v6079_v40 = vadd.f32 %v6078_v4, %v5916_v57  ;;  %v13835_v25 = vadd.f32 %v5564_v60, %v5513_v17  ;;  %v13837_v35 = vadd.f32 %v5968_v2, %v5917_v12  ;;  %v15102_v60 = vld [vmem:[#allocation191_spill] sm:$0xff] }
 0x623   :  { %v5515_v37 = vmul.f32 %v15098_v51, %v5195_v24  ;;  %v5919_v45 = vmul.f32 %v5791_v7, %v5195_v24  ;;  %v5514_v16 = vmul.f32 %v15098_v51, %v5194_v58  ;;  %v5918_v39 = vmul.f32 %v5791_v7, %v5194_v58  ;;  %v15109_v24 = vld [vmem:[#allocation150_spill] sm:$0xff] }
 0x624   :  { %v5196_v48 = vmul.f32 %v5068_v53, %v13770_v21  ;;  %7199 = vtanh.f32 %v13775_v8  ;;  %v4494_v49 = vadd.f32 %v15099_v31, %v15093_v33  ;;  %v4687_v42 = vadd.f32 %v15100_v23, %v15093_v33  ;;  %v15101_v33 = vld [vmem:[#allocation31_spill] sm:$0xff] }
 0x625   :  { %v13847_v55 = vadd.f32 %v5638_v52, %v5515_v37  ;;  %v13849_v19 = vadd.f32 %v6042_v15, %v5919_v45  ;;  %v13851_v30 = vadd.f32 %v5601_v61, %v5514_v16  ;;  %v13853_v56 = vadd.f32 %v6005_v28, %v5918_v39  ;;  %v15107_v52 = vld [vmem:[#allocation208_spill] sm:$0xff]  ;;  %v15108_v61 = vld [vmem:[#allocation139_spill] sm:$0xff]  ;;  %v5795_v45 = vpop.permute.xlu1 %5794 }
 0x626   :  { %v5516_v1 = vmul.f32 %v15098_v51, %v5196_v48  ;;  %v5920_v50 = vmul.f32 %v5791_v7, %v5196_v48  ;;  %7201 = vtanh.f32 %v13785_v62  ;;  %v13857_v21 = vmul.f32 0.5, %v4494_v49  ;;  %v15110_v31 = vld [vmem:[#allocation175_spill] sm:$0xff] }
 0x627   :  { %7203 = vtanh.f32 %v13787_v43  ;;  %v13860_v44 = vmul.f32 0.5, %v4687_v42  ;;  %v4498_v18 = vadd.f32 %v13393_v36, %v15101_v33  ;;  %v4691_v11 = vadd.f32 %v13395_v20, %v15101_v33  ;;  %v15103_v36 = vld [vmem:[#allocation210_spill] sm:$0xff] }
 0x628   :  { %v13866_v27 = vadd.f32 %v5675_v22, %v5516_v1  ;;  %v13868_v4 = vadd.f32 %v6079_v40, %v5920_v50  ;;  %7205 = vtanh.f32 %v13795_v3  ;;  %v4500_v2 = vadd.f32 %v15102_v60, %v15101_v33 }
 0x629   :  { %7207 = vtanh.f32 %v13797_v14  ;;  %v13874_v13 = vmul.f32 0.5, %v4498_v18  ;;  %v13876_v34 = vmul.f32 0.5, %v4691_v11  ;;  %v4693_v54 = vadd.f32 %v15103_v36, %v15101_v33 }
 0x62a   :  { %7209 = vtanh.f32 %v13857_v21  ;;  %v13881_v20 = vmul.f32 0.5, %v4500_v2  ;;  %v4502_v38 = vadd.f32 %v15105_v59, %v15104_v9  ;;  %v4695_v47 = vadd.f32 %v15106_v29, %v15104_v9 }
 0x62b   :  { %v7198_v0 = vpop.eup %7197  ;;  %7211 = vtanh.f32 %v13860_v44  ;;  %v13888_v7 = vmul.f32 0.5, %v4693_v54  ;;  %v4504_v15 = vadd.f32 %v15107_v52, %v15104_v9  ;;  %v4697_v28 = vadd.f32 %v15108_v61, %v15104_v9 }
 0x62c   :  { %v5069_v41 = vadd.f32 1.0, %v7198_v0  ;;  %7213 = vtanh.f32 %v13874_v13  ;;  %v13895_v57 = vmul.f32 0.5, %v4502_v38  ;;  %v13897_v51 = vmul.f32 0.5, %v4695_v47 }
 0x62d   :  { %7215 = vtanh.f32 %v13876_v34  ;;  %v13900_v17 = vmul.f32 0.5, %v4504_v15  ;;  %v13902_v12 = vmul.f32 0.5, %v4697_v28  ;;  %v4508_v58 = vadd.f32 %v13435_v46, %v15109_v24  ;;  %v5799_v15 = vpop.permute.xlu0 %5798 }
 0x62e   :  { %v7200_v53 = vpop.eup %7199  ;;  %v5197_v22 = vmul.f32 %v5069_v41, %v13772_v32  ;;  %7217 = vtanh.f32 %v13881_v20  ;;  %v4701_v40 = vadd.f32 %v13487_v5, %v15109_v24  ;;  %v4510_v37 = vadd.f32 %v13501_v6, %v15109_v24 }
 0x62f   :  { %v5071_v16 = vadd.f32 1.0, %v7200_v53  ;;  %7219 = vtanh.f32 %v13888_v7  ;;  %v13913_v39 = vmul.f32 0.5, %v4508_v58  ;;  %v4703_v46 = vadd.f32 %v13503_v10, %v15109_v24 }
 0x630   :  { %v7202_v48 = vpop.eup %7201  ;;  %v5517_v32 = vmul.f32 %v15110_v31, %v5197_v22  ;;  %v5921_v49 = vmul.f32 %v5795_v45, %v5197_v22  ;;  %7221 = vtanh.f32 %v13895_v57  ;;  %v13919_v23 = vmul.f32 0.5, %v4701_v40 }
 0x631   :  { %v7204_v5 = vpop.eup %7203  ;;  %v5199_v6 = vmul.f32 %v5071_v16, %v13775_v8  ;;  %v5070_v42 = vadd.f32 1.0, %v7202_v48  ;;  %7223 = vtanh.f32 %v13897_v51  ;;  %v13923_v1 = vmul.f32 0.5, %v4510_v37  ;;  %v15111_v37 = vld [vmem:[#allocation35_spill] sm:$0xff] }
 0x632   :  { %v7206_v50 = vpop.eup %7205  ;;  %v5566_v33 = vadd.f32 %v13835_v25, %v5517_v32  ;;  %v5970_v10 = vadd.f32 %v13837_v35, %v5921_v49  ;;  %v5072_v18 = vadd.f32 1.0, %v7204_v5  ;;  %7225 = vtanh.f32 %v13900_v17 }
 0x633   :  { %v7208_v11 = vpop.eup %7207  ;;  %v5519_v60 = vmul.f32 %v15110_v31, %v5199_v6  ;;  %v5923_v2 = vmul.f32 %v5795_v45, %v5199_v6  ;;  %v5198_v36 = vmul.f32 %v5070_v42, %v13785_v62  ;;  %v5073_v8 = vadd.f32 1.0, %v7206_v50 }
 0x634   :  { %v7210_v54 = vpop.eup %7209  ;;  %v5200_v9 = vmul.f32 %v5072_v18, %v13787_v43  ;;  %v5075_v59 = vadd.f32 1.0, %v7208_v11  ;;  %7227 = vtanh.f32 %v13902_v12  ;;  %v13932_v38 = vmul.f32 0.5, %v4703_v46  ;;  %v5803_v11 = vpop.permute.xlu0 %5802 }
 0x635   :  { %v7212_v25 = vpop.eup %7211  ;;  %v5640_v35 = vadd.f32 %v13847_v55, %v5519_v60  ;;  %v6044_v29 = vadd.f32 %v13849_v19, %v5923_v2  ;;  %v5518_v47 = vmul.f32 %v15110_v31, %v5198_v36  ;;  %v5922_v0 = vmul.f32 %v5795_v45, %v5198_v36 }
 0x636   :  { %v7214_v52 = vpop.eup %7213  ;;  %v5520_v62 = vmul.f32 %v15110_v31, %v5200_v9  ;;  %v5924_v61 = vmul.f32 %v5795_v45, %v5200_v9  ;;  %v5201_v43 = vmul.f32 %v5073_v8, %v13795_v3  ;;  %v5203_v28 = vmul.f32 %v5075_v59, %v13797_v14 }
 0x637   :  { %v7216_v41 = vpop.eup %7215  ;;  %v5603_v24 = vadd.f32 %v13851_v30, %v5518_v47  ;;  %v6007_v58 = vadd.f32 %v13853_v56, %v5922_v0  ;;  %v5074_v55 = vadd.f32 1.0, %v7210_v54  ;;  %v5076_v53 = vadd.f32 1.0, %v7212_v25 }
 0x638   :  { %v7218_v19 = vpop.eup %7217  ;;  %v5677_v22 = vadd.f32 %v13866_v27, %v5520_v62  ;;  %v6081_v40 = vadd.f32 %v13868_v4, %v5924_v61  ;;  %v5521_v16 = vmul.f32 %v15111_v37, %v5201_v43  ;;  %v5925_v46 = vmul.f32 %v5799_v15, %v5201_v43 }
 0x639   :  { %v7220_v45 = vpop.eup %7219  ;;  %v5523_v3 = vmul.f32 %v15111_v37, %v5203_v28  ;;  %v5927_v48 = vmul.f32 %v5799_v15, %v5203_v28  ;;  %v5202_v14 = vmul.f32 %v5074_v55, %v13857_v21  ;;  %v5204_v30 = vmul.f32 %v5076_v53, %v13860_v44 }
 0x63a   :  { %v7222_v31 = vpop.eup %7221  ;;  %v5567_v56 = vadd.f32 %v5566_v33, %v5521_v16  ;;  %v5971_v32 = vadd.f32 %v5970_v10, %v5925_v46  ;;  %v5077_v49 = vadd.f32 1.0, %v7214_v52  ;;  %v5079_v5 = vadd.f32 1.0, %v7216_v41 }
 0x63b   :  { %v7224_v6 = vpop.eup %7223  ;;  %v5641_v27 = vadd.f32 %v5640_v35, %v5523_v3  ;;  %v6045_v42 = vadd.f32 %v6044_v29, %v5927_v48  ;;  %v5522_v4 = vmul.f32 %v15111_v37, %v5202_v14  ;;  %v5926_v50 = vmul.f32 %v5799_v15, %v5202_v14 }
 0x63c   :  { %v7226_v18 = vpop.eup %7225  ;;  %v5524_v60 = vmul.f32 %v15111_v37, %v5204_v30  ;;  %v5928_v2 = vmul.f32 %v5799_v15, %v5204_v30  ;;  %v5205_v21 = vmul.f32 %v5077_v49, %v13874_v13  ;;  %v5207_v44 = vmul.f32 %v5079_v5, %v13876_v34  ;;  %v5396_v34 = vpop.permute.xlu1 %5395  ;;  %v15112_v49 = vld [vmem:[#allocation82_spill] sm:$0xff] }
 0x63d   :  { %v5604_v36 = vadd.f32 %v5603_v24, %v5522_v4  ;;  %v6008_v33 = vadd.f32 %v6007_v58, %v5926_v50  ;;  %v5078_v10 = vadd.f32 1.0, %v7218_v19  ;;  %v5080_v8 = vadd.f32 1.0, %v7220_v45  ;;  %v5807_v58 = vpop.permute.xlu0 %5806 }
 0x63e   :  { %v7228_v54 = vpop.eup %7227  ;;  %v5678_v9 = vadd.f32 %v5677_v22, %v5524_v60  ;;  %v6082_v59 = vadd.f32 %v6081_v40, %v5928_v2  ;;  %v5929_v25 = vmul.f32 %v5803_v11, %v5205_v21  ;;  %v5931_v35 = vmul.f32 %v5803_v11, %v5207_v44 }
 0x63f   :  { %v5206_v29 = vmul.f32 %v5078_v10, %v13881_v20  ;;  %v5208_v47 = vmul.f32 %v5080_v8, %v13888_v7  ;;  %v5081_v0 = vadd.f32 1.0, %v7222_v31  ;;  %v5083_v52 = vadd.f32 1.0, %v7224_v6 }
 0x640   :  { %v5972_v15 = vadd.f32 %v5971_v32, %v5929_v25  ;;  %v6046_v62 = vadd.f32 %v6045_v42, %v5931_v35  ;;  %v5082_v13 = vadd.f32 1.0, %v7226_v18  ;;  %v5084_v61 = vadd.f32 1.0, %v7228_v54 }
 0x641   :  { %v5930_v43 = vmul.f32 %v5803_v11, %v5206_v29  ;;  %v5932_v28 = vmul.f32 %v5803_v11, %v5208_v47  ;;  %v5209_v41 = vmul.f32 %v5081_v0, %v13895_v57  ;;  %v5211_v24 = vmul.f32 %v5083_v52, %v13897_v51  ;;  %v5811_v25 = vpop.permute.xlu0 %5810 }
 0x642   :  { %v5210_v55 = vmul.f32 %v5082_v13, %v13900_v17  ;;  %v5212_v20 = vmul.f32 %v5084_v61, %v13902_v12  ;;  %v5525_v53 = vmul.f32 %v5396_v34, %v5205_v21  ;;  %v5526_v7 = vmul.f32 %v5396_v34, %v5206_v29  ;;  %v5401_v12 = vpop.permute.xlu1 %5400 }
 0x643   :  { %v6009_v19 = vadd.f32 %v6008_v33, %v5930_v43  ;;  %v6083_v22 = vadd.f32 %v6082_v59, %v5932_v28  ;;  %v5933_v40 = vmul.f32 %v5807_v58, %v5209_v41  ;;  %v5935_v37 = vmul.f32 %v5807_v58, %v5211_v24 }
 0x644   :  { %v5934_v16 = vmul.f32 %v5807_v58, %v5210_v55  ;;  %v5936_v46 = vmul.f32 %v5807_v58, %v5212_v20  ;;  %v5527_v45 = vmul.f32 %v5396_v34, %v5207_v44  ;;  %v5528_v3 = vmul.f32 %v5396_v34, %v5208_v47  ;;  %v15114_v44 = vld [vmem:[#allocation212_spill] sm:$0xff] }
 0x645   :  { %v5973_v48 = vadd.f32 %v5972_v15, %v5933_v40  ;;  %v6047_v14 = vadd.f32 %v6046_v62, %v5935_v37  ;;  %v5568_v57 = vadd.f32 %v5567_v56, %v5525_v53  ;;  %v5605_v30 = vadd.f32 %v5604_v36, %v5526_v7  ;;  %v5815_v40 = vpop.permute.xlu0 %5814 }
 0x646   :  { %v6010_v51 = vadd.f32 %v6009_v19, %v5934_v16  ;;  %v13958_v31 = vadd.f32 %v6083_v22, %v5936_v46  ;;  %v5642_v17 = vadd.f32 %v5641_v27, %v5527_v45  ;;  %v5679_v32 = vadd.f32 %v5678_v9, %v5528_v3  ;;  %v5406_v13 = vpop.permute.xlu1 %5405 }
 0x647   :  { %7229 = vtanh.f32 %v13913_v39  ;;  %v4512_v5 = vadd.f32 %v13513_v26, %v15112_v49  ;;  %v4705_v6 = vadd.f32 %v13515_v63, %v15112_v49  ;;  %v5529_v42 = vmul.f32 %v5401_v12, %v5209_v41  ;;  %v15113_v26 = vld [vmem:[#allocation38_spill] sm:$0xff] }
 0x648   :  { %7231 = vtanh.f32 %v13919_v23  ;;  %v5530_v4 = vmul.f32 %v5401_v12, %v5210_v55  ;;  %v5531_v56 = vmul.f32 %v5401_v12, %v5211_v24  ;;  %v5532_v50 = vmul.f32 %v5401_v12, %v5212_v20 }
 0x649   :  { %7233 = vtanh.f32 %v13923_v1  ;;  %v4833_v18 = vmul.f32 0.5, %v4512_v5  ;;  %v4835_v27 = vmul.f32 0.5, %v4705_v6  ;;  %v5569_v11 = vadd.f32 %v5568_v57, %v5529_v42 }
 0x64a   :  { %7235 = vtanh.f32 %v13932_v38  ;;  %v5606_v60 = vadd.f32 %v5605_v30, %v5530_v4  ;;  %v5643_v2 = vadd.f32 %v5642_v17, %v5531_v56  ;;  %v5680_v21 = vadd.f32 %v5679_v32, %v5532_v50  ;;  %v5411_v42 = vpop.permute.xlu1 %5410 }
 0x64b   :  { %7237 = vtanh.f32 %v4833_v18  ;;  %v4514_v63 = vadd.f32 %v15113_v26, %v15112_v49  ;;  %v4707_v36 = vadd.f32 %v15114_v44, %v15112_v49  ;;  %v7288_v26 = vmov 1983009808  }
 0x64c   :  { %7239 = vtanh.f32 %v4835_v27 }
 0x64d   :  { %v4834_v33 = vmul.f32 0.5, %v4514_v63  ;;  %v4836_v10 = vmul.f32 0.5, %v4707_v36  ;;  %v13977_v63 = vunpack.c.l.s4 %v7288_v26 }
 0x64f   :  { %7241 = vtanh.f32 %v4834_v33 }
 0x650   :  { %7243 = vtanh.f32 %v4836_v10 }
 0x651   :  { %v7230_v8 = vpop.eup %7229 }
 0x652   :  { %v7232_v54 = vpop.eup %7231  ;;  %v5085_v9 = vadd.f32 1.0, %v7230_v8 }
 0x653   :  { %v7234_v59 = vpop.eup %7233  ;;  %v5087_v35 = vadd.f32 1.0, %v7232_v54 }
 0x654   :  { %v7236_v29 = vpop.eup %7235  ;;  %v5213_v47 = vmul.f32 %v5085_v9, %v13913_v39  ;;  %v5086_v0 = vadd.f32 1.0, %v7234_v59 }
 0x655   :  { %v7238_v52 = vpop.eup %7237  ;;  %v5215_v15 = vmul.f32 %v5087_v35, %v13919_v23  ;;  %v5088_v62 = vadd.f32 1.0, %v7236_v29 }
 0x656   :  { %v7240_v61 = vpop.eup %7239  ;;  %v5937_v34 = vmul.f32 %v5811_v25, %v5213_v47  ;;  %v5214_v43 = vmul.f32 %v5086_v0, %v13923_v1  ;;  %v5089_v28 = vadd.f32 1.0, %v7238_v52  ;;  %v5533_v41 = vmul.f32 %v5406_v13, %v5213_v47 }
 0x657   :  { %v5939_v24 = vmul.f32 %v5811_v25, %v5215_v15  ;;  %v5216_v58 = vmul.f32 %v5088_v62, %v13932_v38  ;;  %v5091_v55 = vadd.f32 1.0, %v7240_v61  ;;  %v5535_v20 = vmul.f32 %v5406_v13, %v5215_v15 }
 0x658   :  { %v5974_v53 = vadd.f32 %v5973_v48, %v5937_v34  ;;  %v5938_v7 = vmul.f32 %v5811_v25, %v5214_v43  ;;  %v5217_v39 = vmul.f32 %v5089_v28, %v4833_v18  ;;  %v5534_v19 = vmul.f32 %v5406_v13, %v5214_v43 }
 0x659   :  { %v7242_v22 = vpop.eup %7241  ;;  %v6048_v23 = vadd.f32 %v6047_v14, %v5939_v24  ;;  %v5940_v37 = vmul.f32 %v5811_v25, %v5216_v58  ;;  %v5219_v16 = vmul.f32 %v5091_v55, %v4835_v27  ;;  %v5536_v46 = vmul.f32 %v5406_v13, %v5216_v58 }
 0x65a   :  { %v7244_v45 = vpop.eup %7243  ;;  %v6011_v3 = vadd.f32 %v6010_v51, %v5938_v7  ;;  %v5941_v1 = vmul.f32 %v5815_v40, %v5217_v39  ;;  %v5090_v57 = vadd.f32 1.0, %v7242_v22  ;;  %v5570_v30 = vadd.f32 %v5569_v11, %v5533_v41 }
 0x65b   :  { %v6085_v17 = vadd.f32 %v13958_v31, %v5940_v37  ;;  %v5943_v38 = vmul.f32 %v5815_v40, %v5219_v16  ;;  %v5092_v32 = vadd.f32 1.0, %v7244_v45  ;;  %v5607_v12 = vadd.f32 %v5606_v60, %v5534_v19 }
 0x65c   :  { %v5975_v48 = vadd.f32 %v5974_v53, %v5941_v1  ;;  %v5218_v49 = vmul.f32 %v5090_v57, %v4834_v33  ;;  %v5644_v5 = vadd.f32 %v5643_v2, %v5535_v20  ;;  %v5681_v6 = vadd.f32 %v5680_v21, %v5536_v46 }
 0x65d   :  { %v6049_v4 = vadd.f32 %v6048_v23, %v5943_v38  ;;  %v5220_v14 = vmul.f32 %v5092_v32, %v4836_v10  ;;  %v5537_v56 = vmul.f32 %v5411_v42, %v5217_v39  ;;  %v5539_v50 = vmul.f32 %v5411_v42, %v5219_v16 }
 0x65e   :  { %v5976_v18 = vrot.slane %v5975_v48, 4  ;;  %v5942_v27 = vmul.f32 %v5815_v40, %v5218_v49  ;;  %v5538_v51 = vmul.f32 %v5411_v42, %v5218_v49 }
 0x65f   :  { %v6050_v11 = vrot.slane %v6049_v4, 4  ;;  %v5944_v31 = vmul.f32 %v5815_v40, %v5220_v14  ;;  %v5540_v44 = vmul.f32 %v5411_v42, %v5220_v14  ;;  %v5571_v36 = vadd.f32 %v5570_v30, %v5537_v56  ;;  %v6102_v42 = vpop.permute.xlu1 %6101 }
 0x660   :  { %v5977_v60 = vadd.f32 %v5976_v18, %v5975_v48  ;;  %v6012_v8 = vadd.f32 %v6011_v3, %v5942_v27  ;;  %v5608_v33 = vadd.f32 %v5607_v12, %v5538_v51  ;;  %v5645_v2 = vadd.f32 %v5644_v5, %v5539_v50 }
 0x661   :  { %v6051_v21 = vadd.f32 %v6050_v11, %v6049_v4  ;;  %v6086_v54 = vadd.f32 %v6085_v17, %v5944_v31  ;;  %v5572_v9 = vrot.slane %v5571_v36, 4  ;;  %v5682_v10 = vadd.f32 %v5681_v6, %v5540_v44  ;;  %v15115_v31 = vld [vmem:[#allocation5_spill] sm:$0xff] }
 0x662   :  { %v5978_v59 = vrot.slane %v5977_v60, 2  ;;  %v6013_v25 = vrot.slane %v6012_v8, 4  ;;  %v5609_v35 = vrot.slane %v5608_v33, 4  ;;  %v5646_v29 = vrot.slane %v5645_v2, 4 }
 0x663   :  { %v6052_v47 = vrot.slane %v6051_v21, 2  ;;  %v6087_v0 = vrot.slane %v6086_v54, 4  ;;  %v5573_v52 = vadd.f32 %v5572_v9, %v5571_v36  ;;  %v5683_v15 = vrot.slane %v5682_v10, 4 }
 0x664   :  { %v6014_v62 = vadd.f32 %v6013_v25, %v6012_v8  ;;  %v5610_v13 = vadd.f32 %v5609_v35, %v5608_v33  ;;  %v5647_v61 = vadd.f32 %v5646_v29, %v5645_v2  ;;  %v5979_v34 = vadd.f32 %v5978_v59, %v5977_v60 }
 0x665   :  { %v6088_v43 = vadd.f32 %v6087_v0, %v6086_v54  ;;  %v5574_v28 = vrot.slane %v5573_v52, 2  ;;  %v5684_v41 = vadd.f32 %v5683_v15, %v5682_v10  ;;  %v6053_v24 = vadd.f32 %v6052_v47, %v6051_v21 }
 0x666   :  { %v6015_v58 = vrot.slane %v6014_v62, 2  ;;  %v5611_v55 = vrot.slane %v5610_v13, 2  ;;  %v5648_v20 = vrot.slane %v5647_v61, 2  ;;  %v5980_v53 = vrot.slane %v5979_v34, 1 }
 0x667   :  { %v6089_v7 = vrot.slane %v6088_v43, 2  ;;  %v5685_v39 = vrot.slane %v5684_v41, 2  ;;  %v5575_v19 = vadd.f32 %v5574_v28, %v5573_v52  ;;  %v6054_v22 = vrot.slane %v6053_v24, 1 }
 0x668   :  { %v5612_v40 = vadd.f32 %v5611_v55, %v5610_v13  ;;  %v5649_v23 = vadd.f32 %v5648_v20, %v5647_v61  ;;  %v6016_v37 = vadd.f32 %v6015_v58, %v6014_v62  ;;  %v5981_v45 = vadd.f32 %v5980_v53, %v5979_v34 }
 0x669   :  { %v5576_v16 = vrot.slane %v5575_v19, 1  ;;  %v5686_v46 = vadd.f32 %v5685_v39, %v5684_v41  ;;  %v6090_v3 = vadd.f32 %v6089_v7, %v6088_v43  ;;  %v6055_v17 = vadd.f32 %v6054_v22, %v6053_v24 }
 0x66a   :  { %v5613_v1 = vrot.slane %v5612_v40, 1  ;;  %v5650_v57 = vrot.slane %v5649_v23, 1  ;;  %v6017_v30 = vrot.slane %v6016_v37, 1  ;;  %v6116_v48 = vunpack.c.0.s8 %v13977_v63 }
 0x66b   :  { %v5577_v38 = vadd.f32 %v5576_v16, %v5575_v19  ;;  %v5687_v32 = vrot.slane %v5686_v46, 1  ;;  %v6091_v12 = vrot.slane %v6090_v3, 1 }
 0x66c   :  { %v5614_v49 = vadd.f32 %v5613_v1, %v5612_v40  ;;  %v5651_v5 = vadd.f32 %v5650_v57, %v5649_v23  ;;  %v6018_v6 = vadd.f32 %v6017_v30, %v6016_v37  ;;  %v6119_v44 = vsub.s32 %v6116_v48, %v15115_v31 }
 0x66d   :  { %v5688_v4 = vadd.f32 %v5687_v32, %v5686_v46  ;;  %v6092_v14 = vadd.f32 %v6091_v12, %v6090_v3  ;;  %v6094_v56 = vsel %vm6093_vm1, %v5577_v38, %v5981_v45 }
 0x66e   :  { %v6095_v50 = vsel %vm6093_vm1, %v5614_v49, %v6018_v6  ;;  %v6096_v18 = vsel %vm6093_vm1, %v5651_v5, %v6055_v17  ;;  %v6104_v27 = vadd.f32 %v6102_v42, %v6094_v56 }
 0x66f   :  { %v6097_v51 = vsel %vm6093_vm1, %v5688_v4, %v6092_v14  ;;  %v6105_v26 = vadd.f32 %v6102_v42, %v6095_v50  ;;  %v6106_v11 = vadd.f32 %v6102_v42, %v6096_v18 }
 0x670   :  { %v6107_v63 = vadd.f32 %v6102_v42, %v6097_v51 }
 0x671   :  { %v6112_v36 = vcombine.low %v6104_v27, %v6105_v26 }
 0x672   :  { %v6113_v60 = vcombine.low %v6106_v11, %v6107_v63 }
 0x673   :  { %v6120_v8 = vrot.slane %v6112_v36, %v6119_v44 }
 0x674   :  { %v6127_v33 = vrot.slane %v6113_v60, %v6119_v44 }
 0x676   :  { %v6128_v2 = vcombine.low %v6120_v8, %v6127_v33 }
 0x678   :  { %6130 = vst [vmem:[#allocation2] sm:$0xff] %v6128_v2 }
 0x679   :  { %7273 = shalt.err (!%p7270_p4)
}
 0x67a   :  { %s7274_s23 = scalar_lea.hbm %s14010_s13, 128 }
 0x67b   :  { %p7275_p5 = scmp.ne.s32.totalorder %s14010_s13, %s7274_s23  ;;  %p7278_p6 = scmp.lt.u32.totalorder %s7274_s23, %s14010_s13 }
 0x67d   :  { %p7280_p7 = pnand %p7278_p6, %p7275_p5 }
 0x67f   :  { %7283 = shalt.err (!%p7280_p7)
}
 0x680   :  { %6140 = dma.vmem_to_hbm [thread:$0]  %s6138_s12, 128, %s14010_s13, [#allocation3]  }
 0x681   :  { %7284 = dma.done.wait [#allocation3], 128  }
 0x682   :  { %7285 = vsyncadd [#allocation3], 4294967168 }
 0x683   :  { %6144 = vsyncpa [#allocation3], 1 }

</bundles_post_ra>
